<compile_context>
chip_gen: v7x
topology: tpu7x:2x2x1
jax: 0.10.0
libtpu: 0.0.40
codegen_flags: <defaults>
</compile_context>

<pallas_src>
import numpy as np
import jax
import jax.numpy as jnp
from jax import lax
from jax.experimental import pallas as pl
from jax.experimental.pallas import tpu as pltpu


def topo_lstm_cell_kernel(masks_ref, emb_ref, h_ref, c_ref, W_ref, U_ref, b_ref,
                          h_out_ref, c_out_ref):
    L = h_ref.shape[0]
    tile_n, H = emb_ref.shape[0], h_ref.shape[2]

    masks = masks_ref[...]                             # (tile_n, L+1)  f32
    seq_mask = masks[:, L:L + 1]                       # (tile_n, 1)

    # Diffusion-path reduction over the leading (L) axis, unrolled.  Each
    # h_ref[l] is a clean (tile_n, H) (8,128)-tiled slab; the topo column is a
    # lane-broadcast multiply + VPU add.  Inputs may be bf16 -> upcast to f32
    # right after load (all elementwise math stays f32; required on v5e).
    h_sum = jnp.zeros((tile_n, H), jnp.float32)
    c_sum = jnp.zeros((tile_n, H), jnp.float32)
    for l in range(L):                                 # L is tiny and static
        w_l = masks[:, l:l + 1]                        # (tile_n, 1)
        h_sum = h_sum + w_l * h_ref[l].astype(jnp.float32)
        c_sum = c_sum + w_l * c_ref[l].astype(jnp.float32)

    # Two accumulating MXU dots into one f32 accumulator (no concat copy).
    prec = (lax.Precision.HIGHEST if W_ref.dtype == jnp.float32
            else lax.Precision.DEFAULT)
    pre = jnp.dot(emb_ref[...].astype(W_ref.dtype), W_ref[...],
                  preferred_element_type=jnp.float32, precision=prec)
    pre = pre + jnp.dot(h_sum.astype(U_ref.dtype), U_ref[...],
                        preferred_element_type=jnp.float32, precision=prec)
    pre = pre + b_ref[...]                             # (tile_n, 4H)  f32

    # One contiguous sigmoid pass over the first 3H lanes, one tanh over the last H.
    gates = jax.nn.sigmoid(pre[:, :3 * H])
    i = gates[:, 0 * H:1 * H]
    f = gates[:, 1 * H:2 * H]
    o = gates[:, 2 * H:3 * H]
    c_tilde = jnp.tanh(pre[:, 3 * H:])

    c_new = seq_mask * (f * c_sum + i * c_tilde)
    # Keep the explicit second mask multiply to preserve the module's exact
    # semantics for non-binary masks (redundant for 0/1 masks, one cheap VPU pass).
    h_new = seq_mask * (o * jnp.tanh(c_new))

    h_out_ref[...] = h_new
    c_out_ref[...] = c_new


def topo_lstm_cell(seq_mask, topo_mask, node_embedding, h_init, c_init, W, U, b,
                   *, tile_n=256, param_dtype=jnp.float32, input_dtype=jnp.float32):
    """Single pallas_call over a sample-tile grid; weights stay VMEM-resident.

    h_init / c_init are consumed in their native (L, N, H) layout (no wrapper
    transpose).  `input_dtype=jnp.bfloat16` halves the dominant HBM read bytes
    (emb/h/c); all in-kernel math stays f32.
    """
    N, H = node_embedding.shape
    L = h_init.shape[0]
    tile_n = min(tile_n, N)
    assert N % tile_n == 0, "demo wrapper assumes tile_n divides N"
    grid = (N // tile_n,)

    # Wrapper-side prep (no transposes of the big tensors).
    masks = jnp.concatenate(
        [topo_mask.astype(jnp.float32),
         seq_mask.reshape(N, 1).astype(jnp.float32)], axis=1)          # (N, L+1)
    emb = node_embedding.astype(input_dtype)                            # (N, H)
    h_lnh = h_init.astype(input_dtype)                                  # (L, N, H)
    c_lnh = c_init.astype(input_dtype)                                  # (L, N, H)
    W_p = W.astype(param_dtype)                                         # (H, 4H)
    U_p = U.astype(param_dtype)                                         # (H, 4H)
    b2 = b.reshape(1, 4 * H).astype(jnp.float32)

    fn = pl.pallas_call(
        topo_lstm_cell_kernel,
        out_shape=(jax.ShapeDtypeStruct((N, H), jnp.float32),
                   jax.ShapeDtypeStruct((N, H), jnp.float32)),
        grid=grid,
        in_specs=[
            pl.BlockSpec((tile_n, L + 1), lambda i: (i, 0)),      # topo | seq masks
            pl.BlockSpec((tile_n, H), lambda i: (i, 0)),          # embedding
            pl.BlockSpec((L, tile_n, H), lambda i: (0, i, 0)),    # h (native layout)
            pl.BlockSpec((L, tile_n, H), lambda i: (0, i, 0)),    # c (native layout)
            pl.BlockSpec((H, 4 * H), lambda i: (0, 0)),           # W — resident
            pl.BlockSpec((H, 4 * H), lambda i: (0, 0)),           # U — resident
            pl.BlockSpec((1, 4 * H), lambda i: (0, 0)),           # bias — resident
        ],
        out_specs=(pl.BlockSpec((tile_n, H), lambda i: (i, 0)),
                   pl.BlockSpec((tile_n, H), lambda i: (i, 0))),
        compiler_params=pltpu.CompilerParams(
            # Sample tiles are independent -> shard across TensorCores on v7x.
            # VMEM footprint at tile_n=256 (incl. double buffers + resident W/U)
            # is ~5 MiB, far under the 32 MiB default scoped limit on all gens.
            dimension_semantics=("parallel",)),
    )
    return fn(masks, emb, h_lnh, c_lnh, W_p, U_p, b2)


def reference(seq_mask, topo_mask, emb, h_init, c_init, W, U, b,
              param_dtype=jnp.float32, input_dtype=jnp.float32):
    """Pure-JAX transcription of the PyTorch forward (optionally emulating the
    kernel's reduced-precision input/weight path for the bf16 check)."""
    H = emb.shape[1]
    hf = h_init.astype(input_dtype).astype(jnp.float32)
    cf = c_init.astype(input_dtype).astype(jnp.float32)
    ef = emb.astype(input_dtype)
    h_sum = jnp.sum(topo_mask[:, :, None] * jnp.transpose(hf, (1, 0, 2)), axis=1)
    c_sum = jnp.sum(topo_mask[:, :, None] * jnp.transpose(cf, (1, 0, 2)), axis=1)
    if param_dtype == jnp.float32:
        # Literal PyTorch structure, full-precision matmuls.
        pre = (jnp.dot(h_sum, U, precision=lax.Precision.HIGHEST)
               + jnp.dot(ef.astype(jnp.float32), W, precision=lax.Precision.HIGHEST)
               + b)
    else:
        pre = (jnp.dot(ef.astype(param_dtype), W.astype(param_dtype),
                       preferred_element_type=jnp.float32)
               + jnp.dot(h_sum.astype(param_dtype), U.astype(param_dtype),
                         preferred_element_type=jnp.float32)
               + b)
    i = jax.nn.sigmoid(pre[:, 0 * H:1 * H])
    f = jax.nn.sigmoid(pre[:, 1 * H:2 * H])
    o = jax.nn.sigmoid(pre[:, 2 * H:3 * H])
    c_t = jnp.tanh(pre[:, 3 * H:4 * H])
    c = f * c_sum + i * c_t
    c = seq_mask[:, None] * c
    h = o * jnp.tanh(c)
    h = seq_mask[:, None] * h
    return h, c


if __name__ == "__main__":
    # N kept at 2 * tile_n so the 'parallel' sample axis has >= 2 tiles
    # (populates both TensorCores on v7x; no-op on v5e/v6e).
    N, L, H = 512, 4, 128  # n_samples, diffusion_path_lengths, hidden_size
    TILE_N = 256

    # Deterministic parameter init mirroring TopoLSTMCell.__init__ (orthogonal blocks).
    rng = np.random.default_rng(0)

    def ortho_weight(n):
        u, _, _ = np.linalg.svd(rng.standard_normal((n, n)))
        return u.astype(np.float32)

    W = jnp.asarray(np.concatenate([ortho_weight(H) for _ in range(4)], axis=1))
    U = jnp.asarray(np.concatenate([ortho_weight(H) for _ in range(4)], axis=1))
    b = jnp.zeros((4 * H,), jnp.float32)

    key = jax.random.PRNGKey(0)
    k1, k2, k3, k4, k5 = jax.random.split(key, 5)
    seq_mask = jax.random.bernoulli(k1, 0.8, (N,)).astype(jnp.float32)
    topo_mask = jax.random.bernoulli(k2, 0.5, (N, L)).astype(jnp.float32)
    node_embedding = jax.random.normal(k3, (N, H), dtype=jnp.float32)
    h_init = jax.random.normal(k4, (L, N, H), dtype=jnp.float32)
    c_init = jax.random.normal(k5, (L, N, H), dtype=jnp.float32)

    # --- f32 inputs + f32 weights: strict check against the PyTorch-structured ref ---
    h_out, c_out = topo_lstm_cell(seq_mask, topo_mask, node_embedding,
                                  h_init, c_init, W, U, b, tile_n=TILE_N)
    jax.block_until_ready((h_out, c_out))
    h_ref, c_ref = reference(seq_mask, topo_mask, node_embedding,
                             h_init, c_init, W, U, b)
    assert jnp.allclose(h_out, h_ref, atol=1e-4, rtol=1e-4)
    assert jnp.allclose(c_out, c_ref, atol=1e-4, rtol=1e-4)

    # --- bf16 inputs + bf16 weights (dominant HBM-read saving), f32 math ---
    h_bf, c_bf = topo_lstm_cell(seq_mask, topo_mask, node_embedding,
                                h_init, c_init, W, U, b, tile_n=TILE_N,
                                param_dtype=jnp.bfloat16,
                                input_dtype=jnp.bfloat16)
    jax.block_until_ready((h_bf, c_bf))
    h_ref_bf, c_ref_bf = reference(seq_mask, topo_mask, node_embedding,
                                   h_init, c_init, W, U, b,
                                   param_dtype=jnp.bfloat16,
                                   input_dtype=jnp.bfloat16)
    assert jnp.allclose(h_bf, h_ref_bf, atol=2e-2, rtol=2e-2)
    assert jnp.allclose(c_bf, c_ref_bf, atol=2e-2, rtol=2e-2)

    print("KERNEL_OK")
</pallas_src>

<mosaic_0001>
module attributes {stable_mosaic.version = 11 : i64} {
  func.func @topo_lstm_cell_kernel(%arg0: i32, %arg1: memref<256x5xf32, #tpu.memory_space<vmem>>, %arg2: memref<256x128xf32, #tpu.memory_space<vmem>>, %arg3: memref<4x256x128xf32, #tpu.memory_space<vmem>>, %arg4: memref<4x256x128xf32, #tpu.memory_space<vmem>>, %arg5: memref<128x512xf32, #tpu.memory_space<vmem>>, %arg6: memref<128x512xf32, #tpu.memory_space<vmem>>, %arg7: memref<1x512xf32, #tpu.memory_space<vmem>>, %arg8: memref<256x128xf32, #tpu.memory_space<vmem>>, %arg9: memref<256x128xf32, #tpu.memory_space<vmem>>) attributes {dimension_semantics = [#tpu.dimension_semantics<parallel>], iteration_bounds = array<i64: 2>, scalar_prefetch = 0 : i64, scratch_operands = 0 : i64, tpu.core_type = #tpu.core_type<tc>, window_params = [{transform_indices = @transform_0, window_bounds = array<i64: 256, 5>}, {transform_indices = @transform_1, window_bounds = array<i64: 256, 128>}, {transform_indices = @transform_2, window_bounds = array<i64: 4, 256, 128>}, {transform_indices = @transform_3, window_bounds = array<i64: 4, 256, 128>}, {pipeline_mode = #tpu.pipeline_mode<synchronous>, transform_indices = @transform_4, window_bounds = array<i64: 128, 512>}, {pipeline_mode = #tpu.pipeline_mode<synchronous>, transform_indices = @transform_5, window_bounds = array<i64: 128, 512>}, {pipeline_mode = #tpu.pipeline_mode<synchronous>, transform_indices = @transform_6, window_bounds = array<i64: 1, 512>}, {transform_indices = @transform_7, window_bounds = array<i64: 256, 128>}, {transform_indices = @transform_8, window_bounds = array<i64: 256, 128>}]} {
    %c0 = arith.constant 0 : index
    %c0_0 = arith.constant 0 : index
    %0 = vector.load %arg1[%c0, %c0_0] : memref<256x5xf32, #tpu.memory_space<vmem>>, vector<256x5xf32>
    %1 = vector.extract_strided_slice %0 {offsets = [0, 4], sizes = [256, 1], strides = [1, 1]} : vector<256x5xf32> to vector<256x1xf32>
    %cst = arith.constant 0.000000e+00 : f32
    %2 = vector.broadcast %cst : f32 to vector<256x128xf32>
    %cst_1 = arith.constant 0.000000e+00 : f32
    %3 = vector.broadcast %cst_1 : f32 to vector<256x128xf32>
    %4 = vector.extract_strided_slice %0 {offsets = [0, 0], sizes = [256, 1], strides = [1, 1]} : vector<256x5xf32> to vector<256x1xf32>
    %c0_2 = arith.constant 0 : index
    %c0_3 = arith.constant 0 : index
    %c0_4 = arith.constant 0 : index
    %5 = vector.load %arg3[%c0_2, %c0_3, %c0_4] : memref<4x256x128xf32, #tpu.memory_space<vmem>>, vector<1x256x128xf32>
    %6 = vector.shape_cast %5 : vector<1x256x128xf32> to vector<256x128xf32>
    %7 = vector.broadcast %4 : vector<256x1xf32> to vector<256x128xf32>
    %8 = arith.mulf %7, %6 : vector<256x128xf32>
    %9 = arith.addf %2, %8 : vector<256x128xf32>
    %c0_5 = arith.constant 0 : index
    %c0_6 = arith.constant 0 : index
    %c0_7 = arith.constant 0 : index
    %10 = vector.load %arg4[%c0_5, %c0_6, %c0_7] : memref<4x256x128xf32, #tpu.memory_space<vmem>>, vector<1x256x128xf32>
    %11 = vector.shape_cast %10 : vector<1x256x128xf32> to vector<256x128xf32>
    %12 = vector.broadcast %4 : vector<256x1xf32> to vector<256x128xf32>
    %13 = arith.mulf %12, %11 : vector<256x128xf32>
    %14 = arith.addf %3, %13 : vector<256x128xf32>
    %15 = vector.extract_strided_slice %0 {offsets = [0, 1], sizes = [256, 1], strides = [1, 1]} : vector<256x5xf32> to vector<256x1xf32>
    %c1 = arith.constant 1 : index
    %c0_8 = arith.constant 0 : index
    %c0_9 = arith.constant 0 : index
    %16 = vector.load %arg3[%c1, %c0_8, %c0_9] : memref<4x256x128xf32, #tpu.memory_space<vmem>>, vector<1x256x128xf32>
    %17 = vector.shape_cast %16 : vector<1x256x128xf32> to vector<256x128xf32>
    %18 = vector.broadcast %15 : vector<256x1xf32> to vector<256x128xf32>
    %19 = arith.mulf %18, %17 : vector<256x128xf32>
    %20 = arith.addf %9, %19 : vector<256x128xf32>
    %c1_10 = arith.constant 1 : index
    %c0_11 = arith.constant 0 : index
    %c0_12 = arith.constant 0 : index
    %21 = vector.load %arg4[%c1_10, %c0_11, %c0_12] : memref<4x256x128xf32, #tpu.memory_space<vmem>>, vector<1x256x128xf32>
    %22 = vector.shape_cast %21 : vector<1x256x128xf32> to vector<256x128xf32>
    %23 = vector.broadcast %15 : vector<256x1xf32> to vector<256x128xf32>
    %24 = arith.mulf %23, %22 : vector<256x128xf32>
    %25 = arith.addf %14, %24 : vector<256x128xf32>
    %26 = vector.extract_strided_slice %0 {offsets = [0, 2], sizes = [256, 1], strides = [1, 1]} : vector<256x5xf32> to vector<256x1xf32>
    %c2 = arith.constant 2 : index
    %c0_13 = arith.constant 0 : index
    %c0_14 = arith.constant 0 : index
    %27 = vector.load %arg3[%c2, %c0_13, %c0_14] : memref<4x256x128xf32, #tpu.memory_space<vmem>>, vector<1x256x128xf32>
    %28 = vector.shape_cast %27 : vector<1x256x128xf32> to vector<256x128xf32>
    %29 = vector.broadcast %26 : vector<256x1xf32> to vector<256x128xf32>
    %30 = arith.mulf %29, %28 : vector<256x128xf32>
    %31 = arith.addf %20, %30 : vector<256x128xf32>
    %c2_15 = arith.constant 2 : index
    %c0_16 = arith.constant 0 : index
    %c0_17 = arith.constant 0 : index
    %32 = vector.load %arg4[%c2_15, %c0_16, %c0_17] : memref<4x256x128xf32, #tpu.memory_space<vmem>>, vector<1x256x128xf32>
    %33 = vector.shape_cast %32 : vector<1x256x128xf32> to vector<256x128xf32>
    %34 = vector.broadcast %26 : vector<256x1xf32> to vector<256x128xf32>
    %35 = arith.mulf %34, %33 : vector<256x128xf32>
    %36 = arith.addf %25, %35 : vector<256x128xf32>
    %37 = vector.extract_strided_slice %0 {offsets = [0, 3], sizes = [256, 1], strides = [1, 1]} : vector<256x5xf32> to vector<256x1xf32>
    %c3 = arith.constant 3 : index
    %c0_18 = arith.constant 0 : index
    %c0_19 = arith.constant 0 : index
    %38 = vector.load %arg3[%c3, %c0_18, %c0_19] : memref<4x256x128xf32, #tpu.memory_space<vmem>>, vector<1x256x128xf32>
    %39 = vector.shape_cast %38 : vector<1x256x128xf32> to vector<256x128xf32>
    %40 = vector.broadcast %37 : vector<256x1xf32> to vector<256x128xf32>
    %41 = arith.mulf %40, %39 : vector<256x128xf32>
    %42 = arith.addf %31, %41 : vector<256x128xf32>
    %c3_20 = arith.constant 3 : index
    %c0_21 = arith.constant 0 : index
    %c0_22 = arith.constant 0 : index
    %43 = vector.load %arg4[%c3_20, %c0_21, %c0_22] : memref<4x256x128xf32, #tpu.memory_space<vmem>>, vector<1x256x128xf32>
    %44 = vector.shape_cast %43 : vector<1x256x128xf32> to vector<256x128xf32>
    %45 = vector.broadcast %37 : vector<256x1xf32> to vector<256x128xf32>
    %46 = arith.mulf %45, %44 : vector<256x128xf32>
    %47 = arith.addf %36, %46 : vector<256x128xf32>
    %c0_23 = arith.constant 0 : index
    %c0_24 = arith.constant 0 : index
    %48 = vector.load %arg2[%c0_23, %c0_24] : memref<256x128xf32, #tpu.memory_space<vmem>>, vector<256x128xf32>
    %c0_25 = arith.constant 0 : index
    %c0_26 = arith.constant 0 : index
    %49 = vector.load %arg5[%c0_25, %c0_26] : memref<128x512xf32, #tpu.memory_space<vmem>>, vector<128x512xf32>
    %cst_27 = arith.constant dense<0.000000e+00> : vector<256x512xf32>
    %50 = tpu.matmul %48, %49, %cst_27 {dimension_numbers = #tpu.dot_dimension_numbers<[1], [0], [0], [1], [0, 0, 1, 1], [], []>, precision = #tpu.contract_precision<fp32>} : vector<256x128xf32>, vector<128x512xf32>, vector<256x512xf32> -> vector<256x512xf32>
    %c0_28 = arith.constant 0 : index
    %c0_29 = arith.constant 0 : index
    %51 = vector.load %arg6[%c0_28, %c0_29] : memref<128x512xf32, #tpu.memory_space<vmem>>, vector<128x512xf32>
    %cst_30 = arith.constant dense<0.000000e+00> : vector<256x512xf32>
    %52 = tpu.matmul %42, %51, %cst_30 {dimension_numbers = #tpu.dot_dimension_numbers<[1], [0], [0], [1], [0, 0, 1, 1], [], []>, precision = #tpu.contract_precision<fp32>} : vector<256x128xf32>, vector<128x512xf32>, vector<256x512xf32> -> vector<256x512xf32>
    %53 = arith.addf %50, %52 : vector<256x512xf32>
    %c0_31 = arith.constant 0 : index
    %c0_32 = arith.constant 0 : index
    %54 = vector.load %arg7[%c0_31, %c0_32] : memref<1x512xf32, #tpu.memory_space<vmem>>, vector<1x512xf32>
    %55 = vector.broadcast %54 : vector<1x512xf32> to vector<256x512xf32>
    %56 = arith.addf %53, %55 : vector<256x512xf32>
    %57 = vector.extract_strided_slice %56 {offsets = [0, 0], sizes = [256, 384], strides = [1, 1]} : vector<256x512xf32> to vector<256x384xf32>
    %58 = arith.negf %57 : vector<256x384xf32>
    %59 = math.exp %58 : vector<256x384xf32>
    %cst_33 = arith.constant 1.000000e+00 : f32
    %60 = vector.broadcast %cst_33 : f32 to vector<256x384xf32>
    %61 = arith.addf %60, %59 : vector<256x384xf32>
    %62 = arith.divf %60, %61 : vector<256x384xf32>
    %63 = vector.extract_strided_slice %62 {offsets = [0, 0], sizes = [256, 128], strides = [1, 1]} : vector<256x384xf32> to vector<256x128xf32>
    %64 = vector.extract_strided_slice %62 {offsets = [0, 128], sizes = [256, 128], strides = [1, 1]} : vector<256x384xf32> to vector<256x128xf32>
    %65 = vector.extract_strided_slice %62 {offsets = [0, 256], sizes = [256, 128], strides = [1, 1]} : vector<256x384xf32> to vector<256x128xf32>
    %66 = vector.extract_strided_slice %56 {offsets = [0, 384], sizes = [256, 128], strides = [1, 1]} : vector<256x512xf32> to vector<256x128xf32>
    %67 = math.tanh %66 : vector<256x128xf32>
    %68 = arith.mulf %64, %47 : vector<256x128xf32>
    %69 = arith.mulf %63, %67 : vector<256x128xf32>
    %70 = arith.addf %68, %69 : vector<256x128xf32>
    %71 = vector.broadcast %1 : vector<256x1xf32> to vector<256x128xf32>
    %72 = arith.mulf %71, %70 : vector<256x128xf32>
    %73 = math.tanh %72 : vector<256x128xf32>
    %74 = arith.mulf %65, %73 : vector<256x128xf32>
    %75 = vector.broadcast %1 : vector<256x1xf32> to vector<256x128xf32>
    %76 = arith.mulf %75, %74 : vector<256x128xf32>
    %c0_34 = arith.constant 0 : index
    %c0_35 = arith.constant 0 : index
    %77 = vector.load %arg8[%c0_34, %c0_35] : memref<256x128xf32, #tpu.memory_space<vmem>>, vector<256x128xf32>
    tpu.vector_store %arg8[%c0_34, %c0_35], %76 {strides = array<i32>} : memref<256x128xf32, #tpu.memory_space<vmem>>, vector<256x128xf32>,
    %c0_36 = arith.constant 0 : index
    %c0_37 = arith.constant 0 : index
    %78 = vector.load %arg9[%c0_36, %c0_37] : memref<256x128xf32, #tpu.memory_space<vmem>>, vector<256x128xf32>
    tpu.vector_store %arg9[%c0_36, %c0_37], %72 {strides = array<i32>} : memref<256x128xf32, #tpu.memory_space<vmem>>, vector<256x128xf32>,
    return
  }
  func.func @transform_0(%arg0: i32) -> (i32, i32) {
    %c0_i32 = arith.constant 0 : i32
    %c0_i32_0 = arith.constant 0 : i32
    return %arg0, %c0_i32 : i32, i32
  }
  func.func @transform_1(%arg0: i32) -> (i32, i32) {
    %c0_i32 = arith.constant 0 : i32
    %c0_i32_0 = arith.constant 0 : i32
    return %arg0, %c0_i32 : i32, i32
  }
  func.func @transform_2(%arg0: i32) -> (i32, i32, i32) {
    %c0_i32 = arith.constant 0 : i32
    %c0_i32_0 = arith.constant 0 : i32
    %c0_i32_1 = arith.constant 0 : i32
    return %c0_i32, %arg0, %c0_i32_0 : i32, i32, i32
  }
  func.func @transform_3(%arg0: i32) -> (i32, i32, i32) {
    %c0_i32 = arith.constant 0 : i32
    %c0_i32_0 = arith.constant 0 : i32
    %c0_i32_1 = arith.constant 0 : i32
    return %c0_i32, %arg0, %c0_i32_0 : i32, i32, i32
  }
  func.func @transform_4(%arg0: i32) -> (i32, i32) {
    %c0_i32 = arith.constant 0 : i32
    %c0_i32_0 = arith.constant 0 : i32
    %c0_i32_1 = arith.constant 0 : i32
    return %c0_i32, %c0_i32_0 : i32, i32
  }
  func.func @transform_5(%arg0: i32) -> (i32, i32) {
    %c0_i32 = arith.constant 0 : i32
    %c0_i32_0 = arith.constant 0 : i32
    %c0_i32_1 = arith.constant 0 : i32
    return %c0_i32, %c0_i32_0 : i32, i32
  }
  func.func @transform_6(%arg0: i32) -> (i32, i32) {
    %c0_i32 = arith.constant 0 : i32
    %c0_i32_0 = arith.constant 0 : i32
    %c0_i32_1 = arith.constant 0 : i32
    return %c0_i32, %c0_i32_0 : i32, i32
  }
  func.func @transform_7(%arg0: i32) -> (i32, i32) {
    %c0_i32 = arith.constant 0 : i32
    %c0_i32_0 = arith.constant 0 : i32
    return %arg0, %c0_i32 : i32, i32
  }
  func.func @transform_8(%arg0: i32) -> (i32, i32) {
    %c0_i32 = arith.constant 0 : i32
    %c0_i32_0 = arith.constant 0 : i32
    return %arg0, %c0_i32 : i32, i32
  }
}

</mosaic_0001>

<bundles_post_ra>
// kernel: tpu_custom_call.1
= control target key start
LH: loop header
LB: loop body
LE: loop exit
PB: predicated region body
PF: predicated region fallthrough
CT: control target
= control target key end

     0   :  { %s22593_s0 = inlined_call_operand.vmem [shape: f32[512,5], index: 0, kind: input, shape index: {}]   ;;  %s22594_s1 = inlined_call_operand.vmem [shape: f32[512,128], index: 1, kind: input, shape index: {}]   ;;  %s22595_s2 = inlined_call_operand.hbm [shape: f32[4,512,128], index: 2, kind: input, shape index: {}]   ;;  %s22596_s3 = inlined_call_operand.hbm [shape: f32[4,512,128], index: 3, kind: input, shape index: {}]   ;;  %s22597_s4 = inlined_call_operand.hbm [shape: f32[128,512], index: 4, kind: input, shape index: {}]   ;;  %s22598_s5 = inlined_call_operand.hbm [shape: f32[128,512], index: 5, kind: input, shape index: {}]   ;;  %s22599_s6 = inlined_call_operand.vmem [shape: f32[1,512], index: 6, kind: input, shape index: {}]   ;;  %s22600_s7 = inlined_call_operand.hbm [shape: f32[512,128], index: 7, kind: output, shape index: {0}]   ;;  %s22601_s8 = inlined_call_operand.hbm [shape: f32[512,128], index: 8, kind: output, shape index: {1}]  }
   0x1   :  { %23574 = sst [smem:[#allocation283_spill]] %s22595_s2 }
   0x2   :  { %14 = vsyncpa [#allocation3], 0 }
   0x3   :  { %16 = vsyncpa [#allocation3 + $0x1], 0 }
   0x4   :  { %17 = vsyncpa [#allocation6], 0 }
   0x5   :  { %19 = vsyncpa [#allocation6 + $0x1], 0 }
   0x6   :  { %20 = vsyncpa [#allocation9], 0 }
   0x7   :  { %21 = vsyncpa [#allocation4], 0 }
   0x8   :  { %23 = vsyncpa [#allocation4 + $0x1], 0 }
   0x9   :  { %24 = vsyncpa [#allocation12], 0 }
   0xa   :  { %26 = vsyncpa [#allocation12 + $0x1], 0  ;;  %s16379_s27 = smov 0   ;;  %s16381_s28 = smov 0  }
   0xb   :  { %s16383_s29 = smov 0   ;;  %s16385_s30 = smov 0  }
   0xc LB: > { %23575 = sst [smem:[#allocation25_spill]] %s16294_s27  ;;  %s16400_s9 = sadd.s32 4294967295, %s16306_s30   ;;  %s16306_s30 = sphi %s16385_s30, %s25103_s30   ;;  %s16302_s29 = sphi %s16383_s29, %s25107_s29   ;;  %s16298_s28 = sphi %s16381_s28, %s25106_s28   ;;  %s16294_s27 = sphi %s16379_s27, %s25105_s27  }
   0xd   : > { %s12888_s10 = sadd.s32 4294967294, %s16306_s30   ;;  %s16404_s11 = sadd.s32 1, %s16306_s30  }
   0xe   : > { %23576 = sst [smem:[#allocation26_spill]] %s16404_s11  ;;  %s91_s12 = sadd.s32 1, %s16302_s29 }
   0xf   : > { %s88_s13 = ssub.s32 %s16306_s30, %s16404_s11  ;;  %p98_p0 = scmp.ne.s32.totalorder %s16302_s29, %s16298_s28 }
  0x10   : > { %p89_p1 = scmp.eq.s32.totalorder %s88_s13, 0  ;;  %p99_p2 = scmp.eq.s32.totalorder %s16306_s30, 0 }
  0x11   : > { %p104_p3 = scmp.ne.s32.totalorder %s16298_s28, %s16294_s27  ;;  %p22602_p4 = scmp.eq.s32.totalorder %s16400_s9, 0 }
  0x12   : > { %s16416_s14 = scalar_select %p89_p1, %s16302_s29, %s91_s12  }
  0x13   : > { %p16418_p5 = por %p99_p2, %p98_p0  ;;  %p16424_p6 = por %p22602_p4, %p104_p3 }
  0x14   : > { %23577 = sst [smem:[#allocation27_spill]] %s16416_s14  ;;  %p217_p7 = scmp.eq.s32.totalorder %s16400_s9, 1 }
  0x15   : > { %s23578_s15 = scalar_select %p16418_p5, 1, 0 }
  0x16   : > { %s23579_s16 = scalar_select %p16424_p6, 1, 0 }
  0x17   : > { %p223_p8 = scmp.eq.s32.totalorder %s12888_s10, 1  ;;  %p12889_p9 = scmp.ge.s32.totalorder %s16306_s30, 1 }
  0x18   : > { %p256_p10 = scmp.lt.s32.totalorder %s16306_s30, 3  ;;  %p16431_p11 = por %p217_p7, %p98_p0 }
  0x19   : > { %p16435_p12 = por %p223_p8, %p104_p3  ;;  %s16308_s20 = smov [#allocation7]  }
  0x1a   : > { %s23580_s17 = scalar_select %p16431_p11, 1, 0 }
  0x1b   : > { %s23581_s18 = scalar_select %p16435_p12, 1, 0 }
  0x1c   : > { %p16439_p13 = pnand %p12889_p9, %p256_p10  ;;  %s268_s21 = sshll.u32 %s16308_s20, 4  ;;  %s269_s21 = int_to_ptr.vmem [resolvable:$true] %s268_s21 }
  0x1d   : > { %23582 = sst [smem:[#allocation28_spill]] %s23581_s18  ;;  %s16309_s23 = smov [#allocation8]  }
  0x1e   : > { %s23583_s19 = scalar_select %p16439_p13, 1, 0 }
  0x1f   : > { %p15420_p1 = pneg %p16439_p13  ;;  %s281_s24 = sshll.u32 %s16309_s23, 4  ;;  %s16451_s24 = int_to_ptr.vmem [resolvable:$true] %s281_s24 }
  0x20   : > { %s16140_s10 = scalar_lea.hbm %s22597_s4, 8192 }
  0x21   : > { %p16447_p2 = pnand %p15420_p1, %p22602_p4  ;;  %p16141_p0 = scmp.ne.s32.totalorder %s22597_s4, %s16140_s10 }
  0x22   : > { %p16147_p9 = scmp.lt.u32.totalorder %s16140_s10, %s22597_s4 }
  0x23   : > { %p16142_p3 = pneg %p16447_p2 }
  0x25   : > { %p16143_p7 = pnand %p16142_p3, %p16141_p0 }
  0x27   : > { %p16144_p8 = pneg %p16143_p7 }
  0x29   : > { %p16149_p10 = pnand %p16147_p9, %p16144_p8 }
  0x2b   : > { %16152 = shalt.err (!%p16149_p10)
}
  0x2c   : > { %s16153_s23 = scalar_lea.vmem %s269_s21, 8192  ;;  %p16161_p11 = scmp.lt.s32.totalorder %s269_s21, %s269_s21 }
  0x2d   : > { %p16154_p1 = scmp.ne.s32.totalorder %s269_s21, %s16153_s23  ;;  %p16162_p6 = scmp.lt.s32.totalorder %s16153_s23, %s16153_s23 }
  0x2f   : > { %p16156_p4 = pnand %p16154_p1, %p16142_p3  ;;  %p16163_p13 = por %p16162_p6, %p16161_p11 }
  0x31   : > { %p16157_p12 = pneg %p16156_p4 }
  0x33   : > { %p16164_p5 = pnand %p16163_p13, %p16157_p12 }
  0x35   : > { %16167 = shalt.err (!%p16164_p5)
}
  0x36   : > { %s16310_s25 = smov 512   ;;  %s16311_s26 = smov 32  }
  0x37   : > { %15423 = dma.hbm_to_vmem [thread:$0]  (!%p16447_p2), %s22597_s4, 8192, %s269_s21, [#allocation6], %s16310_s25, %s16310_s25, %s16311_s26  }
  0x38   : > { %s16168_s20 = scalar_lea.hbm %s22598_s5, 8192 }
  0x39   : > { %p16169_p4 = scmp.ne.s32.totalorder %s22598_s5, %s16168_s20  ;;  %p16175_p11 = scmp.lt.u32.totalorder %s16168_s20, %s22598_s5 }
  0x3b   : > { %p16171_p5 = pnand %p16169_p4, %p16142_p3 }
  0x3d   : > { %p16172_p6 = pneg %p16171_p5 }
  0x3f   : > { %p16177_p12 = pnand %p16175_p11, %p16172_p6 }
  0x41   : > { %16180 = shalt.err (!%p16177_p12)
}
  0x42   : > { %s16181_s21 = scalar_lea.vmem %s16451_s24, 8192  ;;  %p16189_p8 = scmp.lt.s32.totalorder %s16451_s24, %s16451_s24 }
  0x43   : > { %p16182_p13 = scmp.ne.s32.totalorder %s16451_s24, %s16181_s21  ;;  %p16190_p9 = scmp.lt.s32.totalorder %s16181_s21, %s16181_s21 }
  0x45   : > { %p16184_p0 = pnand %p16182_p13, %p16142_p3  ;;  %p16191_p10 = por %p16190_p9, %p16189_p8 }
  0x47   : > { %p16185_p7 = pneg %p16184_p0 }
  0x49   : > { %p16192_p1 = pnand %p16191_p10, %p16185_p7 }
  0x4b   : > { %16195 = shalt.err (!%p16192_p1)
}
  0x4c   : > { %15426 = dma.hbm_to_vmem [thread:$0]  (!%p16447_p2), %s22598_s5, 8192, %s16451_s24, [#allocation9], %s16310_s25, %s16310_s25, %s16311_s26  }
  0x4d   : > { %p12892_p4 = scmp.ge.s32.totalorder %s16306_s30, 2 }
  0x4f   : > { %294 = sbr.rel (%p12892_p4) target bundleno = 113 (0x71), region = 28 }
  0x56   : > { %s316_s18 = sand.u32 1, %s16302_s29   ;;  %s13210_s14 = sshll.u32 %s16306_s30, 12 }
  0x57   : > { %s12893_s22 = sshll.u32 %s316_s18, 10  ;;  %s23585_s2 = sld [smem:[#allocation283_spill]] }
  0x58   : > { %p23586_p2 = scmp.ne.s32.totalorder %s23578_s15, 0  ;;  %s320_s26 = scalar_lea.vmem [#allocation2], %s12893_s22 }
  0x59   : > { %s339_s13 = sshll.u32 %s320_s26, 4  ;;  %s16312_s23 = smov 8192   ;;  %s340_s13 = int_to_ptr.vmem [resolvable:$true] %s339_s13 }
  0x5a   : > { %s15394_s25 = scalar_select %p23586_p2, [#allocation0], [#allocation17] }
  0x5b   : > { %15395 = sst [smem:[#allocation14]] (%p23586_p2), %s16312_s23  ;;  %s16313_s21 = smov 4096  }
  0x5c   : > { %s331_s20 = sld [smem:[%s15394_s25]]   ;;  %s16314_s27 = smov 32  }
  0x5d   : > { %s326_s24 = scalar_lea.hbm %s23585_s2, %s13210_s14  ;;  %15396 = sst [smem:[#allocation14 + $0x1]] (%p23586_p2), %s16313_s21 }
  0x5e   : > { %15397 = sst [smem:[#allocation14 + $0x2]] (%p23586_p2), %s16314_s27  ;;  %s16315_s11 = smov 128  }
  0x5f   : > { %15398 = sst [smem:[#allocation14 + $0x3]] (%p23586_p2), %s16315_s11  ;;  %s16316_s12 = smov 8  }
  0x60   : > { %15399 = sst [smem:[#allocation14 + $0x4]] (%p23586_p2), %s16315_s11  ;;  %s317_s26 = scalar_lea.sflag [#allocation3], %s316_s18 }
  0x61   : > { %15400 = sst [smem:[#allocation14 + $0x5]] (%p23586_p2), %s16316_s12  ;;  %s16317_s2 = smov [#allocation13]  }
  0x62   : > { %s12896_s10 = sshll.u32 %s331_s20, 26 }
  0x63   : > { %s12897_s25 = sadd.s32 134217728, %s12896_s10 }
  0x64   : > { %15401 = dma.general (%p23586_p2), %s326_s24, 16384, %s340_s13, %s317_s26, %s16317_s2, [#allocation14], %s12897_s25, 0  }
  0x65   : > { %s362_s23 = sand.u32 1, %s16306_s30   ;;  %s372_s20 = scalar_lea.hbm %s22596_s3, %s13210_s14 }
  0x66   : > { %s15402_s11 = scalar_select %p23586_p2, [#allocation0], [#allocation18] }
  0x67   : > { %s366_s10 = scalar_lea.vmem [#allocation5], %s12893_s22  ;;  %s16318_s2 = smov 8192  }
  0x68   : > { %s385_s18 = sshll.u32 %s366_s10, 4  ;;  %s377_s12 = sld [smem:[%s15402_s11]]   ;;  %s386_s18 = int_to_ptr.vmem [resolvable:$true] %s385_s18 }
  0x69   : > { %15403 = sst [smem:[#allocation16]] (%p23586_p2), %s16318_s2  ;;  %s16319_s24 = smov 4096  }
  0x6a   : > { %15404 = sst [smem:[#allocation16 + $0x1]] (%p23586_p2), %s16319_s24  ;;  %s16320_s13 = smov 32  }
  0x6b   : > { %15405 = sst [smem:[#allocation16 + $0x2]] (%p23586_p2), %s16320_s13  ;;  %s16321_s25 = smov 128  }
  0x6c   : > { %15406 = sst [smem:[#allocation16 + $0x3]] (%p23586_p2), %s16321_s25  ;;  %s16322_s22 = smov 8  }
  0x6d   : > { %15407 = sst [smem:[#allocation16 + $0x4]] (%p23586_p2), %s16321_s25  ;;  %s363_s21 = scalar_lea.sflag [#allocation6], %s362_s23 }
  0x6e   : > { %s12901_s14 = sshll.u32 %s377_s12, 26  ;;  %15408 = sst [smem:[#allocation16 + $0x5]] (%p23586_p2), %s16322_s22 }
  0x6f   : > { %s12902_s26 = sadd.s32 134217728, %s12901_s14  ;;  %s16323_s27 = smov [#allocation15]  }
  0x70   : > { %15409 = dma.general (%p23586_p2), %s372_s20, 16384, %s386_s18, %s363_s21, %s16323_s27, [#allocation16], %s12902_s26, 0  }
  0x71 PF: > { %p23587_p3 = scmp.ne.s32.totalorder %s23583_s19, 0 }
  0x73   : > { %410 = sbr.rel (%p23587_p3) target bundleno = 2524 (0x9dc), region = 48 }
  0x7a   : > { %s16547_s11 = sand.u32 1, %s16298_s28   ;;  %p23588_p5 = scmp.ne.s32.totalorder %s23579_s16, 0 }
  0x7b   : > { %s12904_s10 = sshll.u32 %s16547_s11, 10  ;;  %s413_s12 = scalar_lea.sflag [#allocation3], %s16547_s11 }
  0x7c   : > { %s16551_s2 = scalar_lea.vmem [#allocation2], %s12904_s10 }
  0x7d   : > { %16269 = dma.done.wait (%p23588_p5), %s413_s12, 16384  }
  0x7e   : > { %16271 = vsyncadd (%p23588_p5), %s413_s12, 4294950912  ;;  %s421_s15 = sand.u32 1, %s16400_s9   ;;  %s16558_s23 = scalar_lea.vmem [#allocation5], %s12904_s10 }
  0x7f   : > { %s422_s19 = scalar_lea.sflag [#allocation6], %s421_s15 }
  0x80   : > { %16273 = dma.done.wait (%p23588_p5), %s422_s19, 16384  }
  0x81   : > { %16275 = vsyncadd (%p23588_p5), %s422_s19, 4294950912  ;;  %p23589_p6 = scmp.eq.s32.totalorder %s16400_s9, 0 }
  0x83   : > { %16277 = dma.done.wait (%p23589_p6), [#allocation6], 8192   ;;  %p23590_p11 = pmov %p23589_p6 }
  0x84   : > { %p23591_p12 = pmov %p23589_p6 }
  0x85   : > { %16279 = vsyncadd (%p23590_p11), [#allocation6], 4294959104 }
  0x86   : > { %16281 = dma.done.wait (%p23591_p12), [#allocation9], 8192   ;;  %p23592_p13 = pmov %p23589_p6 }
  0x87   : > { %s12910_s20 = sshll.u32 %s16400_s9, 5  ;;  %v22613_v0 = vmov 2   ;;  %v22617_v5 = vmov 0   ;;  %v22615_v6 = vmov 3   ;;  %v22611_v7 = vmov 1   ;;  %v1949_v15 = vld [vmem:[#allocation8 + $0x8] sm:$0xff] }
  0x88   : > { %16283 = vsyncadd (%p23592_p13), [#allocation9], 4294959104  ;;  %15504 = vset.pattern.permute.xlu0 %v22613_v0  ;;  %15495 = vset.pattern.permute.xlu1 %v22613_v0  ;;  %p487_p0 = scmp.lt.s32.totalorder %s12910_s20, 63  ;;  %v1953_v16 = vld [vmem:[#allocation8 + $0x28] sm:$0xff]  ;;  %v2012_v17 = vand.u32 4294901760, %v1949_v15  ;;  %v1951_v18 = vld [vmem:[#allocation8 + $0x18] sm:$0xff] }
  0x89   : > { %v1955_v19 = vld [vmem:[#allocation8 + $0x38] sm:$0xff]  ;;  %v2016_v20 = vand.u32 4294901760, %v1953_v16  ;;  %v4386_v21 = vand.u32 4294901760, %v1951_v18  ;;  %v1948_v29 = vld [vmem:[#allocation8] sm:$0xff]  ;;  %v1950_v31 = vld [vmem:[#allocation8 + $0x10] sm:$0xff]  ;;  %s12908_s27 = sshll.u32 %s16547_s11, 8 }
  0x8a   : > { %s25109_s20 = smov (!%p487_p0, %s12910_s20), 63  ;;  %v4390_v22 = vand.u32 4294901760, %v1955_v19  ;;  %v16642_v24 = vsub.f32 %v1949_v15, %v2012_v17  ;;  %v1952_v30 = vld [vmem:[#allocation8 + $0x20] sm:$0xff]  ;;  %v2014_v33 = vand.u32 4294901760, %v1948_v29  ;;  %v1954_v35 = vld [vmem:[#allocation8 + $0x30] sm:$0xff]  ;;  %v4388_v36 = vand.u32 4294901760, %v1950_v31 }
  0x8b   : > { %s12911_s16 = sshll.u32 %s25109_s20, 3  ;;  %v16644_v25 = vpack.c.bf16 %v2016_v20, %v2012_v17  ;;  %v16646_v26 = vsub.f32 %v1953_v16, %v2016_v20  ;;  %v16650_v28 = vsub.f32 %v1951_v18, %v4386_v21  ;;  %v2018_v34 = vand.u32 4294901760, %v1952_v30  ;;  %v1957_v37 = vld [vmem:[#allocation8 + $0x48] sm:$0xff]  ;;  %v1959_v42 = vld [vmem:[#allocation8 + $0x58] sm:$0xff]  ;;  %v1956_v44 = vld [vmem:[#allocation8 + $0x40] sm:$0xff]  ;;  %s21748_s10 = scalar_lea.vmem [#allocation11], %s12908_s27 }
  0x8c   : > { %s16583_s13 = scalar_lea.vmem %s22593_s0, %s12911_s16  ;;  %23593 = vst [vmem:[#allocation29_spill] sm:$0xff] %v16642_v24  ;;  %v16648_v27 = vpack.c.bf16 %v4390_v22, %v4386_v21  ;;  %v16653_v32 = vsub.f32 %v1955_v19, %v4390_v22  ;;  %v1961_v38 = vld [vmem:[#allocation8 + $0x68] sm:$0xff]  ;;  %v4392_v39 = vand.u32 4294901760, %v1954_v35  ;;  %v2020_v40 = vand.u32 4294901760, %v1957_v37  ;;  %v1963_v43 = vld [vmem:[#allocation8 + $0x78] sm:$0xff]  ;;  %v1960_v49 = vld [vmem:[#allocation8 + $0x60] sm:$0xff]  ;;  %s19897_s22 = scalar_lea.vmem %s22594_s1, %s12911_s16 }
  0x8d   : > { %v16586_v1 = vld [vmem:[%s16583_s13 + $0x18] sm:$0xff]  ;;  %v16589_v2 = vld [vmem:[%s16583_s13] sm:$0xff]  ;;  %v16594_v3 = vld [vmem:[%s16583_s13 + $0x30] sm:$0xff]  ;;  %23594 = vst [vmem:[#allocation30_spill] sm:$0xff] %v16644_v25  ;;  %v2024_v41 = vand.u32 4294901760, %v1961_v38  ;;  %13215 = vmatprep.subr.bf16.mxu0 %v16644_v25  ;;  %v16662_v46 = vpack.c.bf16 %v2018_v34, %v2014_v33  ;;  %v4394_v47 = vand.u32 4294901760, %v1959_v42  ;;  %v16664_v51 = vsub.f32 %v1948_v29, %v2014_v33 }
  0x8e   : > { %1254 = vperm.xlu0 %15504, %v16586_v1   ;;  %1242 = vperm.xlu1 %15495, %v16589_v2   ;;  %v503_v4 = vld [vmem:[%s16583_s13 + $0x8] sm:$0xff]  ;;  %v504_v8 = vld [vmem:[%s16583_s13 + $0x10] sm:$0xff]  ;;  %v16612_v10 = vld [vmem:[%s16583_s13 + $0x60] sm:$0xff]  ;;  %23595 = vst [vmem:[#allocation31_spill] sm:$0xff] %v16646_v26  ;;  %v4398_v48 = vand.u32 4294901760, %v1963_v43  ;;  %v2022_v50 = vand.u32 4294901760, %v1956_v44  ;;  %v16666_v52 = vsub.f32 %v1952_v30, %v2018_v34  ;;  %v16668_v53 = vpack.c.bf16 %v4392_v39, %v4388_v36 }
  0x8f   : > { %v16607_v9 = vld [vmem:[%s16583_s13 + $0x48] sm:$0xff]  ;;  %v16627_v12 = vld [vmem:[%s16583_s13 + $0x40] sm:$0xff]  ;;  %v16634_v14 = vld [vmem:[%s16583_s13 + $0x58] sm:$0xff]  ;;  %23596 = vst [vmem:[#allocation32_spill] sm:$0xff] %v16648_v27  ;;  %13407 = vmatprep.subr.bf16.mxu1 %v16648_v27  ;;  %v16670_v54 = vsub.f32 %v1950_v31, %v4388_v36  ;;  %13217 = vmatpush1.bf16.msra.mxu0 %v16662_v46  ;;  %v16673_v57 = vsub.f32 %v1954_v35, %v4392_v39  ;;  %v2026_v15 = vand.u32 4294901760, %v1960_v49  ;;  %s21960_s12 = scalar_lea.vmem [#allocation10], %s12908_s27 }
  0x90   : > { %v16622_v11 = vld [vmem:[%s16583_s13 + $0x28] sm:$0xff]  ;;  %v16631_v13 = vld [vmem:[%s16583_s13 + $0x20] sm:$0xff]  ;;  %v16640_v23 = vld [vmem:[%s16583_s13 + $0x70] sm:$0xff]  ;;  %23597 = vst [vmem:[#allocation33_spill] sm:$0xff] %v16650_v28  ;;  %v16675_v58 = vpack.c.bf16 %v2024_v41, %v2020_v40  ;;  %v16677_v59 = vsub.f32 %v1957_v37, %v2020_v40  ;;  %v16679_v60 = vsub.f32 %v1961_v38, %v2024_v41  ;;  %v16683_v63 = vpack.c.bf16 %v4398_v48, %v4394_v47  ;;  %s12717_s15 = sshll.u32 %s21748_s10, 4  ;;  %s12688_s16 = scalar_lea.sflag [#allocation12], %s16547_s11  ;;  %s22505_s15 = int_to_ptr.vmem [resolvable:$true] %s12717_s15 }
  0x91   : > { %23598 = vst [vmem:[#allocation34_spill] sm:$0xff] %v16653_v32  ;;  %v16658_v45 = vld [vmem:[%s16583_s13 + $0x88] sm:$0xff]  ;;  %23599 = vst [vmem:[#allocation35_spill] sm:$0xff] %v16662_v46  ;;  %v1958_v55 = vld [vmem:[#allocation8 + $0x50] sm:$0xff]  ;;  %13409 = vmatpush1.bf16.msra.mxu1 %v16668_v53  ;;  %v16692_v18 = vsub.f32 %v1956_v44, %v2022_v50  ;;  %v16696_v30 = vpack.c.bf16 %v2026_v15, %v2022_v50  ;;  %v16698_v31 = vsub.f32 %v1960_v49, %v2026_v15  ;;  %s16196_s18 = scalar_lea.vmem %s22505_s15, 4096  ;;  %p25099_p8 = scmp.ne.s32.totalorder %s23580_s17, 0 }
  0x92   : > { %1266 = vperm.xlu0 %15504, %v16594_v3   ;;  %15496 = vset.pattern.permute.xlu1 %v22617_v5  ;;  %23600 = vst [vmem:[#allocation36_spill] sm:$0xff] %v16664_v51  ;;  %23601 = vst [vmem:[#allocation37_spill] sm:$0xff] %v16666_v52  ;;  %v1962_v56 = vld [vmem:[#allocation8 + $0x70] sm:$0xff]  ;;  %v1965_v61 = vld [vmem:[#allocation8 + $0x88] sm:$0xff]  ;;  %v4396_v19 = vand.u32 4294901760, %v1958_v55  ;;  %v23652_v52 = vmov 1   ;;  %p16197_p7 = scmp.ne.s32.totalorder %s22505_s15, %s16196_s18 }
  0x93   : > { %573 = vperm.xlu1 %15496, %v503_v4   ;;  %23602 = vst [vmem:[#allocation38_spill] sm:$0xff] %v16668_v53  ;;  %23603 = vst [vmem:[#allocation39_spill] sm:$0xff] %v16670_v54  ;;  %v1969_v62 = vld [vmem:[#allocation8 + $0xa8] sm:$0xff]  ;;  %v1967_v16 = vld [vmem:[#allocation8 + $0x98] sm:$0xff]  ;;  %v4400_v20 = vand.u32 4294901760, %v1962_v56  ;;  %v2028_v21 = vand.u32 4294901760, %v1965_v61  ;;  %13219 = vmatprep.subr.bf16.mxu0 %v16675_v58 }
  0x94   : > { %23604 = vst [vmem:[#allocation40_spill] sm:$0xff] %v16673_v57  ;;  %23605 = vst [vmem:[#allocation41_spill] sm:$0xff] %v16675_v58  ;;  %v522_v17 = vld [vmem:[%s16583_s13 + $0xa0] sm:$0xff]  ;;  %v1971_v22 = vld [vmem:[#allocation8 + $0xb8] sm:$0xff]  ;;  %13411 = vmatprep.subr.bf16.mxu1 %v16683_v63  ;;  %v2032_v33 = vand.u32 4294901760, %v1969_v62  ;;  %v4402_v34 = vand.u32 4294901760, %v1967_v16  ;;  %v16702_v39 = vsub.f32 %v1958_v55, %v4396_v19  ;;  %13221 = vmatpush1.bf16.msra.mxu0 %v16696_v30  ;;  %p16198_p9 = pnand %p16197_p7, %p25099_p8 }
  0x95   : > { %23606 = vst [vmem:[#allocation42_spill] sm:$0xff] %v16677_v59  ;;  %23607 = vst [vmem:[#allocation43_spill] sm:$0xff] %v16679_v60  ;;  %v1964_v29 = vld [vmem:[#allocation8 + $0x80] sm:$0xff]  ;;  %v1966_v36 = vld [vmem:[#allocation8 + $0x90] sm:$0xff]  ;;  %v16700_v38 = vpack.c.bf16 %v4400_v20, %v4396_v19  ;;  %v16704_v40 = vsub.f32 %v1962_v56, %v4400_v20  ;;  %v16706_v41 = vsub.f32 %v1965_v61, %v2028_v21  ;;  %s16330_s24 = smov [#allocation11]  }
  0x96   : > { %15513 = vset.pattern.permute.xlu0 %v22615_v6  ;;  %23608 = vst [vmem:[#allocation44_spill] sm:$0xff] %v16683_v63  ;;  %23611 = vst [vmem:[#allocation47_spill] sm:$0xff] %v16692_v18  ;;  %v1968_v35 = vld [vmem:[#allocation8 + $0xa0] sm:$0xff]  ;;  %v1970_v37 = vld [vmem:[#allocation8 + $0xb0] sm:$0xff]  ;;  %v16709_v44 = vpack.c.bf16 %v2032_v33, %v2028_v21  ;;  %v16713_v49 = vsub.f32 %v1967_v16, %v4402_v34  ;;  %v2030_v50 = vand.u32 4294901760, %v1964_v29  ;;  %v4404_v56 = vand.u32 4294901760, %v1966_v36  ;;  %p16199_p10 = pneg %p16198_p9 }
  0x97   : > { %1564 = vperm.xlu0 %15513, %v16589_v2   ;;  %15497 = vset.pattern.permute.xlu1 %v22611_v7  ;;  %23612 = vst [vmem:[#allocation48_spill] sm:$0xff] %v16696_v30  ;;  %23613 = vst [vmem:[#allocation49_spill] sm:$0xff] %v16698_v31  ;;  %v2034_v55 = vand.u32 4294901760, %v1968_v35  ;;  %v4408_v61 = vand.u32 4294901760, %v1970_v37  ;;  %v1975_v15 = vld [vmem:[#allocation8 + $0xd8] sm:$0xff]  ;;  %v1972_v21 = vld [vmem:[#allocation8 + $0xc0] sm:$0xff] }
  0x98   : > { %924 = vperm.xlu1 %15497, %v503_v4   ;;  %23614 = vst [vmem:[#allocation50_spill] sm:$0xff] %v16700_v38  ;;  %23615 = vst [vmem:[#allocation51_spill] sm:$0xff] %v16702_v39  ;;  %13413 = vmatpush1.bf16.msra.mxu1 %v16700_v38  ;;  %v1979_v20 = vld [vmem:[#allocation8 + $0xf8] sm:$0xff]  ;;  %v1974_v38 = vld [vmem:[#allocation8 + $0xd0] sm:$0xff]  ;;  %v4410_v30 = vand.u32 4294901760, %v1975_v15  ;;  %v2038_v53 = vand.u32 4294901760, %v1972_v21 }
  0x99   : > { %23616 = vst [vmem:[#allocation52_spill] sm:$0xff] %v16704_v40  ;;  %23617 = vst [vmem:[#allocation53_spill] sm:$0xff] %v16706_v41  ;;  %13223 = vmatprep.subr.bf16.mxu0 %v16709_v44  ;;  %v1978_v63 = vld [vmem:[#allocation8 + $0xf0] sm:$0xff]  ;;  %v1999_v31 = vld [vmem:[#allocation8 + $0x198] sm:$0xff] }
  0x9a   : > { %23618 = vst [vmem:[#allocation54_spill] sm:$0xff] %v16709_v44  ;;  %23620 = vst [vmem:[#allocation56_spill] sm:$0xff] %v16713_v49  ;;  %v23627_v44 = vmov 0   ;;  %v4416_v58 = vand.u32 4294901760, %v1978_v63  ;;  %v16770_v46 = vld [vmem:[#allocation8 + $0x110] sm:$0xff]  ;;  %v2003_v18 = vld [vmem:[#allocation8 + $0x1b8] sm:$0xff] }
  0x9b   : > { %1576 = vperm.xlu0 %15513, %v16586_v1   ;;  %v16772_v27 = vld [vmem:[#allocation8 + $0x130] sm:$0xff]  ;;  %v1996_v57 = vld [vmem:[#allocation8 + $0x180] sm:$0xff] }
  0x9c   : > { %15498 = vset.pattern.permute.xlu1 %v22613_v0  ;;  %v2000_v59 = vld [vmem:[#allocation8 + $0x1a0] sm:$0xff]  ;;  %v1998_v32 = vld [vmem:[#allocation8 + $0x190] sm:$0xff] }
  0x9d   : > { %1246 = vperm.xlu1 %15498, %v503_v4   ;;  %v2002_v28 = vld [vmem:[#allocation8 + $0x1b0] sm:$0xff] }
  0x9f   : > { %1588 = vperm.xlu0 %15513, %v16594_v3  }
  0xa1   : > { %15499 = vset.pattern.permute.xlu1 %v22617_v5 }
  0xa2   : > { %578 = vperm.xlu1 %15499, %v504_v8  }
  0xa3   : > { %1600 = vperm.xlu0 %15513, %v16607_v9  }
  0xa6   : > { %15500 = vset.pattern.permute.xlu1 %v22615_v6 }
  0xa7   : > { %1612 = vperm.xlu0 %15513, %v16612_v10   ;;  %1568 = vperm.xlu1 %15500, %v503_v4   ;;  %v16685_v4 = vsub.f32 %v1959_v42, %v4394_v47  ;;  %v1973_v42 = vld [vmem:[#allocation8 + $0xc8] sm:$0xff]  ;;  %v16711_v47 = vsub.f32 %v1969_v62, %v2032_v33  ;;  %v16723_v33 = vpack.c.bf16 %v2034_v55, %v2030_v50 }
  0xa8   : > { %v2036_v19 = vand.u32 4294901760, %v1973_v42 }
  0xa9   : > { %23609 = vst [vmem:[#allocation45_spill] sm:$0xff] %v16685_v4  ;;  %23619 = vst [vmem:[#allocation55_spill] sm:$0xff] %v16711_v47  ;;  %13225 = vmatpush1.bf16.msra.mxu0 %v16723_v33 }
  0xaa   : > { %23623 = vst [vmem:[#allocation59_spill] sm:$0xff] %v16723_v33  ;;  %v16755_v33 = vld [vmem:[#allocation8 + $0x138] sm:$0xff] }
  0xab   : > { %15532 = vset.pattern.permute.xlu0 %v22611_v7  ;;  %15501 = vset.pattern.permute.xlu1 %v22613_v0 }
  0xac   : > { %920 = vperm.xlu0 %15532, %v16589_v2   ;;  %1250 = vperm.xlu1 %15501, %v504_v8  }
  0xb0   : > { %928 = vperm.xlu0 %15532, %v504_v8   ;;  %15502 = vset.pattern.permute.xlu1 %v22611_v7 }
  0xb1   : > { %932 = vperm.xlu1 %15502, %v16586_v1  }
  0xb4   : > { %940 = vperm.xlu0 %15532, %v16622_v11  }
  0xb5   : > { %15503 = vset.pattern.permute.xlu1 %v22615_v6  ;;  %v16729_v6 = vpack.c.bf16 %v4408_v61, %v4404_v56 }
  0xb6   : > { %1572 = vperm.xlu1 %15503, %v504_v8   ;;  %v16687_v8 = vsub.f32 %v1963_v43, %v4398_v48  ;;  %v1977_v43 = vld [vmem:[#allocation8 + $0xe8] sm:$0xff]  ;;  %v4406_v48 = vand.u32 4294901760, %v1971_v22 }
  0xb7   : > { %v2040_v16 = vand.u32 4294901760, %v1977_v43  ;;  %23626 = vst [vmem:[#allocation62_spill] sm:$0xff] %v16729_v6 }
  0xb8   : > { %952 = vperm.xlu0 %15532, %v16627_v12   ;;  %23610 = vst [vmem:[#allocation46_spill] sm:$0xff] %v16687_v8  ;;  %v16721_v62 = vsub.f32 %v1971_v22, %v4406_v48  ;;  %v16733_v22 = vsub.f32 %v1966_v36, %v4404_v56  ;;  %v23633_v36 = vmov 3  }
  0xba   : > { %15505 = vset.pattern.permute.xlu1 %v22617_v5  ;;  %23622 = vst [vmem:[#allocation58_spill] sm:$0xff] %v16721_v62  ;;  %23628 = vst [vmem:[#allocation63_spill] sm:$0xff] %v16733_v22  ;;  %v16818_v22 = vld [vmem:[#allocation8 + $0x188] sm:$0xff] }
  0xbb   : > { %588 = vperm.xlu1 %15505, %v16631_v13   ;;  %v2060_v4 = vand.u32 4294901760, %v16818_v22 }
  0xbc   : > { %964 = vperm.xlu0 %15532, %v16634_v14  }
  0xbf   : > { %15506 = vset.pattern.permute.xlu1 %v22611_v7  ;;  %v16725_v7 = vsub.f32 %v1964_v29, %v2030_v50  ;;  %v16739_v29 = vld [vmem:[#allocation8 + $0x108] sm:$0xff]  ;;  %v16745_v50 = vsub.f32 %v1977_v43, %v2040_v16 }
  0xc0   : > { %976 = vperm.xlu0 %15532, %v16640_v23   ;;  %936 = vperm.xlu1 %15506, %v16631_v13  }
  0xc1   : > { %23624 = vst [vmem:[#allocation60_spill] sm:$0xff] %v16725_v7  ;;  %23632 = vst [vmem:[#allocation67_spill] sm:$0xff] %v16745_v50  ;;  %v16820_v50 = vld [vmem:[#allocation8 + $0x1a8] sm:$0xff] }
  0xc4   : > { %988 = vperm.xlu0 %15532, %v16658_v45   ;;  %15507 = vset.pattern.permute.xlu1 %v22613_v0  ;;  %v16727_v0 = vsub.f32 %v1968_v35, %v2034_v55  ;;  %v16743_v35 = vsub.f32 %v1973_v42, %v2036_v19  ;;  %v4414_v55 = vand.u32 4294901760, %v1979_v20  ;;  %v16757_v42 = vld [vmem:[#allocation8 + $0x100] sm:$0xff] }
  0xc5   : > { %1258 = vperm.xlu1 %15507, %v16631_v13  }
  0xc6   : > { %23625 = vst [vmem:[#allocation61_spill] sm:$0xff] %v16727_v0  ;;  %23631 = vst [vmem:[#allocation66_spill] sm:$0xff] %v16743_v35  ;;  %v16761_v43 = vpack.c.bf16 %v4414_v55, %v4410_v30 }
  0xc8   : > { %1000 = vperm.xlu0 %15532, %v522_v17   ;;  %v16719_v17 = vpack.c.bf16 %v4406_v48, %v4402_v34  ;;  %v16735_v34 = vsub.f32 %v1970_v37, %v4408_v61  ;;  %v16737_v48 = vpack.c.bf16 %v2040_v16, %v2036_v19  ;;  %v16751_v37 = vsub.f32 %v1975_v15, %v4410_v30 }
  0xc9   : > { %15508 = vset.pattern.permute.xlu1 %v22617_v5  ;;  %v1976_v5 = vld [vmem:[#allocation8 + $0xe0] sm:$0xff]  ;;  %v4412_v61 = vand.u32 4294901760, %v1974_v38  ;;  %23635 = vst [vmem:[#allocation69_spill] sm:$0xff] %v16761_v43  ;;  %v16763_v19 = vsub.f32 %v1979_v20, %v4414_v55  ;;  %v16765_v16 = vsub.f32 %v1972_v21, %v2038_v53  ;;  %v2044_v15 = vand.u32 4294901760, %v16739_v29  ;;  %v16782_v20 = vld [vmem:[#allocation8 + $0x148] sm:$0xff] }
  0xca   : > { %593 = vperm.xlu1 %15508, %v16622_v11   ;;  %23621 = vst [vmem:[#allocation57_spill] sm:$0xff] %v16719_v17  ;;  %13415 = vmatprep.subr.bf16.mxu1 %v16719_v17  ;;  %23629 = vst [vmem:[#allocation64_spill] sm:$0xff] %v16735_v34  ;;  %v16747_v17 = vld [vmem:[#allocation8 + $0x128] sm:$0xff]  ;;  %v2042_v56 = vand.u32 4294901760, %v1976_v5  ;;  %v16788_v55 = vsub.f32 %v1978_v63, %v4416_v58  ;;  %v4420_v63 = vand.u32 4294901760, %v16770_v46  ;;  %v16816_v34 = vld [vmem:[#allocation8 + $0x170] sm:$0xff] }
  0xcb   : > { %23630 = vst [vmem:[#allocation65_spill] sm:$0xff] %v16737_v48  ;;  %13417 = vmatpush1.bf16.msra.mxu1 %v16729_v6  ;;  %23634 = vst [vmem:[#allocation68_spill] sm:$0xff] %v16751_v37  ;;  %13227 = vmatprep.subr.bf16.mxu0 %v16737_v48  ;;  %v16768_v6 = vld [vmem:[#allocation8 + $0x120] sm:$0xff]  ;;  %v16780_v30 = vsub.f32 %v1974_v38, %v4412_v61  ;;  %v16784_v21 = vld [vmem:[#allocation8 + $0x168] sm:$0xff]  ;;  %v2048_v48 = vand.u32 4294901760, %v16747_v17  ;;  %v4432_v8 = vand.u32 4294901760, %v16816_v34 }
  0xcc   : > { %15551 = vset.pattern.permute.xlu0 %v23627_v44  ;;  %23636 = vst [vmem:[#allocation70_spill] sm:$0xff] %v16763_v19  ;;  %23637 = vst [vmem:[#allocation71_spill] sm:$0xff] %v16765_v16  ;;  %v16774_v25 = vpack.c.bf16 %v2042_v56, %v2038_v53  ;;  %v16776_v37 = vsub.f32 %v1976_v5, %v2042_v56  ;;  %13419 = vmatprep.subr.bf16.mxu1 %v16761_v43  ;;  %v4422_v5 = vand.u32 4294901760, %v16755_v33  ;;  %v16793_v56 = vld [vmem:[#allocation8 + $0x158] sm:$0xff]  ;;  %v23643_v19 = vmov 2  }
  0xcd   : > { %568 = vperm.xlu0 %15551, %v16589_v2   ;;  %v16753_v2 = vld [vmem:[#allocation8 + $0x118] sm:$0xff]  ;;  %23641 = vst [vmem:[#allocation75_spill] sm:$0xff] %v16780_v30  ;;  %23642 = vst [vmem:[#allocation76_spill] sm:$0xff] %v16788_v55  ;;  %v4424_v43 = vand.u32 4294901760, %v16772_v27  ;;  %v16805_v55 = vld [vmem:[#allocation8 + $0x160] sm:$0xff]  ;;  %v4426_v49 = vand.u32 4294901760, %v16793_v56  ;;  %v16844_v54 = vsub.f32 %v16739_v29, %v2044_v15  ;;  %v16847_v60 = vsub.f32 %v16747_v17, %v2048_v48 }
  0xce   : > { %15509 = vset.pattern.permute.xlu1 %v23633_v36  ;;  %23638 = vst [vmem:[#allocation72_spill] sm:$0xff] %v16774_v25  ;;  %23639 = vst [vmem:[#allocation73_spill] sm:$0xff] %v16776_v37  ;;  %v4418_v53 = vand.u32 4294901760, %v16753_v2  ;;  %v16795_v38 = vld [vmem:[#allocation8 + $0x178] sm:$0xff]  ;;  %13229 = vmatpush1.bf16.msra.mxu0 %v16774_v25  ;;  %v16807_v30 = vld [vmem:[#allocation8 + $0x150] sm:$0xff]  ;;  %v16810_v37 = vpack.c.bf16 %v2048_v48, %v2044_v15  ;;  %v2056_v25 = vand.u32 4294901760, %v16784_v21 }
  0xcf   : > { %1580 = vperm.xlu1 %15509, %v16631_v13   ;;  %v16778_v13 = vpack.c.bf16 %v4416_v58, %v4412_v61  ;;  %v16797_v61 = vld [vmem:[#allocation8 + $0x140] sm:$0xff]  ;;  %v2050_v58 = vand.u32 4294901760, %v16768_v6  ;;  %v16825_v62 = vpack.c.bf16 %v4424_v43, %v4420_v63  ;;  %v4430_v0 = vand.u32 4294901760, %v16795_v38  ;;  %23650 = vst [vmem:[#allocation83_spill] sm:$0xff] %v16844_v54  ;;  %23651 = vst [vmem:[#allocation84_spill] sm:$0xff] %v16847_v60  ;;  %v16873_v15 = vld [vmem:[#allocation8 + $0x1d8] sm:$0xff] }
  0xd0   : > { %23644 = vst [vmem:[#allocation77_spill] sm:$0xff] %v16810_v37  ;;  %v16812_v16 = vpack.c.bf16 %v4422_v5, %v4418_v53  ;;  %13231 = vmatprep.subr.bf16.mxu0 %v16810_v37  ;;  %v2054_v40 = vand.u32 4294901760, %v16797_v61  ;;  %v2058_v39 = vand.u32 4294901760, %v16805_v55  ;;  %v4428_v47 = vand.u32 4294901760, %v16807_v30 }
  0xd1   : > { %23640 = vst [vmem:[#allocation74_spill] sm:$0xff] %v16778_v13  ;;  %583 = vperm.xlu0 %15551, %v16586_v1   ;;  %13421 = vmatpush1.bf16.msra.mxu1 %v16778_v13  ;;  %v2046_v1 = vand.u32 4294901760, %v16757_v42  ;;  %v2052_v13 = vand.u32 4294901760, %v16782_v20  ;;  %23647 = vst [vmem:[#allocation80_spill] sm:$0xff] %v16825_v62  ;;  %v16838_v41 = vpack.c.bf16 %v4430_v0, %v4426_v49  ;;  %v2064_v37 = vand.u32 4294901760, %v16820_v50 }
  0xd2   : > { %23645 = vst [vmem:[#allocation78_spill] sm:$0xff] %v16812_v16  ;;  %13423 = vmatprep.subr.bf16.mxu1 %v16812_v16  ;;  %v16850_v16 = vsub.f32 %v16753_v2, %v4418_v53  ;;  %v16861_v29 = vsub.f32 %v16768_v6, %v2050_v58  ;;  %v16864_v17 = vsub.f32 %v16770_v46, %v4420_v63  ;;  %v16871_v2 = vld [vmem:[#allocation8 + $0x1e8] sm:$0xff]  ;;  %v4434_v46 = vand.u32 4294901760, %v1999_v31 }
  0xd3   : > { %15510 = vset.pattern.permute.xlu1 %v23643_v19  ;;  %v16823_v35 = vpack.c.bf16 %v2050_v58, %v2046_v1  ;;  %v16831_v7 = vpack.c.bf16 %v2056_v25, %v2052_v13  ;;  %23649 = vst [vmem:[#allocation82_spill] sm:$0xff] %v16838_v41  ;;  %v16858_v51 = vsub.f32 %v16757_v42, %v2046_v1  ;;  %v4436_v1 = vand.u32 4294901760, %v1998_v32  ;;  %v2011_v58 = vld [vmem:[#allocation8 + $0x1f8] sm:$0xff] }
  0xd4   : > { %1262 = vperm.xlu1 %15510, %v16622_v11   ;;  %23654 = vst [vmem:[#allocation86_spill] sm:$0xff] %v16864_v17  ;;  %v16867_v48 = vsub.f32 %v16772_v27, %v4424_v43  ;;  %v16877_v42 = vpack.c.bf16 %v2058_v39, %v2054_v40  ;;  %v16879_v6 = vpack.c.bf16 %v4432_v8, %v4428_v47  ;;  %v4438_v27 = vand.u32 4294901760, %v2003_v18 }
  0xd5   : > { %23646 = vst [vmem:[#allocation79_spill] sm:$0xff] %v16823_v35  ;;  %598 = vperm.xlu0 %15551, %v16594_v3   ;;  %23648 = vst [vmem:[#allocation81_spill] sm:$0xff] %v16831_v7  ;;  %13233 = vmatpush1.bf16.msra.mxu0 %v16823_v35  ;;  %v16853_v35 = vsub.f32 %v16755_v33, %v4422_v5  ;;  %v16869_v33 = vld [vmem:[#allocation8 + $0x1c8] sm:$0xff]  ;;  %v16881_v53 = vpack.c.bf16 %v2064_v37, %v2060_v4  ;;  %v2062_v43 = vand.u32 4294901760, %v1996_v57 }
  0xd6   : > { %13425 = vmatpush1.bf16.msra.mxu1 %v16825_v62  ;;  %23653 = vst [vmem:[#allocation85_spill] sm:$0xff] %v16858_v51  ;;  %23655 = vst [vmem:[#allocation87_spill] sm:$0xff] %v16867_v48  ;;  %13235 = vmatprep.subr.bf16.mxu0 %v16831_v7  ;;  %v2066_v5 = vand.u32 4294901760, %v2000_v59  ;;  %v2068_v63 = vand.u32 4294901760, %v16869_v33  ;;  %v2072_v62 = vand.u32 4294901760, %v16871_v2  ;;  %v4442_v48 = vand.u32 4294901760, %v16873_v15 }
  0xd7   : > { %23656 = vst [vmem:[#allocation88_spill] sm:$0xff] %v16877_v42  ;;  %23657 = vst [vmem:[#allocation89_spill] sm:$0xff] %v16879_v6  ;;  %13427 = vmatprep.subr.bf16.mxu1 %v16838_v41  ;;  %v16891_v7 = vsub.f32 %v16782_v20, %v2052_v13  ;;  %v16894_v41 = vsub.f32 %v16784_v21, %v2056_v25  ;;  %v16897_v17 = vsub.f32 %v16793_v56, %v4426_v49 }
  0xd8   : > { %15511 = vset.pattern.permute.xlu1 %v23652_v52  ;;  %23658 = vst [vmem:[#allocation90_spill] sm:$0xff] %v16881_v53  ;;  %v16909_v13 = vsub.f32 %v16805_v55, %v2058_v39  ;;  %v16912_v25 = vsub.f32 %v16807_v30, %v4428_v47  ;;  %v4446_v49 = vand.u32 4294901760, %v2011_v58  ;;  %v16919_v20 = vsub.f32 %v16816_v34, %v4432_v8  ;;  %v2004_v55 = vld [vmem:[#allocation8 + $0x1c0] sm:$0xff]  ;;  %v2006_v8 = vld [vmem:[#allocation8 + $0x1d0] sm:$0xff] }
  0xd9   : > { %944 = vperm.xlu1 %15511, %v16594_v3   ;;  %613 = vperm.xlu0 %15551, %v16607_v9   ;;  %v4440_v3 = vand.u32 4294901760, %v2002_v28  ;;  %23659 = vst [vmem:[#allocation91_spill] sm:$0xff] %v16891_v7  ;;  %23660 = vst [vmem:[#allocation92_spill] sm:$0xff] %v16894_v41  ;;  %v16922_v21 = vsub.f32 %v16818_v22, %v2060_v4  ;;  %v16927_v39 = vpack.c.bf16 %v4438_v27, %v4434_v46  ;;  %v2008_v47 = vld [vmem:[#allocation8 + $0x1e0] sm:$0xff]  ;;  %v2010_v34 = vld [vmem:[#allocation8 + $0x1f0] sm:$0xff] }
  0xda   : > { %13237 = vmatpush1.bf16.msra.mxu0 %v16877_v42  ;;  %13429 = vmatpush1.bf16.msra.mxu1 %v16879_v6  ;;  %23661 = vst [vmem:[#allocation93_spill] sm:$0xff] %v16897_v17  ;;  %v16900_v42 = vsub.f32 %v16795_v38, %v4430_v0  ;;  %v16906_v6 = vsub.f32 %v16797_v61, %v2054_v40  ;;  %23664 = vst [vmem:[#allocation96_spill] sm:$0xff] %v16909_v13  ;;  %v16916_v0 = vld [vmem:[%s16583_s13 + $0x78] sm:$0xff]  ;;  %v2070_v61 = vand.u32 4294901760, %v2004_v55  ;;  %v12914_v17 = vld [vmem:[%s16551_s2 + $0x100] sm:$0xff] }
  0xdb   : > { %13239 = vmatprep.subr.bf16.mxu0 %v16881_v53  ;;  %23665 = vst [vmem:[#allocation97_spill] sm:$0xff] %v16912_v25  ;;  %23666 = vst [vmem:[#allocation98_spill] sm:$0xff] %v16919_v20  ;;  %v16925_v40 = vsub.f32 %v16820_v50, %v2064_v37  ;;  %v16929_v30 = vsub.f32 %v1999_v31, %v4434_v46  ;;  %v16931_v56 = vsub.f32 %v2003_v18, %v4438_v27  ;;  %v509_v4 = vld [vmem:[%s16583_s13 + $0x38] sm:$0xff]  ;;  %v536_v25 = vld [vmem:[%s16551_s2 + $0x10] sm:$0xff] }
  0xdc   : > { %23662 = vst [vmem:[#allocation94_spill] sm:$0xff] %v16900_v42  ;;  %23663 = vst [vmem:[#allocation95_spill] sm:$0xff] %v16906_v6  ;;  %v16935_v38 = vsub.f32 %v1996_v57, %v2062_v43  ;;  %13431 = vmatprep.subr.bf16.mxu1 %v16927_v39  ;;  %v16939_v22 = vsub.f32 %v2000_v59, %v2066_v5  ;;  %v16941_v50 = vpack.c.bf16 %v4440_v3, %v4436_v1  ;;  %v16955_v59 = vld [vmem:[%s16583_s13 + $0x90] sm:$0xff]  ;;  %v12982_v6 = vld [vmem:[%s16551_s2 + $0x220] sm:$0xff] }
  0xdd   : > { %15512 = vset.pattern.permute.xlu1 %v23633_v36  ;;  %628 = vperm.xlu0 %15551, %v16612_v10   ;;  %23667 = vst [vmem:[#allocation99_spill] sm:$0xff] %v16922_v21  ;;  %23668 = vst [vmem:[#allocation100_spill] sm:$0xff] %v16925_v40  ;;  %v16943_v37 = vsub.f32 %v1998_v32, %v4436_v1  ;;  %v16945_v31 = vsub.f32 %v2002_v28, %v4440_v3  ;;  %v2074_v46 = vand.u32 4294901760, %v2008_v47 }
  0xde   : > { %1584 = vperm.xlu1 %15512, %v16622_v11   ;;  %23669 = vst [vmem:[#allocation101_spill] sm:$0xff] %v16927_v39  ;;  %23670 = vst [vmem:[#allocation102_spill] sm:$0xff] %v16929_v30  ;;  %v16933_v11 = vpack.c.bf16 %v2066_v5, %v2062_v43  ;;  %v16949_v57 = vpack.c.bf16 %v2072_v62, %v2068_v63  ;;  %v16951_v18 = vpack.c.bf16 %v4446_v49, %v4442_v48  ;;  %v13043_v30 = vld [vmem:[%s16551_s2 + $0x308] sm:$0xff] }
  0xdf   : > { %23671 = vst [vmem:[#allocation103_spill] sm:$0xff] %v16931_v56  ;;  %23673 = vst [vmem:[#allocation105_spill] sm:$0xff] %v16935_v38  ;;  %13433 = vmatpush1.bf16.msra.mxu1 %v16941_v50  ;;  %v4444_v32 = vand.u32 4294901760, %v2006_v8  ;;  %v4448_v27 = vand.u32 4294901760, %v2010_v34  ;;  %v16960_v28 = vsub.f32 %v16869_v33, %v2068_v63  ;;  %v16963_v43 = vsub.f32 %v16871_v2, %v2072_v62  ;;  %v17015_v63 = vld [vmem:[%s16583_s13 + $0xd8] sm:$0xff] }
  0xe0   : > { %23672 = vst [vmem:[#allocation104_spill] sm:$0xff] %v16933_v11  ;;  %23674 = vst [vmem:[#allocation106_spill] sm:$0xff] %v16939_v22  ;;  %13241 = vmatpush1.bf16.msra.mxu0 %v16933_v11  ;;  %v16966_v5 = vsub.f32 %v16873_v15, %v4442_v48  ;;  %13435 = vmatprep.subr.bf16.mxu1 %v16951_v18  ;;  %v16969_v1 = vsub.f32 %v2011_v58, %v4446_v49  ;;  %v22703_v48 = vmov 0.0   ;;  %v16986_v15 = vld [vmem:[%s16583_s13 + $0xa8] sm:$0xff]  ;;  %v16994_v58 = vld [vmem:[%s16583_s13 + $0xc0] sm:$0xff] }
  0xe1   : > { %23675 = vst [vmem:[#allocation107_spill] sm:$0xff] %v16941_v50  ;;  %23676 = vst [vmem:[#allocation108_spill] sm:$0xff] %v16943_v37  ;;  %643 = vperm.xlu0 %15551, %v16916_v0   ;;  %13243 = vmatprep.subr.bf16.mxu0 %v16949_v57  ;;  %v16971_v3 = vpack.c.bf16 %v2074_v46, %v2070_v61  ;;  %v16973_v50 = vsub.f32 %v2004_v55, %v2070_v61  ;;  %v512_v49 = vld [vmem:[%s16583_s13 + $0x50] sm:$0xff]  ;;  %v515_v11 = vld [vmem:[%s16583_s13 + $0x68] sm:$0xff] }
  0xe2   : > { %23677 = vst [vmem:[#allocation109_spill] sm:$0xff] %v16945_v31  ;;  %23678 = vst [vmem:[#allocation110_spill] sm:$0xff] %v16949_v57  ;;  %15514 = vset.pattern.permute.xlu1 %v23627_v44  ;;  %v16975_v39 = vsub.f32 %v2008_v47, %v2074_v46  ;;  %v16978_v33 = vpack.c.bf16 %v4448_v27, %v4444_v32  ;;  %v16980_v62 = vsub.f32 %v2006_v8, %v4444_v32  ;;  %v12916_v37 = vld [vmem:[%s16551_s2 + $0x110] sm:$0xff] }
  0xe3   : > { %23679 = vst [vmem:[#allocation111_spill] sm:$0xff] %v16951_v18  ;;  %603 = vperm.xlu1 %15514, %v509_v4   ;;  %23680 = vst [vmem:[#allocation112_spill] sm:$0xff] %v16960_v28  ;;  %v16982_v2 = vsub.f32 %v2010_v34, %v4448_v27  ;;  %2108 = vmatprep.mubr.f32.mxu0 %v22703_v48  ;;  %v12979_v28 = vld [vmem:[%s16551_s2 + $0x208] sm:$0xff] }
  0xe4   : > { %23681 = vst [vmem:[#allocation113_spill] sm:$0xff] %v16963_v43  ;;  %23682 = vst [vmem:[#allocation114_spill] sm:$0xff] %v16966_v5  ;;  %13245 = vmatpush1.bf16.msra.mxu0 %v16971_v3  ;;  %4482 = vmatprep.mubr.f32.mxu1 %v22703_v48  ;;  %v535_v43 = vld [vmem:[%s16551_s2 + $0x8] sm:$0xff] }
  0xe5   : > { %23683 = vst [vmem:[#allocation115_spill] sm:$0xff] %v16969_v1  ;;  %23684 = vst [vmem:[#allocation116_spill] sm:$0xff] %v16971_v3  ;;  %658 = vperm.xlu0 %15551, %v16955_v59   ;;  %13437 = vmatpush1.bf16.msra.mxu1 %v16978_v33 }
  0xe6   : > { %23685 = vst [vmem:[#allocation117_spill] sm:$0xff] %v16973_v50  ;;  %23686 = vst [vmem:[#allocation118_spill] sm:$0xff] %v16975_v39  ;;  %v12915_v50 = vld [vmem:[%s16551_s2 + $0x108] sm:$0xff] }
  0xe7   : > { %23687 = vst [vmem:[#allocation119_spill] sm:$0xff] %v16978_v33  ;;  %23688 = vst [vmem:[#allocation120_spill] sm:$0xff] %v16980_v62  ;;  %15515 = vset.pattern.permute.xlu1 %v23652_v52  ;;  %v17084_v62 = vld [vmem:[%s16583_s13 + $0xb8] sm:$0xff] }
  0xe8   : > { %23689 = vst [vmem:[#allocation121_spill] sm:$0xff] %v16982_v2  ;;  %948 = vperm.xlu1 %15515, %v509_v4  }
  0xe9   : > { %673 = vperm.xlu0 %15551, %v16986_v15  }
  0xec   : > { %15516 = vset.pattern.permute.xlu1 %v23643_v19 }
  0xed   : > { %1270 = vperm.xlu1 %15516, %v509_v4   ;;  %688 = vperm.xlu0 %15551, %v16994_v58  }
  0xf1   : > { %15517 = vset.pattern.permute.xlu1 %v23627_v44  ;;  %15562 = vset.pattern.permute.xlu0 %v23643_v19 }
  0xf2   : > { %608 = vperm.xlu1 %15517, %v16627_v12   ;;  %1278 = vperm.xlu0 %15562, %v16607_v9  }
  0xf6   : > { %15518 = vset.pattern.permute.xlu1 %v23633_v36  ;;  %1290 = vperm.xlu0 %15562, %v16612_v10  }
  0xf7   : > { %1592 = vperm.xlu1 %15518, %v509_v4  }
  0xfa   : > { %1302 = vperm.xlu0 %15562, %v16916_v0  }
  0xfb   : > { %15519 = vset.pattern.permute.xlu1 %v23643_v19 }
  0xfc   : > { %1274 = vperm.xlu1 %15519, %v16627_v12  }
  0xfe   : > { %1314 = vperm.xlu0 %15562, %v16955_v59  }
 0x100   : > { %15520 = vset.pattern.permute.xlu1 %v23652_v52 }
 0x101   : > { %956 = vperm.xlu1 %15520, %v16607_v9  }
 0x102   : > { %1326 = vperm.xlu0 %15562, %v16986_v15  }
 0x105   : > { %15521 = vset.pattern.permute.xlu1 %v23633_v36 }
 0x106   : > { %1596 = vperm.xlu1 %15521, %v16627_v12   ;;  %1338 = vperm.xlu0 %15562, %v16994_v58  }
 0x10a   : > { %15522 = vset.pattern.permute.xlu1 %v23627_v44  ;;  %1350 = vperm.xlu0 %15562, %v17015_v63  }
 0x10b   : > { %618 = vperm.xlu1 %15522, %v512_v49  }
 0x10d   : > { %v17020_v55 = vpop.permute.xlu1 %1242  ;;  %v17022_v47 = vpop.permute.xlu0 %1254 }
 0x10e   : > { %23690 = vst [vmem:[#allocation122_spill] sm:$0xff] %v17020_v55  ;;  %23691 = vst [vmem:[#allocation123_spill] sm:$0xff] %v17022_v47  ;;  %15573 = vset.pattern.permute.xlu0 %v23633_v36 }
 0x10f   : > { %15523 = vset.pattern.permute.xlu1 %v23652_v52  ;;  %1624 = vperm.xlu0 %15573, %v16916_v0  }
 0x110   : > { %960 = vperm.xlu1 %15523, %v512_v49  }
 0x111   : > { %v17027_v9 = vpop.permute.xlu0 %1266 }
 0x112   : > { %23692 = vst [vmem:[#allocation124_spill] sm:$0xff] %v17027_v9  ;;  %v17029_v12 = vpop.permute.xlu1 %573 }
 0x113   : > { %23693 = vst [vmem:[#allocation125_spill] sm:$0xff] %v17029_v12  ;;  %1636 = vperm.xlu0 %15573, %v16955_v59   ;;  %v727_v38 = vmul.f32 %v17029_v12, %v535_v43  ;;  %v12980_v12 = vld [vmem:[%s16551_s2 + $0x210] sm:$0xff] }
 0x114   : > { %15524 = vset.pattern.permute.xlu1 %v23643_v19 }
 0x115   : > { %1282 = vperm.xlu1 %15524, %v512_v49  }
 0x116   : > { %v17033_v8 = vpop.permute.xlu0 %1564 }
 0x117   : > { %23694 = vst [vmem:[#allocation126_spill] sm:$0xff] %v17033_v8  ;;  %v17035_v34 = vpop.permute.xlu1 %924  ;;  %1648 = vperm.xlu0 %15573, %v16986_v15  }
 0x118   : > { %23695 = vst [vmem:[#allocation127_spill] sm:$0xff] %v17035_v34  ;;  %v1048_v31 = vmul.f32 %v12915_v50, %v17035_v34 }
 0x119   : > { %15525 = vset.pattern.permute.xlu1 %v23627_v44 }
 0x11a   : > { %623 = vperm.xlu1 %15525, %v16634_v14   ;;  %v17040_v4 = vpop.permute.xlu0 %1576  ;;  %v1080_v50 = vadd.f32 %v1048_v31, %v727_v38 }
 0x11b   : > { %23696 = vst [vmem:[#allocation128_spill] sm:$0xff] %v17040_v4  ;;  %1660 = vperm.xlu0 %15573, %v16994_v58  }
 0x11c   : > { %v17043_v61 = vpop.permute.xlu1 %1246 }
 0x11d   : > { %23697 = vst [vmem:[#allocation129_spill] sm:$0xff] %v17043_v61  ;;  %v1370_v20 = vmul.f32 %v12979_v28, %v17043_v61  ;;  %v13044_v28 = vld [vmem:[%s16551_s2 + $0x310] sm:$0xff] }
 0x11e   : > { %15526 = vset.pattern.permute.xlu1 %v23633_v36  ;;  %v17046_v46 = vpop.permute.xlu0 %1588 }
 0x11f   : > { %23698 = vst [vmem:[#allocation130_spill] sm:$0xff] %v17046_v46  ;;  %1604 = vperm.xlu1 %15526, %v512_v49   ;;  %1672 = vperm.xlu0 %15573, %v17015_v63   ;;  %v1402_v43 = vadd.f32 %v1370_v20, %v1080_v50 }
 0x121   : > { %v17049_v32 = vpop.permute.xlu1 %578 }
 0x122   : > { %23699 = vst [vmem:[#allocation131_spill] sm:$0xff] %v17049_v32  ;;  %v17051_v27 = vpop.permute.xlu0 %1600  ;;  %v728_v42 = vmul.f32 %v17049_v32, %v536_v25 }
 0x123   : > { %23700 = vst [vmem:[#allocation132_spill] sm:$0xff] %v17051_v27  ;;  %15527 = vset.pattern.permute.xlu1 %v23643_v19  ;;  %15576 = vset.pattern.permute.xlu0 %v23652_v52 }
 0x124   : > { %1286 = vperm.xlu1 %15527, %v16634_v14   ;;  %1012 = vperm.xlu0 %15576, %v17084_v62  }
 0x126   : > { %v17056_v48 = vpop.permute.xlu1 %1568  ;;  %v17058_v33 = vpop.permute.xlu0 %1612 }
 0x127   : > { %23701 = vst [vmem:[#allocation133_spill] sm:$0xff] %v17056_v48  ;;  %23702 = vst [vmem:[#allocation134_spill] sm:$0xff] %v17058_v33  ;;  %v1692_v34 = vmul.f32 %v13043_v30, %v17056_v48  ;;  %v12978_v30 = vld [vmem:[%s16551_s2 + $0x200] sm:$0xff]  ;;  %v537_v48 = vld [vmem:[%s16551_s2 + $0x18] sm:$0xff] }
 0x128   : > { %15528 = vset.pattern.permute.xlu1 %v23652_v52  ;;  %v1369_v50 = vmul.f32 %v12978_v30, %v17020_v55 }
 0x129   : > { %968 = vperm.xlu1 %15528, %v16612_v10   ;;  %v1724_v13 = vadd.f32 %v1692_v34, %v1402_v43  ;;  %v12981_v43 = vld [vmem:[%s16551_s2 + $0x218] sm:$0xff] }
 0x12b   : > { %v17062_v49 = vpop.permute.xlu0 %920  ;;  %v17064_v18 = vpop.permute.xlu1 %1250 }
 0x12c   : > { %23703 = vst [vmem:[#allocation135_spill] sm:$0xff] %v17062_v49  ;;  %23704 = vst [vmem:[#allocation136_spill] sm:$0xff] %v17064_v18  ;;  %v1047_v38 = vmul.f32 %v12914_v17, %v17062_v49  ;;  %v1371_v25 = vmul.f32 %v12980_v12, %v17064_v18  ;;  %v17137_v18 = vand.u32 4294901760, %v1724_v13  ;;  %v538_v49 = vld [vmem:[%s16551_s2 + $0x20] sm:$0xff] }
 0x12d   : > { %15529 = vset.pattern.permute.xlu1 %v23633_v36 }
 0x12e   : > { %1608 = vperm.xlu1 %15529, %v16634_v14   ;;  %23719 = vst [vmem:[#allocation151_spill] sm:$0xff] %v17137_v18 }
 0x12f   : > { %v17068_v3 = vpop.permute.xlu0 %928 }
 0x130   : > { %23705 = vst [vmem:[#allocation137_spill] sm:$0xff] %v17068_v3  ;;  %v17070_v57 = vpop.permute.xlu1 %932  ;;  %v1049_v40 = vmul.f32 %v12916_v37, %v17068_v3  ;;  %v534_v3 = vld [vmem:[%s16551_s2] sm:$0xff] }
 0x131   : > { %23706 = vst [vmem:[#allocation138_spill] sm:$0xff] %v17070_v57 }
 0x132   : > { %15530 = vset.pattern.permute.xlu1 %v23627_v44  ;;  %v1081_v37 = vadd.f32 %v1049_v40, %v728_v42  ;;  %v12918_v40 = vld [vmem:[%s16551_s2 + $0x120] sm:$0xff] }
 0x133   : > { %633 = vperm.xlu1 %15530, %v515_v11   ;;  %v17074_v10 = vpop.permute.xlu0 %940 }
 0x134   : > { %23707 = vst [vmem:[#allocation139_spill] sm:$0xff] %v17074_v10  ;;  %v1403_v17 = vadd.f32 %v1371_v25, %v1081_v37  ;;  %v13045_v37 = vld [vmem:[%s16551_s2 + $0x318] sm:$0xff] }
 0x135   : > { %v17076_v53 = vpop.permute.xlu1 %1572 }
 0x136   : > { %23708 = vst [vmem:[#allocation140_spill] sm:$0xff] %v17076_v53  ;;  %v1693_v20 = vmul.f32 %v13044_v28, %v17076_v53  ;;  %v12917_v28 = vld [vmem:[%s16551_s2 + $0x118] sm:$0xff] }
 0x137   : > { %15531 = vset.pattern.permute.xlu1 %v23652_v52  ;;  %v17079_v2 = vpop.permute.xlu0 %952 }
 0x138   : > { %23709 = vst [vmem:[#allocation141_spill] sm:$0xff] %v17079_v2  ;;  %972 = vperm.xlu1 %15531, %v515_v11   ;;  %v1725_v32 = vadd.f32 %v1693_v20, %v1403_v17  ;;  %v13046_v20 = vld [vmem:[%s16551_s2 + $0x320] sm:$0xff]  ;;  %v17154_v17 = vsub.f32 %v1724_v13, %v17137_v18  ;;  %v12919_v13 = vld [vmem:[%s16551_s2 + $0x128] sm:$0xff] }
 0x13a   : > { %v17081_v14 = vpop.permute.xlu1 %588  ;;  %23721 = vst [vmem:[#allocation153_spill] sm:$0xff] %v17154_v17 }
 0x13b   : > { %23710 = vst [vmem:[#allocation142_spill] sm:$0xff] %v17081_v14  ;;  %v17086_v1 = vpop.permute.xlu0 %964 }
 0x13c   : > { %23711 = vst [vmem:[#allocation143_spill] sm:$0xff] %v17086_v1  ;;  %15533 = vset.pattern.permute.xlu1 %v23643_v19 }
 0x13d   : > { %1294 = vperm.xlu1 %15533, %v515_v11  }
 0x13f   : > { %v17090_v5 = vpop.permute.xlu1 %936  ;;  %v17092_v39 = vpop.permute.xlu0 %976 }
 0x140   : > { %23712 = vst [vmem:[#allocation144_spill] sm:$0xff] %v17090_v5  ;;  %23713 = vst [vmem:[#allocation145_spill] sm:$0xff] %v17092_v39  ;;  %v1051_v30 = vmul.f32 %v12918_v40, %v17090_v5  ;;  %v540_v5 = vld [vmem:[%s16551_s2 + $0x30] sm:$0xff] }
 0x141   : > { %15534 = vset.pattern.permute.xlu1 %v23627_v44 }
 0x142   : > { %638 = vperm.xlu1 %15534, %v16640_v23  }
 0x143   : > { %v17101_v56 = vpop.permute.xlu0 %988 }
 0x144   : > { %23714 = vst [vmem:[#allocation146_spill] sm:$0xff] %v17101_v56  ;;  %v17104_v22 = vpop.permute.xlu1 %1258 }
 0x145   : > { %23715 = vst [vmem:[#allocation147_spill] sm:$0xff] %v17104_v22  ;;  %v1373_v40 = vmul.f32 %v12982_v6, %v17104_v22 }
 0x146   : > { %15535 = vset.pattern.permute.xlu1 %v23633_v36 }
 0x147   : > { %1616 = vperm.xlu1 %15535, %v515_v11   ;;  %v17112_v21 = vpop.permute.xlu0 %1000  ;;  %v13042_v11 = vld [vmem:[%s16551_s2 + $0x300] sm:$0xff] }
 0x148   : > { %v1691_v12 = vmul.f32 %v13042_v11, %v17033_v8  ;;  %v1372_v11 = vmul.f32 %v12981_v43, %v17022_v47  ;;  %v730_v8 = vmul.f32 %v17081_v14, %v538_v49  ;;  %v17161_v43 = vand.u32 4294901760, %v1725_v32  ;;  %v12984_v49 = vld [vmem:[%s16551_s2 + $0x230] sm:$0xff]  ;;  %v531_v14 = vld [vmem:[%s16583_s13 + $0xe8] sm:$0xff] }
 0x149   : > { %v17118_v61 = vpop.permute.xlu1 %593 }
 0x14a   : > { %23716 = vst [vmem:[#allocation148_spill] sm:$0xff] %v17118_v61  ;;  %23723 = vst [vmem:[#allocation155_spill] sm:$0xff] %v17161_v43 }
 0x14b   : > { %15536 = vset.pattern.permute.xlu1 %v23643_v19 }
 0x14c   : > { %v17127_v31 = vpop.permute.xlu0 %568  ;;  %1298 = vperm.xlu1 %15536, %v16640_v23  }
 0x14d   : > { %23717 = vst [vmem:[#allocation149_spill] sm:$0xff] %v17127_v31  ;;  %v726_v42 = vmul.f32 %v17127_v31, %v534_v3  ;;  %v12985_v31 = vld [vmem:[%s16551_s2 + $0x238] sm:$0xff] }
 0x14e   : > { %v17132_v34 = vpop.permute.xlu1 %1580 }
 0x14f   : > { %23718 = vst [vmem:[#allocation150_spill] sm:$0xff] %v17132_v34  ;;  %v1079_v53 = vadd.f32 %v1047_v38, %v726_v42  ;;  %v1050_v38 = vmul.f32 %v12917_v28, %v17070_v57  ;;  %v539_v57 = vld [vmem:[%s16551_s2 + $0x28] sm:$0xff]  ;;  %v1695_v6 = vmul.f32 %v13046_v20, %v17132_v34  ;;  %v1052_v20 = vmul.f32 %v12919_v13, %v17074_v10 }
 0x150   : > { %v17143_v3 = vpop.permute.xlu0 %583  ;;  %15537 = vset.pattern.permute.xlu1 %v23652_v52  ;;  %v17185_v34 = vsub.f32 %v1725_v32, %v17161_v43 }
 0x151   : > { %23720 = vst [vmem:[#allocation152_spill] sm:$0xff] %v17143_v3  ;;  %v1401_v25 = vadd.f32 %v1369_v50, %v1079_v53  ;;  %980 = vperm.xlu1 %15537, %v16916_v0   ;;  %v729_v42 = vmul.f32 %v17143_v3, %v537_v48  ;;  %v1694_v0 = vmul.f32 %v13045_v37, %v17040_v4  ;;  %v12920_v37 = vld [vmem:[%s16551_s2 + $0x130] sm:$0xff] }
 0x152   : > { %v1083_v3 = vadd.f32 %v1051_v30, %v730_v8  ;;  %v17181_v30 = vand.u32 4294901760, %v17154_v17  ;;  %23728 = vst [vmem:[#allocation160_spill] sm:$0xff] %v17185_v34 }
 0x153   : > { %v1723_v53 = vadd.f32 %v1691_v12, %v1401_v25  ;;  %v17158_v50 = vpop.permute.xlu1 %1262  ;;  %v1082_v28 = vadd.f32 %v1050_v38, %v729_v42  ;;  %v12983_v42 = vld [vmem:[%s16551_s2 + $0x228] sm:$0xff] }
 0x154   : > { %23722 = vst [vmem:[#allocation154_spill] sm:$0xff] %v17158_v50  ;;  %v17164_v48 = vpop.permute.xlu0 %598  ;;  %v1405_v25 = vadd.f32 %v1373_v40, %v1083_v3  ;;  %23727 = vst [vmem:[#allocation159_spill] sm:$0xff] %v17181_v30  ;;  %v17191_v3 = vld [vmem:[%s16583_s13 + $0x80] sm:$0xff]  ;;  %v1375_v40 = vmul.f32 %v12984_v49, %v17027_v9  ;;  %v17213_v9 = vand.u32 4294901760, %v17185_v34 }
 0x155   : > { %23724 = vst [vmem:[#allocation156_spill] sm:$0xff] %v17164_v48  ;;  %v17168_v47 = vand.u32 4294901760, %v1723_v53  ;;  %15538 = vset.pattern.permute.xlu1 %v23633_v36  ;;  %v1404_v12 = vadd.f32 %v1372_v11, %v1082_v28  ;;  %v732_v8 = vmul.f32 %v17164_v48, %v540_v5  ;;  %v731_v11 = vmul.f32 %v17118_v61, %v539_v57 }
 0x156   : > { %1620 = vperm.xlu1 %15538, %v16640_v23   ;;  %v1727_v5 = vadd.f32 %v1695_v6, %v1405_v25  ;;  %v1374_v57 = vmul.f32 %v12983_v42, %v17158_v50  ;;  %v2123_v25 = vsub.f32 %v17154_v17, %v17181_v30  ;;  %23732 = vst [vmem:[#allocation164_spill] sm:$0xff] %v17213_v9 }
 0x157   : > { %23725 = vst [vmem:[#allocation157_spill] sm:$0xff] %v17168_v47  ;;  %v17176_v38 = vsub.f32 %v1723_v53, %v17168_v47  ;;  %v1726_v23 = vadd.f32 %v1694_v0, %v1404_v12  ;;  %v13048_v53 = vld [vmem:[%s16551_s2 + $0x330] sm:$0xff]  ;;  %v13047_v12 = vld [vmem:[%s16551_s2 + $0x328] sm:$0xff] }
 0x158   : > { %v17188_v28 = vpop.permute.xlu1 %944  ;;  %v17199_v13 = vpop.permute.xlu0 %613  ;;  %v1697_v49 = vmul.f32 %v13048_v53, %v17046_v46 }
 0x159   : > { %23726 = vst [vmem:[#allocation158_spill] sm:$0xff] %v17176_v38  ;;  %23729 = vst [vmem:[#allocation161_spill] sm:$0xff] %v17188_v28  ;;  %v1053_v48 = vmul.f32 %v12920_v37, %v17188_v28  ;;  %v17197_v22 = vand.u32 4294901760, %v17176_v38  ;;  %v17201_v32 = vand.u32 4294901760, %v1726_v23  ;;  %v1084_v37 = vadd.f32 %v1052_v20, %v731_v11 }
 0x15a   : > { %15539 = vset.pattern.permute.xlu1 %v23627_v44  ;;  %v17215_v28 = vand.u32 4294901760, %v1727_v5 }
 0x15b   : > { %23730 = vst [vmem:[#allocation162_spill] sm:$0xff] %v17197_v22  ;;  %23731 = vst [vmem:[#allocation163_spill] sm:$0xff] %v17201_v32  ;;  %v1085_v0 = vadd.f32 %v1053_v48, %v732_v8  ;;  %648 = vperm.xlu1 %15539, %v17191_v3   ;;  %v2112_v6 = vsub.f32 %v17176_v38, %v17197_v22  ;;  %v17218_v42 = vsub.f32 %v1726_v23, %v17201_v32  ;;  %v12986_v22 = vld [vmem:[%s16551_s2 + $0x240] sm:$0xff] }
 0x15c   : > { %23733 = vst [vmem:[#allocation165_spill] sm:$0xff] %v17215_v28  ;;  %v1406_v61 = vadd.f32 %v1374_v57, %v1084_v37  ;;  %v17224_v20 = vpop.permute.xlu0 %628  ;;  %v2134_v23 = vsub.f32 %v17185_v34, %v17213_v9  ;;  %v23737_v57 = vmov 0.0  }
 0x15d   : > { %23734 = vst [vmem:[#allocation166_spill] sm:$0xff] %v17218_v42  ;;  %v1407_v48 = vadd.f32 %v1375_v40, %v1085_v0  ;;  %v17220_v8 = vpop.permute.xlu1 %1584  ;;  %v2113_v50 = vand.u32 4294901760, %v2112_v6  ;;  %v17230_v40 = vsub.f32 %v1727_v5, %v17215_v28  ;;  %v2124_v0 = vand.u32 4294901760, %v2123_v25 }
 0x15e   : > { %23735 = vst [vmem:[#allocation167_spill] sm:$0xff] %v17220_v8  ;;  %v1696_v10 = vmul.f32 %v13047_v12, %v17220_v8  ;;  %v17235_v12 = vand.u32 4294901760, %v17218_v42 }
 0x15f   : > { %15540 = vset.pattern.permute.xlu1 %v23652_v52  ;;  %2114 = vmatmul.mubr.f32.vlgmr.msra.gmra.mrb[0].mxu0 %v2113_v50  ;;  %23736 = vst [vmem:[#allocation168_spill] sm:$0xff] %v17230_v40  ;;  %v1729_v53 = vadd.f32 %v1697_v49, %v1407_v48  ;;  %v17256_v25 = vand.u32 4294901760, %v17230_v40 }
 0x160   : > { %v1728_v11 = vadd.f32 %v1696_v10, %v1406_v61  ;;  %4488 = vmatmul.mubr.f32.vlgmr.msra.gmra.mrb[0].mxu1 %v2113_v50  ;;  %984 = vperm.xlu1 %15540, %v17191_v3   ;;  %23738 = vst [vmem:[#allocation169_spill] sm:$0xff] %v17235_v12  ;;  %v17242_v10 = vld [vmem:[%s16583_s13 + $0xd0] sm:$0xff]  ;;  %v2135_v50 = vand.u32 4294901760, %v2134_v23  ;;  %v2145_v37 = vsub.f32 %v17218_v42, %v17235_v12  ;;  %v17258_v48 = vpop.permute.xlu0 %643 }
 0x161   : > { %2119 = vmatprep.mubr.f32.mxu0 %v23737_v57  ;;  %4493 = vmatprep.mubr.f32.mxu1 %v23737_v57  ;;  %v17246_v5 = vand.u32 4294901760, %v1729_v53  ;;  %23743 = vst [vmem:[#allocation174_spill] sm:$0xff] %v17256_v25  ;;  %v2156_v46 = vsub.f32 %v17230_v40, %v17256_v25 }
 0x162   : > { %v17237_v6 = vand.u32 4294901760, %v1728_v11  ;;  %v17239_v61 = vpop.permute.xlu1 %603  ;;  %1024 = vperm.xlu0 %15576, %v17242_v10  }
 0x163   : > { %23740 = vst [vmem:[#allocation171_spill] sm:$0xff] %v17239_v61  ;;  %2125 = vmatmul.mubr.f32.gmra.mrb[2].mxu0 %v2124_v0  ;;  %23741 = vst [vmem:[#allocation172_spill] sm:$0xff] %v17246_v5 }
 0x164   : > { %23739 = vst [vmem:[#allocation170_spill] sm:$0xff] %v17237_v6  ;;  %4499 = vmatmul.mubr.f32.gmra.mrb[2].mxu1 %v2124_v0  ;;  %15541 = vset.pattern.permute.xlu1 %v23643_v19  ;;  %v17249_v49 = vsub.f32 %v1728_v11, %v17237_v6  ;;  %v17265_v11 = vsub.f32 %v1729_v53, %v17246_v5  ;;  %v2146_v0 = vand.u32 4294901760, %v2145_v37  ;;  %v2157_v37 = vand.u32 4294901760, %v2156_v46 }
 0x165   : > { %1306 = vperm.xlu1 %15541, %v17191_v3   ;;  %2130 = vmatprep.mubr.f32.mxu0 %v23737_v57 }
 0x166   : > { %23742 = vst [vmem:[#allocation173_spill] sm:$0xff] %v17249_v49  ;;  %4504 = vmatprep.mubr.f32.mxu1 %v23737_v57  ;;  %23745 = vst [vmem:[#allocation176_spill] sm:$0xff] %v17265_v11  ;;  %v17272_v8 = vand.u32 4294901760, %v17249_v49  ;;  %v17285_v55 = vand.u32 4294901760, %v17265_v11  ;;  %1036 = vperm.xlu0 %15576, %v531_v14  }
 0x167   : > { %2136 = vmatmul.mubr.f32.gmra.mrb[4].mxu0 %v2135_v50  ;;  %v17261_v23 = vpop.permute.xlu1 %948 }
 0x168   : > { %23744 = vst [vmem:[#allocation175_spill] sm:$0xff] %v17261_v23  ;;  %4510 = vmatmul.mubr.f32.gmra.mrb[4].mxu1 %v2135_v50  ;;  %2141 = vmatprep.mubr.f32.mxu0 %v23737_v57  ;;  %23746 = vst [vmem:[#allocation177_spill] sm:$0xff] %v17272_v8  ;;  %v17275_v50 = vpop.permute.xlu0 %658  ;;  %v2167_v4 = vsub.f32 %v17249_v49, %v17272_v8  ;;  %v2178_v14 = vsub.f32 %v17265_v11, %v17285_v55  ;;  %v13051_v49 = vld [vmem:[%s16551_s2 + $0x348] sm:$0xff] }
 0x169   : > { %15542 = vset.pattern.permute.xlu1 %v23627_v44  ;;  %4515 = vmatprep.mubr.f32.mxu1 %v23737_v57  ;;  %23748 = vst [vmem:[#allocation179_spill] sm:$0xff] %v17285_v55 }
 0x16a   : > { %653 = vperm.xlu1 %15542, %v16658_v45   ;;  %v12921_v45 = vld [vmem:[%s16551_s2 + $0x138] sm:$0xff]  ;;  %v2168_v25 = vand.u32 4294901760, %v2167_v4  ;;  %15579 = vset.pattern.permute.xlu0 %v23627_v44  ;;  %v2179_v4 = vand.u32 4294901760, %v2178_v14  ;;  %v799_v14 = vld [vmem:[%s16558_s23 + $0x48] sm:$0xff] }
 0x16b   : > { %2147 = vmatmul.mubr.f32.gmra.mrb[6].mxu0 %v2146_v0  ;;  %v1054_v46 = vmul.f32 %v12921_v45, %v17261_v23  ;;  %v16104_v45 = vld [vmem:[%s16583_s13 + $0x88] sm:$0xff]  ;;  %v13049_v23 = vld [vmem:[%s16551_s2 + $0x338] sm:$0xff]  ;;  %703 = vperm.xlu0 %15579, %v17015_v63   ;;  %v831_v30 = vmul.f32 %v799_v14, %v17199_v13  ;;  %v1700_v14 = vmul.f32 %v13051_v49, %v17051_v27  ;;  %v13054_v27 = vld [vmem:[%s16551_s2 + $0x360] sm:$0xff] }
 0x16c   : > { %4521 = vmatmul.mubr.f32.gmra.mrb[6].mxu1 %v2146_v0  ;;  %v17277_v53 = vpop.permute.xlu1 %1270  ;;  %2152 = vmatprep.mubr.f32.mxu0 %v23737_v57  ;;  %v541_v0 = vld [vmem:[%s16551_s2 + $0x38] sm:$0xff]  ;;  %v17299_v12 = vpop.permute.xlu0 %673 }
 0x16d   : > { %23747 = vst [vmem:[#allocation178_spill] sm:$0xff] %v17277_v53  ;;  %4526 = vmatprep.mubr.f32.mxu1 %v23737_v57 }
 0x16e   : > { %15543 = vset.pattern.permute.xlu1 %v23633_v36 }
 0x16f   : > { %1628 = vperm.xlu1 %15543, %v17191_v3   ;;  %2158 = vmatmul.mubr.f32.gmra.mrb[8].mxu0 %v2157_v37  ;;  %v733_v3 = vmul.f32 %v17239_v61, %v541_v0 }
 0x170   : > { %4532 = vmatmul.mubr.f32.gmra.mrb[8].mxu1 %v2157_v37  ;;  %2163 = vmatprep.mubr.f32.mxu0 %v23737_v57  ;;  %v1376_v37 = vmul.f32 %v12985_v31, %v17277_v53  ;;  %v17313_v0 = vpop.permute.xlu0 %688  ;;  %v13019_v53 = vld [vmem:[%s16558_s23 + $0x248] sm:$0xff] }
 0x171   : > { %v17294_v8 = vpop.permute.xlu1 %608  ;;  %4537 = vmatprep.mubr.f32.mxu1 %v23737_v57  ;;  %v1086_v9 = vadd.f32 %v1054_v46, %v733_v3  ;;  %v12922_v3 = vld [vmem:[%s16551_s2 + $0x140] sm:$0xff] }
 0x172   : > { %23749 = vst [vmem:[#allocation180_spill] sm:$0xff] %v17294_v8 }
 0x173   : > { %15544 = vset.pattern.permute.xlu1 %v23643_v19  ;;  %2169 = vmatmul.mubr.f32.gmra.mrb[10].mxu0 %v2168_v25  ;;  %v1408_v31 = vadd.f32 %v1376_v37, %v1086_v9  ;;  %v542_v37 = vld [vmem:[%s16551_s2 + $0x40] sm:$0xff] }
 0x174   : > { %4543 = vmatmul.mubr.f32.gmra.mrb[10].mxu1 %v2168_v25  ;;  %1310 = vperm.xlu1 %15544, %v16104_v45   ;;  %v734_v40 = vmul.f32 %v17294_v8, %v542_v37  ;;  %v13050_v37 = vld [vmem:[%s16551_s2 + $0x340] sm:$0xff] }
 0x175   : > { %2174 = vmatprep.mubr.f32.mxu0 %v23737_v57  ;;  %4548 = vmatprep.mubr.f32.mxu1 %v23737_v57 }
 0x176   : > { %v17309_v55 = vpop.permute.xlu1 %1592 }
 0x177   : > { %23750 = vst [vmem:[#allocation181_spill] sm:$0xff] %v17309_v55  ;;  %v1698_v25 = vmul.f32 %v13049_v23, %v17309_v55  ;;  %2180 = vmatmul.mubr.f32.gmra.mrb[12].mxu0 %v2179_v4  ;;  %v543_v23 = vld [vmem:[%s16551_s2 + $0x48] sm:$0xff] }
 0x178   : > { %4554 = vmatmul.mubr.f32.gmra.mrb[12].mxu1 %v2179_v4  ;;  %15545 = vset.pattern.permute.xlu1 %v23652_v52  ;;  %v12955_v55 = vld [vmem:[%s16558_s23 + $0x148] sm:$0xff]  ;;  %v735_v61 = vmul.f32 %v17199_v13, %v543_v23 }
 0x179   : > { %v1730_v46 = vadd.f32 %v1698_v25, %v1408_v31  ;;  %992 = vperm.xlu1 %15545, %v16955_v59   ;;  %2185 = vmatprep.mubr.f32.mxu0 %v23737_v57  ;;  %v12987_v59 = vld [vmem:[%s16551_s2 + $0x248] sm:$0xff]  ;;  %v1279_v31 = vpop.permute.xlu0 %1278 }
 0x17a   : > { %4559 = vmatprep.mubr.f32.mxu1 %v23737_v57  ;;  %v12923_v25 = vld [vmem:[%s16551_s2 + $0x148] sm:$0xff]  ;;  %v1378_v34 = vmul.f32 %v12987_v59, %v1279_v31 }
 0x17b   : > { %v17319_v63 = vand.u32 4294901760, %v1730_v46  ;;  %v17321_v9 = vpop.permute.xlu1 %1274 }
 0x17c   : > { %23752 = vst [vmem:[#allocation183_spill] sm:$0xff] %v17321_v9  ;;  %v1377_v13 = vmul.f32 %v12986_v22, %v17321_v9 }
 0x17d   : > { %23751 = vst [vmem:[#allocation182_spill] sm:$0xff] %v17319_v63  ;;  %v17328_v4 = vsub.f32 %v1730_v46, %v17319_v63  ;;  %15546 = vset.pattern.permute.xlu1 %v23633_v36  ;;  %v1055_v46 = vmul.f32 %v12922_v3, %v17079_v2  ;;  %v1475_v63 = vmul.f32 %v13019_v53, %v1279_v31 }
 0x17e   : > { %1632 = vperm.xlu1 %15546, %v16104_v45   ;;  %v521_v45 = vld [vmem:[%s16583_s13 + $0x98] sm:$0xff] }
 0x17f   : > { %23753 = vst [vmem:[#allocation184_spill] sm:$0xff] %v17328_v4  ;;  %v17339_v11 = vand.u32 4294901760, %v17328_v4  ;;  %v1087_v8 = vadd.f32 %v1055_v46, %v734_v40  ;;  %v17387_v46 = vld [vmem:[%s16583_s13 + $0xf0] sm:$0xff] }
 0x180   : > { %v957_v42 = vpop.permute.xlu1 %956  ;;  %718 = vperm.xlu0 %15579, %v17387_v46  }
 0x181   : > { %23754 = vst [vmem:[#allocation185_spill] sm:$0xff] %v17339_v11  ;;  %v1056_v17 = vmul.f32 %v12923_v25, %v957_v42  ;;  %v1153_v38 = vmul.f32 %v12955_v55, %v957_v42  ;;  %v2189_v23 = vsub.f32 %v17328_v4, %v17339_v11  ;;  %v1409_v42 = vadd.f32 %v1377_v13, %v1087_v8  ;;  %v12924_v13 = vld [vmem:[%s16551_s2 + $0x150] sm:$0xff] }
 0x182   : > { %15547 = vset.pattern.permute.xlu1 %v23627_v44 }
 0x183   : > { %v1088_v5 = vadd.f32 %v1056_v17, %v735_v61  ;;  %v1185_v3 = vadd.f32 %v1153_v38, %v831_v30  ;;  %663 = vperm.xlu1 %15547, %v521_v45   ;;  %v2190_v2 = vand.u32 4294901760, %v2189_v23 }
 0x184   : > { %15584 = vset.pattern.permute.xlu0 %v23643_v19 }
 0x185   : > { %v1410_v59 = vadd.f32 %v1378_v34, %v1088_v5  ;;  %v17351_v6 = vadd.f32 %v1475_v63, %v1185_v3  ;;  %2191 = vmatmul.mubr.f32.gmra.mrb[14].mxu0 %v2190_v2  ;;  %4565 = vmatmul.mubr.f32.gmra.mrb[14].mxu1 %v2190_v2  ;;  %v17353_v55 = vpop.permute.xlu1 %1596  ;;  %v16105_v63 = vld [vmem:[%s16583_s13 + $0xa0] sm:$0xff]  ;;  %v544_v3 = vld [vmem:[%s16551_s2 + $0x50] sm:$0xff] }
 0x186   : > { %23756 = vst [vmem:[#allocation187_spill] sm:$0xff] %v17353_v55  ;;  %v1699_v22 = vmul.f32 %v13050_v37, %v17353_v55  ;;  %2196 = vmatprep.mubr.f32.mxu0 %v23737_v57  ;;  %4570 = vmatprep.mubr.f32.mxu1 %v23737_v57  ;;  %v12988_v37 = vld [vmem:[%s16551_s2 + $0x250] sm:$0xff] }
 0x187   : > { %23755 = vst [vmem:[#allocation186_spill] sm:$0xff] %v17351_v6  ;;  %v1732_v17 = vadd.f32 %v1700_v14, %v1410_v59  ;;  %15548 = vset.pattern.permute.xlu1 %v23652_v52  ;;  %1362 = vperm.xlu0 %15584, %v17387_v46  }
 0x188   : > { %v1731_v38 = vadd.f32 %v1699_v22, %v1409_v42  ;;  %996 = vperm.xlu1 %15548, %v521_v45  }
 0x189   : > { %v17359_v34 = vand.u32 4294901760, %v1732_v17 }
 0x18a   : > { %v17361_v30 = vand.u32 4294901760, %v1731_v38  ;;  %v17363_v2 = vpop.permute.xlu1 %618 }
 0x18b   : > { %23757 = vst [vmem:[#allocation188_spill] sm:$0xff] %v17359_v34  ;;  %23759 = vst [vmem:[#allocation190_spill] sm:$0xff] %v17363_v2  ;;  %v17366_v8 = vsub.f32 %v1732_v17, %v17359_v34  ;;  %v736_v22 = vmul.f32 %v17363_v2, %v544_v3  ;;  %15587 = vset.pattern.permute.xlu0 %v23633_v36 }
 0x18c   : > { %23758 = vst [vmem:[#allocation189_spill] sm:$0xff] %v17361_v30  ;;  %v17369_v40 = vsub.f32 %v1731_v38, %v17361_v30  ;;  %15549 = vset.pattern.permute.xlu1 %v23643_v19  ;;  %1684 = vperm.xlu0 %15587, %v17387_v46   ;;  %v23792_v30 = vld [vmem:[#allocation34_spill] sm:$0xff] }
 0x18d   : > { %23760 = vst [vmem:[#allocation191_spill] sm:$0xff] %v17366_v8  ;;  %1318 = vperm.xlu1 %15549, %v521_v45   ;;  %v17376_v5 = vand.u32 4294901760, %v17366_v8 }
 0x18e   : > { %23761 = vst [vmem:[#allocation192_spill] sm:$0xff] %v17369_v40  ;;  %v17373_v61 = vand.u32 4294901760, %v17369_v40 }
 0x18f   : > { %23763 = vst [vmem:[#allocation194_spill] sm:$0xff] %v17376_v5  ;;  %v17378_v49 = vpop.permute.xlu1 %960  ;;  %v2211_v25 = vsub.f32 %v17366_v8, %v17376_v5 }
 0x190   : > { %23762 = vst [vmem:[#allocation193_spill] sm:$0xff] %v17373_v61  ;;  %23764 = vst [vmem:[#allocation195_spill] sm:$0xff] %v17378_v49  ;;  %v2200_v53 = vsub.f32 %v17369_v40, %v17373_v61  ;;  %v1057_v59 = vmul.f32 %v12924_v13, %v17378_v49  ;;  %v12989_v49 = vld [vmem:[%s16551_s2 + $0x258] sm:$0xff] }
 0x191   : > { %15550 = vset.pattern.permute.xlu1 %v23627_v44  ;;  %v2212_v14 = vand.u32 4294901760, %v2211_v25 }
 0x192   : > { %668 = vperm.xlu1 %15550, %v16105_v63   ;;  %v2201_v31 = vand.u32 4294901760, %v2200_v53  ;;  %v1089_v38 = vadd.f32 %v1057_v59, %v736_v22  ;;  %v802_v59 = vld [vmem:[%s16558_s23 + $0x60] sm:$0xff]  ;;  %v12925_v22 = vld [vmem:[%s16551_s2 + $0x158] sm:$0xff] }
 0x193   : > { %v834_v2 = vmul.f32 %v802_v59, %v17224_v20  ;;  %v1703_v59 = vmul.f32 %v13054_v27, %v17058_v33  ;;  %v23786_v33 = vld [vmem:[#allocation37_spill] sm:$0xff] }
 0x194   : > { %2202 = vmatmul.mubr.f32.gmra.mrb[16].mxu0 %v2201_v31  ;;  %4576 = vmatmul.mubr.f32.gmra.mrb[16].mxu1 %v2201_v31  ;;  %v17389_v23 = vpop.permute.xlu1 %1282 }
 0x195   : > { %23765 = vst [vmem:[#allocation196_spill] sm:$0xff] %v17389_v23  ;;  %2207 = vmatprep.mubr.f32.mxu0 %v23737_v57  ;;  %4581 = vmatprep.mubr.f32.mxu1 %v23737_v57  ;;  %v1379_v17 = vmul.f32 %v12988_v37, %v17389_v23  ;;  %v546_v37 = vld [vmem:[%s16551_s2 + $0x60] sm:$0xff] }
 0x196   : > { %15552 = vset.pattern.permute.xlu1 %v23633_v36  ;;  %v738_v23 = vmul.f32 %v17224_v20, %v546_v37 }
 0x197   : > { %1640 = vperm.xlu1 %15552, %v521_v45   ;;  %v13052_v45 = vld [vmem:[%s16551_s2 + $0x350] sm:$0xff]  ;;  %v1411_v31 = vadd.f32 %v1379_v17, %v1089_v38  ;;  %v545_v17 = vld [vmem:[%s16551_s2 + $0x58] sm:$0xff]  ;;  %v12990_v38 = vld [vmem:[%s16551_s2 + $0x260] sm:$0xff] }
 0x198   : > { %2213 = vmatmul.mubr.f32.gmra.mrb[18].mxu0 %v2212_v14  ;;  %4587 = vmatmul.mubr.f32.gmra.mrb[18].mxu1 %v2212_v14 }
 0x199   : > { %v17399_v42 = vpop.permute.xlu1 %623  ;;  %2218 = vmatprep.mubr.f32.mxu0 %v23737_v57  ;;  %4592 = vmatprep.mubr.f32.mxu1 %v23737_v57 }
 0x19a   : > { %23766 = vst [vmem:[#allocation197_spill] sm:$0xff] %v17399_v42  ;;  %v737_v55 = vmul.f32 %v17399_v42, %v545_v17  ;;  %v13053_v17 = vld [vmem:[%s16551_s2 + $0x358] sm:$0xff] }
 0x19b   : > { %15553 = vset.pattern.permute.xlu1 %v23643_v19 }
 0x19c   : > { %1322 = vperm.xlu1 %15553, %v16105_v63  }
 0x19e   : > { %v17409_v53 = vpop.permute.xlu1 %1604 }
 0x19f   : > { %23767 = vst [vmem:[#allocation198_spill] sm:$0xff] %v17409_v53  ;;  %v1701_v25 = vmul.f32 %v13052_v45, %v17409_v53  ;;  %v13022_v53 = vld [vmem:[%s16558_s23 + $0x260] sm:$0xff] }
 0x1a0   : > { %15554 = vset.pattern.permute.xlu1 %v23652_v52 }
 0x1a1   : > { %v1733_v13 = vadd.f32 %v1701_v25, %v1411_v31  ;;  %1004 = vperm.xlu1 %15554, %v16986_v15   ;;  %v1291_v31 = vpop.permute.xlu0 %1290  ;;  %v12926_v15 = vld [vmem:[%s16551_s2 + $0x160] sm:$0xff] }
 0x1a2   : > { %v12958_v25 = vld [vmem:[%s16558_s23 + $0x160] sm:$0xff]  ;;  %v1381_v5 = vmul.f32 %v12990_v38, %v1291_v31  ;;  %v1478_v8 = vmul.f32 %v13022_v53, %v1291_v31 }
 0x1a3   : > { %v17416_v14 = vand.u32 4294901760, %v1733_v13  ;;  %v17418_v3 = vpop.permute.xlu1 %1286 }
 0x1a4   : > { %23769 = vst [vmem:[#allocation200_spill] sm:$0xff] %v17418_v3  ;;  %v1380_v20 = vmul.f32 %v12989_v49, %v17418_v3  ;;  %v12928_v3 = vld [vmem:[%s16551_s2 + $0x170] sm:$0xff] }
 0x1a5   : > { %23768 = vst [vmem:[#allocation199_spill] sm:$0xff] %v17416_v14  ;;  %v17425_v45 = vsub.f32 %v1733_v13, %v17416_v14  ;;  %15555 = vset.pattern.permute.xlu1 %v23633_v36  ;;  %v1058_v13 = vmul.f32 %v12925_v22, %v17086_v1  ;;  %v23791_v14 = vld [vmem:[#allocation33_spill] sm:$0xff] }
 0x1a6   : > { %1644 = vperm.xlu1 %15555, %v16105_v63   ;;  %v524_v63 = vld [vmem:[%s16583_s13 + $0xb0] sm:$0xff]  ;;  %v22879_v34 = vand.u32 4294901760, %v23791_v14 }
 0x1a7   : > { %23770 = vst [vmem:[#allocation201_spill] sm:$0xff] %v17425_v45  ;;  %v17436_v6 = vand.u32 4294901760, %v17425_v45  ;;  %v1090_v42 = vadd.f32 %v1058_v13, %v737_v55 }
 0x1a8   : > { %v969_v9 = vpop.permute.xlu1 %968 }
 0x1a9   : > { %23771 = vst [vmem:[#allocation202_spill] sm:$0xff] %v17436_v6  ;;  %v1059_v61 = vmul.f32 %v12926_v15, %v969_v9  ;;  %v1156_v11 = vmul.f32 %v12958_v25, %v969_v9  ;;  %v2222_v37 = vsub.f32 %v17425_v45, %v17436_v6  ;;  %v1412_v53 = vadd.f32 %v1380_v20, %v1090_v42  ;;  %v12993_v6 = vld [vmem:[%s16551_s2 + $0x278] sm:$0xff] }
 0x1aa   : > { %15556 = vset.pattern.permute.xlu1 %v23627_v44 }
 0x1ab   : > { %v1091_v40 = vadd.f32 %v1059_v61, %v738_v23  ;;  %v1188_v22 = vadd.f32 %v1156_v11, %v834_v2  ;;  %678 = vperm.xlu1 %15556, %v524_v63   ;;  %v2223_v1 = vand.u32 4294901760, %v2222_v37  ;;  %v17458_v2 = vpop.permute.xlu0 %1302 }
 0x1ad   : > { %v1413_v38 = vadd.f32 %v1381_v5, %v1091_v40  ;;  %v17448_v4 = vadd.f32 %v1478_v8, %v1188_v22  ;;  %2224 = vmatmul.mubr.f32.gmra.mrb[20].mxu0 %v2223_v1  ;;  %4598 = vmatmul.mubr.f32.gmra.mrb[20].mxu1 %v2223_v1  ;;  %v17450_v9 = vpop.permute.xlu1 %1608 }
 0x1ae   : > { %23773 = vst [vmem:[#allocation204_spill] sm:$0xff] %v17450_v9  ;;  %v1702_v49 = vmul.f32 %v13053_v17, %v17450_v9  ;;  %2229 = vmatprep.mubr.f32.mxu0 %v23737_v57  ;;  %4603 = vmatprep.mubr.f32.mxu1 %v23737_v57  ;;  %v547_v17 = vld [vmem:[%s16551_s2 + $0x68] sm:$0xff] }
 0x1af   : > { %23772 = vst [vmem:[#allocation203_spill] sm:$0xff] %v17448_v4  ;;  %v1735_v27 = vadd.f32 %v1703_v59, %v1413_v38  ;;  %15557 = vset.pattern.permute.xlu1 %v23652_v52  ;;  %v17479_v31 = vpop.permute.xlu0 %1314  ;;  %v12927_v59 = vld [vmem:[%s16551_s2 + $0x168] sm:$0xff]  ;;  %v23785_v4 = vld [vmem:[#allocation36_spill] sm:$0xff] }
 0x1b0   : > { %v1734_v11 = vadd.f32 %v1702_v49, %v1412_v53  ;;  %1008 = vperm.xlu1 %15557, %v524_v63   ;;  %v12991_v38 = vld [vmem:[%s16551_s2 + $0x268] sm:$0xff] }
 0x1b1   : > { %v17456_v55 = vand.u32 4294901760, %v1735_v27 }
 0x1b2   : > { %v17460_v8 = vand.u32 4294901760, %v1734_v11  ;;  %v17462_v1 = vpop.permute.xlu1 %633 }
 0x1b3   : > { %23774 = vst [vmem:[#allocation205_spill] sm:$0xff] %v17456_v55  ;;  %23776 = vst [vmem:[#allocation207_spill] sm:$0xff] %v17462_v1  ;;  %v17465_v40 = vsub.f32 %v1735_v27, %v17456_v55  ;;  %v17491_v20 = vpop.permute.xlu0 %1326  ;;  %v739_v27 = vmul.f32 %v17462_v1, %v547_v17  ;;  %v22840_v17 = vand.u32 4294901760, %v23786_v33 }
 0x1b4   : > { %23775 = vst [vmem:[#allocation206_spill] sm:$0xff] %v17460_v8  ;;  %v17468_v61 = vsub.f32 %v1734_v11, %v17460_v8  ;;  %15558 = vset.pattern.permute.xlu1 %v23643_v19 }
 0x1b5   : > { %23777 = vst [vmem:[#allocation208_spill] sm:$0xff] %v17465_v40  ;;  %1330 = vperm.xlu1 %15558, %v524_v63   ;;  %v17475_v23 = vand.u32 4294901760, %v17465_v40 }
 0x1b6   : > { %23778 = vst [vmem:[#allocation209_spill] sm:$0xff] %v17468_v61  ;;  %v17472_v5 = vand.u32 4294901760, %v17468_v61 }
 0x1b7   : > { %23780 = vst [vmem:[#allocation211_spill] sm:$0xff] %v17475_v23  ;;  %v17477_v42 = vpop.permute.xlu1 %972  ;;  %v2244_v13 = vsub.f32 %v17465_v40, %v17475_v23 }
 0x1b8   : > { %23779 = vst [vmem:[#allocation210_spill] sm:$0xff] %v17472_v5  ;;  %23781 = vst [vmem:[#allocation212_spill] sm:$0xff] %v17477_v42  ;;  %v2233_v15 = vsub.f32 %v17468_v61, %v17472_v5  ;;  %v1060_v53 = vmul.f32 %v12927_v59, %v17477_v42  ;;  %v22832_v59 = vand.u32 4294901760, %v16646_v26  ;;  %v22839_v42 = vand.u32 4294901760, %v23785_v4  ;;  %v549_v5 = vld [vmem:[%s16551_s2 + $0x78] sm:$0xff] }
 0x1b9   : > { %15559 = vset.pattern.permute.xlu1 %v23627_v44  ;;  %v2245_v22 = vand.u32 4294901760, %v2244_v13  ;;  %v22833_v13 = vand.u32 4294901760, %v16642_v24  ;;  %v13089_v61 = vld [vmem:[%s16558_s23 + $0x378] sm:$0xff] }
 0x1ba   : > { %683 = vperm.xlu1 %15559, %v17084_v62   ;;  %v2234_v25 = vand.u32 4294901760, %v2233_v15  ;;  %v17505_v15 = vpop.permute.xlu0 %1338 }
 0x1bb   : > { %v2464_v1 = vsub.f32 %v16642_v24, %v22833_v13 }
 0x1bc   : > { %2235 = vmatmul.mubr.f32.gmra.mrb[22].mxu0 %v2234_v25  ;;  %4609 = vmatmul.mubr.f32.gmra.mrb[22].mxu1 %v2234_v25  ;;  %v17487_v37 = vpop.permute.xlu1 %1294  ;;  %v1092_v25 = vadd.f32 %v1060_v53, %v739_v27  ;;  %v2476_v53 = vsub.f32 %v16646_v26, %v22832_v59  ;;  %v2470_v27 = vsub.f32 %v23785_v4, %v22839_v42 }
 0x1bd   : > { %23782 = vst [vmem:[#allocation213_spill] sm:$0xff] %v17487_v37  ;;  %2240 = vmatprep.mubr.f32.mxu0 %v23737_v57  ;;  %4614 = vmatprep.mubr.f32.mxu1 %v23737_v57  ;;  %v1382_v11 = vmul.f32 %v12991_v38, %v17487_v37  ;;  %v2465_v59 = vand.u32 4294901760, %v2464_v1  ;;  %v13025_v1 = vld [vmem:[%s16558_s23 + $0x278] sm:$0xff] }
 0x1be   : > { %15560 = vset.pattern.permute.xlu1 %v23633_v36  ;;  %v2477_v13 = vand.u32 4294901760, %v2476_v53 }
 0x1bf   : > { %1652 = vperm.xlu1 %15560, %v524_v63   ;;  %v13055_v63 = vld [vmem:[%s16551_s2 + $0x368] sm:$0xff]  ;;  %v1414_v38 = vadd.f32 %v1382_v11, %v1092_v25  ;;  %v2482_v11 = vsub.f32 %v23786_v33, %v22840_v17  ;;  %v17530_v25 = vpop.permute.xlu0 %1350 }
 0x1c0   : > { %2246 = vmatmul.mubr.f32.gmra.mrb[24].mxu0 %v2245_v22  ;;  %4620 = vmatmul.mubr.f32.gmra.mrb[24].mxu1 %v2245_v22  ;;  %v13246_v17 = vpack.c.bf16 %v2477_v13, %v2465_v59  ;;  %v12929_v13 = vld [vmem:[%s16551_s2 + $0x178] sm:$0xff] }
 0x1c1   : > { %v17498_v49 = vpop.permute.xlu1 %638  ;;  %2251 = vmatprep.mubr.f32.mxu0 %v23737_v57  ;;  %4625 = vmatprep.mubr.f32.mxu1 %v23737_v57  ;;  %v2483_v9 = vand.u32 4294901760, %v2482_v11  ;;  %v12992_v11 = vld [vmem:[%s16551_s2 + $0x270] sm:$0xff]  ;;  %v12961_v59 = vld [vmem:[%s16558_s23 + $0x178] sm:$0xff] }
 0x1c2   : > { %23783 = vst [vmem:[#allocation214_spill] sm:$0xff] %v17498_v49  ;;  %13247 = vmatprep.subr.bf16.mxu0 %v13246_v17 }
 0x1c3   : > { %15561 = vset.pattern.permute.xlu1 %v23643_v19  ;;  %v1625_v45 = vpop.permute.xlu0 %1624 }
 0x1c4   : > { %1334 = vperm.xlu1 %15561, %v17084_v62  }
 0x1c6   : > { %v17511_v22 = vpop.permute.xlu1 %1616 }
 0x1c7   : > { %23784 = vst [vmem:[#allocation215_spill] sm:$0xff] %v17511_v22  ;;  %v1704_v37 = vmul.f32 %v13055_v63, %v17511_v22  ;;  %v2471_v22 = vand.u32 4294901760, %v2470_v27  ;;  %v1061_v27 = vmul.f32 %v12928_v3, %v17092_v39  ;;  %v1384_v3 = vmul.f32 %v12993_v6, %v17458_v2 }
 0x1c8   : > { %15563 = vset.pattern.permute.xlu1 %v23652_v52 }
 0x1c9   : > { %v1736_v63 = vadd.f32 %v1704_v37, %v1414_v38  ;;  %1016 = vperm.xlu1 %15563, %v16994_v58   ;;  %v805_v37 = vld [vmem:[%s16558_s23 + $0x78] sm:$0xff]  ;;  %v548_v38 = vld [vmem:[%s16551_s2 + $0x70] sm:$0xff]  ;;  %v13248_v58 = vpack.c.bf16 %v2483_v9, %v2471_v22  ;;  %v741_v9 = vmul.f32 %v17258_v48, %v549_v5 }
 0x1ca   : > { %v837_v22 = vmul.f32 %v805_v37, %v17258_v48  ;;  %v740_v40 = vmul.f32 %v17498_v49, %v548_v38  ;;  %v1803_v49 = vmul.f32 %v13089_v61, %v1625_v45 }
 0x1cb   : > { %v17533_v23 = vand.u32 4294901760, %v1736_v63  ;;  %v17535_v42 = vpop.permute.xlu1 %1298  ;;  %13249 = vmatpush1.bf16.msra.mxu0 %v13248_v58 }
 0x1cc   : > { %23788 = vst [vmem:[#allocation37_spill] sm:$0xff] %v17535_v42  ;;  %v1383_v5 = vmul.f32 %v12992_v11, %v17535_v42  ;;  %v1093_v55 = vadd.f32 %v1061_v27, %v740_v40  ;;  %v22877_v11 = vand.u32 4294901760, %v23792_v30  ;;  %v23796_v40 = vld [vmem:[#allocation39_spill] sm:$0xff] }
 0x1cd   : > { %23787 = vst [vmem:[#allocation36_spill] sm:$0xff] %v17533_v23  ;;  %v17543_v53 = vsub.f32 %v1736_v63, %v17533_v23  ;;  %15564 = vset.pattern.permute.xlu1 %v23633_v36  ;;  %v13057_v63 = vld [vmem:[%s16551_s2 + $0x378] sm:$0xff]  ;;  %v17562_v23 = vld [vmem:[%s16583_s13 + $0xc8] sm:$0xff]  ;;  %v22873_v61 = vand.u32 4294901760, %v23796_v40 }
 0x1ce   : > { %1656 = vperm.xlu1 %15564, %v17084_v62   ;;  %v1481_v62 = vmul.f32 %v13025_v1, %v17458_v2  ;;  %v1706_v38 = vmul.f32 %v13057_v63, %v1625_v45  ;;  %v13056_v1 = vld [vmem:[%s16551_s2 + $0x370] sm:$0xff] }
 0x1cf   : > { %23789 = vst [vmem:[#allocation216_spill] sm:$0xff] %v17543_v53  ;;  %v17557_v17 = vand.u32 4294901760, %v17543_v53 }
 0x1d0   : > { %v981_v39 = vpop.permute.xlu1 %980 }
 0x1d1   : > { %23790 = vst [vmem:[#allocation217_spill] sm:$0xff] %v17557_v17  ;;  %v1062_v58 = vmul.f32 %v12929_v13, %v981_v39  ;;  %v1159_v48 = vmul.f32 %v12961_v59, %v981_v39  ;;  %v2255_v37 = vsub.f32 %v17543_v53, %v17557_v17  ;;  %v23793_v13 = vld [vmem:[#allocation42_spill] sm:$0xff]  ;;  %v23794_v59 = vld [vmem:[#allocation43_spill] sm:$0xff]  ;;  %v1415_v17 = vadd.f32 %v1383_v5, %v1093_v55 }
 0x1d2   : > { %15565 = vset.pattern.permute.xlu1 %v23627_v44  ;;  %v22874_v39 = vand.u32 4294901760, %v23793_v13  ;;  %v22872_v42 = vand.u32 4294901760, %v23794_v59  ;;  %v4850_v5 = vsub.f32 %v23792_v30, %v22877_v11 }
 0x1d3   : > { %v1094_v8 = vadd.f32 %v1062_v58, %v741_v9  ;;  %v1191_v6 = vadd.f32 %v1159_v48, %v837_v22  ;;  %693 = vperm.xlu1 %15565, %v17562_v23   ;;  %v2256_v2 = vand.u32 4294901760, %v2255_v37  ;;  %v4838_v9 = vsub.f32 %v23791_v14, %v22879_v34  ;;  %v23797_v22 = vld [vmem:[#allocation40_spill] sm:$0xff]  ;;  %v23811_v34 = vld [vmem:[#allocation46_spill] sm:$0xff] }
 0x1d4   : > { %v22875_v55 = vand.u32 4294901760, %v23797_v22  ;;  %v2488_v58 = vsub.f32 %v23793_v13, %v22874_v39 }
 0x1d5   : > { %v1416_v53 = vadd.f32 %v1384_v3, %v1094_v8  ;;  %v1513_v28 = vadd.f32 %v1481_v62, %v1191_v6  ;;  %2257 = vmatmul.mubr.f32.gmra.mrb[26].mxu0 %v2256_v2  ;;  %4631 = vmatmul.mubr.f32.gmra.mrb[26].mxu1 %v2256_v2  ;;  %v17574_v45 = vpop.permute.xlu1 %1620  ;;  %v23798_v8 = vld [vmem:[#allocation47_spill] sm:$0xff]  ;;  %v4839_v37 = vand.u32 4294901760, %v4838_v9  ;;  %v4844_v6 = vsub.f32 %v23796_v40, %v22873_v61 }
 0x1d6   : > { %23795 = vst [vmem:[#allocation42_spill] sm:$0xff] %v17574_v45  ;;  %v1705_v27 = vmul.f32 %v13056_v1, %v17574_v45  ;;  %2262 = vmatprep.mubr.f32.mxu0 %v23737_v57  ;;  %4636 = vmatprep.mubr.f32.mxu1 %v23737_v57  ;;  %v22876_v63 = vand.u32 4294901760, %v23798_v8  ;;  %v23816_v45 = vand.u32 4294901760, %v23811_v34 }
 0x1d7   : > { %v1738_v3 = vadd.f32 %v1706_v38, %v1416_v53  ;;  %v17585_v62 = vadd.f32 %v1803_v49, %v1513_v28  ;;  %15566 = vset.pattern.permute.xlu1 %v23652_v52  ;;  %v2500_v53 = vsub.f32 %v23794_v59, %v22872_v42  ;;  %v4851_v49 = vand.u32 4294901760, %v4850_v5 }
 0x1d8   : > { %v1737_v48 = vadd.f32 %v1705_v27, %v1415_v17  ;;  %1020 = vperm.xlu1 %15566, %v17562_v23   ;;  %v2489_v38 = vand.u32 4294901760, %v2488_v58  ;;  %v4856_v27 = vsub.f32 %v23797_v22, %v22875_v55  ;;  %v2494_v5 = vsub.f32 %v23798_v8, %v22876_v63 }
 0x1d9   : > { %23799 = vst [vmem:[#allocation43_spill] sm:$0xff] %v17585_v62  ;;  %v17598_v28 = vand.u32 4294901760, %v1738_v3  ;;  %v2501_v17 = vand.u32 4294901760, %v2500_v53  ;;  %v13438_v42 = vpack.c.bf16 %v4851_v49, %v4839_v37  ;;  %v4845_v39 = vand.u32 4294901760, %v4844_v6  ;;  %v23812_v62 = vld [vmem:[#allocation53_spill] sm:$0xff] }
 0x1da   : > { %v17603_v2 = vand.u32 4294901760, %v1737_v48  ;;  %v17605_v1 = vpop.permute.xlu1 %648  ;;  %v4857_v53 = vand.u32 4294901760, %v4856_v27  ;;  %v2495_v11 = vand.u32 4294901760, %v2494_v5  ;;  %v12930_v27 = vld [vmem:[%s16551_s2 + $0x180] sm:$0xff] }
 0x1db   : > { %23800 = vst [vmem:[#allocation39_spill] sm:$0xff] %v17598_v28  ;;  %23802 = vst [vmem:[#allocation47_spill] sm:$0xff] %v17605_v1  ;;  %v17611_v9 = vsub.f32 %v1738_v3, %v17598_v28  ;;  %v13250_v61 = vpack.c.bf16 %v2501_v17, %v2489_v38  ;;  %13439 = vmatprep.subr.bf16.mxu1 %v13438_v42  ;;  %v23806_v3 = vld [vmem:[#allocation49_spill] sm:$0xff] }
 0x1dc   : > { %23801 = vst [vmem:[#allocation40_spill] sm:$0xff] %v17603_v2  ;;  %v17617_v58 = vsub.f32 %v1737_v48, %v17603_v2  ;;  %15567 = vset.pattern.permute.xlu1 %v23643_v19  ;;  %v22878_v37 = vand.u32 4294901760, %v23806_v3  ;;  %v13440_v48 = vpack.c.bf16 %v4857_v53, %v4845_v39  ;;  %v23810_v53 = vld [vmem:[#allocation45_spill] sm:$0xff] }
 0x1dd   : > { %23803 = vst [vmem:[#allocation218_spill] sm:$0xff] %v17611_v9  ;;  %1342 = vperm.xlu1 %15567, %v17562_v23   ;;  %v17622_v55 = vand.u32 4294901760, %v17611_v9  ;;  %13251 = vmatprep.subr.bf16.mxu0 %v13250_v61 }
 0x1de   : > { %23804 = vst [vmem:[#allocation219_spill] sm:$0xff] %v17617_v58  ;;  %v17626_v49 = vand.u32 4294901760, %v17617_v58  ;;  %v2506_v38 = vsub.f32 %v23806_v3, %v22878_v37  ;;  %13441 = vmatpush1.bf16.msra.mxu1 %v13440_v48  ;;  %v22893_v37 = vand.u32 4294901760, %v23810_v53 }
 0x1df   : > { %23805 = vst [vmem:[#allocation220_spill] sm:$0xff] %v17622_v55  ;;  %v17628_v63 = vpop.permute.xlu1 %984  ;;  %v2277_v42 = vsub.f32 %v17611_v9, %v17622_v55  ;;  %v23817_v55 = vand.u32 4294901760, %v23812_v62 }
 0x1e0   : > { %23807 = vst [vmem:[#allocation49_spill] sm:$0xff] %v17626_v49  ;;  %23808 = vst [vmem:[#allocation221_spill] sm:$0xff] %v17628_v63  ;;  %v2266_v6 = vsub.f32 %v17617_v58, %v17626_v49  ;;  %v2507_v17 = vand.u32 4294901760, %v2506_v38  ;;  %v23813_v49 = vld [vmem:[#allocation55_spill] sm:$0xff]  ;;  %v4862_v48 = vsub.f32 %v23810_v53, %v22893_v37  ;;  %v4874_v58 = vsub.f32 %v23811_v34, %v23816_v45  ;;  %v12994_v45 = vld [vmem:[%s16551_s2 + $0x280] sm:$0xff] }
 0x1e1   : > { %15568 = vset.pattern.permute.xlu1 %v23627_v44  ;;  %v23814_v38 = vld [vmem:[#allocation51_spill] sm:$0xff]  ;;  %v2512_v9 = vsub.f32 %v23812_v62, %v23817_v55  ;;  %v13059_v34 = vld [vmem:[%s16551_s2 + $0x388] sm:$0xff]  ;;  %v23830_v53 = vld [vmem:[#allocation56_spill] sm:$0xff] }
 0x1e2   : > { %698 = vperm.xlu1 %15568, %v17242_v10   ;;  %v2267_v39 = vand.u32 4294901760, %v2266_v6  ;;  %v13252_v61 = vpack.c.bf16 %v2507_v17, %v2495_v11  ;;  %v2278_v11 = vand.u32 4294901760, %v2277_v42  ;;  %v23815_v17 = vld [vmem:[#allocation52_spill] sm:$0xff]  ;;  %v550_v6 = vld [vmem:[%s16551_s2 + $0x80] sm:$0xff]  ;;  %v23820_v37 = vand.u32 4294901760, %v23814_v38 }
 0x1e3   : > { %v23818_v42 = vld [vmem:[#allocation60_spill] sm:$0xff]  ;;  %v4863_v43 = vand.u32 4294901760, %v4862_v48  ;;  %v4875_v55 = vand.u32 4294901760, %v4874_v58  ;;  %v2513_v18 = vand.u32 4294901760, %v2512_v9  ;;  %v23821_v28 = vand.u32 4294901760, %v23815_v17  ;;  %v23824_v48 = vld [vmem:[#allocation61_spill] sm:$0xff] }
 0x1e4   : > { %2268 = vmatmul.mubr.f32.gmra.mrb[28].mxu0 %v2267_v39  ;;  %4642 = vmatmul.mubr.f32.gmra.mrb[28].mxu1 %v2267_v39  ;;  %v17640_v5 = vpop.permute.xlu1 %1306  ;;  %v1063_v39 = vmul.f32 %v12930_v27, %v17628_v63  ;;  %v4868_v32 = vsub.f32 %v23814_v38, %v23820_v37  ;;  %v23823_v37 = vand.u32 4294901760, %v23818_v42  ;;  %v22905_v58 = vand.u32 4294901760, %v23824_v48 }
 0x1e5   : > { %23809 = vst [vmem:[#allocation222_spill] sm:$0xff] %v17640_v5  ;;  %2273 = vmatprep.mubr.f32.mxu0 %v23737_v57  ;;  %4647 = vmatprep.mubr.f32.mxu1 %v23737_v57  ;;  %v4880_v27 = vsub.f32 %v23815_v17, %v23821_v28  ;;  %v742_v9 = vmul.f32 %v17605_v1, %v550_v6 }
 0x1e6   : > { %15569 = vset.pattern.permute.xlu1 %v23633_v36  ;;  %13253 = vmatpush1.bf16.msra.mxu0 %v13252_v61  ;;  %v23819_v61 = vand.u32 4294901760, %v23813_v49  ;;  %v13442_v38 = vpack.c.bf16 %v4875_v55, %v4863_v43  ;;  %v1385_v28 = vmul.f32 %v12994_v45, %v17640_v5 }
 0x1e7   : > { %1664 = vperm.xlu1 %15569, %v17562_v23   ;;  %v1095_v43 = vadd.f32 %v1063_v39, %v742_v9  ;;  %v12996_v9 = vld [vmem:[%s16551_s2 + $0x290] sm:$0xff] }
 0x1e8   : > { %v2524_v2 = vsub.f32 %v23813_v49, %v23819_v61  ;;  %2279 = vmatmul.mubr.f32.gmra.mrb[30].mxu0 %v2278_v11  ;;  %4653 = vmatmul.mubr.f32.gmra.mrb[30].mxu1 %v2278_v11  ;;  %v4869_v61 = vand.u32 4294901760, %v4868_v32  ;;  %v2518_v11 = vsub.f32 %v23818_v42, %v23823_v37  ;;  %v4881_v49 = vand.u32 4294901760, %v4880_v27 }
 0x1e9   : > { %v17674_v63 = vpop.permute.xlu1 %653  ;;  %2284 = vmatprep.mubr.f32.mxu0 %v23737_v57  ;;  %4658 = vmatprep.mubr.f32.mxu1 %v23737_v57  ;;  %v2530_v32 = vsub.f32 %v23824_v48, %v22905_v58  ;;  %v1637_v58 = vpop.permute.xlu0 %1636 }
 0x1ea   : > { %23822 = vst [vmem:[#allocation223_spill] sm:$0xff] %v17674_v63  ;;  %v2525_v23 = vand.u32 4294901760, %v2524_v2  ;;  %v2519_v62 = vand.u32 4294901760, %v2518_v11  ;;  %v13058_v2 = vld [vmem:[%s16551_s2 + $0x380] sm:$0xff]  ;;  %13443 = vmatprep.subr.bf16.mxu1 %v13442_v38  ;;  %v13444_v6 = vpack.c.bf16 %v4881_v49, %v4869_v61  ;;  %v16106_v38 = vld [vmem:[%s16583_s13 + $0xd8] sm:$0xff]  ;;  %v12931_v49 = vld [vmem:[%s16551_s2 + $0x188] sm:$0xff] }
 0x1eb   : > { %15570 = vset.pattern.permute.xlu1 %v23643_v19  ;;  %v2531_v45 = vand.u32 4294901760, %v2530_v32  ;;  %v552_v11 = vld [vmem:[%s16551_s2 + $0x90] sm:$0xff]  ;;  %v1064_v32 = vmul.f32 %v12931_v49, %v17101_v56  ;;  %v1387_v49 = vmul.f32 %v12996_v9, %v17479_v31 }
 0x1ec   : > { %v13254_v17 = vpack.c.bf16 %v2525_v23, %v2513_v18  ;;  %1346 = vperm.xlu1 %15570, %v17242_v10   ;;  %13445 = vmatpush1.bf16.msra.mxu1 %v13444_v6  ;;  %v1417_v18 = vadd.f32 %v1385_v28, %v1095_v43  ;;  %v12932_v43 = vld [vmem:[%s16551_s2 + $0x190] sm:$0xff] }
 0x1ed   : > { %v13256_v23 = vpack.c.bf16 %v2531_v45, %v2519_v62  ;;  %v808_v62 = vld [vmem:[%s16558_s23 + $0x90] sm:$0xff] }
 0x1ee   : > { %13255 = vmatprep.subr.bf16.mxu0 %v13254_v17  ;;  %v17690_v55 = vpop.permute.xlu1 %1628  ;;  %v551_v17 = vld [vmem:[%s16551_s2 + $0x88] sm:$0xff]  ;;  %v12964_v45 = vld [vmem:[%s16558_s23 + $0x190] sm:$0xff] }
 0x1ef   : > { %23825 = vst [vmem:[#allocation224_spill] sm:$0xff] %v17690_v55  ;;  %v1707_v27 = vmul.f32 %v13058_v2, %v17690_v55  ;;  %13257 = vmatpush1.bf16.msra.mxu0 %v13256_v23  ;;  %v13028_v2 = vld [vmem:[%s16558_s23 + $0x290] sm:$0xff]  ;;  %v743_v6 = vmul.f32 %v17674_v63, %v551_v17  ;;  %v12995_v23 = vld [vmem:[%s16551_s2 + $0x288] sm:$0xff]  ;;  %v17724_v17 = vld [vmem:[%s16583_s13 + $0xe0] sm:$0xff] }
 0x1f0   : > { %15571 = vset.pattern.permute.xlu1 %v23652_v52 }
 0x1f1   : > { %v1739_v37 = vadd.f32 %v1707_v27, %v1417_v18  ;;  %1028 = vperm.xlu1 %15571, %v16106_v38   ;;  %v744_v18 = vmul.f32 %v17275_v50, %v552_v11  ;;  %v840_v27 = vmul.f32 %v808_v62, %v17275_v50  ;;  %v13060_v38 = vld [vmem:[%s16551_s2 + $0x390] sm:$0xff]  ;;  %v1096_v11 = vadd.f32 %v1064_v32, %v743_v6 }
 0x1f2   : > { %v1709_v56 = vmul.f32 %v13060_v38, %v1637_v58  ;;  %v23834_v6 = vld [vmem:[#allocation63_spill] sm:$0xff] }
 0x1f3   : > { %v17697_v39 = vand.u32 4294901760, %v1739_v37  ;;  %v17699_v61 = vpop.permute.xlu1 %1310 }
 0x1f4   : > { %23827 = vst [vmem:[#allocation226_spill] sm:$0xff] %v17699_v61  ;;  %v1386_v62 = vmul.f32 %v12995_v23, %v17699_v61  ;;  %v22924_v23 = vand.u32 4294901760, %v23834_v6 }
 0x1f5   : > { %23826 = vst [vmem:[#allocation225_spill] sm:$0xff] %v17697_v39  ;;  %v17705_v28 = vsub.f32 %v1739_v37, %v17697_v39  ;;  %15572 = vset.pattern.permute.xlu1 %v23633_v36  ;;  %v13092_v37 = vld [vmem:[%s16558_s23 + $0x390] sm:$0xff] }
 0x1f6   : > { %1668 = vperm.xlu1 %15572, %v17242_v10   ;;  %v1484_v10 = vmul.f32 %v13028_v2, %v17479_v31  ;;  %v1806_v39 = vmul.f32 %v13092_v37, %v1637_v58  ;;  %v22927_v31 = vand.u32 4294901760, %v23830_v53  ;;  %v23831_v2 = vld [vmem:[#allocation58_spill] sm:$0xff]  ;;  %v23836_v58 = vld [vmem:[#allocation64_spill] sm:$0xff] }
 0x1f7   : > { %23828 = vst [vmem:[#allocation227_spill] sm:$0xff] %v17705_v28  ;;  %v17720_v55 = vand.u32 4294901760, %v17705_v28 }
 0x1f8   : > { %v993_v5 = vpop.permute.xlu1 %992 }
 0x1f9   : > { %23829 = vst [vmem:[#allocation228_spill] sm:$0xff] %v17720_v55  ;;  %v1065_v63 = vmul.f32 %v12932_v43, %v993_v5  ;;  %v1162_v1 = vmul.f32 %v12964_v45, %v993_v5  ;;  %v2288_v50 = vsub.f32 %v17705_v28, %v17720_v55  ;;  %v22922_v5 = vand.u32 4294901760, %v23831_v2  ;;  %v23832_v43 = vld [vmem:[#allocation66_spill] sm:$0xff]  ;;  %v23833_v55 = vld [vmem:[#allocation67_spill] sm:$0xff] }
 0x1fa   : > { %15574 = vset.pattern.permute.xlu1 %v23627_v44  ;;  %v22926_v45 = vand.u32 4294901760, %v23832_v43  ;;  %v22923_v32 = vand.u32 4294901760, %v23833_v55 }
 0x1fb   : > { %v1097_v48 = vadd.f32 %v1065_v63, %v744_v18  ;;  %v1194_v9 = vadd.f32 %v1162_v1, %v840_v27  ;;  %708 = vperm.xlu1 %15574, %v17724_v17   ;;  %v2289_v42 = vand.u32 4294901760, %v2288_v50  ;;  %v4886_v1 = vsub.f32 %v23830_v53, %v22927_v31  ;;  %v23845_v31 = vld [vmem:[#allocation68_spill] sm:$0xff] }
 0x1fc   : > { %v22925_v18 = vand.u32 4294901760, %v23836_v58  ;;  %v1418_v27 = vadd.f32 %v1386_v62, %v1096_v11 }
 0x1fd   : > { %v1419_v61 = vadd.f32 %v1387_v49, %v1097_v48  ;;  %v1516_v28 = vadd.f32 %v1484_v10, %v1194_v9  ;;  %2290 = vmatmul.mubr.f32.gmra.mrb[32].mxu0 %v2289_v42  ;;  %4664 = vmatmul.mubr.f32.gmra.mrb[32].mxu1 %v2289_v42  ;;  %v17738_v63 = vpop.permute.xlu1 %1632  ;;  %v4898_v48 = vsub.f32 %v23831_v2, %v22922_v5  ;;  %v23837_v42 = vld [vmem:[#allocation71_spill] sm:$0xff]  ;;  %v4887_v50 = vand.u32 4294901760, %v4886_v1 }
 0x1fe   : > { %23835 = vst [vmem:[#allocation56_spill] sm:$0xff] %v17738_v63  ;;  %v1708_v38 = vmul.f32 %v13059_v34, %v17738_v63  ;;  %2295 = vmatprep.mubr.f32.mxu0 %v23737_v57  ;;  %4669 = vmatprep.mubr.f32.mxu1 %v23737_v57  ;;  %v22928_v37 = vand.u32 4294901760, %v23837_v42  ;;  %v2536_v34 = vsub.f32 %v23832_v43, %v22926_v45 }
 0x1ff   : > { %v1741_v49 = vadd.f32 %v1709_v56, %v1419_v61  ;;  %v17751_v10 = vadd.f32 %v1806_v39, %v1516_v28  ;;  %15575 = vset.pattern.permute.xlu1 %v23652_v52  ;;  %v4899_v62 = vand.u32 4294901760, %v4898_v48  ;;  %v2548_v9 = vsub.f32 %v23833_v55, %v22923_v32 }
 0x200   : > { %v1740_v11 = vadd.f32 %v1708_v38, %v1418_v27  ;;  %1032 = vperm.xlu1 %15575, %v17724_v17   ;;  %v2537_v56 = vand.u32 4294901760, %v2536_v34  ;;  %v4892_v39 = vsub.f32 %v23834_v6, %v22924_v23  ;;  %v4904_v61 = vsub.f32 %v23836_v58, %v22925_v18 }
 0x201   : > { %23838 = vst [vmem:[#allocation58_spill] sm:$0xff] %v17751_v10  ;;  %v17761_v5 = vand.u32 4294901760, %v1741_v49  ;;  %v13446_v27 = vpack.c.bf16 %v4899_v62, %v4887_v50  ;;  %v2549_v38 = vand.u32 4294901760, %v2548_v9  ;;  %v2542_v48 = vsub.f32 %v23837_v42, %v22928_v37  ;;  %v23844_v62 = vld [vmem:[#allocation73_spill] sm:$0xff]  ;;  %v23846_v37 = vld [vmem:[#allocation70_spill] sm:$0xff] }
 0x202   : > { %v17769_v28 = vand.u32 4294901760, %v1740_v11  ;;  %v17771_v1 = vpop.permute.xlu1 %663  ;;  %v4893_v32 = vand.u32 4294901760, %v4892_v39  ;;  %v4905_v45 = vand.u32 4294901760, %v4904_v61  ;;  %v22932_v9 = vand.u32 4294901760, %v23844_v62 }
 0x203   : > { %23839 = vst [vmem:[#allocation66_spill] sm:$0xff] %v17761_v5  ;;  %23841 = vst [vmem:[#allocation63_spill] sm:$0xff] %v17771_v1  ;;  %v17777_v34 = vsub.f32 %v1741_v49, %v17761_v5  ;;  %13447 = vmatprep.subr.bf16.mxu1 %v13446_v27  ;;  %v13258_v18 = vpack.c.bf16 %v2549_v38, %v2537_v56  ;;  %v2543_v50 = vand.u32 4294901760, %v2542_v48  ;;  %v22935_v10 = vand.u32 4294901760, %v23845_v31 }
 0x204   : > { %23840 = vst [vmem:[#allocation67_spill] sm:$0xff] %v17769_v28  ;;  %v17780_v23 = vsub.f32 %v1740_v11, %v17769_v28  ;;  %15577 = vset.pattern.permute.xlu1 %v23643_v19  ;;  %v22936_v63 = vand.u32 4294901760, %v23846_v37  ;;  %v13448_v39 = vpack.c.bf16 %v4905_v45, %v4893_v32  ;;  %v22941_v56 = vand.u32 4294901760, %v16844_v54 }
 0x205   : > { %23842 = vst [vmem:[#allocation64_spill] sm:$0xff] %v17777_v34  ;;  %1354 = vperm.xlu1 %15577, %v17724_v17   ;;  %v17791_v11 = vand.u32 4294901760, %v17777_v34  ;;  %13259 = vmatprep.subr.bf16.mxu0 %v13258_v18  ;;  %v2554_v27 = vsub.f32 %v23844_v62, %v22932_v9  ;;  %v4910_v38 = vsub.f32 %v23845_v31, %v22935_v10  ;;  %v17813_v10 = vld [vmem:[%s16583_s13 + $0xe8] sm:$0xff]  ;;  %v12997_v31 = vld [vmem:[%s16551_s2 + $0x298] sm:$0xff] }
 0x206   : > { %23843 = vst [vmem:[#allocation71_spill] sm:$0xff] %v17780_v23  ;;  %v17788_v49 = vand.u32 4294901760, %v17780_v23  ;;  %v4922_v48 = vsub.f32 %v23846_v37, %v22936_v63  ;;  %13449 = vmatpush1.bf16.msra.mxu1 %v13448_v39  ;;  %v2560_v32 = vsub.f32 %v16844_v54, %v22941_v56  ;;  %v23850_v56 = vand.u32 4294901760, %v16847_v60  ;;  %v23853_v37 = vld [vmem:[#allocation76_spill] sm:$0xff] }
 0x207   : > { %23848 = vst [vmem:[#allocation230_spill] sm:$0xff] %v17791_v11  ;;  %v17794_v61 = vpop.permute.xlu1 %996  ;;  %v2555_v18 = vand.u32 4294901760, %v2554_v27  ;;  %v4911_v9 = vand.u32 4294901760, %v4910_v38  ;;  %v2310_v5 = vsub.f32 %v17777_v34, %v17791_v11  ;;  %v23851_v38 = vld [vmem:[#allocation75_spill] sm:$0xff]  ;;  %v22957_v11 = vand.u32 4294901760, %v16858_v51 }
 0x208   : > { %23847 = vst [vmem:[#allocation229_spill] sm:$0xff] %v17788_v49  ;;  %23849 = vst [vmem:[#allocation231_spill] sm:$0xff] %v17794_v61  ;;  %v2299_v45 = vsub.f32 %v17780_v23, %v17788_v49  ;;  %v4923_v28 = vand.u32 4294901760, %v4922_v48  ;;  %v2561_v49 = vand.u32 4294901760, %v2560_v32  ;;  %v2572_v27 = vsub.f32 %v16847_v60, %v23850_v56  ;;  %v553_v56 = vld [vmem:[%s16551_s2 + $0x98] sm:$0xff] }
 0x209   : > { %15578 = vset.pattern.permute.xlu1 %v23627_v44  ;;  %v13260_v39 = vpack.c.bf16 %v2555_v18, %v2543_v50  ;;  %v22952_v48 = vand.u32 4294901760, %v23851_v38  ;;  %v12933_v50 = vld [vmem:[%s16551_s2 + $0x198] sm:$0xff]  ;;  %v2311_v18 = vand.u32 4294901760, %v2310_v5  ;;  %v2566_v34 = vsub.f32 %v16858_v51, %v22957_v11 }
 0x20a   : > { %713 = vperm.xlu1 %15578, %v17813_v10   ;;  %v2300_v63 = vand.u32 4294901760, %v2299_v45  ;;  %v13450_v23 = vpack.c.bf16 %v4923_v28, %v4911_v9  ;;  %v22954_v45 = vand.u32 4294901760, %v23853_v37  ;;  %v2573_v28 = vand.u32 4294901760, %v2572_v27  ;;  %v12966_v9 = vld [vmem:[%s16558_s23 + $0x1a0] sm:$0xff] }
 0x20b   : > { %13261 = vmatpush1.bf16.msra.mxu0 %v13260_v39  ;;  %v23854_v27 = vand.u32 4294901760, %v16861_v29  ;;  %v1066_v39 = vmul.f32 %v12933_v50, %v17794_v61  ;;  %v1164_v11 = vmul.f32 %v12966_v9, %v17112_v21  ;;  %v745_v51 = vmul.f32 %v17771_v1, %v553_v56 }
 0x20c   : > { %2301 = vmatmul.mubr.f32.gmra.mrb[34].mxu0 %v2300_v63  ;;  %4675 = vmatmul.mubr.f32.gmra.mrb[34].mxu1 %v2300_v63  ;;  %v17822_v54 = vpop.permute.xlu1 %1318  ;;  %v4916_v63 = vsub.f32 %v23851_v38, %v22952_v48  ;;  %v4928_v32 = vsub.f32 %v23853_v37, %v22954_v45  ;;  %v810_v48 = vld [vmem:[%s16558_s23 + $0xa0] sm:$0xff]  ;;  %v13262_v38 = vpack.c.bf16 %v2573_v28, %v2561_v49  ;;  %v2567_v37 = vand.u32 4294901760, %v2566_v34 }
 0x20d   : > { %23852 = vst [vmem:[#allocation232_spill] sm:$0xff] %v17822_v54  ;;  %2306 = vmatprep.mubr.f32.mxu0 %v23737_v57  ;;  %4680 = vmatprep.mubr.f32.mxu1 %v23737_v57  ;;  %v2578_v60 = vsub.f32 %v16861_v29, %v23854_v27  ;;  %v1098_v34 = vadd.f32 %v1066_v39, %v745_v51  ;;  %v22962_v28 = vand.u32 4294901760, %v16850_v16  ;;  %v23856_v51 = vld [vmem:[#allocation86_spill] sm:$0xff] }
 0x20e   : > { %15580 = vset.pattern.permute.xlu1 %v23633_v36  ;;  %13451 = vmatprep.subr.bf16.mxu1 %v13450_v23  ;;  %v4917_v5 = vand.u32 4294901760, %v4916_v63  ;;  %v4929_v45 = vand.u32 4294901760, %v4928_v32  ;;  %v22960_v63 = vand.u32 4294901760, %v16853_v35 }
 0x20f   : > { %1676 = vperm.xlu1 %15580, %v17724_v17   ;;  %v2579_v62 = vand.u32 4294901760, %v2578_v60  ;;  %v1388_v17 = vmul.f32 %v12997_v31, %v17822_v54  ;;  %13263 = vmatprep.subr.bf16.mxu0 %v13262_v38  ;;  %v13061_v60 = vld [vmem:[%s16551_s2 + $0x398] sm:$0xff]  ;;  %v22961_v31 = vand.u32 4294901760, %v16891_v7  ;;  %v22965_v38 = vand.u32 4294901760, %v16894_v41 }
 0x210   : > { %2312 = vmatmul.mubr.f32.gmra.mrb[36].mxu0 %v2311_v18  ;;  %4686 = vmatmul.mubr.f32.gmra.mrb[36].mxu1 %v2311_v18  ;;  %v13452_v49 = vpack.c.bf16 %v4929_v45, %v4917_v5  ;;  %v4934_v56 = vsub.f32 %v16850_v16, %v22962_v28  ;;  %v4946_v18 = vsub.f32 %v16853_v35, %v22960_v63  ;;  %v23858_v5 = vld [vmem:[#allocation95_spill] sm:$0xff] }
 0x211   : > { %v669_v27 = vpop.permute.xlu1 %668  ;;  %2317 = vmatprep.mubr.f32.mxu0 %v23737_v57  ;;  %4691 = vmatprep.mubr.f32.mxu1 %v23737_v57  ;;  %v13264_v50 = vpack.c.bf16 %v2579_v62, %v2567_v37  ;;  %v1420_v37 = vadd.f32 %v1388_v17, %v1098_v34  ;;  %v12934_v17 = vld [vmem:[%s16551_s2 + $0x1a0] sm:$0xff] }
 0x212   : > { %v842_v23 = vmul.f32 %v810_v48, %v669_v27  ;;  %13453 = vmatpush1.bf16.msra.mxu1 %v13452_v49  ;;  %v23857_v48 = vld [vmem:[#allocation87_spill] sm:$0xff]  ;;  %v2596_v49 = vsub.f32 %v16894_v41, %v22965_v38  ;;  %v4935_v28 = vand.u32 4294901760, %v4934_v56  ;;  %v4947_v39 = vand.u32 4294901760, %v4946_v18  ;;  %v555_v41 = vld [vmem:[%s16551_s2 + $0xa8] sm:$0xff]  ;;  %v12998_v56 = vld [vmem:[%s16551_s2 + $0x2a0] sm:$0xff] }
 0x213   : > { %15581 = vset.pattern.permute.xlu1 %v23643_v19  ;;  %13265 = vmatpush1.bf16.msra.mxu0 %v13264_v50  ;;  %v22972_v45 = vand.u32 4294901760, %v23857_v48 }
 0x214   : > { %v1196_v32 = vadd.f32 %v1164_v11, %v842_v23  ;;  %1358 = vperm.xlu1 %15581, %v17813_v10   ;;  %v22968_v11 = vand.u32 4294901760, %v23856_v51  ;;  %v2584_v23 = vsub.f32 %v16891_v7, %v22961_v31  ;;  %v13030_v31 = vld [vmem:[%s16558_s23 + $0x2a0] sm:$0xff]  ;;  %v2597_v1 = vand.u32 4294901760, %v2596_v49  ;;  %v13031_v49 = vld [vmem:[%s16558_s23 + $0x2a8] sm:$0xff] }
 0x215   : > { %v4952_v34 = vsub.f32 %v23857_v48, %v22972_v45  ;;  %v811_v45 = vld [vmem:[%s16558_s23 + $0xa8] sm:$0xff] }
 0x216   : > { %v17861_v62 = vpop.permute.xlu1 %1640  ;;  %v4940_v50 = vsub.f32 %v23856_v51, %v22968_v11  ;;  %v2585_v38 = vand.u32 4294901760, %v2584_v23  ;;  %v1067_v51 = vmul.f32 %v12934_v17, %v17112_v21  ;;  %v12999_v23 = vld [vmem:[%s16551_s2 + $0x2a8] sm:$0xff]  ;;  %v23862_v21 = vand.u32 4294901760, %v23858_v5 }
 0x217   : > { %23855 = vst [vmem:[#allocation233_spill] sm:$0xff] %v17861_v62  ;;  %v1710_v9 = vmul.f32 %v13061_v60, %v17861_v62  ;;  %v554_v60 = vld [vmem:[%s16551_s2 + $0xa0] sm:$0xff]  ;;  %v23859_v62 = vld [vmem:[#allocation96_spill] sm:$0xff]  ;;  %v4953_v11 = vand.u32 4294901760, %v4952_v34  ;;  %v13063_v17 = vld [vmem:[%s16551_s2 + $0x3a8] sm:$0xff] }
 0x218   : > { %15582 = vset.pattern.permute.xlu1 %v23652_v52  ;;  %v4941_v61 = vand.u32 4294901760, %v4940_v50  ;;  %v13266_v54 = vpack.c.bf16 %v2597_v1, %v2585_v38  ;;  %v747_v1 = vmul.f32 %v17299_v12, %v555_v41  ;;  %v13095_v34 = vld [vmem:[%s16558_s23 + $0x3a8] sm:$0xff]  ;;  %v1390_v41 = vmul.f32 %v12999_v23, %v17491_v20 }
 0x219   : > { %v1742_v63 = vadd.f32 %v1710_v9, %v1420_v37  ;;  %1040 = vperm.xlu1 %15582, %v17387_v46   ;;  %v13454_v46 = vpack.c.bf16 %v4947_v39, %v4935_v28  ;;  %v746_v9 = vmul.f32 %v669_v27, %v554_v60  ;;  %v2590_v27 = vsub.f32 %v23858_v5, %v23862_v21  ;;  %v1649_v60 = vpop.permute.xlu0 %1648 }
 0x21a   : > { %v13456_v7 = vpack.c.bf16 %v4953_v11, %v4941_v61  ;;  %v23863_v28 = vand.u32 4294901760, %v23859_v62  ;;  %v843_v61 = vmul.f32 %v811_v45, %v17299_v12  ;;  %v12967_v11 = vld [vmem:[%s16558_s23 + $0x1a8] sm:$0xff]  ;;  %13267 = vmatprep.subr.bf16.mxu0 %v13266_v54  ;;  %v1487_v12 = vmul.f32 %v13031_v49, %v17491_v20  ;;  %v17922_v45 = vld [vmem:[%s16583_s13 + $0xf8] sm:$0xff]  ;;  %v23865_v49 = vld [vmem:[#allocation93_spill] sm:$0xff] }
 0x21b   : > { %v17894_v48 = vand.u32 4294901760, %v1742_v63  ;;  %v1323_v37 = vpop.permute.xlu1 %1322  ;;  %13455 = vmatprep.subr.bf16.mxu1 %v13454_v46  ;;  %v2591_v21 = vand.u32 4294901760, %v2590_v27  ;;  %v1809_v27 = vmul.f32 %v13095_v34, %v1649_v60 }
 0x21c   : > { %v1486_v18 = vmul.f32 %v13030_v31, %v1323_v37  ;;  %v2602_v31 = vsub.f32 %v23859_v62, %v23863_v28  ;;  %v1389_v39 = vmul.f32 %v12998_v56, %v1323_v37  ;;  %13457 = vmatpush1.bf16.msra.mxu1 %v13456_v7  ;;  %v1712_v7 = vmul.f32 %v13063_v17, %v1649_v60  ;;  %v23867_v62 = vld [vmem:[#allocation99_spill] sm:$0xff]  ;;  %v23870_v60 = vld [vmem:[#allocation98_spill] sm:$0xff] }
 0x21d   : > { %23860 = vst [vmem:[#allocation234_spill] sm:$0xff] %v17894_v48  ;;  %v17900_v50 = vsub.f32 %v1742_v63, %v17894_v48  ;;  %15583 = vset.pattern.permute.xlu1 %v23633_v36  ;;  %v12935_v63 = vld [vmem:[%s16551_s2 + $0x1a8] sm:$0xff] }
 0x21e   : > { %v1518_v38 = vadd.f32 %v1486_v18, %v1196_v32  ;;  %1680 = vperm.xlu1 %15583, %v17813_v10   ;;  %v2603_v28 = vand.u32 4294901760, %v2602_v31  ;;  %v1099_v10 = vadd.f32 %v1067_v51, %v746_v9  ;;  %v13062_v51 = vld [vmem:[%s16551_s2 + $0x3a0] sm:$0xff] }
 0x21f   : > { %23861 = vst [vmem:[#allocation235_spill] sm:$0xff] %v17900_v50  ;;  %v17917_v46 = vand.u32 4294901760, %v17900_v50  ;;  %v13094_v9 = vld [vmem:[%s16558_s23 + $0x3a0] sm:$0xff] }
 0x220   : > { %v1005_v32 = vpop.permute.xlu1 %1004  ;;  %v13268_v18 = vpack.c.bf16 %v2603_v28, %v2591_v21  ;;  %v1421_v31 = vadd.f32 %v1389_v39, %v1099_v10  ;;  %v23868_v21 = vld [vmem:[#allocation100_spill] sm:$0xff]  ;;  %v23869_v39 = vld [vmem:[#allocation97_spill] sm:$0xff]  ;;  %v22986_v10 = vand.u32 4294901760, %v23870_v60 }
 0x221   : > { %23864 = vst [vmem:[#allocation236_spill] sm:$0xff] %v17917_v46  ;;  %v1068_v54 = vmul.f32 %v12935_v63, %v1005_v32  ;;  %v1165_v37 = vmul.f32 %v12967_v11, %v1005_v32  ;;  %v2321_v56 = vsub.f32 %v17900_v50, %v17917_v46  ;;  %v22985_v63 = vand.u32 4294901760, %v23865_v49  ;;  %v23866_v11 = vld [vmem:[#allocation94_spill] sm:$0xff]  ;;  %v13032_v50 = vld [vmem:[%s16558_s23 + $0x2b0] sm:$0xff] }
 0x222   : > { %15585 = vset.pattern.permute.xlu1 %v23627_v44  ;;  %13269 = vmatpush1.bf16.msra.mxu0 %v13268_v18  ;;  %v22984_v32 = vand.u32 4294901760, %v23866_v11  ;;  %v22983_v46 = vand.u32 4294901760, %v23867_v62  ;;  %v22981_v28 = vand.u32 4294901760, %v23868_v21  ;;  %v22982_v34 = vand.u32 4294901760, %v23869_v39 }
 0x223   : > { %v1100_v23 = vadd.f32 %v1068_v54, %v747_v1  ;;  %v1197_v48 = vadd.f32 %v1165_v37, %v843_v61  ;;  %723 = vperm.xlu1 %15585, %v17922_v45   ;;  %v2322_v20 = vand.u32 4294901760, %v2321_v56  ;;  %v17934_v61 = vpop.permute.xlu0 %1660 }
 0x225   : > { %v1422_v44 = vadd.f32 %v1390_v41, %v1100_v23  ;;  %v1519_v17 = vadd.f32 %v1487_v12, %v1197_v48  ;;  %2323 = vmatmul.mubr.f32.gmra.mrb[38].mxu0 %v2322_v20  ;;  %4697 = vmatmul.mubr.f32.gmra.mrb[38].mxu1 %v2322_v20  ;;  %v1645_v1 = vpop.permute.xlu1 %1644  ;;  %v4958_v41 = vsub.f32 %v23865_v49, %v22985_v63  ;;  %v23871_v48 = vld [vmem:[#allocation105_spill] sm:$0xff]  ;;  %v812_v63 = vld [vmem:[%s16558_s23 + $0xb0] sm:$0xff] }
 0x226   : > { %v1711_v54 = vmul.f32 %v13062_v51, %v1645_v1  ;;  %v1808_v37 = vmul.f32 %v13094_v9, %v1645_v1  ;;  %2328 = vmatprep.mubr.f32.mxu0 %v23737_v57  ;;  %4702 = vmatprep.mubr.f32.mxu1 %v23737_v57  ;;  %v22987_v12 = vand.u32 4294901760, %v23871_v48  ;;  %v4970_v23 = vsub.f32 %v23866_v11, %v22984_v32 }
 0x227   : > { %v1744_v56 = vadd.f32 %v1712_v7, %v1422_v44  ;;  %v17944_v18 = vadd.f32 %v1809_v27, %v1519_v17  ;;  %15586 = vset.pattern.permute.xlu1 %v23652_v52  ;;  %v2608_v20 = vsub.f32 %v23867_v62, %v22983_v46  ;;  %v4959_v1 = vand.u32 4294901760, %v4958_v41 }
 0x228   : > { %v1743_v51 = vadd.f32 %v1711_v54, %v1421_v31  ;;  %v17953_v9 = vadd.f32 %v1808_v37, %v1518_v38  ;;  %1044 = vperm.xlu1 %15586, %v17922_v45   ;;  %v2620_v7 = vsub.f32 %v23868_v21, %v22981_v28  ;;  %v4971_v52 = vand.u32 4294901760, %v4970_v23  ;;  %v17972_v28 = vpop.permute.xlu0 %1672 }
 0x229   : > { %23872 = vst [vmem:[#allocation237_spill] sm:$0xff] %v17944_v18  ;;  %v17959_v27 = vand.u32 4294901760, %v1744_v56  ;;  %v2609_v44 = vand.u32 4294901760, %v2608_v20  ;;  %v4964_v17 = vsub.f32 %v23869_v39, %v22982_v34  ;;  %v4976_v37 = vsub.f32 %v23870_v60, %v22986_v10  ;;  %v23878_v10 = vld [vmem:[#allocation106_spill] sm:$0xff]  ;;  %v12969_v18 = vld [vmem:[%s16558_s23 + $0x1b8] sm:$0xff] }
 0x22a   : > { %23873 = vst [vmem:[#allocation238_spill] sm:$0xff] %v17953_v9  ;;  %v17964_v31 = vand.u32 4294901760, %v1743_v51  ;;  %v679_v38 = vpop.permute.xlu1 %678  ;;  %v2621_v54 = vand.u32 4294901760, %v2620_v7  ;;  %v13458_v23 = vpack.c.bf16 %v4971_v52, %v4959_v1  ;;  %v2614_v20 = vsub.f32 %v23871_v48, %v22987_v12 }
 0x22b   : > { %23874 = vst [vmem:[#allocation239_spill] sm:$0xff] %v17959_v27  ;;  %v17970_v41 = vsub.f32 %v1744_v56, %v17959_v27  ;;  %v4965_v46 = vand.u32 4294901760, %v4964_v17  ;;  %v4977_v32 = vand.u32 4294901760, %v4976_v37  ;;  %v12968_v56 = vld [vmem:[%s16558_s23 + $0x1b0] sm:$0xff]  ;;  %v22990_v1 = vand.u32 4294901760, %v23878_v10 }
 0x22c   : > { %23875 = vst [vmem:[#allocation240_spill] sm:$0xff] %v17964_v31  ;;  %v17978_v34 = vsub.f32 %v1743_v51, %v17964_v31  ;;  %15588 = vset.pattern.permute.xlu1 %v23643_v19  ;;  %v13270_v7 = vpack.c.bf16 %v2621_v54, %v2609_v44  ;;  %13459 = vmatprep.subr.bf16.mxu1 %v13458_v23  ;;  %v2615_v17 = vand.u32 4294901760, %v2614_v20 }
 0x22d   : > { %23876 = vst [vmem:[#allocation241_spill] sm:$0xff] %v17970_v41  ;;  %1366 = vperm.xlu1 %15588, %v17922_v45   ;;  %v17989_v51 = vand.u32 4294901760, %v17970_v41  ;;  %v13460_v19 = vpack.c.bf16 %v4977_v32, %v4965_v46  ;;  %v2626_v54 = vsub.f32 %v23878_v10, %v22990_v1  ;;  %v844_v37 = vmul.f32 %v812_v63, %v679_v38  ;;  %v556_v32 = vld [vmem:[%s16551_s2 + $0xb0] sm:$0xff] }
 0x22e   : > { %23877 = vst [vmem:[#allocation242_spill] sm:$0xff] %v17978_v34  ;;  %v17986_v52 = vand.u32 4294901760, %v17978_v34  ;;  %13271 = vmatprep.subr.bf16.mxu0 %v13270_v7  ;;  %v17998_v7 = vpop.permute.xlu0 %1012 }
 0x22f   : > { %23880 = vst [vmem:[#allocation244_spill] sm:$0xff] %v17989_v51  ;;  %v1009_v44 = vpop.permute.xlu1 %1008  ;;  %13461 = vmatpush1.bf16.msra.mxu1 %v13460_v19  ;;  %v2627_v46 = vand.u32 4294901760, %v2626_v54  ;;  %v2343_v63 = vsub.f32 %v17970_v41, %v17989_v51  ;;  %v13000_v19 = vld [vmem:[%s16551_s2 + $0x2b0] sm:$0xff] }
 0x230   : > { %23879 = vst [vmem:[#allocation243_spill] sm:$0xff] %v17986_v52  ;;  %v1166_v23 = vmul.f32 %v12968_v56, %v1009_v44  ;;  %v2332_v12 = vsub.f32 %v17978_v34, %v17986_v52  ;;  %v12936_v56 = vld [vmem:[%s16551_s2 + $0x1b0] sm:$0xff]  ;;  %v1167_v52 = vmul.f32 %v12969_v18, %v17998_v7  ;;  %v748_v34 = vmul.f32 %v679_v38, %v556_v32  ;;  %v813_v18 = vld [vmem:[%s16558_s23 + $0xb8] sm:$0xff] }
 0x231   : > { %15589 = vset.pattern.permute.xlu1 %v23633_v36  ;;  %v13272_v1 = vpack.c.bf16 %v2627_v46, %v2615_v17  ;;  %v1069_v51 = vmul.f32 %v12936_v56, %v1009_v44  ;;  %v2344_v41 = vand.u32 4294901760, %v2343_v63  ;;  %v23883_v17 = vld [vmem:[#allocation108_spill] sm:$0xff]  ;;  %v23884_v46 = vld [vmem:[#allocation109_spill] sm:$0xff] }
 0x232   : > { %v1198_v20 = vadd.f32 %v1166_v23, %v844_v37  ;;  %1688 = vperm.xlu1 %15589, %v17922_v45   ;;  %v2333_v9 = vand.u32 4294901760, %v2332_v12  ;;  %v23881_v45 = vld [vmem:[#allocation102_spill] sm:$0xff]  ;;  %v23882_v37 = vld [vmem:[#allocation103_spill] sm:$0xff]  ;;  %v23008_v27 = vand.u32 4294901760, %v23884_v46  ;;  %v23885_v44 = vld [vmem:[#allocation112_spill] sm:$0xff] }
 0x233   : > { %v23005_v12 = vand.u32 4294901760, %v23881_v45  ;;  %v23004_v23 = vand.u32 4294901760, %v23882_v37  ;;  %13273 = vmatpush1.bf16.msra.mxu0 %v13272_v1  ;;  %v23886_v1 = vld [vmem:[#allocation113_spill] sm:$0xff]  ;;  %v1101_v32 = vadd.f32 %v1069_v51, %v748_v34  ;;  %v13064_v34 = vld [vmem:[%s16551_s2 + $0x3b0] sm:$0xff] }
 0x234   : > { %2334 = vmatmul.mubr.f32.gmra.mrb[40].mxu0 %v2333_v9  ;;  %4708 = vmatmul.mubr.f32.gmra.mrb[40].mxu1 %v2333_v9  ;;  %v1331_v36 = vpop.permute.xlu1 %1330  ;;  %v23006_v9 = vand.u32 4294901760, %v23883_v17  ;;  %v13096_v51 = vld [vmem:[%s16558_s23 + $0x3b0] sm:$0xff] }
 0x235   : > { %v1488_v54 = vmul.f32 %v13032_v50, %v1331_v36  ;;  %2339 = vmatprep.mubr.f32.mxu0 %v23737_v57  ;;  %4713 = vmatprep.mubr.f32.mxu1 %v23737_v57  ;;  %v1391_v31 = vmul.f32 %v13000_v19, %v1331_v36  ;;  %v4982_v50 = vsub.f32 %v23881_v45, %v23005_v12  ;;  %v23888_v12 = vld [vmem:[#allocation118_spill] sm:$0xff] }
 0x236   : > { %v4994_v38 = vsub.f32 %v23882_v37, %v23004_v23  ;;  %v4988_v56 = vsub.f32 %v23883_v17, %v23006_v9  ;;  %v23889_v17 = vand.u32 4294901760, %v23885_v44 }
 0x237   : > { %v1520_v10 = vadd.f32 %v1488_v54, %v1198_v20  ;;  %v5000_v20 = vsub.f32 %v23884_v46, %v23008_v27  ;;  %v23887_v54 = vld [vmem:[#allocation117_spill] sm:$0xff]  ;;  %v23890_v46 = vand.u32 4294901760, %v23886_v1 }
 0x238   : > { %2345 = vmatmul.mubr.f32.gmra.mrb[42].mxu0 %v2344_v41  ;;  %4719 = vmatmul.mubr.f32.gmra.mrb[42].mxu1 %v2344_v41  ;;  %v4983_v41 = vand.u32 4294901760, %v4982_v50  ;;  %v4995_v36 = vand.u32 4294901760, %v4994_v38  ;;  %v23018_v23 = vand.u32 4294901760, %v23887_v54  ;;  %v2632_v27 = vsub.f32 %v23885_v44, %v23889_v17 }
 0x239   : > { %v18029_v19 = vpop.permute.xlu1 %683  ;;  %2350 = vmatprep.mubr.f32.mxu0 %v23737_v57  ;;  %4724 = vmatprep.mubr.f32.mxu1 %v23737_v57  ;;  %v2644_v37 = vsub.f32 %v23886_v1, %v23890_v46  ;;  %v4989_v48 = vand.u32 4294901760, %v4988_v56  ;;  %v5001_v60 = vand.u32 4294901760, %v5000_v20  ;;  %v1423_v38 = vadd.f32 %v1391_v31, %v1101_v32  ;;  %v23893_v1 = vld [vmem:[#allocation115_spill] sm:$0xff]  ;;  %v23894_v31 = vld [vmem:[#allocation120_spill] sm:$0xff] }
 0x23a   : > { %v845_v9 = vmul.f32 %v813_v18, %v18029_v19  ;;  %v13462_v45 = vpack.c.bf16 %v4995_v36, %v4983_v41  ;;  %v2638_v50 = vsub.f32 %v23887_v54, %v23018_v23  ;;  %v2633_v18 = vand.u32 4294901760, %v2632_v27  ;;  %v23892_v41 = vld [vmem:[#allocation114_spill] sm:$0xff] }
 0x23b   : > { %v2645_v39 = vand.u32 4294901760, %v2644_v37  ;;  %v13464_v21 = vpack.c.bf16 %v5001_v60, %v4989_v48  ;;  %v23891_v44 = vand.u32 4294901760, %v23888_v12  ;;  %v23022_v56 = vand.u32 4294901760, %v23892_v41 }
 0x23c   : > { %v1199_v63 = vadd.f32 %v1167_v52, %v845_v9  ;;  %13463 = vmatprep.subr.bf16.mxu1 %v13462_v45  ;;  %v2639_v17 = vand.u32 4294901760, %v2638_v50  ;;  %v23020_v23 = vand.u32 4294901760, %v23893_v1  ;;  %v23019_v52 = vand.u32 4294901760, %v23894_v31  ;;  %v23895_v9 = vld [vmem:[#allocation121_spill] sm:$0xff] }
 0x23d   : > { %v2650_v46 = vsub.f32 %v23888_v12, %v23891_v44  ;;  %v13274_v36 = vpack.c.bf16 %v2645_v39, %v2633_v18  ;;  %v23021_v32 = vand.u32 4294901760, %v23895_v9  ;;  %13465 = vmatpush1.bf16.msra.mxu1 %v13464_v21  ;;  %v5006_v48 = vsub.f32 %v23892_v41, %v23022_v56 }
 0x23e   : > { %v1653_v20 = vpop.permute.xlu1 %1652  ;;  %v5018_v39 = vsub.f32 %v23893_v1, %v23020_v23  ;;  %v5012_v45 = vsub.f32 %v23894_v31, %v23019_v52  ;;  %v13278_v52 = vpack.c.bf16 %v16646_v26, %v16642_v24  ;;  %v12970_v26 = vld [vmem:[%s16558_s23 + $0x1c0] sm:$0xff]  ;;  %v13065_v1 = vld [vmem:[%s16551_s2 + $0x3b8] sm:$0xff] }
 0x23f   : > { %v1713_v27 = vmul.f32 %v13064_v34, %v1653_v20  ;;  %v1810_v37 = vmul.f32 %v13096_v51, %v1653_v20  ;;  %v2651_v60 = vand.u32 4294901760, %v2650_v46  ;;  %13275 = vmatprep.subr.bf16.mxu0 %v13274_v36  ;;  %v5024_v21 = vsub.f32 %v23895_v9, %v23021_v32  ;;  %v13033_v34 = vld [vmem:[%s16558_s23 + $0x2b8] sm:$0xff]  ;;  %v13034_v32 = vld [vmem:[%s16558_s23 + $0x2c0] sm:$0xff] }
 0x240   : > { %v5007_v18 = vand.u32 4294901760, %v5006_v48  ;;  %v5019_v46 = vand.u32 4294901760, %v5018_v39  ;;  %v5013_v20 = vand.u32 4294901760, %v5012_v45  ;;  %v13002_v48 = vld [vmem:[%s16551_s2 + $0x2c0] sm:$0xff]  ;;  %v12937_v39 = vld [vmem:[%s16551_s2 + $0x1b8] sm:$0xff] }
 0x241   : > { %v1745_v44 = vadd.f32 %v1713_v27, %v1423_v38  ;;  %v18066_v50 = vadd.f32 %v1810_v37, %v1520_v10  ;;  %v13276_v51 = vpack.c.bf16 %v2651_v60, %v2639_v17  ;;  %v5025_v36 = vand.u32 4294901760, %v5024_v21  ;;  %v558_v10 = vld [vmem:[%s16551_s2 + $0xc0] sm:$0xff]  ;;  %v557_v45 = vld [vmem:[%s16551_s2 + $0xb8] sm:$0xff] }
 0x242   : > { %v814_v27 = vld [vmem:[%s16558_s23 + $0xc0] sm:$0xff]  ;;  %v13466_v37 = vpack.c.bf16 %v5019_v46, %v5007_v18  ;;  %v13001_v9 = vld [vmem:[%s16551_s2 + $0x2b8] sm:$0xff]  ;;  %v1393_v18 = vmul.f32 %v13002_v48, %v17505_v15  ;;  %v749_v46 = vmul.f32 %v18029_v19, %v557_v45 }
 0x243   : > { %23896 = vst [vmem:[#allocation117_spill] sm:$0xff] %v18066_v50  ;;  %v18071_v23 = vand.u32 4294901760, %v1745_v44  ;;  %v1335_v38 = vpop.permute.xlu1 %1334  ;;  %13277 = vmatpush1.bf16.msra.mxu0 %v13276_v51  ;;  %v13468_v60 = vpack.c.bf16 %v5025_v36, %v5013_v20  ;;  %v12938_v50 = vld [vmem:[%s16551_s2 + $0x1c0] sm:$0xff]  ;;  %v750_v51 = vmul.f32 %v17313_v0, %v558_v10  ;;  %v1490_v36 = vmul.f32 %v13034_v32, %v17505_v15 }
 0x244   : > { %v1489_v17 = vmul.f32 %v13033_v34, %v1335_v38  ;;  %13279 = vmatprep.subr.bf16.mxu0 %v13278_v52  ;;  %13467 = vmatprep.subr.bf16.mxu1 %v13466_v37  ;;  %v13066_v24 = vld [vmem:[%s16551_s2 + $0x3c0] sm:$0xff]  ;;  %v846_v52 = vmul.f32 %v814_v27, %v17313_v0  ;;  %v1392_v0 = vmul.f32 %v13001_v9, %v1335_v38 }
 0x245   : > { %23897 = vst [vmem:[#allocation118_spill] sm:$0xff] %v18071_v23  ;;  %v18079_v21 = vsub.f32 %v1745_v44, %v18071_v23  ;;  %13469 = vmatpush1.bf16.msra.mxu1 %v13468_v60  ;;  %v13098_v44 = vld [vmem:[%s16558_s23 + $0x3c0] sm:$0xff]  ;;  %v1715_v60 = vmul.f32 %v13066_v24, %v17934_v61 }
 0x246   : > { %v1521_v56 = vadd.f32 %v1489_v17, %v1199_v63  ;;  %v1070_v63 = vmul.f32 %v12937_v39, %v17998_v7  ;;  %v1812_v27 = vmul.f32 %v13098_v44, %v17934_v61  ;;  %v13097_v7 = vld [vmem:[%s16558_s23 + $0x3b8] sm:$0xff]  ;;  %v815_v44 = vld [vmem:[%s16558_s23 + $0xc8] sm:$0xff] }
 0x247   : > { %23898 = vst [vmem:[#allocation114_spill] sm:$0xff] %v18079_v21  ;;  %v18088_v34 = vand.u32 4294901760, %v18079_v21 }
 0x248   : > { %v1017_v20 = vpop.permute.xlu1 %1016  ;;  %v1102_v39 = vadd.f32 %v1070_v63, %v749_v46  ;;  %v12971_v63 = vld [vmem:[%s16558_s23 + $0x1c8] sm:$0xff] }
 0x249   : > { %23899 = vst [vmem:[#allocation245_spill] sm:$0xff] %v18088_v34  ;;  %v1071_v10 = vmul.f32 %v12938_v50, %v1017_v20  ;;  %v1168_v17 = vmul.f32 %v12970_v26, %v1017_v20  ;;  %v2354_v37 = vsub.f32 %v18079_v21, %v18088_v34 }
 0x24a   : > { %v1424_v26 = vadd.f32 %v1392_v0, %v1102_v39  ;;  %v13035_v0 = vld [vmem:[%s16558_s23 + $0x2c8] sm:$0xff]  ;;  %v12972_v39 = vld [vmem:[%s16558_s23 + $0x1d0] sm:$0xff] }
 0x24b   : > { %v1103_v48 = vadd.f32 %v1071_v10, %v750_v51  ;;  %v1200_v23 = vadd.f32 %v1168_v17, %v846_v52  ;;  %v2355_v31 = vand.u32 4294901760, %v2354_v37 }
 0x24d   : > { %v1425_v19 = vadd.f32 %v1393_v18, %v1103_v48  ;;  %v1522_v45 = vadd.f32 %v1490_v36, %v1200_v23  ;;  %2356 = vmatmul.mubr.f32.gmra.mrb[44].mxu0 %v2355_v31  ;;  %4730 = vmatmul.mubr.f32.gmra.mrb[44].mxu1 %v2355_v31  ;;  %v1657_v15 = vpop.permute.xlu1 %1656  ;;  %v13470_v23 = vpack.c.bf16 %v23792_v30, %v23791_v14  ;;  %v13068_v30 = vld [vmem:[%s16551_s2 + $0x3d0] sm:$0xff] }
 0x24e   : > { %v1714_v32 = vmul.f32 %v13065_v1, %v1657_v15  ;;  %v1811_v50 = vmul.f32 %v13097_v7, %v1657_v15  ;;  %2361 = vmatprep.mubr.f32.mxu0 %v23737_v57  ;;  %4735 = vmatprep.mubr.f32.mxu1 %v23737_v57  ;;  %v13100_v14 = vld [vmem:[%s16558_s23 + $0x3d0] sm:$0xff] }
 0x24f   : > { %v1747_v24 = vadd.f32 %v1715_v60, %v1425_v19  ;;  %v18104_v61 = vadd.f32 %v1812_v27, %v1522_v45  ;;  %13471 = vmatprep.subr.bf16.mxu1 %v13470_v23  ;;  %v1025_v19 = vpop.permute.xlu0 %1024  ;;  %v12939_v45 = vld [vmem:[%s16551_s2 + $0x1c8] sm:$0xff] }
 0x250   : > { %v1746_v9 = vadd.f32 %v1714_v32, %v1424_v26  ;;  %v18106_v38 = vadd.f32 %v1811_v50, %v1521_v56  ;;  %v816_v32 = vld [vmem:[%s16558_s23 + $0xd0] sm:$0xff]  ;;  %v559_v50 = vld [vmem:[%s16551_s2 + $0xc8] sm:$0xff] }
 0x251   : > { %23900 = vst [vmem:[#allocation246_spill] sm:$0xff] %v18104_v61  ;;  %v18110_v31 = vand.u32 4294901760, %v1747_v24 }
 0x252   : > { %23901 = vst [vmem:[#allocation247_spill] sm:$0xff] %v18106_v38  ;;  %v18112_v51 = vand.u32 4294901760, %v1746_v9  ;;  %v694_v1 = vpop.permute.xlu1 %693 }
 0x253   : > { %23902 = vst [vmem:[#allocation248_spill] sm:$0xff] %v18110_v31  ;;  %v18115_v52 = vsub.f32 %v1747_v24, %v18110_v31  ;;  %v847_v36 = vmul.f32 %v815_v44, %v694_v1  ;;  %v13003_v24 = vld [vmem:[%s16551_s2 + $0x2c8] sm:$0xff] }
 0x254   : > { %23903 = vst [vmem:[#allocation249_spill] sm:$0xff] %v18112_v51  ;;  %v18118_v18 = vsub.f32 %v1746_v9, %v18112_v51  ;;  %v1170_v9 = vmul.f32 %v12972_v39, %v1025_v19 }
 0x255   : > { %23904 = vst [vmem:[#allocation250_spill] sm:$0xff] %v18115_v52  ;;  %v18126_v46 = vand.u32 4294901760, %v18115_v52 }
 0x256   : > { %23905 = vst [vmem:[#allocation251_spill] sm:$0xff] %v18118_v18  ;;  %v18123_v56 = vand.u32 4294901760, %v18118_v18 }
 0x257   : > { %23907 = vst [vmem:[#allocation253_spill] sm:$0xff] %v18126_v46  ;;  %v1021_v20 = vpop.permute.xlu1 %1020  ;;  %v2376_v27 = vsub.f32 %v18115_v52, %v18126_v46  ;;  %v13101_v52 = vld [vmem:[%s16558_s23 + $0x3d8] sm:$0xff] }
 0x258   : > { %23906 = vst [vmem:[#allocation252_spill] sm:$0xff] %v18123_v56  ;;  %v1169_v10 = vmul.f32 %v12971_v63, %v1021_v20  ;;  %v2365_v17 = vsub.f32 %v18118_v18, %v18123_v56  ;;  %v1072_v23 = vmul.f32 %v12939_v45, %v1021_v20  ;;  %v13069_v56 = vld [vmem:[%s16551_s2 + $0x3d8] sm:$0xff] }
 0x259   : > { %v2377_v15 = vand.u32 4294901760, %v2376_v27 }
 0x25a   : > { %v1201_v37 = vadd.f32 %v1169_v10, %v847_v36  ;;  %v2366_v60 = vand.u32 4294901760, %v2365_v17  ;;  %v751_v36 = vmul.f32 %v694_v1, %v559_v50 }
 0x25c   : > { %2367 = vmatmul.mubr.f32.gmra.mrb[46].mxu0 %v2366_v60  ;;  %4741 = vmatmul.mubr.f32.gmra.mrb[46].mxu1 %v2366_v60  ;;  %v1343_v48 = vpop.permute.xlu1 %1342  ;;  %v13099_v60 = vld [vmem:[%s16558_s23 + $0x3c8] sm:$0xff] }
 0x25d   : > { %v1491_v7 = vmul.f32 %v13035_v0, %v1343_v48  ;;  %2372 = vmatprep.mubr.f32.mxu0 %v23737_v57  ;;  %4746 = vmatprep.mubr.f32.mxu1 %v23737_v57  ;;  %v1394_v10 = vmul.f32 %v13003_v24, %v1343_v48  ;;  %v1104_v0 = vadd.f32 %v1072_v23, %v751_v36  ;;  %v13036_v48 = vld [vmem:[%s16558_s23 + $0x2d0] sm:$0xff]  ;;  %v817_v23 = vld [vmem:[%s16558_s23 + $0xd8] sm:$0xff] }
 0x25e   : > { %v12940_v36 = vld [vmem:[%s16551_s2 + $0x1d0] sm:$0xff] }
 0x25f   : > { %v1523_v26 = vadd.f32 %v1491_v7, %v1201_v37  ;;  %v13067_v37 = vld [vmem:[%s16551_s2 + $0x3c8] sm:$0xff]  ;;  %v18144_v7 = vpop.permute.xlu0 %1036  ;;  %v1426_v20 = vadd.f32 %v1394_v10, %v1104_v0  ;;  %v560_v10 = vld [vmem:[%s16551_s2 + $0xd0] sm:$0xff]  ;;  %v12941_v0 = vld [vmem:[%s16551_s2 + $0x1d8] sm:$0xff]  ;;  %v1073_v61 = vmul.f32 %v12940_v36, %v1025_v19  ;;  %v1718_v19 = vmul.f32 %v13069_v56, %v17972_v28 }
 0x260   : > { %2378 = vmatmul.mubr.f32.gmra.mrb[48].mxu0 %v2377_v15  ;;  %4752 = vmatmul.mubr.f32.gmra.mrb[48].mxu1 %v2377_v15  ;;  %v1815_v36 = vmul.f32 %v13101_v52, %v17972_v28  ;;  %v12974_v56 = vld [vmem:[%s16558_s23 + $0x1e0] sm:$0xff] }
 0x261   : > { %v699_v44 = vpop.permute.xlu1 %698  ;;  %2383 = vmatprep.mubr.f32.mxu0 %v23737_v57  ;;  %4757 = vmatprep.mubr.f32.mxu1 %v23737_v57 }
 0x262   : > { %v848_v63 = vmul.f32 %v816_v32, %v699_v44  ;;  %v752_v38 = vmul.f32 %v699_v44, %v560_v10 }
 0x264   : > { %v1202_v17 = vadd.f32 %v1170_v9, %v848_v63  ;;  %v561_v9 = vld [vmem:[%s16551_s2 + $0xd8] sm:$0xff]  ;;  %v704_v63 = vpop.permute.xlu0 %703  ;;  %v1105_v44 = vadd.f32 %v1073_v61, %v752_v38 }
 0x266   : > { %v1665_v27 = vpop.permute.xlu1 %1664 }
 0x267   : > { %v1716_v39 = vmul.f32 %v13067_v37, %v1665_v27  ;;  %v1813_v45 = vmul.f32 %v13099_v60, %v1665_v27  ;;  %v13005_v27 = vld [vmem:[%s16551_s2 + $0x2d8] sm:$0xff] }
 0x269   : > { %v1748_v15 = vadd.f32 %v1716_v39, %v1426_v20  ;;  %v18146_v1 = vadd.f32 %v1813_v45, %v1523_v26  ;;  %v12973_v26 = vld [vmem:[%s16558_s23 + $0x1d8] sm:$0xff]  ;;  %v13004_v20 = vld [vmem:[%s16551_s2 + $0x2d0] sm:$0xff]  ;;  %v753_v39 = vmul.f32 %v704_v63, %v561_v9  ;;  %v849_v45 = vmul.f32 %v817_v23, %v704_v63 }
 0x26b   : > { %23908 = vst [vmem:[#allocation254_spill] sm:$0xff] %v18146_v1  ;;  %v18149_v32 = vand.u32 4294901760, %v1748_v15  ;;  %v1347_v50 = vpop.permute.xlu1 %1346 }
 0x26c   : > { %v1492_v24 = vmul.f32 %v13036_v48, %v1347_v50  ;;  %v13037_v48 = vld [vmem:[%s16558_s23 + $0x2d8] sm:$0xff]  ;;  %v1395_v9 = vmul.f32 %v13004_v20, %v1347_v50 }
 0x26d   : > { %23909 = vst [vmem:[#allocation255_spill] sm:$0xff] %v18149_v32  ;;  %v18156_v37 = vsub.f32 %v1748_v15, %v18149_v32  ;;  %v1493_v23 = vmul.f32 %v13037_v48, %v17530_v25 }
 0x26e   : > { %v1524_v60 = vadd.f32 %v1492_v24, %v1202_v17  ;;  %v1396_v24 = vmul.f32 %v13005_v27, %v17530_v25  ;;  %v1427_v50 = vadd.f32 %v1395_v9, %v1105_v44  ;;  %v13038_v9 = vld [vmem:[%s16558_s23 + $0x2e0] sm:$0xff] }
 0x26f   : > { %23910 = vst [vmem:[#allocation256_spill] sm:$0xff] %v18156_v37  ;;  %v18163_v1 = vand.u32 4294901760, %v18156_v37 }
 0x270   : > { %v1029_v46 = vpop.permute.xlu1 %1028 }
 0x271   : > { %23911 = vst [vmem:[#allocation257_spill] sm:$0xff] %v18163_v1  ;;  %v1074_v15 = vmul.f32 %v12941_v0, %v1029_v46  ;;  %v1171_v34 = vmul.f32 %v12973_v26, %v1029_v46  ;;  %v2387_v17 = vsub.f32 %v18156_v37, %v18163_v1 }
 0x273   : > { %v1106_v63 = vadd.f32 %v1074_v15, %v753_v39  ;;  %v1203_v18 = vadd.f32 %v1171_v34, %v849_v45  ;;  %v2388_v21 = vand.u32 4294901760, %v2387_v17 }
 0x275   : > { %v1428_v46 = vadd.f32 %v1396_v24, %v1106_v63  ;;  %v1525_v10 = vadd.f32 %v1493_v23, %v1203_v18  ;;  %2389 = vmatmul.mubr.f32.gmra.mrb[50].mxu0 %v2388_v21  ;;  %4763 = vmatmul.mubr.f32.gmra.mrb[50].mxu1 %v2388_v21  ;;  %v1669_v0 = vpop.permute.xlu1 %1668 }
 0x276   : > { %v1717_v26 = vmul.f32 %v13068_v30, %v1669_v0  ;;  %v1814_v25 = vmul.f32 %v13100_v14, %v1669_v0  ;;  %2394 = vmatprep.mubr.f32.mxu0 %v23737_v57  ;;  %4768 = vmatprep.mubr.f32.mxu1 %v23737_v57  ;;  %v818_v14 = vld [vmem:[%s16558_s23 + $0xe0] sm:$0xff]  ;;  %v819_v0 = vld [vmem:[%s16558_s23 + $0xe8] sm:$0xff] }
 0x277   : > { %v1750_v34 = vadd.f32 %v1718_v19, %v1428_v46  ;;  %v18178_v27 = vadd.f32 %v1815_v36, %v1525_v10  ;;  %v12975_v19 = vld [vmem:[%s16558_s23 + $0x1e8] sm:$0xff]  ;;  %v12942_v36 = vld [vmem:[%s16551_s2 + $0x1e0] sm:$0xff] }
 0x278   : > { %v1749_v61 = vadd.f32 %v1717_v26, %v1427_v50  ;;  %v18180_v38 = vadd.f32 %v1814_v25, %v1524_v60  ;;  %v1173_v50 = vmul.f32 %v12975_v19, %v18144_v7  ;;  %v562_v26 = vld [vmem:[%s16551_s2 + $0xe0] sm:$0xff] }
 0x279   : > { %23912 = vst [vmem:[#allocation258_spill] sm:$0xff] %v18178_v27  ;;  %v18182_v28 = vand.u32 4294901760, %v1750_v34  ;;  %v13006_v25 = vld [vmem:[%s16551_s2 + $0x2e0] sm:$0xff] }
 0x27a   : > { %23913 = vst [vmem:[#allocation259_spill] sm:$0xff] %v18180_v38  ;;  %v18184_v21 = vand.u32 4294901760, %v1749_v61  ;;  %v709_v52 = vpop.permute.xlu1 %708 }
 0x27b   : > { %23914 = vst [vmem:[#allocation260_spill] sm:$0xff] %v18182_v28  ;;  %v18187_v18 = vsub.f32 %v1750_v34, %v18182_v28  ;;  %v850_v45 = vmul.f32 %v818_v14, %v709_v52 }
 0x27c   : > { %23915 = vst [vmem:[#allocation261_spill] sm:$0xff] %v18184_v21  ;;  %v18190_v30 = vsub.f32 %v1749_v61, %v18184_v21 }
 0x27d   : > { %23916 = vst [vmem:[#allocation262_spill] sm:$0xff] %v18187_v18  ;;  %v18198_v60 = vand.u32 4294901760, %v18187_v18 }
 0x27e   : > { %23917 = vst [vmem:[#allocation263_spill] sm:$0xff] %v18190_v30  ;;  %v18195_v20 = vand.u32 4294901760, %v18190_v30 }
 0x27f   : > { %23919 = vst [vmem:[#allocation265_spill] sm:$0xff] %v18198_v60  ;;  %v1033_v39 = vpop.permute.xlu1 %1032  ;;  %v2409_v23 = vsub.f32 %v18187_v18, %v18198_v60 }
 0x280   : > { %23918 = vst [vmem:[#allocation264_spill] sm:$0xff] %v18195_v20  ;;  %v1172_v48 = vmul.f32 %v12974_v56, %v1033_v39  ;;  %v2398_v15 = vsub.f32 %v18190_v30, %v18195_v20  ;;  %v1075_v34 = vmul.f32 %v12942_v36, %v1033_v39  ;;  %v754_v56 = vmul.f32 %v709_v52, %v562_v26 }
 0x281   : > { %v2410_v46 = vand.u32 4294901760, %v2409_v23 }
 0x282   : > { %v1204_v17 = vadd.f32 %v1172_v48, %v850_v45  ;;  %v2399_v24 = vand.u32 4294901760, %v2398_v15  ;;  %v13070_v15 = vld [vmem:[%s16551_s2 + $0x3e0] sm:$0xff] }
 0x284   : > { %2400 = vmatmul.mubr.f32.gmra.mrb[52].mxu0 %v2399_v24  ;;  %4774 = vmatmul.mubr.f32.gmra.mrb[52].mxu1 %v2399_v24  ;;  %v1355_v63 = vpop.permute.xlu1 %1354  ;;  %v719_v24 = vpop.permute.xlu0 %718 }
 0x285   : > { %v1494_v44 = vmul.f32 %v13038_v9, %v1355_v63  ;;  %2405 = vmatprep.mubr.f32.mxu0 %v23737_v57  ;;  %4779 = vmatprep.mubr.f32.mxu1 %v23737_v57  ;;  %v1397_v45 = vmul.f32 %v13006_v25, %v1355_v63  ;;  %v1107_v9 = vadd.f32 %v1075_v34, %v754_v56  ;;  %v13039_v63 = vld [vmem:[%s16558_s23 + $0x2e8] sm:$0xff]  ;;  %v564_v25 = vld [vmem:[%s16551_s2 + $0xf0] sm:$0xff] }
 0x286   : > { %v820_v34 = vld [vmem:[%s16558_s23 + $0xf0] sm:$0xff]  ;;  %v563_v56 = vld [vmem:[%s16551_s2 + $0xe8] sm:$0xff] }
 0x287   : > { %v1526_v10 = vadd.f32 %v1494_v44, %v1204_v17  ;;  %v13102_v17 = vld [vmem:[%s16558_s23 + $0x3e0] sm:$0xff]  ;;  %v1429_v39 = vadd.f32 %v1397_v45, %v1107_v9  ;;  %v13040_v9 = vld [vmem:[%s16558_s23 + $0x2f0] sm:$0xff] }
 0x288   : > { %2411 = vmatmul.mubr.f32.gmra.mrb[54].mxu0 %v2410_v46  ;;  %4785 = vmatmul.mubr.f32.gmra.mrb[54].mxu1 %v2410_v46  ;;  %v1363_v46 = vpop.permute.xlu0 %1362 }
 0x289   : > { %v714_v61 = vpop.permute.xlu1 %713  ;;  %2416 = vmatprep.mubr.f32.mxu0 %v23737_v57  ;;  %4790 = vmatprep.mubr.f32.mxu1 %v23737_v57 }
 0x28a   : > { %v851_v14 = vmul.f32 %v819_v0, %v714_v61  ;;  %v755_v27 = vmul.f32 %v714_v61, %v563_v56 }
 0x28c   : > { %v1205_v48 = vadd.f32 %v1173_v50, %v851_v14  ;;  %v12943_v14 = vld [vmem:[%s16551_s2 + $0x1e8] sm:$0xff]  ;;  %v18239_v20 = vpop.permute.xlu0 %1684 }
 0x28d   : > { %23923 = vst [vmem:[#allocation269_spill] sm:$0xff] %v18239_v20 }
 0x28e   : > { %v1677_v23 = vpop.permute.xlu1 %1676 }
 0x28f   : > { %v1719_v19 = vmul.f32 %v13070_v15, %v1677_v23  ;;  %v1816_v44 = vmul.f32 %v13102_v17, %v1677_v23  ;;  %v13008_v15 = vld [vmem:[%s16551_s2 + $0x2f0] sm:$0xff] }
 0x290   : > { %v12976_v23 = vld [vmem:[%s16558_s23 + $0x1f0] sm:$0xff]  ;;  %v1399_v38 = vmul.f32 %v13008_v15, %v1363_v46 }
 0x291   : > { %v1751_v36 = vadd.f32 %v1719_v19, %v1429_v39  ;;  %v18217_v52 = vadd.f32 %v1816_v44, %v1526_v10  ;;  %v12944_v10 = vld [vmem:[%s16551_s2 + $0x1f0] sm:$0xff]  ;;  %v13007_v39 = vld [vmem:[%s16551_s2 + $0x2e8] sm:$0xff]  ;;  %v756_v19 = vmul.f32 %v719_v24, %v564_v25  ;;  %v852_v44 = vmul.f32 %v820_v34, %v719_v24 }
 0x293   : > { %23920 = vst [vmem:[#allocation266_spill] sm:$0xff] %v18217_v52  ;;  %v18220_v0 = vand.u32 4294901760, %v1751_v36  ;;  %v1359_v50 = vpop.permute.xlu1 %1358 }
 0x294   : > { %v1495_v26 = vmul.f32 %v13039_v63, %v1359_v50  ;;  %v1076_v63 = vmul.f32 %v12943_v14, %v18144_v7  ;;  %v1398_v24 = vmul.f32 %v13007_v39, %v1359_v50  ;;  %v13071_v7 = vld [vmem:[%s16551_s2 + $0x3e8] sm:$0xff] }
 0x295   : > { %23921 = vst [vmem:[#allocation267_spill] sm:$0xff] %v18220_v0  ;;  %v18227_v45 = vsub.f32 %v1751_v36, %v18220_v0  ;;  %v13072_v36 = vld [vmem:[%s16551_s2 + $0x3f0] sm:$0xff]  ;;  %v13103_v14 = vld [vmem:[%s16558_s23 + $0x3e8] sm:$0xff] }
 0x296   : > { %v1527_v17 = vadd.f32 %v1495_v26, %v1205_v48  ;;  %v1496_v48 = vmul.f32 %v13040_v9, %v1363_v46  ;;  %v1721_v30 = vmul.f32 %v13072_v36, %v18239_v20  ;;  %v1108_v61 = vadd.f32 %v1076_v63, %v755_v27 }
 0x297   : > { %v18235_v52 = vand.u32 4294901760, %v18227_v45 }
 0x298   : > { %v1041_v60 = vpop.permute.xlu1 %1040  ;;  %v1430_v46 = vadd.f32 %v1398_v24, %v1108_v61  ;;  %v565_v61 = vld [vmem:[%s16551_s2 + $0xf8] sm:$0xff] }
 0x299   : > { %23922 = vst [vmem:[#allocation268_spill] sm:$0xff] %v18235_v52  ;;  %v1077_v26 = vmul.f32 %v12944_v10, %v1041_v60  ;;  %v1174_v1 = vmul.f32 %v12976_v23, %v1041_v60  ;;  %v2420_v25 = vsub.f32 %v18227_v45, %v18235_v52  ;;  %v23954_v52 = vld [vmem:[#allocation92_spill] sm:$0xff] }
 0x29b   : > { %v1109_v34 = vadd.f32 %v1077_v26, %v756_v19  ;;  %v1206_v18 = vadd.f32 %v1174_v1, %v852_v44  ;;  %v2421_v37 = vand.u32 4294901760, %v2420_v25  ;;  %v821_v19 = vld [vmem:[%s16558_s23 + $0xf8] sm:$0xff] }
 0x29c   : > { %v12945_v25 = vld [vmem:[%s16551_s2 + $0x1f8] sm:$0xff] }
 0x29d   : > { %v1431_v56 = vadd.f32 %v1399_v38, %v1109_v34  ;;  %v18246_v15 = vadd.f32 %v1496_v48, %v1206_v18  ;;  %2422 = vmatmul.mubr.f32.gmra.mrb[56].mxu0 %v2421_v37  ;;  %4796 = vmatmul.mubr.f32.gmra.mrb[56].mxu1 %v2421_v37  ;;  %v1681_v60 = vpop.permute.xlu1 %1680 }
 0x29e   : > { %v1720_v9 = vmul.f32 %v13071_v7, %v1681_v60  ;;  %v1817_v10 = vmul.f32 %v13103_v14, %v1681_v60  ;;  %2427 = vmatprep.mubr.f32.mxu0 %v23737_v57  ;;  %4801 = vmatprep.mubr.f32.mxu1 %v23737_v57  ;;  %v13041_v7 = vld [vmem:[%s16558_s23 + $0x2f8] sm:$0xff] }
 0x29f   : > { %23924 = vst [vmem:[#allocation270_spill] sm:$0xff] %v18246_v15  ;;  %v1753_v1 = vadd.f32 %v1721_v30, %v1431_v56  ;;  %v12977_v30 = vld [vmem:[%s16558_s23 + $0x1f8] sm:$0xff]  ;;  %v23943_v15 = vld [vmem:[#allocation155_spill] sm:$0xff] }
 0x2a0   : > { %v1752_v50 = vadd.f32 %v1720_v9, %v1430_v46  ;;  %v18250_v23 = vadd.f32 %v1817_v10, %v1527_v17  ;;  %v13009_v56 = vld [vmem:[%s16551_s2 + $0x2f8] sm:$0xff] }
 0x2a1   : > { %v18252_v27 = vand.u32 4294901760, %v1753_v1 }
 0x2a2   : > { %23925 = vst [vmem:[#allocation271_spill] sm:$0xff] %v18250_v23  ;;  %v18254_v38 = vand.u32 4294901760, %v1752_v50  ;;  %v724_v37 = vpop.permute.xlu1 %723  ;;  %v23947_v23 = vld [vmem:[#allocation83_spill] sm:$0xff] }
 0x2a3   : > { %23926 = vst [vmem:[#allocation272_spill] sm:$0xff] %v18252_v27  ;;  %v18257_v18 = vsub.f32 %v1753_v1, %v18252_v27  ;;  %v853_v36 = vmul.f32 %v821_v19, %v724_v37  ;;  %v757_v10 = vmul.f32 %v724_v37, %v565_v61  ;;  %v13280_v61 = vpack.c.bf16 %v23786_v33, %v23785_v4 }
 0x2a4   : > { %23927 = vst [vmem:[#allocation273_spill] sm:$0xff] %v18254_v38  ;;  %v18260_v39 = vsub.f32 %v1752_v50, %v18254_v38 }
 0x2a5   : > { %v18268_v17 = vand.u32 4294901760, %v18257_v18 }
 0x2a6   : > { %v18265_v44 = vand.u32 4294901760, %v18260_v39 }
 0x2a7   : > { %23929 = vst [vmem:[#allocation275_spill] sm:$0xff] %v18268_v17  ;;  %v1045_v63 = vpop.permute.xlu1 %1044  ;;  %v2442_v14 = vsub.f32 %v18257_v18, %v18268_v17  ;;  %v23950_v17 = vld [vmem:[#allocation76_spill] sm:$0xff] }
 0x2a8   : > { %23928 = vst [vmem:[#allocation274_spill] sm:$0xff] %v18265_v44  ;;  %v1175_v48 = vmul.f32 %v12977_v30, %v1045_v63  ;;  %v2431_v26 = vsub.f32 %v18260_v39, %v18265_v44  ;;  %v1078_v60 = vmul.f32 %v12945_v25, %v1045_v63  ;;  %v13073_v30 = vld [vmem:[%s16551_s2 + $0x3f8] sm:$0xff]  ;;  %v23951_v44 = vld [vmem:[#allocation163_spill] sm:$0xff]  ;;  %s13212_s2 = sshll.u32 %s16400_s9, 12 }
 0x2a9   : > { %v2443_v50 = vand.u32 4294901760, %v2442_v14  ;;  %s22503_s20 = scalar_lea.hbm %s22601_s8, %s13212_s2 }
 0x2aa   : > { %v1207_v24 = vadd.f32 %v1175_v48, %v853_v36  ;;  %v2432_v34 = vand.u32 4294901760, %v2431_v26  ;;  %v1110_v36 = vadd.f32 %v1078_v60, %v757_v10  ;;  %v13472_v60 = vpack.c.bf16 %v23797_v22, %v23796_v40  ;;  %v23935_v10 = vld [vmem:[#allocation46_spill] sm:$0xff] }
 0x2ac   : > { %2433 = vmatmul.mubr.f32.gmra.mrb[58].mxu0 %v2432_v34  ;;  %4807 = vmatmul.mubr.f32.gmra.mrb[58].mxu1 %v2432_v34  ;;  %v1367_v46 = vpop.permute.xlu1 %1366 }
 0x2ad   : > { %v1497_v9 = vmul.f32 %v13041_v7, %v1367_v46  ;;  %2438 = vmatprep.mubr.f32.mxu0 %v23737_v57  ;;  %4812 = vmatprep.mubr.f32.mxu1 %v23737_v57  ;;  %v1400_v1 = vmul.f32 %v13009_v56, %v1367_v46  ;;  %v13282_v56 = vpack.c.bf16 %v23794_v59, %v23793_v13 }
 0x2ae   : > { %v13284_v46 = vpack.c.bf16 %v23806_v3, %v23798_v8 }
 0x2af   : > { %v18280_v19 = vadd.f32 %v1497_v9, %v1207_v24  ;;  %v1432_v63 = vadd.f32 %v1400_v1, %v1110_v36  ;;  %v23934_v9 = vld [vmem:[#allocation45_spill] sm:$0xff] }
 0x2b0   : > { %2444 = vmatmul.mubr.f32.gmra.mrb[60].mxu0 %v2443_v50  ;;  %4818 = vmatmul.mubr.f32.gmra.mrb[60].mxu1 %v2443_v50  ;;  %v13474_v1 = vpack.c.bf16 %v23935_v10, %v23934_v9  ;;  %v23936_v50 = vld [vmem:[#allocation53_spill] sm:$0xff] }
 0x2b1   : > { %23930 = vst [vmem:[#allocation276_spill] sm:$0xff] %v18280_v19  ;;  %v18283_v48 = vpop.permute.xlu1 %1688  ;;  %2449 = vmatprep.mubr.f32.mxu0 %v23737_v57  ;;  %4823 = vmatprep.mubr.f32.mxu1 %v23737_v57  ;;  %v13290_v19 = vpack.c.bf16 %v23833_v55, %v23832_v43 }
 0x2b2   : > { %23931 = vst [vmem:[#allocation277_spill] sm:$0xff] %v18283_v48  ;;  %v1722_v26 = vmul.f32 %v13073_v30, %v18283_v48  ;;  %v23937_v30 = vld [vmem:[#allocation55_spill] sm:$0xff]  ;;  %v13480_v48 = vpack.c.bf16 %v23836_v58, %v23834_v6 }
 0x2b3   : > { %v13286_v36 = vpack.c.bf16 %v23937_v30, %v23936_v50 }
 0x2b4   : > { %v1754_v25 = vadd.f32 %v1722_v26, %v1432_v63  ;;  %v23938_v63 = vld [vmem:[#allocation51_spill] sm:$0xff]  ;;  %v23939_v26 = vld [vmem:[#allocation52_spill] sm:$0xff] }
 0x2b6   : > { %v18288_v34 = vand.u32 4294901760, %v1754_v25 }
 0x2b8   : > { %23932 = vst [vmem:[#allocation278_spill] sm:$0xff] %v18288_v34  ;;  %v18291_v37 = vsub.f32 %v1754_v25, %v18288_v34  ;;  %v13476_v25 = vpack.c.bf16 %v23939_v26, %v23938_v63 }
 0x2ba   : > { %v18294_v24 = vand.u32 4294901760, %v18291_v37 }
 0x2bc   : > { %23933 = vst [vmem:[#allocation279_spill] sm:$0xff] %v18294_v24  ;;  %v2453_v7 = vsub.f32 %v18291_v37, %v18294_v24  ;;  %v23949_v24 = vld [vmem:[#allocation75_spill] sm:$0xff] }
 0x2be   : > { %v2454_v14 = vand.u32 4294901760, %v2453_v7  ;;  %v23940_v7 = vld [vmem:[#allocation151_spill] sm:$0xff] }
 0x2c0   : > { %2455 = vmatmul.mubr.f32.gmra.mrb[62].mxu0 %v2454_v14  ;;  %4829 = vmatmul.mubr.f32.gmra.mrb[62].mxu1 %v2454_v14  ;;  %v23941_v14 = vld [vmem:[#allocation60_spill] sm:$0xff] }
 0x2c1   : > { %2685 = vmatprep.mubr.f32.mxu0 %v23737_v57  ;;  %5059 = vmatprep.mubr.f32.mxu1 %v23737_v57 }
 0x2c4   : > { %2687 = vmatmul.mubr.f32.vlgmr.msra.gmra.mrb[0].mxu0 %v17168_v47  ;;  %5061 = vmatmul.mubr.f32.vlgmr.msra.gmra.mrb[0].mxu1 %v17168_v47 }
 0x2c5   : > { %13281 = vmatpush1.bf16.msra.mxu0 %v13280_v61  ;;  %2692 = vmatprep.mubr.f32.mxu0 %v23737_v57  ;;  %v23942_v61 = vld [vmem:[#allocation61_spill] sm:$0xff] }
 0x2c6   : > { %5066 = vmatprep.mubr.f32.mxu1 %v23737_v57  ;;  %13283 = vmatprep.subr.bf16.mxu0 %v13282_v56  ;;  %v13288_v56 = vpack.c.bf16 %v23942_v61, %v23941_v14 }
 0x2c7   : > { %13473 = vmatpush1.bf16.msra.mxu1 %v13472_v60  ;;  %v13478_v60 = vpack.c.bf16 %v23831_v2, %v23830_v53 }
 0x2c8   : > { %2694 = vmatmul.mubr.f32.gmra.mrb[2].mxu0 %v23940_v7  ;;  %5068 = vmatmul.mubr.f32.gmra.mrb[2].mxu1 %v23940_v7  ;;  %v23948_v7 = vld [vmem:[#allocation84_spill] sm:$0xff] }
 0x2c9   : > { %2699 = vmatprep.mubr.f32.mxu0 %v23737_v57  ;;  %5073 = vmatprep.mubr.f32.mxu1 %v23737_v57  ;;  %v13294_v47 = vpack.c.bf16 %v23948_v7, %v23947_v23  ;;  %v23956_v7 = vld [vmem:[#allocation87_spill] sm:$0xff]  ;;  %v23957_v23 = vld [vmem:[#allocation165_spill] sm:$0xff] }
 0x2ca   : > { %13285 = vmatpush1.bf16.msra.mxu0 %v13284_v46  ;;  %13475 = vmatprep.subr.bf16.mxu1 %v13474_v1  ;;  %v23944_v46 = vld [vmem:[#allocation73_spill] sm:$0xff] }
 0x2cb   : > { %13287 = vmatprep.subr.bf16.mxu0 %v13286_v36  ;;  %13477 = vmatpush1.bf16.msra.mxu1 %v13476_v25  ;;  %v13292_v1 = vpack.c.bf16 %v23944_v46, %v23837_v42  ;;  %v23945_v36 = vld [vmem:[#allocation68_spill] sm:$0xff]  ;;  %v23946_v25 = vld [vmem:[#allocation70_spill] sm:$0xff] }
 0x2cc   : > { %2701 = vmatmul.mubr.f32.gmra.mrb[4].mxu0 %v23943_v15  ;;  %5075 = vmatmul.mubr.f32.gmra.mrb[4].mxu1 %v23943_v15  ;;  %v13482_v20 = vpack.c.bf16 %v23946_v25, %v23945_v36  ;;  %v13484_v15 = vpack.c.bf16 %v23950_v17, %v23949_v24  ;;  %v23955_v24 = vld [vmem:[#allocation86_spill] sm:$0xff] }
 0x2cd   : > { %2706 = vmatprep.mubr.f32.mxu0 %v23737_v57  ;;  %5080 = vmatprep.mubr.f32.mxu1 %v23737_v57 }
 0x2ce   : > { %13289 = vmatpush1.bf16.msra.mxu0 %v13288_v56  ;;  %13479 = vmatprep.subr.bf16.mxu1 %v13478_v60  ;;  %v23952_v56 = vld [vmem:[#allocation85_spill] sm:$0xff]  ;;  %v23953_v60 = vld [vmem:[#allocation91_spill] sm:$0xff] }
 0x2cf   : > { %13291 = vmatprep.subr.bf16.mxu0 %v13290_v19  ;;  %13481 = vmatpush1.bf16.msra.mxu1 %v13480_v48  ;;  %v13296_v19 = vpack.c.bf16 %v16861_v29, %v23952_v56  ;;  %v13486_v48 = vpack.c.bf16 %v16853_v35, %v16850_v16  ;;  %v13298_v17 = vpack.c.bf16 %v23954_v52, %v23953_v60  ;;  %v23961_v52 = vld [vmem:[#allocation98_spill] sm:$0xff] }
 0x2d0   : > { %2708 = vmatmul.mubr.f32.gmra.mrb[6].mxu0 %v23951_v44  ;;  %5082 = vmatmul.mubr.f32.gmra.mrb[6].mxu1 %v23951_v44  ;;  %v13488_v44 = vpack.c.bf16 %v23956_v7, %v23955_v24  ;;  %v23960_v24 = vld [vmem:[#allocation97_spill] sm:$0xff]  ;;  %v23962_v60 = vld [vmem:[#allocation170_spill] sm:$0xff] }
 0x2d1   : > { %2713 = vmatprep.mubr.f32.mxu0 %v23737_v57  ;;  %5087 = vmatprep.mubr.f32.mxu1 %v23737_v57 }
 0x2d2   : > { %13293 = vmatpush1.bf16.msra.mxu0 %v13292_v1  ;;  %13483 = vmatprep.subr.bf16.mxu1 %v13482_v20  ;;  %v23958_v20 = vld [vmem:[#allocation96_spill] sm:$0xff] }
 0x2d3   : > { %13295 = vmatprep.subr.bf16.mxu0 %v13294_v47  ;;  %13485 = vmatpush1.bf16.msra.mxu1 %v13484_v15  ;;  %v13300_v47 = vpack.c.bf16 %v23958_v20, %v23858_v5  ;;  %v13490_v15 = vpack.c.bf16 %v23866_v11, %v23865_v49  ;;  %v23959_v1 = vld [vmem:[#allocation100_spill] sm:$0xff]  ;;  %v23966_v11 = vld [vmem:[#allocation103_spill] sm:$0xff]  ;;  %v23970_v20 = vld [vmem:[#allocation109_spill] sm:$0xff] }
 0x2d4   : > { %2715 = vmatmul.mubr.f32.gmra.mrb[8].mxu0 %v23957_v23  ;;  %5089 = vmatmul.mubr.f32.gmra.mrb[8].mxu1 %v23957_v23  ;;  %v13302_v7 = vpack.c.bf16 %v23959_v1, %v23867_v62  ;;  %v13492_v23 = vpack.c.bf16 %v23961_v52, %v23960_v24  ;;  %v23967_v1 = vld [vmem:[#allocation112_spill] sm:$0xff]  ;;  %v23968_v52 = vld [vmem:[#allocation113_spill] sm:$0xff] }
 0x2d5   : > { %2720 = vmatprep.mubr.f32.mxu0 %v23737_v57  ;;  %5094 = vmatprep.mubr.f32.mxu1 %v23737_v57  ;;  %v13306_v24 = vpack.c.bf16 %v23968_v52, %v23967_v1  ;;  %v23969_v62 = vld [vmem:[#allocation108_spill] sm:$0xff]  ;;  %v23975_v52 = vld [vmem:[#allocation182_spill] sm:$0xff] }
 0x2d6   : > { %13297 = vmatpush1.bf16.msra.mxu0 %v13296_v19  ;;  %13487 = vmatprep.subr.bf16.mxu1 %v13486_v48  ;;  %v23963_v19 = vld [vmem:[#allocation105_spill] sm:$0xff]  ;;  %v23964_v48 = vld [vmem:[#allocation106_spill] sm:$0xff]  ;;  %v23971_v5 = vld [vmem:[#allocation172_spill] sm:$0xff] }
 0x2d7   : > { %13299 = vmatprep.subr.bf16.mxu0 %v13298_v17  ;;  %13489 = vmatpush1.bf16.msra.mxu1 %v13488_v44  ;;  %v13304_v17 = vpack.c.bf16 %v23964_v48, %v23963_v19  ;;  %v23965_v44 = vld [vmem:[#allocation102_spill] sm:$0xff] }
 0x2d8   : > { %2722 = vmatmul.mubr.f32.gmra.mrb[10].mxu0 %v23962_v60  ;;  %5096 = vmatmul.mubr.f32.gmra.mrb[10].mxu1 %v23962_v60  ;;  %v13494_v49 = vpack.c.bf16 %v23966_v11, %v23965_v44  ;;  %v13496_v60 = vpack.c.bf16 %v23970_v20, %v23969_v62  ;;  %v23974_v20 = vld [vmem:[#allocation121_spill] sm:$0xff] }
 0x2d9   : > { %2727 = vmatprep.mubr.f32.mxu0 %v23737_v57  ;;  %5101 = vmatprep.mubr.f32.mxu1 %v23737_v57 }
 0x2da   : > { %13301 = vmatpush1.bf16.msra.mxu0 %v13300_v47  ;;  %13491 = vmatprep.subr.bf16.mxu1 %v13490_v15  ;;  %v23973_v15 = vld [vmem:[#allocation120_spill] sm:$0xff] }
 0x2db   : > { %13303 = vmatprep.subr.bf16.mxu0 %v13302_v7  ;;  %13493 = vmatpush1.bf16.msra.mxu1 %v13492_v23  ;;  %v13308_v7 = vpack.c.bf16 %v23888_v12, %v23887_v54  ;;  %v23972_v23 = vld [vmem:[#allocation115_spill] sm:$0xff]  ;;  %v13500_v62 = vpack.c.bf16 %v23974_v20, %v23973_v15 }
 0x2dc   : > { %2729 = vmatmul.mubr.f32.gmra.mrb[12].mxu0 %v23971_v5  ;;  %5103 = vmatmul.mubr.f32.gmra.mrb[12].mxu1 %v23971_v5  ;;  %v13498_v47 = vpack.c.bf16 %v23972_v23, %v23892_v41  ;;  %v24011_v5 = vld [vmem:[#allocation74_spill] sm:$0xff] }
 0x2dd   : > { %2734 = vmatprep.mubr.f32.mxu0 %v23737_v57  ;;  %5108 = vmatprep.mubr.f32.mxu1 %v23737_v57 }
 0x2de   : > { %13305 = vmatpush1.bf16.msra.mxu0 %v13304_v17  ;;  %13495 = vmatprep.subr.bf16.mxu1 %v13494_v49  ;;  %v23976_v49 = vld [vmem:[#allocation30_spill] sm:$0xff]  ;;  %v23977_v17 = vld [vmem:[#allocation189_spill] sm:$0xff] }
 0x2df   : > { %13307 = vmatprep.subr.bf16.mxu0 %v13306_v24  ;;  %13497 = vmatpush1.bf16.msra.mxu1 %v13496_v60  ;;  %v23978_v24 = vld [vmem:[#allocation32_spill] sm:$0xff] }
 0x2e0   : > { %2736 = vmatmul.mubr.f32.gmra.mrb[14].mxu0 %v23975_v52  ;;  %5110 = vmatmul.mubr.f32.gmra.mrb[14].mxu1 %v23975_v52  ;;  %v23979_v60 = vld [vmem:[#allocation188_spill] sm:$0xff]  ;;  %v24010_v52 = vld [vmem:[#allocation77_spill] sm:$0xff] }
 0x2e1   : > { %2741 = vmatprep.mubr.f32.mxu0 %v23737_v57  ;;  %5115 = vmatprep.mubr.f32.mxu1 %v23737_v57 }
 0x2e2   : > { %13309 = vmatpush1.bf16.msra.mxu0 %v13308_v7  ;;  %13499 = vmatprep.subr.bf16.mxu1 %v13498_v47  ;;  %v23981_v7 = vld [vmem:[#allocation206_spill] sm:$0xff]  ;;  %v23982_v47 = vld [vmem:[#allocation205_spill] sm:$0xff] }
 0x2e3   : > { %13501 = vmatpush1.bf16.msra.mxu1 %v13500_v62  ;;  %13311 = vmatprep.subr.bf16.mxu0 %v23976_v49  ;;  %v23980_v62 = vld [vmem:[#allocation199_spill] sm:$0xff] }
 0x2e4   : > { %2743 = vmatmul.mubr.f32.gmra.mrb[16].mxu0 %v23977_v17  ;;  %5117 = vmatmul.mubr.f32.gmra.mrb[16].mxu1 %v23977_v17  ;;  %v24009_v17 = vld [vmem:[#allocation69_spill] sm:$0xff] }
 0x2e5   : > { %2748 = vmatprep.mubr.f32.mxu0 %v23737_v57  ;;  %5122 = vmatprep.mubr.f32.mxu1 %v23737_v57 }
 0x2e6   : > { %13503 = vmatprep.subr.bf16.mxu1 %v23978_v24 }
 0x2e8   : > { %2750 = vmatmul.mubr.f32.gmra.mrb[18].mxu0 %v23979_v60  ;;  %5124 = vmatmul.mubr.f32.gmra.mrb[18].mxu1 %v23979_v60  ;;  %v24007_v60 = vld [vmem:[#allocation166_spill] sm:$0xff] }
 0x2e9   : > { %2755 = vmatprep.mubr.f32.mxu0 %v23737_v57  ;;  %5129 = vmatprep.mubr.f32.mxu1 %v23737_v57 }
 0x2ec   : > { %2757 = vmatmul.mubr.f32.gmra.mrb[20].mxu0 %v23980_v62  ;;  %5131 = vmatmul.mubr.f32.gmra.mrb[20].mxu1 %v23980_v62  ;;  %v23983_v62 = vld [vmem:[#allocation36_spill] sm:$0xff] }
 0x2ed   : > { %2762 = vmatprep.mubr.f32.mxu0 %v23737_v57  ;;  %5136 = vmatprep.mubr.f32.mxu1 %v23737_v57 }
 0x2f0   : > { %2764 = vmatmul.mubr.f32.gmra.mrb[22].mxu0 %v23981_v7  ;;  %5138 = vmatmul.mubr.f32.gmra.mrb[22].mxu1 %v23981_v7  ;;  %v23984_v7 = vld [vmem:[#allocation40_spill] sm:$0xff] }
 0x2f1   : > { %2769 = vmatprep.mubr.f32.mxu0 %v23737_v57  ;;  %5143 = vmatprep.mubr.f32.mxu1 %v23737_v57 }
 0x2f4   : > { %2771 = vmatmul.mubr.f32.gmra.mrb[24].mxu0 %v23982_v47  ;;  %5145 = vmatmul.mubr.f32.gmra.mrb[24].mxu1 %v23982_v47  ;;  %v23985_v47 = vld [vmem:[#allocation39_spill] sm:$0xff] }
 0x2f5   : > { %2776 = vmatprep.mubr.f32.mxu0 %v23737_v57  ;;  %5150 = vmatprep.mubr.f32.mxu1 %v23737_v57 }
 0x2f8   : > { %2778 = vmatmul.mubr.f32.gmra.mrb[26].mxu0 %v23983_v62  ;;  %5152 = vmatmul.mubr.f32.gmra.mrb[26].mxu1 %v23983_v62  ;;  %v23986_v62 = vld [vmem:[#allocation225_spill] sm:$0xff] }
 0x2f9   : > { %2783 = vmatprep.mubr.f32.mxu0 %v23737_v57  ;;  %5157 = vmatprep.mubr.f32.mxu1 %v23737_v57 }
 0x2fc   : > { %2785 = vmatmul.mubr.f32.gmra.mrb[28].mxu0 %v23984_v7  ;;  %5159 = vmatmul.mubr.f32.gmra.mrb[28].mxu1 %v23984_v7  ;;  %v23987_v7 = vld [vmem:[#allocation67_spill] sm:$0xff] }
 0x2fd   : > { %2790 = vmatprep.mubr.f32.mxu0 %v23737_v57  ;;  %5164 = vmatprep.mubr.f32.mxu1 %v23737_v57 }
 0x300   : > { %2792 = vmatmul.mubr.f32.gmra.mrb[30].mxu0 %v23985_v47  ;;  %5166 = vmatmul.mubr.f32.gmra.mrb[30].mxu1 %v23985_v47  ;;  %v23988_v47 = vld [vmem:[#allocation66_spill] sm:$0xff] }
 0x301   : > { %2797 = vmatprep.mubr.f32.mxu0 %v23737_v57  ;;  %5171 = vmatprep.mubr.f32.mxu1 %v23737_v57 }
 0x304   : > { %2799 = vmatmul.mubr.f32.gmra.mrb[32].mxu0 %v23986_v62  ;;  %5173 = vmatmul.mubr.f32.gmra.mrb[32].mxu1 %v23986_v62  ;;  %v23989_v62 = vld [vmem:[#allocation234_spill] sm:$0xff] }
 0x305   : > { %2804 = vmatprep.mubr.f32.mxu0 %v23737_v57  ;;  %5178 = vmatprep.mubr.f32.mxu1 %v23737_v57 }
 0x308   : > { %2806 = vmatmul.mubr.f32.gmra.mrb[34].mxu0 %v23987_v7  ;;  %5180 = vmatmul.mubr.f32.gmra.mrb[34].mxu1 %v23987_v7  ;;  %v23990_v7 = vld [vmem:[#allocation240_spill] sm:$0xff] }
 0x309   : > { %2811 = vmatprep.mubr.f32.mxu0 %v23737_v57  ;;  %5185 = vmatprep.mubr.f32.mxu1 %v23737_v57 }
 0x30c   : > { %2813 = vmatmul.mubr.f32.gmra.mrb[36].mxu0 %v23988_v47  ;;  %5187 = vmatmul.mubr.f32.gmra.mrb[36].mxu1 %v23988_v47  ;;  %v23991_v47 = vld [vmem:[#allocation239_spill] sm:$0xff] }
 0x30d   : > { %2818 = vmatprep.mubr.f32.mxu0 %v23737_v57  ;;  %5192 = vmatprep.mubr.f32.mxu1 %v23737_v57 }
 0x310   : > { %2820 = vmatmul.mubr.f32.gmra.mrb[38].mxu0 %v23989_v62  ;;  %5194 = vmatmul.mubr.f32.gmra.mrb[38].mxu1 %v23989_v62  ;;  %v23992_v62 = vld [vmem:[#allocation118_spill] sm:$0xff] }
 0x311   : > { %2825 = vmatprep.mubr.f32.mxu0 %v23737_v57  ;;  %5199 = vmatprep.mubr.f32.mxu1 %v23737_v57 }
 0x314   : > { %2827 = vmatmul.mubr.f32.gmra.mrb[40].mxu0 %v23990_v7  ;;  %5201 = vmatmul.mubr.f32.gmra.mrb[40].mxu1 %v23990_v7  ;;  %v24006_v7 = vld [vmem:[#allocation62_spill] sm:$0xff] }
 0x315   : > { %2832 = vmatprep.mubr.f32.mxu0 %v23737_v57  ;;  %5206 = vmatprep.mubr.f32.mxu1 %v23737_v57 }
 0x318   : > { %2834 = vmatmul.mubr.f32.gmra.mrb[42].mxu0 %v23991_v47  ;;  %5208 = vmatmul.mubr.f32.gmra.mrb[42].mxu1 %v23991_v47  ;;  %v24005_v47 = vld [vmem:[#allocation65_spill] sm:$0xff] }
 0x319   : > { %2839 = vmatprep.mubr.f32.mxu0 %v23737_v57  ;;  %5213 = vmatprep.mubr.f32.mxu1 %v23737_v57 }
 0x31c   : > { %2841 = vmatmul.mubr.f32.gmra.mrb[44].mxu0 %v23992_v62  ;;  %5215 = vmatmul.mubr.f32.gmra.mrb[44].mxu1 %v23992_v62  ;;  %v24004_v62 = vld [vmem:[#allocation57_spill] sm:$0xff] }
 0x31d   : > { %2846 = vmatprep.mubr.f32.mxu0 %v23737_v57  ;;  %5220 = vmatprep.mubr.f32.mxu1 %v23737_v57 }
 0x320   : > { %2848 = vmatmul.mubr.f32.gmra.mrb[46].mxu0 %v18112_v51  ;;  %5222 = vmatmul.mubr.f32.gmra.mrb[46].mxu1 %v18112_v51  ;;  %v24002_v51 = vld [vmem:[#allocation160_spill] sm:$0xff] }
 0x321   : > { %2853 = vmatprep.mubr.f32.mxu0 %v23737_v57  ;;  %5227 = vmatprep.mubr.f32.mxu1 %v23737_v57 }
 0x324   : > { %2855 = vmatmul.mubr.f32.gmra.mrb[48].mxu0 %v18110_v31  ;;  %5229 = vmatmul.mubr.f32.gmra.mrb[48].mxu1 %v18110_v31  ;;  %v24001_v31 = vld [vmem:[#allocation50_spill] sm:$0xff] }
 0x325   : > { %2860 = vmatprep.mubr.f32.mxu0 %v23737_v57  ;;  %5234 = vmatprep.mubr.f32.mxu1 %v23737_v57 }
 0x328   : > { %2862 = vmatmul.mubr.f32.gmra.mrb[50].mxu0 %v18149_v32  ;;  %5236 = vmatmul.mubr.f32.gmra.mrb[50].mxu1 %v18149_v32  ;;  %v24000_v32 = vld [vmem:[#allocation54_spill] sm:$0xff] }
 0x329   : > { %2867 = vmatprep.mubr.f32.mxu0 %v23737_v57  ;;  %5241 = vmatprep.mubr.f32.mxu1 %v23737_v57 }
 0x32c   : > { %2869 = vmatmul.mubr.f32.gmra.mrb[52].mxu0 %v18184_v21  ;;  %5243 = vmatmul.mubr.f32.gmra.mrb[52].mxu1 %v18184_v21  ;;  %v23997_v21 = vld [vmem:[#allocation153_spill] sm:$0xff] }
 0x32d   : > { %2874 = vmatprep.mubr.f32.mxu0 %v23737_v57  ;;  %5248 = vmatprep.mubr.f32.mxu1 %v23737_v57 }
 0x330   : > { %2876 = vmatmul.mubr.f32.gmra.mrb[54].mxu0 %v18182_v28  ;;  %5250 = vmatmul.mubr.f32.gmra.mrb[54].mxu1 %v18182_v28  ;;  %v23996_v28 = vld [vmem:[#allocation38_spill] sm:$0xff] }
 0x331   : > { %2881 = vmatprep.mubr.f32.mxu0 %v23737_v57  ;;  %5255 = vmatprep.mubr.f32.mxu1 %v23737_v57 }
 0x334   : > { %2883 = vmatmul.mubr.f32.gmra.mrb[56].mxu0 %v18220_v0  ;;  %5257 = vmatmul.mubr.f32.gmra.mrb[56].mxu1 %v18220_v0  ;;  %v23994_v0 = vld [vmem:[#allocation35_spill] sm:$0xff] }
 0x335   : > { %2888 = vmatprep.mubr.f32.mxu0 %v23737_v57  ;;  %5262 = vmatprep.mubr.f32.mxu1 %v23737_v57 }
 0x338   : > { %2890 = vmatmul.mubr.f32.gmra.mrb[58].mxu0 %v18254_v38  ;;  %5264 = vmatmul.mubr.f32.gmra.mrb[58].mxu1 %v18254_v38  ;;  %v23993_v38 = vld [vmem:[#allocation158_spill] sm:$0xff] }
 0x339   : > { %2895 = vmatprep.mubr.f32.mxu0 %v23737_v57  ;;  %5269 = vmatprep.mubr.f32.mxu1 %v23737_v57 }
 0x33c   : > { %2897 = vmatmul.mubr.f32.gmra.mrb[60].mxu0 %v18252_v27  ;;  %5271 = vmatmul.mubr.f32.gmra.mrb[60].mxu1 %v18252_v27  ;;  %v23995_v27 = vld [vmem:[#allocation41_spill] sm:$0xff] }
 0x33d   : > { %2902 = vmatprep.mubr.f32.mxu0 %v23737_v57  ;;  %5276 = vmatprep.mubr.f32.mxu1 %v23737_v57 }
 0x340   : > { %2904 = vmatmul.mubr.f32.gmra.mrb[62].mxu0 %v18288_v34  ;;  %5278 = vmatmul.mubr.f32.gmra.mrb[62].mxu1 %v18288_v34  ;;  %v23998_v34 = vld [vmem:[#allocation48_spill] sm:$0xff] }
 0x341   : > { %3038 = vmatprep.mubr.f32.mxu0 %v23737_v57  ;;  %5412 = vmatprep.mubr.f32.mxu1 %v23737_v57 }
 0x344   : > { %3041 = vmatmul.mubr.f32.vlgmr.msra.gmra.mrb[0].mxu0 %v23993_v38  ;;  %5415 = vmatmul.mubr.f32.vlgmr.msra.gmra.mrb[0].mxu1 %v23993_v38  ;;  %v23999_v38 = vld [vmem:[#allocation44_spill] sm:$0xff] }
 0x345   : > { %13313 = vmatpush1.bf16.msra.mxu0 %v23994_v0  ;;  %3046 = vmatprep.mubr.f32.mxu0 %v23737_v57 }
 0x346   : > { %5420 = vmatprep.mubr.f32.mxu1 %v23737_v57  ;;  %13315 = vmatprep.subr.bf16.mxu0 %v23995_v27 }
 0x347   : > { %13505 = vmatpush1.bf16.msra.mxu1 %v23996_v28 }
 0x348   : > { %3049 = vmatmul.mubr.f32.gmra.mrb[2].mxu0 %v23997_v21  ;;  %5423 = vmatmul.mubr.f32.gmra.mrb[2].mxu1 %v23997_v21  ;;  %v24003_v21 = vld [vmem:[#allocation59_spill] sm:$0xff] }
 0x349   : > { %3054 = vmatprep.mubr.f32.mxu0 %v23737_v57  ;;  %5428 = vmatprep.mubr.f32.mxu1 %v23737_v57 }
 0x34a   : > { %13317 = vmatpush1.bf16.msra.mxu0 %v23998_v34  ;;  %13507 = vmatprep.subr.bf16.mxu1 %v23999_v38  ;;  %v24038_v34 = vld [vmem:[#allocation119_spill] sm:$0xff] }
 0x34b   : > { %13319 = vmatprep.subr.bf16.mxu0 %v24000_v32  ;;  %13509 = vmatpush1.bf16.msra.mxu1 %v24001_v31  ;;  %v24031_v32 = vld [vmem:[#allocation184_spill] sm:$0xff] }
 0x34c   : > { %3057 = vmatmul.mubr.f32.gmra.mrb[4].mxu0 %v24002_v51  ;;  %5431 = vmatmul.mubr.f32.gmra.mrb[4].mxu1 %v24002_v51  ;;  %v24008_v51 = vld [vmem:[#allocation72_spill] sm:$0xff] }
 0x34d   : > { %3062 = vmatprep.mubr.f32.mxu0 %v23737_v57  ;;  %5436 = vmatprep.mubr.f32.mxu1 %v23737_v57 }
 0x34e   : > { %13321 = vmatpush1.bf16.msra.mxu0 %v24003_v21  ;;  %13511 = vmatprep.subr.bf16.mxu1 %v24004_v62  ;;  %v24012_v62 = vld [vmem:[#allocation168_spill] sm:$0xff]  ;;  %v24029_v21 = vld [vmem:[#allocation31_spill] sm:$0xff] }
 0x34f   : > { %13323 = vmatprep.subr.bf16.mxu0 %v24005_v47  ;;  %13513 = vmatpush1.bf16.msra.mxu1 %v24006_v7  ;;  %v24014_v7 = vld [vmem:[#allocation78_spill] sm:$0xff]  ;;  %v24015_v47 = vld [vmem:[#allocation81_spill] sm:$0xff] }
 0x350   : > { %3065 = vmatmul.mubr.f32.gmra.mrb[6].mxu0 %v24007_v60  ;;  %5439 = vmatmul.mubr.f32.gmra.mrb[6].mxu1 %v24007_v60  ;;  %v24013_v60 = vld [vmem:[#allocation79_spill] sm:$0xff] }
 0x351   : > { %3070 = vmatprep.mubr.f32.mxu0 %v23737_v57  ;;  %5444 = vmatprep.mubr.f32.mxu1 %v23737_v57 }
 0x352   : > { %13325 = vmatpush1.bf16.msra.mxu0 %v24008_v51  ;;  %13515 = vmatprep.subr.bf16.mxu1 %v24009_v17  ;;  %v24016_v51 = vld [vmem:[#allocation80_spill] sm:$0xff]  ;;  %v24017_v17 = vld [vmem:[#allocation173_spill] sm:$0xff] }
 0x353   : > { %13327 = vmatprep.subr.bf16.mxu0 %v24010_v52  ;;  %13517 = vmatpush1.bf16.msra.mxu1 %v24011_v5  ;;  %v24019_v5 = vld [vmem:[#allocation82_spill] sm:$0xff] }
 0x354   : > { %3073 = vmatmul.mubr.f32.gmra.mrb[8].mxu0 %v24012_v62  ;;  %5447 = vmatmul.mubr.f32.gmra.mrb[8].mxu1 %v24012_v62  ;;  %v24018_v62 = vld [vmem:[#allocation88_spill] sm:$0xff]  ;;  %v24020_v52 = vld [vmem:[#allocation90_spill] sm:$0xff] }
 0x355   : > { %3078 = vmatprep.mubr.f32.mxu0 %v23737_v57  ;;  %5452 = vmatprep.mubr.f32.mxu1 %v23737_v57 }
 0x356   : > { %13329 = vmatpush1.bf16.msra.mxu0 %v24013_v60  ;;  %13519 = vmatprep.subr.bf16.mxu1 %v24014_v7  ;;  %v24021_v60 = vld [vmem:[#allocation89_spill] sm:$0xff]  ;;  %v24022_v7 = vld [vmem:[#allocation176_spill] sm:$0xff] }
 0x357   : > { %13331 = vmatprep.subr.bf16.mxu0 %v24015_v47  ;;  %13521 = vmatpush1.bf16.msra.mxu1 %v24016_v51  ;;  %v24024_v51 = vld [vmem:[#allocation101_spill] sm:$0xff]  ;;  %v24025_v47 = vld [vmem:[#allocation110_spill] sm:$0xff] }
 0x358   : > { %3081 = vmatmul.mubr.f32.gmra.mrb[10].mxu0 %v24017_v17  ;;  %5455 = vmatmul.mubr.f32.gmra.mrb[10].mxu1 %v24017_v17  ;;  %v24023_v17 = vld [vmem:[#allocation104_spill] sm:$0xff] }
 0x359   : > { %3086 = vmatprep.mubr.f32.mxu0 %v23737_v57  ;;  %5460 = vmatprep.mubr.f32.mxu1 %v23737_v57 }
 0x35a   : > { %13333 = vmatpush1.bf16.msra.mxu0 %v24018_v62  ;;  %13523 = vmatprep.subr.bf16.mxu1 %v24019_v5  ;;  %v24026_v62 = vld [vmem:[#allocation107_spill] sm:$0xff]  ;;  %v24027_v5 = vld [vmem:[#allocation29_spill] sm:$0xff] }
 0x35b   : > { %13335 = vmatprep.subr.bf16.mxu0 %v24020_v52  ;;  %13525 = vmatpush1.bf16.msra.mxu1 %v24021_v60  ;;  %v24028_v52 = vand.u32 4294901760, %v24027_v5  ;;  %v24030_v60 = vand.u32 4294901760, %v24029_v21  ;;  %v24044_v21 = vld [vmem:[#allocation216_spill] sm:$0xff] }
 0x35c   : > { %3089 = vmatmul.mubr.f32.gmra.mrb[12].mxu0 %v24022_v7  ;;  %5463 = vmatmul.mubr.f32.gmra.mrb[12].mxu1 %v24022_v7  ;;  %v24032_v7 = vld [vmem:[#allocation116_spill] sm:$0xff] }
 0x35d   : > { %3094 = vmatprep.mubr.f32.mxu0 %v23737_v57  ;;  %5468 = vmatprep.mubr.f32.mxu1 %v23737_v57  ;;  %v13342_v31 = vpack.c.bf16 %v24030_v60, %v24028_v52  ;;  %v24039_v52 = vld [vmem:[#allocation192_spill] sm:$0xff]  ;;  %v24045_v60 = vld [vmem:[#allocation219_spill] sm:$0xff] }
 0x35e   : > { %13337 = vmatpush1.bf16.msra.mxu0 %v24023_v17  ;;  %13527 = vmatprep.subr.bf16.mxu1 %v24024_v51  ;;  %v24033_v51 = vld [vmem:[#allocation111_spill] sm:$0xff] }
 0x35f   : > { %13339 = vmatprep.subr.bf16.mxu0 %v24025_v47  ;;  %13529 = vmatpush1.bf16.msra.mxu1 %v24026_v62  ;;  %v24034_v47 = vld [vmem:[#allocation33_spill] sm:$0xff]  ;;  %v24036_v62 = vld [vmem:[#allocation34_spill] sm:$0xff] }
 0x360   : > { %3097 = vmatmul.mubr.f32.gmra.mrb[14].mxu0 %v24031_v32  ;;  %5471 = vmatmul.mubr.f32.gmra.mrb[14].mxu1 %v24031_v32  ;;  %v24035_v17 = vand.u32 4294901760, %v24034_v47  ;;  %v24037_v38 = vand.u32 4294901760, %v24036_v62  ;;  %v24040_v32 = vld [vmem:[#allocation191_spill] sm:$0xff]  ;;  %v24041_v47 = vld [vmem:[#allocation201_spill] sm:$0xff]  ;;  %v24046_v62 = vld [vmem:[#allocation218_spill] sm:$0xff] }
 0x361   : > { %3102 = vmatprep.mubr.f32.mxu0 %v23737_v57  ;;  %5476 = vmatprep.mubr.f32.mxu1 %v23737_v57 }
 0x362   : > { %13341 = vmatpush1.bf16.msra.mxu0 %v24032_v7  ;;  %13531 = vmatprep.subr.bf16.mxu1 %v24033_v51  ;;  %v13534_v5 = vpack.c.bf16 %v24037_v38, %v24035_v17  ;;  %v24043_v38 = vld [vmem:[#allocation208_spill] sm:$0xff]  ;;  %v24047_v17 = vld [vmem:[#allocation227_spill] sm:$0xff] }
 0x363   : > { %13533 = vmatpush1.bf16.msra.mxu1 %v24038_v34  ;;  %13343 = vmatprep.subr.bf16.mxu0 %v13342_v31  ;;  %v24042_v31 = vld [vmem:[#allocation209_spill] sm:$0xff] }
 0x364   : > { %3105 = vmatmul.mubr.f32.gmra.mrb[16].mxu0 %v24039_v52  ;;  %5479 = vmatmul.mubr.f32.gmra.mrb[16].mxu1 %v24039_v52  ;;  %v24049_v52 = vld [vmem:[#allocation64_spill] sm:$0xff] }
 0x365   : > { %3110 = vmatprep.mubr.f32.mxu0 %v23737_v57  ;;  %5484 = vmatprep.mubr.f32.mxu1 %v23737_v57 }
 0x366   : > { %13535 = vmatprep.subr.bf16.mxu1 %v13534_v5  ;;  %v24048_v5 = vld [vmem:[#allocation71_spill] sm:$0xff] }
 0x368   : > { %3113 = vmatmul.mubr.f32.gmra.mrb[18].mxu0 %v24040_v32  ;;  %5487 = vmatmul.mubr.f32.gmra.mrb[18].mxu1 %v24040_v32  ;;  %v24050_v32 = vld [vmem:[#allocation235_spill] sm:$0xff] }
 0x369   : > { %3118 = vmatprep.mubr.f32.mxu0 %v23737_v57  ;;  %5492 = vmatprep.mubr.f32.mxu1 %v23737_v57 }
 0x36c   : > { %3121 = vmatmul.mubr.f32.gmra.mrb[20].mxu0 %v24041_v47  ;;  %5495 = vmatmul.mubr.f32.gmra.mrb[20].mxu1 %v24041_v47  ;;  %v24051_v47 = vld [vmem:[#allocation242_spill] sm:$0xff] }
 0x36d   : > { %3126 = vmatprep.mubr.f32.mxu0 %v23737_v57  ;;  %5500 = vmatprep.mubr.f32.mxu1 %v23737_v57 }
 0x370   : > { %3129 = vmatmul.mubr.f32.gmra.mrb[22].mxu0 %v24042_v31  ;;  %5503 = vmatmul.mubr.f32.gmra.mrb[22].mxu1 %v24042_v31  ;;  %v24052_v31 = vld [vmem:[#allocation241_spill] sm:$0xff] }
 0x371   : > { %3134 = vmatprep.mubr.f32.mxu0 %v23737_v57  ;;  %5508 = vmatprep.mubr.f32.mxu1 %v23737_v57 }
 0x374   : > { %3137 = vmatmul.mubr.f32.gmra.mrb[24].mxu0 %v24043_v38  ;;  %5511 = vmatmul.mubr.f32.gmra.mrb[24].mxu1 %v24043_v38  ;;  %v24053_v38 = vld [vmem:[#allocation114_spill] sm:$0xff] }
 0x375   : > { %3142 = vmatprep.mubr.f32.mxu0 %v23737_v57  ;;  %5516 = vmatprep.mubr.f32.mxu1 %v23737_v57 }
 0x378   : > { %3145 = vmatmul.mubr.f32.gmra.mrb[26].mxu0 %v24044_v21  ;;  %5519 = vmatmul.mubr.f32.gmra.mrb[26].mxu1 %v24044_v21  ;;  %v24054_v21 = vld [vmem:[#allocation251_spill] sm:$0xff] }
 0x379   : > { %3150 = vmatprep.mubr.f32.mxu0 %v23737_v57  ;;  %5524 = vmatprep.mubr.f32.mxu1 %v23737_v57 }
 0x37c   : > { %3153 = vmatmul.mubr.f32.gmra.mrb[28].mxu0 %v24045_v60  ;;  %5527 = vmatmul.mubr.f32.gmra.mrb[28].mxu1 %v24045_v60  ;;  %v24055_v60 = vld [vmem:[#allocation250_spill] sm:$0xff] }
 0x37d   : > { %3158 = vmatprep.mubr.f32.mxu0 %v23737_v57  ;;  %5532 = vmatprep.mubr.f32.mxu1 %v23737_v57 }
 0x380   : > { %3161 = vmatmul.mubr.f32.gmra.mrb[30].mxu0 %v24046_v62  ;;  %5535 = vmatmul.mubr.f32.gmra.mrb[30].mxu1 %v24046_v62  ;;  %v24056_v62 = vld [vmem:[#allocation256_spill] sm:$0xff] }
 0x381   : > { %3166 = vmatprep.mubr.f32.mxu0 %v23737_v57  ;;  %5540 = vmatprep.mubr.f32.mxu1 %v23737_v57 }
 0x384   : > { %3169 = vmatmul.mubr.f32.gmra.mrb[32].mxu0 %v24047_v17  ;;  %5543 = vmatmul.mubr.f32.gmra.mrb[32].mxu1 %v24047_v17  ;;  %v24057_v17 = vld [vmem:[#allocation263_spill] sm:$0xff] }
 0x385   : > { %3174 = vmatprep.mubr.f32.mxu0 %v23737_v57  ;;  %5548 = vmatprep.mubr.f32.mxu1 %v23737_v57 }
 0x388   : > { %3177 = vmatmul.mubr.f32.gmra.mrb[34].mxu0 %v24048_v5  ;;  %5551 = vmatmul.mubr.f32.gmra.mrb[34].mxu1 %v24048_v5  ;;  %v24058_v5 = vld [vmem:[#allocation262_spill] sm:$0xff] }
 0x389   : > { %3182 = vmatprep.mubr.f32.mxu0 %v23737_v57  ;;  %5556 = vmatprep.mubr.f32.mxu1 %v23737_v57 }
 0x38c   : > { %3185 = vmatmul.mubr.f32.gmra.mrb[36].mxu0 %v24049_v52  ;;  %5559 = vmatmul.mubr.f32.gmra.mrb[36].mxu1 %v24049_v52 }
 0x38d   : > { %3190 = vmatprep.mubr.f32.mxu0 %v23737_v57  ;;  %5564 = vmatprep.mubr.f32.mxu1 %v23737_v57 }
 0x390   : > { %3193 = vmatmul.mubr.f32.gmra.mrb[38].mxu0 %v24050_v32  ;;  %5567 = vmatmul.mubr.f32.gmra.mrb[38].mxu1 %v24050_v32  ;;  %v24061_v32 = vand.u32 4294901760, %v23793_v13 }
 0x391   : > { %3198 = vmatprep.mubr.f32.mxu0 %v23737_v57  ;;  %5572 = vmatprep.mubr.f32.mxu1 %v23737_v57 }
 0x394   : > { %3201 = vmatmul.mubr.f32.gmra.mrb[40].mxu0 %v24051_v47  ;;  %5575 = vmatmul.mubr.f32.gmra.mrb[40].mxu1 %v24051_v47 }
 0x395   : > { %3206 = vmatprep.mubr.f32.mxu0 %v23737_v57  ;;  %5580 = vmatprep.mubr.f32.mxu1 %v23737_v57 }
 0x398   : > { %3209 = vmatmul.mubr.f32.gmra.mrb[42].mxu0 %v24052_v31  ;;  %5583 = vmatmul.mubr.f32.gmra.mrb[42].mxu1 %v24052_v31  ;;  %v24063_v31 = vand.u32 4294901760, %v23796_v40  ;;  %v24069_v40 = vand.u32 4294901760, %v23935_v10 }
 0x399   : > { %3214 = vmatprep.mubr.f32.mxu0 %v23737_v57  ;;  %5588 = vmatprep.mubr.f32.mxu1 %v23737_v57 }
 0x39c   : > { %3217 = vmatmul.mubr.f32.gmra.mrb[44].mxu0 %v24053_v38  ;;  %5591 = vmatmul.mubr.f32.gmra.mrb[44].mxu1 %v24053_v38  ;;  %v24064_v38 = vand.u32 4294901760, %v23797_v22 }
 0x39d   : > { %3222 = vmatprep.mubr.f32.mxu0 %v23737_v57  ;;  %5596 = vmatprep.mubr.f32.mxu1 %v23737_v57 }
 0x3a0   : > { %3225 = vmatmul.mubr.f32.gmra.mrb[46].mxu0 %v24054_v21  ;;  %5599 = vmatmul.mubr.f32.gmra.mrb[46].mxu1 %v24054_v21  ;;  %v13536_v21 = vpack.c.bf16 %v24064_v38, %v24063_v31  ;;  %v24083_v31 = vld [vmem:[#allocation164_spill] sm:$0xff] }
 0x3a1   : > { %3230 = vmatprep.mubr.f32.mxu0 %v23737_v57  ;;  %5604 = vmatprep.mubr.f32.mxu1 %v23737_v57 }
 0x3a4   : > { %3233 = vmatmul.mubr.f32.gmra.mrb[48].mxu0 %v24055_v60  ;;  %5607 = vmatmul.mubr.f32.gmra.mrb[48].mxu1 %v24055_v60  ;;  %v24070_v60 = vand.u32 4294901760, %v23936_v50  ;;  %v24077_v50 = vand.u32 4294901760, %v23830_v53  ;;  %v24084_v53 = vand.u32 4294901760, %v23837_v42 }
 0x3a5   : > { %3238 = vmatprep.mubr.f32.mxu0 %v23737_v57  ;;  %5612 = vmatprep.mubr.f32.mxu1 %v23737_v57 }
 0x3a8   : > { %3241 = vmatmul.mubr.f32.gmra.mrb[50].mxu0 %v24056_v62  ;;  %5615 = vmatmul.mubr.f32.gmra.mrb[50].mxu1 %v24056_v62  ;;  %v24071_v62 = vand.u32 4294901760, %v23937_v30  ;;  %v24078_v30 = vand.u32 4294901760, %v23831_v2 }
 0x3a9   : > { %3246 = vmatprep.mubr.f32.mxu0 %v23737_v57  ;;  %5620 = vmatprep.mubr.f32.mxu1 %v23737_v57 }
 0x3ac   : > { %3249 = vmatmul.mubr.f32.gmra.mrb[52].mxu0 %v24057_v17  ;;  %5623 = vmatmul.mubr.f32.gmra.mrb[52].mxu1 %v24057_v17  ;;  %v13350_v17 = vpack.c.bf16 %v24071_v62, %v24070_v60  ;;  %v24099_v60 = vand.u32 4294901760, %v16850_v16  ;;  %v24100_v62 = vand.u32 4294901760, %v16853_v35  ;;  %v24110_v35 = vld [vmem:[#allocation95_spill] sm:$0xff] }
 0x3ad   : > { %3254 = vmatprep.mubr.f32.mxu0 %v23737_v57  ;;  %5628 = vmatprep.mubr.f32.mxu1 %v23737_v57  ;;  %v24111_v16 = vand.u32 4294901760, %v24110_v35  ;;  %v24156_v35 = vld [vmem:[#allocation230_spill] sm:$0xff] }
 0x3b0   : > { %3257 = vmatmul.mubr.f32.gmra.mrb[54].mxu0 %v24058_v5  ;;  %5631 = vmatmul.mubr.f32.gmra.mrb[54].mxu1 %v24058_v5  ;;  %v24072_v5 = vand.u32 4294901760, %v23938_v63  ;;  %v13542_v63 = vpack.c.bf16 %v24078_v30, %v24077_v50  ;;  %v24107_v50 = vld [vmem:[#allocation87_spill] sm:$0xff] }
 0x3b1   : > { %3262 = vmatprep.mubr.f32.mxu0 %v23737_v57  ;;  %5636 = vmatprep.mubr.f32.mxu1 %v23737_v57  ;;  %v24108_v30 = vand.u32 4294901760, %v24107_v50 }
 0x3b4   : > { %3265 = vmatmul.mubr.f32.gmra.mrb[56].mxu0 %v18227_v45  ;;  %5639 = vmatmul.mubr.f32.gmra.mrb[56].mxu1 %v18227_v45  ;;  %v24059_v45 = vand.u32 4294901760, %v23785_v4  ;;  %v24067_v4 = vand.u32 4294901760, %v23806_v3  ;;  %v24075_v3 = vand.u32 4294901760, %v23941_v14 }
 0x3b5   : > { %3270 = vmatprep.mubr.f32.mxu0 %v23737_v57  ;;  %5644 = vmatprep.mubr.f32.mxu1 %v23737_v57 }
 0x3b8   : > { %3273 = vmatmul.mubr.f32.gmra.mrb[58].mxu0 %v18260_v39  ;;  %5647 = vmatmul.mubr.f32.gmra.mrb[58].mxu1 %v18260_v39  ;;  %v24060_v39 = vand.u32 4294901760, %v23786_v33  ;;  %v24066_v33 = vand.u32 4294901760, %v23798_v8  ;;  %v24074_v8 = vld [vmem:[#allocation159_spill] sm:$0xff] }
 0x3b9   : > { %3278 = vmatprep.mubr.f32.mxu0 %v23737_v57  ;;  %5652 = vmatprep.mubr.f32.mxu1 %v23737_v57 }
 0x3ba   : > { %v13344_v52 = vpack.c.bf16 %v24060_v39, %v24059_v45  ;;  %v13348_v13 = vpack.c.bf16 %v24067_v4, %v24066_v33  ;;  %v24073_v45 = vand.u32 4294901760, %v23939_v26  ;;  %v24079_v26 = vand.u32 4294901760, %v23832_v43  ;;  %v24092_v4 = vld [vmem:[#allocation75_spill] sm:$0xff] }
 0x3bb   : > { %v24086_v43 = vand.u32 4294901760, %v23945_v36  ;;  %v24098_v36 = vand.u32 4294901760, %v16861_v29  ;;  %v24112_v29 = vld [vmem:[#allocation96_spill] sm:$0xff] }
 0x3bc   : > { %3281 = vmatmul.mubr.f32.gmra.mrb[60].mxu0 %v18257_v18  ;;  %5655 = vmatmul.mubr.f32.gmra.mrb[60].mxu1 %v18257_v18  ;;  %v24062_v18 = vand.u32 4294901760, %v23794_v59  ;;  %v24068_v59 = vand.u32 4294901760, %v23934_v9  ;;  %v13540_v39 = vpack.c.bf16 %v24073_v45, %v24072_v5  ;;  %v24076_v9 = vand.u32 4294901760, %v23942_v61  ;;  %v24088_v61 = vld [vmem:[#allocation83_spill] sm:$0xff] }
 0x3bd   : > { %3286 = vmatprep.mubr.f32.mxu0 %v23737_v57  ;;  %5660 = vmatprep.mubr.f32.mxu1 %v23737_v57  ;;  %v24089_v38 = vand.u32 4294901760, %v24088_v61  ;;  %v24101_v5 = vld [vmem:[#allocation91_spill] sm:$0xff] }
 0x3be   : > { %v13346_v47 = vpack.c.bf16 %v24062_v18, %v24061_v32  ;;  %v13538_v22 = vpack.c.bf16 %v24069_v40, %v24068_v59  ;;  %v13352_v10 = vpack.c.bf16 %v24076_v9, %v24075_v3  ;;  %v24081_v18 = vand.u32 4294901760, %v23834_v6  ;;  %v24094_v59 = vld [vmem:[#allocation76_spill] sm:$0xff]  ;;  %v24105_v9 = vld [vmem:[#allocation86_spill] sm:$0xff] }
 0x3bf   : > { %v24087_v6 = vand.u32 4294901760, %v23946_v25  ;;  %v24095_v40 = vand.u32 4294901760, %v24094_v59  ;;  %v24102_v45 = vand.u32 4294901760, %v24101_v5  ;;  %v24136_v5 = vld [vmem:[#allocation109_spill] sm:$0xff] }
 0x3c0   : > { %3289 = vmatmul.mubr.f32.gmra.mrb[62].mxu0 %v18291_v37  ;;  %5663 = vmatmul.mubr.f32.gmra.mrb[62].mxu1 %v18291_v37  ;;  %v24065_v37 = vld [vmem:[#allocation162_spill] sm:$0xff] }
 0x3c1   : > { %3391 = vmatprep.mubr.f32.mxu0 %v23737_v57  ;;  %5765 = vmatprep.mubr.f32.mxu1 %v23737_v57 }
 0x3c4   : > { %3395 = vmatmul.mubr.f32.vlgmr.msra.gmra.mrb[0].mxu0 %v24065_v37  ;;  %5769 = vmatmul.mubr.f32.vlgmr.msra.gmra.mrb[0].mxu1 %v24065_v37 }
 0x3c5   : > { %13345 = vmatpush1.bf16.msra.mxu0 %v13344_v52  ;;  %3400 = vmatprep.mubr.f32.mxu0 %v23737_v57  ;;  %v24080_v52 = vand.u32 4294901760, %v23833_v55  ;;  %v24085_v55 = vand.u32 4294901760, %v23944_v46  ;;  %v24097_v46 = vand.u32 4294901760, %v23952_v56 }
 0x3c6   : > { %5774 = vmatprep.mubr.f32.mxu1 %v23737_v57  ;;  %13347 = vmatprep.subr.bf16.mxu0 %v13346_v47  ;;  %v24082_v47 = vand.u32 4294901760, %v23836_v58  ;;  %v13546_v58 = vpack.c.bf16 %v24087_v6, %v24086_v43 }
 0x3c7   : > { %13537 = vmatpush1.bf16.msra.mxu1 %v13536_v21  ;;  %v13354_v32 = vpack.c.bf16 %v24080_v52, %v24079_v26  ;;  %v13356_v2 = vpack.c.bf16 %v24085_v55, %v24084_v53  ;;  %v24090_v21 = vld [vmem:[#allocation84_spill] sm:$0xff]  ;;  %v13360_v25 = vpack.c.bf16 %v24098_v36, %v24097_v46  ;;  %v24113_v26 = vand.u32 4294901760, %v24112_v29  ;;  %v24118_v53 = vld [vmem:[#allocation99_spill] sm:$0xff]  ;;  %v24132_v36 = vld [vmem:[#allocation113_spill] sm:$0xff] }
 0x3c8   : > { %3404 = vmatmul.mubr.f32.gmra.mrb[2].mxu0 %v24074_v8  ;;  %5778 = vmatmul.mubr.f32.gmra.mrb[2].mxu1 %v24074_v8  ;;  %v13544_v14 = vpack.c.bf16 %v24082_v47, %v24081_v18  ;;  %v24091_v37 = vand.u32 4294901760, %v24090_v21  ;;  %v24116_v47 = vld [vmem:[#allocation94_spill] sm:$0xff]  ;;  %v24119_v55 = vand.u32 4294901760, %v24118_v53  ;;  %v24131_v46 = vand.u32 4294901760, %v23967_v1  ;;  %v24158_v29 = vld [vmem:[#allocation243_spill] sm:$0xff]  ;;  %v24166_v53 = vld [vmem:[#allocation268_spill] sm:$0xff] }
 0x3c9   : > { %3409 = vmatprep.mubr.f32.mxu0 %v23737_v57  ;;  %5783 = vmatprep.mubr.f32.mxu1 %v23737_v57  ;;  %v13364_v52 = vpack.c.bf16 %v24113_v26, %v24111_v16  ;;  %v24140_v1 = vand.u32 4294901760, %v23888_v12  ;;  %v24146_v12 = vld [vmem:[#allocation193_spill] sm:$0xff]  ;;  %v24157_v16 = vld [vmem:[#allocation236_spill] sm:$0xff] }
 0x3ca   : > { %13349 = vmatpush1.bf16.msra.mxu0 %v13348_v13  ;;  %13539 = vmatprep.subr.bf16.mxu1 %v13538_v22  ;;  %v13358_v33 = vpack.c.bf16 %v24091_v37, %v24089_v38  ;;  %v24093_v13 = vand.u32 4294901760, %v24092_v4  ;;  %v24096_v22 = vld [vmem:[#allocation169_spill] sm:$0xff]  ;;  %v24124_v38 = vld [vmem:[#allocation98_spill] sm:$0xff]  ;;  %v24127_v4 = vand.u32 4294901760, %v23963_v19  ;;  %v24159_v26 = vld [vmem:[#allocation244_spill] sm:$0xff] }
 0x3cb   : > { %13351 = vmatprep.subr.bf16.mxu0 %v13350_v17  ;;  %13541 = vmatpush1.bf16.msra.mxu1 %v13540_v39  ;;  %v13550_v17 = vpack.c.bf16 %v24100_v62, %v24099_v60  ;;  %v24103_v39 = vld [vmem:[#allocation92_spill] sm:$0xff]  ;;  %v24125_v21 = vand.u32 4294901760, %v24124_v38 }
 0x3cc   : > { %3413 = vmatmul.mubr.f32.gmra.mrb[4].mxu0 %v24083_v31  ;;  %5787 = vmatmul.mubr.f32.gmra.mrb[4].mxu1 %v24083_v31  ;;  %v13548_v42 = vpack.c.bf16 %v24095_v40, %v24093_v13  ;;  %v24104_v8 = vand.u32 4294901760, %v24103_v39  ;;  %v24128_v13 = vand.u32 4294901760, %v23964_v48  ;;  %v24129_v40 = vand.u32 4294901760, %v23965_v44  ;;  %v24134_v62 = vld [vmem:[#allocation108_spill] sm:$0xff]  ;;  %v24138_v39 = vld [vmem:[#allocation179_spill] sm:$0xff] }
 0x3cd   : > { %3418 = vmatprep.mubr.f32.mxu0 %v23737_v57  ;;  %5792 = vmatprep.mubr.f32.mxu1 %v23737_v57  ;;  %v24141_v44 = vand.u32 4294901760, %v23892_v41  ;;  %v24148_v41 = vld [vmem:[#allocation202_spill] sm:$0xff] }
 0x3ce   : > { %13353 = vmatpush1.bf16.msra.mxu0 %v13352_v10  ;;  %13543 = vmatprep.subr.bf16.mxu1 %v13542_v63  ;;  %v13362_v3 = vpack.c.bf16 %v24104_v8, %v24102_v45  ;;  %v24106_v10 = vand.u32 4294901760, %v24105_v9  ;;  %v24109_v63 = vld [vmem:[#allocation174_spill] sm:$0xff]  ;;  %v13368_v59 = vpack.c.bf16 %v24128_v13, %v24127_v4  ;;  %v24137_v45 = vand.u32 4294901760, %v24136_v5  ;;  %v18924_v4 = vld [vmem:[#allocation7] sm:$0xff] }
 0x3cf   : > { %13355 = vmatprep.subr.bf16.mxu0 %v13354_v32  ;;  %13545 = vmatpush1.bf16.msra.mxu1 %v13544_v14  ;;  %v24114_v32 = vld [vmem:[#allocation93_spill] sm:$0xff]  ;;  %v24117_v14 = vand.u32 4294901760, %v24116_v47  ;;  %v24142_v8 = vand.u32 4294901760, %v23972_v23  ;;  %v24143_v9 = vand.u32 4294901760, %v23973_v15  ;;  %v24150_v23 = vld [vmem:[#allocation211_spill] sm:$0xff]  ;;  %v24182_v5 = vld [vmem:[#allocation62_spill] sm:$0xff] }
 0x3d0   : > { %3422 = vmatmul.mubr.f32.gmra.mrb[6].mxu0 %v24096_v22  ;;  %5796 = vmatmul.mubr.f32.gmra.mrb[6].mxu1 %v24096_v22  ;;  %v13552_v56 = vpack.c.bf16 %v24108_v30, %v24106_v10  ;;  %v24115_v18 = vand.u32 4294901760, %v24114_v32  ;;  %v24144_v10 = vand.u32 4294901760, %v23974_v20  ;;  %v24145_v30 = vld [vmem:[#allocation185_spill] sm:$0xff]  ;;  %v24149_v20 = vld [vmem:[#allocation210_spill] sm:$0xff]  ;;  %v24161_v32 = vld [vmem:[#allocation252_spill] sm:$0xff] }
 0x3d1   : > { %3427 = vmatprep.mubr.f32.mxu0 %v23737_v57  ;;  %5801 = vmatprep.mubr.f32.mxu1 %v23737_v57  ;;  %v24151_v15 = vld [vmem:[#allocation217_spill] sm:$0xff] }
 0x3d2   : > { %13357 = vmatpush1.bf16.msra.mxu0 %v13356_v2  ;;  %13547 = vmatprep.subr.bf16.mxu1 %v13546_v58  ;;  %v13554_v31 = vpack.c.bf16 %v24117_v14, %v24115_v18  ;;  %v24120_v2 = vld [vmem:[#allocation100_spill] sm:$0xff]  ;;  %v24122_v58 = vld [vmem:[#allocation97_spill] sm:$0xff]  ;;  %v13564_v50 = vpack.c.bf16 %v24144_v10, %v24143_v9 }
 0x3d3   : > { %13359 = vmatprep.subr.bf16.mxu0 %v13358_v33  ;;  %13549 = vmatpush1.bf16.msra.mxu1 %v13548_v42  ;;  %v24121_v43 = vand.u32 4294901760, %v24120_v2  ;;  %v24123_v61 = vand.u32 4294901760, %v24122_v58  ;;  %v24126_v33 = vld [vmem:[#allocation177_spill] sm:$0xff]  ;;  %v24130_v42 = vand.u32 4294901760, %v23966_v11  ;;  %v24139_v11 = vand.u32 4294901760, %v23887_v54  ;;  %v24147_v54 = vld [vmem:[#allocation194_spill] sm:$0xff] }
 0x3d4   : > { %3431 = vmatmul.mubr.f32.gmra.mrb[8].mxu0 %v24109_v63  ;;  %5805 = vmatmul.mubr.f32.gmra.mrb[8].mxu1 %v24109_v63  ;;  %v24155_v63 = vld [vmem:[#allocation229_spill] sm:$0xff]  ;;  %v24164_v14 = vld [vmem:[#allocation264_spill] sm:$0xff]  ;;  %v24168_v2 = vld [vmem:[#allocation275_spill] sm:$0xff] }
 0x3d5   : > { %3436 = vmatprep.mubr.f32.mxu0 %v23737_v57  ;;  %5810 = vmatprep.mubr.f32.mxu1 %v23737_v57  ;;  %v13366_v6 = vpack.c.bf16 %v24121_v43, %v24119_v55  ;;  %v13556_v37 = vpack.c.bf16 %v24125_v21, %v24123_v61  ;;  %v13558_v22 = vpack.c.bf16 %v24130_v42, %v24129_v40  ;;  %v24162_v18 = vld [vmem:[#allocation253_spill] sm:$0xff]  ;;  %v24167_v55 = vld [vmem:[#allocation274_spill] sm:$0xff]  ;;  %v24169_v43 = vld [vmem:[#allocation279_spill] sm:$0xff] }
 0x3d6   : > { %13361 = vmatpush1.bf16.msra.mxu0 %v13360_v25  ;;  %13551 = vmatprep.subr.bf16.mxu1 %v13550_v17  ;;  %v24133_v25 = vand.u32 4294901760, %v24132_v36  ;;  %v24135_v17 = vand.u32 4294901760, %v24134_v62  ;;  %v13372_v48 = vpack.c.bf16 %v24140_v1, %v24139_v11  ;;  %v24163_v47 = vld [vmem:[#allocation257_spill] sm:$0xff]  ;;  %v18908_v58 = vld [vmem:[#allocation7 + $0x28] sm:$0xff] }
 0x3d7   : > { %13363 = vmatprep.subr.bf16.mxu0 %v13362_v3  ;;  %13553 = vmatpush1.bf16.msra.mxu1 %v13552_v56  ;;  %v13562_v3 = vpack.c.bf16 %v24142_v8, %v24141_v44  ;;  %v24154_v56 = vld [vmem:[#allocation228_spill] sm:$0xff]  ;;  %v6764_v38 = vand.u32 4294901760, %v18908_v58  ;;  %v24170_v21 = vld [vmem:[#allocation157_spill] sm:$0xff]  ;;  %v24177_v36 = vld [vmem:[#allocation50_spill] sm:$0xff] }
 0x3d8   : > { %3440 = vmatmul.mubr.f32.gmra.mrb[10].mxu0 %v24126_v33  ;;  %5814 = vmatmul.mubr.f32.gmra.mrb[10].mxu1 %v24126_v33  ;;  %v13370_v60 = vpack.c.bf16 %v24133_v25, %v24131_v46  ;;  %v13560_v19 = vpack.c.bf16 %v24137_v45, %v24135_v17  ;;  %v18926_v13 = vld [vmem:[#allocation7 + $0x20] sm:$0xff]  ;;  %v24176_v46 = vld [vmem:[#allocation54_spill] sm:$0xff]  ;;  %v24178_v25 = vld [vmem:[#allocation155_spill] sm:$0xff] }
 0x3d9   : > { %3445 = vmatprep.mubr.f32.mxu0 %v23737_v57  ;;  %5819 = vmatprep.mubr.f32.mxu1 %v23737_v57  ;;  %v18922_v33 = vsub.f32 %v18908_v58, %v6764_v38  ;;  %v23126_v40 = vand.u32 4294901760, %v18926_v13  ;;  %v24180_v62 = vld [vmem:[#allocation57_spill] sm:$0xff]  ;;  %v24183_v45 = vld [vmem:[#allocation163_spill] sm:$0xff]  ;;  %v18973_v44 = vld [vmem:[#allocation7 + $0x68] sm:$0xff] }
 0x3da   : > { %13365 = vmatpush1.bf16.msra.mxu0 %v13364_v52  ;;  %13555 = vmatprep.subr.bf16.mxu1 %v13554_v31  ;;  %v24160_v52 = vld [vmem:[#allocation245_spill] sm:$0xff]  ;;  %v18975_v8 = vld [vmem:[#allocation7 + $0x10] sm:$0xff]  ;;  %v19075_v58 = vld [vmem:[#allocation7 + $0xa8] sm:$0xff] }
 0x3db   : > { %13367 = vmatprep.subr.bf16.mxu0 %v13366_v6  ;;  %13557 = vmatpush1.bf16.msra.mxu1 %v13556_v37  ;;  %v24165_v31 = vld [vmem:[#allocation265_spill] sm:$0xff]  ;;  %v18906_v6 = vld [vmem:[#allocation7 + $0x8] sm:$0xff] }
 0x3dc   : > { %3449 = vmatmul.mubr.f32.gmra.mrb[12].mxu0 %v24138_v39  ;;  %5823 = vmatmul.mubr.f32.gmra.mrb[12].mxu1 %v24138_v39  ;;  %v6760_v61 = vand.u32 4294901760, %v18906_v6  ;;  %v24181_v17 = vld [vmem:[#allocation65_spill] sm:$0xff]  ;;  %v18965_v39 = vld [vmem:[#allocation7 + $0x38] sm:$0xff] }
 0x3dd   : > { %3454 = vmatprep.mubr.f32.mxu0 %v23737_v57  ;;  %5828 = vmatprep.mubr.f32.mxu1 %v23737_v57  ;;  %v9138_v1 = vand.u32 4294901760, %v18965_v39  ;;  %v24185_v9 = vld [vmem:[#allocation69_spill] sm:$0xff] }
 0x3de   : > { %13369 = vmatpush1.bf16.msra.mxu0 %v13368_v59  ;;  %13559 = vmatprep.subr.bf16.mxu1 %v13558_v22  ;;  %v18917_v37 = vsub.f32 %v18906_v6, %v6760_v61  ;;  %v23127_v59 = vand.u32 4294901760, %v18924_v4  ;;  %v24173_v22 = vld [vmem:[#allocation151_spill] sm:$0xff] }
 0x3df   : > { %13371 = vmatprep.subr.bf16.mxu0 %v13370_v60  ;;  %13561 = vmatpush1.bf16.msra.mxu1 %v13560_v19  ;;  %v24179_v60 = vld [vmem:[#allocation59_spill] sm:$0xff]  ;;  %v18963_v19 = vld [vmem:[#allocation7 + $0x18] sm:$0xff] }
 0x3e0   : > { %3458 = vmatmul.mubr.f32.gmra.mrb[14].mxu0 %v24145_v30  ;;  %5832 = vmatmul.mubr.f32.gmra.mrb[14].mxu1 %v24145_v30  ;;  %v18938_v42 = vsub.f32 %v18924_v4, %v23127_v59  ;;  %v9134_v11 = vand.u32 4294901760, %v18963_v19  ;;  %v18981_v30 = vld [vmem:[#allocation7 + $0x30] sm:$0xff] }
 0x3e1   : > { %3463 = vmatprep.mubr.f32.mxu0 %v23737_v57  ;;  %5837 = vmatprep.mubr.f32.mxu1 %v23737_v57 }
 0x3e2   : > { %13373 = vmatpush1.bf16.msra.mxu0 %v13372_v48  ;;  %13563 = vmatprep.subr.bf16.mxu1 %v13562_v3  ;;  %24171 = vst [vmem:[#allocation45_spill] sm:$0xff] %v18938_v42  ;;  %v18971_v48 = vld [vmem:[#allocation7 + $0x48] sm:$0xff]  ;;  %v24184_v3 = vld [vmem:[#allocation72_spill] sm:$0xff]  ;;  %v19328_v42 = vld [vmem:[#allocation7 + $0x110] sm:$0xff] }
 0x3e3   : > { %13565 = vmatpush1.bf16.msra.mxu1 %v13564_v50  ;;  %13375 = vmatprep.subr.bf16.mxu0 %v23976_v49  ;;  %v24152_v49 = vld [vmem:[#allocation49_spill] sm:$0xff]  ;;  %v23125_v10 = vand.u32 4294901760, %v18971_v48  ;;  %v23124_v50 = vand.u32 4294901760, %v18973_v44 }
 0x3e4   : > { %3467 = vmatmul.mubr.f32.gmra.mrb[16].mxu0 %v24146_v12  ;;  %5841 = vmatmul.mubr.f32.gmra.mrb[16].mxu1 %v24146_v12  ;;  %v24186_v12 = vld [vmem:[#allocation77_spill] sm:$0xff] }
 0x3e5   : > { %3472 = vmatprep.mubr.f32.mxu0 %v23737_v57  ;;  %5846 = vmatprep.mubr.f32.mxu1 %v23737_v57 }
 0x3e6   : > { %13567 = vmatprep.subr.bf16.mxu1 %v23978_v24  ;;  %v24153_v24 = vld [vmem:[#allocation220_spill] sm:$0xff] }
 0x3e8   : > { %3476 = vmatmul.mubr.f32.gmra.mrb[18].mxu0 %v24147_v54  ;;  %5850 = vmatmul.mubr.f32.gmra.mrb[18].mxu1 %v24147_v54  ;;  %v24187_v54 = vld [vmem:[#allocation74_spill] sm:$0xff] }
 0x3e9   : > { %3481 = vmatprep.mubr.f32.mxu0 %v23737_v57  ;;  %5855 = vmatprep.mubr.f32.mxu1 %v23737_v57 }
 0x3ec   : > { %3485 = vmatmul.mubr.f32.gmra.mrb[20].mxu0 %v24148_v41  ;;  %5859 = vmatmul.mubr.f32.gmra.mrb[20].mxu1 %v24148_v41  ;;  %v18988_v41 = vsub.f32 %v18963_v19, %v9134_v11 }
 0x3ed   : > { %3490 = vmatprep.mubr.f32.mxu0 %v23737_v57  ;;  %5864 = vmatprep.mubr.f32.mxu1 %v23737_v57 }
 0x3ee   : > { %24188 = vst [vmem:[#allocation53_spill] sm:$0xff] %v18988_v41  ;;  %v24285_v41 = vld [vmem:[#allocation255_spill] sm:$0xff] }
 0x3f0   : > { %3494 = vmatmul.mubr.f32.gmra.mrb[22].mxu0 %v24149_v20  ;;  %5868 = vmatmul.mubr.f32.gmra.mrb[22].mxu1 %v24149_v20  ;;  %v18993_v20 = vsub.f32 %v18965_v39, %v9138_v1 }
 0x3f1   : > { %3499 = vmatprep.mubr.f32.mxu0 %v23737_v57  ;;  %5873 = vmatprep.mubr.f32.mxu1 %v23737_v57 }
 0x3f2   : > { %24189 = vst [vmem:[#allocation55_spill] sm:$0xff] %v18993_v20  ;;  %v24275_v20 = vld [vmem:[#allocation248_spill] sm:$0xff] }
 0x3f4   : > { %3503 = vmatmul.mubr.f32.gmra.mrb[24].mxu0 %v24150_v23  ;;  %5877 = vmatmul.mubr.f32.gmra.mrb[24].mxu1 %v24150_v23  ;;  %v23123_v23 = vand.u32 4294901760, %v18975_v8 }
 0x3f5   : > { %3508 = vmatprep.mubr.f32.mxu0 %v23737_v57  ;;  %5882 = vmatprep.mubr.f32.mxu1 %v23737_v57 }
 0x3f8   : > { %3512 = vmatmul.mubr.f32.gmra.mrb[26].mxu0 %v24151_v15  ;;  %5886 = vmatmul.mubr.f32.gmra.mrb[26].mxu1 %v24151_v15  ;;  %v23122_v15 = vand.u32 4294901760, %v18981_v30 }
 0x3f9   : > { %3517 = vmatprep.mubr.f32.mxu0 %v23737_v57  ;;  %5891 = vmatprep.mubr.f32.mxu1 %v23737_v57 }
 0x3fc   : > { %3521 = vmatmul.mubr.f32.gmra.mrb[28].mxu0 %v24152_v49  ;;  %5895 = vmatmul.mubr.f32.gmra.mrb[28].mxu1 %v24152_v49  ;;  %v24190_v49 = vld [vmem:[#allocation165_spill] sm:$0xff] }
 0x3fd   : > { %3526 = vmatprep.mubr.f32.mxu0 %v23737_v57  ;;  %5900 = vmatprep.mubr.f32.mxu1 %v23737_v57 }
 0x400   : > { %3530 = vmatmul.mubr.f32.gmra.mrb[30].mxu0 %v24153_v24  ;;  %5904 = vmatmul.mubr.f32.gmra.mrb[30].mxu1 %v24153_v24  ;;  %v19002_v24 = vsub.f32 %v18971_v48, %v23125_v10 }
 0x401   : > { %3535 = vmatprep.mubr.f32.mxu0 %v23737_v57  ;;  %5909 = vmatprep.mubr.f32.mxu1 %v23737_v57 }
 0x402   : > { %24191 = vst [vmem:[#allocation51_spill] sm:$0xff] %v19002_v24  ;;  %v24250_v24 = vld [vmem:[#allocation67_spill] sm:$0xff] }
 0x404   : > { %3539 = vmatmul.mubr.f32.gmra.mrb[32].mxu0 %v24154_v56  ;;  %5913 = vmatmul.mubr.f32.gmra.mrb[32].mxu1 %v24154_v56  ;;  %v19007_v56 = vsub.f32 %v18973_v44, %v23124_v50  ;;  %v19172_v50 = vld [vmem:[#allocation7 + $0xb0] sm:$0xff] }
 0x405   : > { %3544 = vmatprep.mubr.f32.mxu0 %v23737_v57  ;;  %5918 = vmatprep.mubr.f32.mxu1 %v23737_v57 }
 0x406   : > { %24192 = vst [vmem:[#allocation52_spill] sm:$0xff] %v19007_v56 }
 0x408   : > { %3548 = vmatmul.mubr.f32.gmra.mrb[34].mxu0 %v24155_v63  ;;  %5922 = vmatmul.mubr.f32.gmra.mrb[34].mxu1 %v24155_v63  ;;  %v19009_v63 = vld [vmem:[#allocation7 + $0x40] sm:$0xff] }
 0x409   : > { %3553 = vmatprep.mubr.f32.mxu0 %v23737_v57  ;;  %5927 = vmatprep.mubr.f32.mxu1 %v23737_v57 }
 0x40c   : > { %3557 = vmatmul.mubr.f32.gmra.mrb[36].mxu0 %v24156_v35  ;;  %5931 = vmatmul.mubr.f32.gmra.mrb[36].mxu1 %v24156_v35  ;;  %v19011_v35 = vld [vmem:[#allocation7 + $0x60] sm:$0xff] }
 0x40d   : > { %3562 = vmatprep.mubr.f32.mxu0 %v23737_v57  ;;  %5936 = vmatprep.mubr.f32.mxu1 %v23737_v57 }
 0x410   : > { %3566 = vmatmul.mubr.f32.gmra.mrb[38].mxu0 %v24157_v16  ;;  %5940 = vmatmul.mubr.f32.gmra.mrb[38].mxu1 %v24157_v16  ;;  %v19018_v16 = vsub.f32 %v18975_v8, %v23123_v23 }
 0x411   : > { %3571 = vmatprep.mubr.f32.mxu0 %v23737_v57  ;;  %5945 = vmatprep.mubr.f32.mxu1 %v23737_v57 }
 0x412   : > { %24193 = vst [vmem:[#allocation60_spill] sm:$0xff] %v19018_v16  ;;  %v24242_v16 = vld [vmem:[#allocation225_spill] sm:$0xff] }
 0x414   : > { %3575 = vmatmul.mubr.f32.gmra.mrb[40].mxu0 %v24158_v29  ;;  %5949 = vmatmul.mubr.f32.gmra.mrb[40].mxu1 %v24158_v29  ;;  %v19023_v29 = vsub.f32 %v18981_v30, %v23122_v15 }
 0x415   : > { %3580 = vmatprep.mubr.f32.mxu0 %v23737_v57  ;;  %5954 = vmatprep.mubr.f32.mxu1 %v23737_v57 }
 0x416   : > { %24194 = vst [vmem:[#allocation61_spill] sm:$0xff] %v19023_v29 }
 0x418   : > { %3584 = vmatmul.mubr.f32.gmra.mrb[42].mxu0 %v24159_v26  ;;  %5958 = vmatmul.mubr.f32.gmra.mrb[42].mxu1 %v24159_v26  ;;  %v23121_v26 = vand.u32 4294901760, %v19009_v63 }
 0x419   : > { %3589 = vmatprep.mubr.f32.mxu0 %v23737_v57  ;;  %5963 = vmatprep.mubr.f32.mxu1 %v23737_v57 }
 0x41c   : > { %3593 = vmatmul.mubr.f32.gmra.mrb[44].mxu0 %v24160_v52  ;;  %5967 = vmatmul.mubr.f32.gmra.mrb[44].mxu1 %v24160_v52  ;;  %v24195_v52 = vld [vmem:[#allocation79_spill] sm:$0xff] }
 0x41d   : > { %3598 = vmatprep.mubr.f32.mxu0 %v23737_v57  ;;  %5972 = vmatprep.mubr.f32.mxu1 %v23737_v57 }
 0x420   : > { %3602 = vmatmul.mubr.f32.gmra.mrb[46].mxu0 %v24161_v32  ;;  %5976 = vmatmul.mubr.f32.gmra.mrb[46].mxu1 %v24161_v32  ;;  %v24196_v32 = vld [vmem:[#allocation78_spill] sm:$0xff] }
 0x421   : > { %3607 = vmatprep.mubr.f32.mxu0 %v23737_v57  ;;  %5981 = vmatprep.mubr.f32.mxu1 %v23737_v57 }
 0x424   : > { %3611 = vmatmul.mubr.f32.gmra.mrb[48].mxu0 %v24162_v18  ;;  %5985 = vmatmul.mubr.f32.gmra.mrb[48].mxu1 %v24162_v18  ;;  %v23120_v18 = vand.u32 4294901760, %v19011_v35 }
 0x425   : > { %3616 = vmatprep.mubr.f32.mxu0 %v23737_v57  ;;  %5990 = vmatprep.mubr.f32.mxu1 %v23737_v57 }
 0x428   : > { %3620 = vmatmul.mubr.f32.gmra.mrb[50].mxu0 %v24163_v47  ;;  %5994 = vmatmul.mubr.f32.gmra.mrb[50].mxu1 %v24163_v47  ;;  %v24197_v47 = vld [vmem:[#allocation81_spill] sm:$0xff] }
 0x429   : > { %3625 = vmatprep.mubr.f32.mxu0 %v23737_v57  ;;  %5999 = vmatprep.mubr.f32.mxu1 %v23737_v57 }
 0x42c   : > { %3629 = vmatmul.mubr.f32.gmra.mrb[52].mxu0 %v24164_v14  ;;  %6003 = vmatmul.mubr.f32.gmra.mrb[52].mxu1 %v24164_v14  ;;  %v24198_v14 = vld [vmem:[#allocation80_spill] sm:$0xff] }
 0x42d   : > { %3634 = vmatprep.mubr.f32.mxu0 %v23737_v57  ;;  %6008 = vmatprep.mubr.f32.mxu1 %v23737_v57 }
 0x430   : > { %3638 = vmatmul.mubr.f32.gmra.mrb[54].mxu0 %v24165_v31  ;;  %6012 = vmatmul.mubr.f32.gmra.mrb[54].mxu1 %v24165_v31  ;;  %v19034_v31 = vsub.f32 %v19009_v63, %v23121_v26  ;;  %v19168_v26 = vld [vmem:[#allocation7 + $0x90] sm:$0xff] }
 0x431   : > { %3643 = vmatprep.mubr.f32.mxu0 %v23737_v57  ;;  %6017 = vmatprep.mubr.f32.mxu1 %v23737_v57  ;;  %v23141_v59 = vand.u32 4294901760, %v19168_v26 }
 0x432   : > { %24199 = vst [vmem:[#allocation73_spill] sm:$0xff] %v19034_v31 }
 0x434   : > { %3647 = vmatmul.mubr.f32.gmra.mrb[56].mxu0 %v24166_v53  ;;  %6021 = vmatmul.mubr.f32.gmra.mrb[56].mxu1 %v24166_v53  ;;  %v24200_v53 = vld [vmem:[#allocation170_spill] sm:$0xff] }
 0x435   : > { %3652 = vmatprep.mubr.f32.mxu0 %v23737_v57  ;;  %6026 = vmatprep.mubr.f32.mxu1 %v23737_v57 }
 0x438   : > { %3656 = vmatmul.mubr.f32.gmra.mrb[58].mxu0 %v24167_v55  ;;  %6030 = vmatmul.mubr.f32.gmra.mrb[58].mxu1 %v24167_v55  ;;  %v19041_v55 = vsub.f32 %v19011_v35, %v23120_v18  ;;  %v19166_v18 = vld [vmem:[#allocation7 + $0xe8] sm:$0xff] }
 0x439   : > { %3661 = vmatprep.mubr.f32.mxu0 %v23737_v57  ;;  %6035 = vmatprep.mubr.f32.mxu1 %v23737_v57 }
 0x43a   : > { %24201 = vst [vmem:[#allocation68_spill] sm:$0xff] %v19041_v55 }
 0x43c   : > { %3665 = vmatmul.mubr.f32.gmra.mrb[60].mxu0 %v24168_v2  ;;  %6039 = vmatmul.mubr.f32.gmra.mrb[60].mxu1 %v24168_v2  ;;  %v24202_v2 = vld [vmem:[#allocation88_spill] sm:$0xff] }
 0x43d   : > { %3670 = vmatprep.mubr.f32.mxu0 %v23737_v57  ;;  %6044 = vmatprep.mubr.f32.mxu1 %v23737_v57 }
 0x440   : > { %3674 = vmatmul.mubr.f32.gmra.mrb[62].mxu0 %v24169_v43  ;;  %6048 = vmatmul.mubr.f32.gmra.mrb[62].mxu1 %v24169_v43  ;;  %v24203_v43 = vld [vmem:[#allocation82_spill] sm:$0xff] }
 0x441   : > { %3840 = vmatprep.mubr.f32.mxu0 %v23737_v57  ;;  %6214 = vmatprep.mubr.f32.mxu1 %v23737_v57 }
 0x444   : > { %3842 = vmatmul.mubr.f32.vlgmr.msra.gmra.mrb[0].mxu0 %v24170_v21  ;;  %6216 = vmatmul.mubr.f32.vlgmr.msra.gmra.mrb[0].mxu1 %v24170_v21 }
 0x445   : > { %13377 = vmatpush1.bf16.msra.mxu0 %v23994_v0  ;;  %3847 = vmatprep.mubr.f32.mxu0 %v23737_v57  ;;  %v18943_v0 = vsub.f32 %v18926_v13, %v23126_v40 }
 0x446   : > { %6221 = vmatprep.mubr.f32.mxu1 %v23737_v57  ;;  %13379 = vmatprep.subr.bf16.mxu0 %v23995_v27  ;;  %v24174_v27 = vld [vmem:[#allocation48_spill] sm:$0xff] }
 0x447   : > { %13569 = vmatpush1.bf16.msra.mxu1 %v23996_v28  ;;  %24172 = vst [vmem:[#allocation46_spill] sm:$0xff] %v18943_v0  ;;  %v24175_v28 = vld [vmem:[#allocation44_spill] sm:$0xff]  ;;  %v19326_v0 = vld [vmem:[#allocation7 + $0x168] sm:$0xff] }
 0x448   : > { %3849 = vmatmul.mubr.f32.gmra.mrb[2].mxu0 %v24173_v22  ;;  %6223 = vmatmul.mubr.f32.gmra.mrb[2].mxu1 %v24173_v22 }
 0x449   : > { %3854 = vmatprep.mubr.f32.mxu0 %v23737_v57  ;;  %6228 = vmatprep.mubr.f32.mxu1 %v23737_v57 }
 0x44a   : > { %13381 = vmatpush1.bf16.msra.mxu0 %v24174_v27  ;;  %13571 = vmatprep.subr.bf16.mxu1 %v24175_v28  ;;  %v24204_v27 = vld [vmem:[#allocation90_spill] sm:$0xff]  ;;  %v24205_v28 = vld [vmem:[#allocation89_spill] sm:$0xff] }
 0x44b   : > { %13383 = vmatprep.subr.bf16.mxu0 %v24176_v46  ;;  %13573 = vmatpush1.bf16.msra.mxu1 %v24177_v36  ;;  %v24206_v46 = vld [vmem:[#allocation172_spill] sm:$0xff] }
 0x44c   : > { %3856 = vmatmul.mubr.f32.gmra.mrb[4].mxu0 %v24178_v25  ;;  %6230 = vmatmul.mubr.f32.gmra.mrb[4].mxu1 %v24178_v25  ;;  %v24207_v36 = vld [vmem:[#allocation104_spill] sm:$0xff] }
 0x44d   : > { %3861 = vmatprep.mubr.f32.mxu0 %v23737_v57  ;;  %6235 = vmatprep.mubr.f32.mxu1 %v23737_v57 }
 0x44e   : > { %13385 = vmatpush1.bf16.msra.mxu0 %v24179_v60  ;;  %13575 = vmatprep.subr.bf16.mxu1 %v24180_v62  ;;  %v24208_v60 = vld [vmem:[#allocation101_spill] sm:$0xff]  ;;  %v24209_v62 = vld [vmem:[#allocation110_spill] sm:$0xff] }
 0x44f   : > { %13387 = vmatprep.subr.bf16.mxu0 %v24181_v17  ;;  %13577 = vmatpush1.bf16.msra.mxu1 %v24182_v5  ;;  %v24210_v17 = vld [vmem:[#allocation107_spill] sm:$0xff]  ;;  %v19061_v5 = vpack.c.bf16 %v6764_v38, %v6760_v61  ;;  %v19085_v38 = vpack.c.bf16 %v9138_v1, %v9134_v11  ;;  %v24216_v11 = vld [vmem:[#allocation189_spill] sm:$0xff] }
 0x450   : > { %3863 = vmatmul.mubr.f32.gmra.mrb[6].mxu0 %v24183_v45  ;;  %6237 = vmatmul.mubr.f32.gmra.mrb[6].mxu1 %v24183_v45  ;;  %v19077_v61 = vld [vmem:[#allocation7 + $0x50] sm:$0xff] }
 0x451   : > { %3868 = vmatprep.mubr.f32.mxu0 %v23737_v57  ;;  %6242 = vmatprep.mubr.f32.mxu1 %v23737_v57  ;;  %24211 = vst [vmem:[#allocation70_spill] sm:$0xff] %v19061_v5  ;;  %24213 = vst [vmem:[#allocation85_spill] sm:$0xff] %v19085_v38  ;;  %v23113_v19 = vand.u32 4294901760, %v19077_v61 }
 0x452   : > { %13389 = vmatpush1.bf16.msra.mxu0 %v24184_v3  ;;  %13579 = vmatprep.subr.bf16.mxu1 %v24185_v9  ;;  %v24212_v3 = vld [vmem:[#allocation182_spill] sm:$0xff]  ;;  %v19065_v9 = vld [vmem:[#allocation7 + $0x58] sm:$0xff] }
 0x453   : > { %13391 = vmatprep.subr.bf16.mxu0 %v24186_v12  ;;  %13581 = vmatpush1.bf16.msra.mxu1 %v24187_v54  ;;  %v19067_v12 = vld [vmem:[#allocation7 + $0x78] sm:$0xff]  ;;  %v23119_v54 = vand.u32 4294901760, %v19065_v9 }
 0x454   : > { %3870 = vmatmul.mubr.f32.gmra.mrb[8].mxu0 %v24190_v49  ;;  %6244 = vmatmul.mubr.f32.gmra.mrb[8].mxu1 %v24190_v49  ;;  %v23118_v6 = vand.u32 4294901760, %v19067_v12 }
 0x455   : > { %3875 = vmatprep.mubr.f32.mxu0 %v23737_v57  ;;  %6249 = vmatprep.mubr.f32.mxu1 %v23737_v57 }
 0x456   : > { %13393 = vmatpush1.bf16.msra.mxu0 %v24195_v52  ;;  %13583 = vmatprep.subr.bf16.mxu1 %v24196_v32  ;;  %v19073_v52 = vld [vmem:[#allocation7 + $0x88] sm:$0xff] }
 0x457   : > { %13395 = vmatprep.subr.bf16.mxu0 %v24197_v47  ;;  %13585 = vmatpush1.bf16.msra.mxu1 %v24198_v14  ;;  %v23117_v32 = vand.u32 4294901760, %v19073_v52  ;;  %v23115_v47 = vand.u32 4294901760, %v19075_v58  ;;  %v19089_v14 = vld [vmem:[#allocation7 + $0x70] sm:$0xff] }
 0x458   : > { %3877 = vmatmul.mubr.f32.gmra.mrb[10].mxu0 %v24200_v53  ;;  %6251 = vmatmul.mubr.f32.gmra.mrb[10].mxu1 %v24200_v53  ;;  %v23112_v39 = vand.u32 4294901760, %v19089_v14 }
 0x459   : > { %3882 = vmatprep.mubr.f32.mxu0 %v23737_v57  ;;  %6256 = vmatprep.mubr.f32.mxu1 %v23737_v57  ;;  %v19115_v1 = vsub.f32 %v19075_v58, %v23115_v47  ;;  %v19156_v47 = vld [vmem:[#allocation7 + $0x98] sm:$0xff] }
 0x45a   : > { %13397 = vmatpush1.bf16.msra.mxu0 %v24202_v2  ;;  %13587 = vmatprep.subr.bf16.mxu1 %v24203_v43  ;;  %v19117_v2 = vld [vmem:[#allocation7 + $0x80] sm:$0xff] }
 0x45b   : > { %13399 = vmatprep.subr.bf16.mxu0 %v24204_v27  ;;  %13589 = vmatpush1.bf16.msra.mxu1 %v24205_v28  ;;  %24218 = vst [vmem:[#allocation103_spill] sm:$0xff] %v19115_v1  ;;  %v19119_v43 = vld [vmem:[#allocation7 + $0xa0] sm:$0xff]  ;;  %v19126_v27 = vsub.f32 %v19077_v61, %v23113_v19  ;;  %v19131_v28 = vsub.f32 %v19089_v14, %v23112_v39  ;;  %v24224_v19 = vld [vmem:[#allocation199_spill] sm:$0xff] }
 0x45c   : > { %3884 = vmatmul.mubr.f32.gmra.mrb[12].mxu0 %v24206_v46  ;;  %6258 = vmatmul.mubr.f32.gmra.mrb[12].mxu1 %v24206_v46 }
 0x45d   : > { %3889 = vmatprep.mubr.f32.mxu0 %v23737_v57  ;;  %6263 = vmatprep.mubr.f32.mxu1 %v23737_v57  ;;  %24219 = vst [vmem:[#allocation112_spill] sm:$0xff] %v19126_v27  ;;  %24220 = vst [vmem:[#allocation115_spill] sm:$0xff] %v19131_v28  ;;  %v19246_v28 = vld [vmem:[#allocation7 + $0x128] sm:$0xff]  ;;  %v19248_v27 = vld [vmem:[#allocation7 + $0xd0] sm:$0xff] }
 0x45e   : > { %13401 = vmatpush1.bf16.msra.mxu0 %v24207_v36  ;;  %13591 = vmatprep.subr.bf16.mxu1 %v24208_v60  ;;  %v23114_v36 = vand.u32 4294901760, %v19117_v2  ;;  %v23116_v60 = vand.u32 4294901760, %v19119_v43  ;;  %v23167_v31 = vand.u32 4294901760, %v19248_v27 }
 0x45f   : > { %13403 = vmatprep.subr.bf16.mxu0 %v24209_v62  ;;  %13593 = vmatpush1.bf16.msra.mxu1 %v24210_v17  ;;  %v24222_v17 = vld [vmem:[#allocation188_spill] sm:$0xff] }
 0x460   : > { %3891 = vmatmul.mubr.f32.gmra.mrb[14].mxu0 %v24212_v3  ;;  %6265 = vmatmul.mubr.f32.gmra.mrb[14].mxu1 %v24212_v3  ;;  %v19139_v62 = vsub.f32 %v19117_v2, %v23114_v36  ;;  %v19146_v39 = vsub.f32 %v19119_v43, %v23116_v60  ;;  %v24225_v36 = vld [vmem:[#allocation206_spill] sm:$0xff]  ;;  %v19158_v60 = vld [vmem:[#allocation7 + $0xb8] sm:$0xff]  ;;  %v19287_v29 = vsub.f32 %v19248_v27, %v23167_v31 }
 0x461   : > { %3896 = vmatprep.mubr.f32.mxu0 %v23737_v57  ;;  %6270 = vmatprep.mubr.f32.mxu1 %v23737_v57 }
 0x462   : > { %13405 = vmatpush1.bf16.msra.mxu0 %v24032_v7  ;;  %13595 = vmatprep.subr.bf16.mxu1 %v24033_v51  ;;  %v19096_v51 = vsub.f32 %v19065_v9, %v23119_v54  ;;  %v19101_v7 = vsub.f32 %v19067_v12, %v23118_v6  ;;  %24221 = vst [vmem:[#allocation120_spill] sm:$0xff] %v19139_v62  ;;  %24223 = vst [vmem:[#allocation121_spill] sm:$0xff] %v19146_v39  ;;  %v23134_v6 = vand.u32 4294901760, %v19158_v60  ;;  %v19164_v54 = vld [vmem:[#allocation7 + $0xc8] sm:$0xff]  ;;  %v24236_v62 = vld [vmem:[#allocation36_spill] sm:$0xff] }
 0x463   : > { %13597 = vmatpush1.bf16.msra.mxu1 %v24038_v34  ;;  %13599 = vmatprep.subr.bf16.mxu0 %v19061_v5  ;;  %v19110_v34 = vsub.f32 %v19073_v52, %v23117_v32  ;;  %v23132_v32 = vand.u32 4294901760, %v19156_v47  ;;  %v23136_v15 = vand.u32 4294901760, %v19164_v54  ;;  %v24228_v5 = vld [vmem:[#allocation205_spill] sm:$0xff]  ;;  %24246 = vst [vmem:[#allocation29_spill] sm:$0xff] %v19287_v29  ;;  %v19324_v29 = vld [vmem:[#allocation7 + $0x148] sm:$0xff] }
 0x464   : > { %24214 = vst [vmem:[#allocation105_spill] sm:$0xff] %v19096_v51  ;;  %24215 = vst [vmem:[#allocation106_spill] sm:$0xff] %v19101_v7  ;;  %3898 = vmatmul.mubr.f32.gmra.mrb[16].mxu0 %v24216_v11  ;;  %6272 = vmatmul.mubr.f32.gmra.mrb[16].mxu1 %v24216_v11  ;;  %v19182_v40 = vsub.f32 %v19158_v60, %v23134_v6  ;;  %v19198_v6 = vld [vmem:[#allocation7 + $0xc0] sm:$0xff]  ;;  %v19252_v7 = vld [vmem:[#allocation7 + $0xf0] sm:$0xff] }
 0x465   : > { %24217 = vst [vmem:[#allocation102_spill] sm:$0xff] %v19110_v34  ;;  %3903 = vmatprep.mubr.f32.mxu0 %v23737_v57  ;;  %6277 = vmatprep.mubr.f32.mxu1 %v23737_v57  ;;  %v19177_v10 = vsub.f32 %v19156_v47, %v23132_v32  ;;  %v19191_v23 = vsub.f32 %v19164_v54, %v23136_v15  ;;  %v24230_v32 = vand.u32 4294901760, %v19166_v18  ;;  %v24233_v15 = vand.u32 4294901760, %v19172_v50 }
 0x466   : > { %13791 = vmatprep.subr.bf16.mxu1 %v19085_v38  ;;  %24227 = vst [vmem:[#allocation32_spill] sm:$0xff] %v19182_v40  ;;  %v19200_v40 = vld [vmem:[#allocation7 + $0xe0] sm:$0xff]  ;;  %v19207_v38 = vsub.f32 %v19168_v26, %v23141_v59 }
 0x467   : > { %24226 = vst [vmem:[#allocation30_spill] sm:$0xff] %v19177_v10  ;;  %24229 = vst [vmem:[#allocation158_spill] sm:$0xff] %v19191_v23  ;;  %v19196_v10 = vsub.f32 %v19166_v18, %v24230_v32  ;;  %v19212_v23 = vsub.f32 %v19172_v50, %v24233_v15  ;;  %v23142_v32 = vand.u32 4294901760, %v19198_v6  ;;  %v24238_v15 = vld [vmem:[#allocation40_spill] sm:$0xff] }
 0x468   : > { %3905 = vmatmul.mubr.f32.gmra.mrb[18].mxu0 %v24222_v17  ;;  %6279 = vmatmul.mubr.f32.gmra.mrb[18].mxu1 %v24222_v17  ;;  %24232 = vst [vmem:[#allocation41_spill] sm:$0xff] %v19207_v38  ;;  %v19244_v38 = vld [vmem:[#allocation7 + $0x108] sm:$0xff]  ;;  %v19412_v17 = vld [vmem:[#allocation7 + $0x170] sm:$0xff] }
 0x469   : > { %3910 = vmatprep.mubr.f32.mxu0 %v23737_v57  ;;  %6284 = vmatprep.mubr.f32.mxu1 %v23737_v57  ;;  %24231 = vst [vmem:[#allocation35_spill] sm:$0xff] %v19196_v10  ;;  %24234 = vst [vmem:[#allocation38_spill] sm:$0xff] %v19212_v23  ;;  %v23144_v10 = vand.u32 4294901760, %v19200_v40  ;;  %v19219_v39 = vsub.f32 %v19198_v6, %v23142_v32  ;;  %v24239_v32 = vld [vmem:[#allocation39_spill] sm:$0xff]  ;;  %v23162_v1 = vand.u32 4294901760, %v19244_v38 }
 0x46a   : > { %24272 = vst [vmem:[#allocation227_spill] sm:$0xff] %v19412_v17 }
 0x46b   : > { %24235 = vst [vmem:[#allocation153_spill] sm:$0xff] %v19219_v39  ;;  %v19226_v59 = vsub.f32 %v19200_v40, %v23144_v10  ;;  %v19236_v39 = vld [vmem:[#allocation7 + $0xd8] sm:$0xff]  ;;  %v19271_v34 = vsub.f32 %v19244_v38, %v23162_v1  ;;  %v24247_v1 = vand.u32 4294901760, %v19252_v7 }
 0x46c   : > { %3912 = vmatmul.mubr.f32.gmra.mrb[20].mxu0 %v24224_v19  ;;  %6286 = vmatmul.mubr.f32.gmra.mrb[20].mxu1 %v24224_v19  ;;  %v19238_v10 = vld [vmem:[#allocation7 + $0xf8] sm:$0xff] }
 0x46d   : > { %3917 = vmatprep.mubr.f32.mxu0 %v23737_v57  ;;  %6291 = vmatprep.mubr.f32.mxu1 %v23737_v57  ;;  %24237 = vst [vmem:[#allocation160_spill] sm:$0xff] %v19226_v59  ;;  %v23158_v59 = vand.u32 4294901760, %v19236_v39  ;;  %v23160_v23 = vand.u32 4294901760, %v19238_v10  ;;  %24243 = vst [vmem:[#allocation173_spill] sm:$0xff] %v19271_v34  ;;  %v19292_v34 = vsub.f32 %v19252_v7, %v24247_v1  ;;  %v24252_v1 = vld [vmem:[#allocation66_spill] sm:$0xff] }
 0x46f   : > { %v19257_v51 = vsub.f32 %v19236_v39, %v23158_v59  ;;  %v19262_v55 = vsub.f32 %v19238_v10, %v23160_v23  ;;  %v24244_v59 = vand.u32 4294901760, %v19246_v28  ;;  %v19278_v23 = vld [vmem:[#allocation7 + $0x100] sm:$0xff]  ;;  %24248 = vst [vmem:[#allocation31_spill] sm:$0xff] %v19292_v34 }
 0x470   : > { %3919 = vmatmul.mubr.f32.gmra.mrb[22].mxu0 %v24225_v36  ;;  %6293 = vmatmul.mubr.f32.gmra.mrb[22].mxu1 %v24225_v36  ;;  %v24264_v36 = vld [vmem:[#allocation239_spill] sm:$0xff] }
 0x471   : > { %3924 = vmatprep.mubr.f32.mxu0 %v23737_v57  ;;  %6298 = vmatprep.mubr.f32.mxu1 %v23737_v57  ;;  %24240 = vst [vmem:[#allocation166_spill] sm:$0xff] %v19257_v51  ;;  %24241 = vst [vmem:[#allocation168_spill] sm:$0xff] %v19262_v55  ;;  %v19276_v51 = vsub.f32 %v19246_v28, %v24244_v59  ;;  %v19280_v55 = vld [vmem:[#allocation7 + $0x120] sm:$0xff]  ;;  %v23168_v59 = vand.u32 4294901760, %v19278_v23 }
 0x473   : > { %24245 = vst [vmem:[#allocation176_spill] sm:$0xff] %v19276_v51  ;;  %v23170_v51 = vand.u32 4294901760, %v19280_v55  ;;  %v19299_v56 = vsub.f32 %v19278_v23, %v23168_v59  ;;  %v24253_v59 = vld [vmem:[#allocation234_spill] sm:$0xff] }
 0x474   : > { %3926 = vmatmul.mubr.f32.gmra.mrb[24].mxu0 %v24228_v5  ;;  %6300 = vmatmul.mubr.f32.gmra.mrb[24].mxu1 %v24228_v5  ;;  %v24256_v5 = vld [vmem:[#allocation240_spill] sm:$0xff] }
 0x475   : > { %3931 = vmatprep.mubr.f32.mxu0 %v23737_v57  ;;  %6305 = vmatprep.mubr.f32.mxu1 %v23737_v57  ;;  %24249 = vst [vmem:[#allocation184_spill] sm:$0xff] %v19299_v56  ;;  %v19306_v31 = vsub.f32 %v19280_v55, %v23170_v51  ;;  %v19316_v56 = vld [vmem:[#allocation7 + $0x118] sm:$0xff] }
 0x476   : > { %v19318_v51 = vld [vmem:[#allocation7 + $0x138] sm:$0xff] }
 0x477   : > { %24251 = vst [vmem:[#allocation116_spill] sm:$0xff] %v19306_v31  ;;  %v23184_v31 = vand.u32 4294901760, %v19316_v56  ;;  %v23186_v34 = vand.u32 4294901760, %v19318_v51 }
 0x478   : > { %3933 = vmatmul.mubr.f32.gmra.mrb[26].mxu0 %v24236_v62  ;;  %6307 = vmatmul.mubr.f32.gmra.mrb[26].mxu1 %v24236_v62 }
 0x479   : > { %3938 = vmatprep.mubr.f32.mxu0 %v23737_v57  ;;  %6312 = vmatprep.mubr.f32.mxu1 %v23737_v57 }
 0x47c   : > { %3940 = vmatmul.mubr.f32.gmra.mrb[28].mxu0 %v24238_v15  ;;  %6314 = vmatmul.mubr.f32.gmra.mrb[28].mxu1 %v24238_v15  ;;  %v23193_v15 = vand.u32 4294901760, %v19328_v42 }
 0x47d   : > { %3945 = vmatprep.mubr.f32.mxu0 %v23737_v57  ;;  %6319 = vmatprep.mubr.f32.mxu1 %v23737_v57 }
 0x47e   : > { %v19367_v62 = vsub.f32 %v19328_v42, %v23193_v15 }
 0x480   : > { %3947 = vmatmul.mubr.f32.gmra.mrb[30].mxu0 %v24239_v32  ;;  %6321 = vmatmul.mubr.f32.gmra.mrb[30].mxu1 %v24239_v32  ;;  %v19342_v32 = vsub.f32 %v19318_v51, %v23186_v34  ;;  %v19358_v34 = vld [vmem:[#allocation7 + $0x140] sm:$0xff]  ;;  %24260 = vst [vmem:[#allocation192_spill] sm:$0xff] %v19367_v62  ;;  %v19404_v62 = vld [vmem:[#allocation7 + $0x188] sm:$0xff] }
 0x481   : > { %3952 = vmatprep.mubr.f32.mxu0 %v23737_v57  ;;  %6326 = vmatprep.mubr.f32.mxu1 %v23737_v57  ;;  %24269 = vst [vmem:[#allocation216_spill] sm:$0xff] %v19404_v62 }
 0x482   : > { %24255 = vst [vmem:[#allocation33_spill] sm:$0xff] %v19342_v32  ;;  %v19360_v32 = vld [vmem:[#allocation7 + $0x160] sm:$0xff] }
 0x484   : > { %3954 = vmatmul.mubr.f32.gmra.mrb[32].mxu0 %v24242_v16  ;;  %6328 = vmatmul.mubr.f32.gmra.mrb[32].mxu1 %v24242_v16  ;;  %v19337_v16 = vsub.f32 %v19316_v56, %v23184_v31  ;;  %v24258_v31 = vand.u32 4294901760, %v19326_v0 }
 0x485   : > { %3959 = vmatprep.mubr.f32.mxu0 %v23737_v57  ;;  %6333 = vmatprep.mubr.f32.mxu1 %v23737_v57 }
 0x486   : > { %24254 = vst [vmem:[#allocation111_spill] sm:$0xff] %v19337_v16  ;;  %v19356_v16 = vsub.f32 %v19326_v0, %v24258_v31  ;;  %v23194_v31 = vand.u32 4294901760, %v19358_v34 }
 0x488   : > { %3961 = vmatmul.mubr.f32.gmra.mrb[34].mxu0 %v24250_v24  ;;  %6335 = vmatmul.mubr.f32.gmra.mrb[34].mxu1 %v24250_v24  ;;  %v19332_v24 = vld [vmem:[#allocation7 + $0x130] sm:$0xff]  ;;  %24259 = vst [vmem:[#allocation119_spill] sm:$0xff] %v19356_v16  ;;  %v23196_v16 = vand.u32 4294901760, %v19360_v32 }
 0x489   : > { %3966 = vmatprep.mubr.f32.mxu0 %v23737_v57  ;;  %6340 = vmatprep.mubr.f32.mxu1 %v23737_v57 }
 0x48a   : > { %v19386_v15 = vsub.f32 %v19360_v32, %v23196_v16  ;;  %v19398_v16 = vld [vmem:[#allocation7 + $0x178] sm:$0xff] }
 0x48b   : > { %24268 = vst [vmem:[#allocation208_spill] sm:$0xff] %v19398_v16 }
 0x48c   : > { %3968 = vmatmul.mubr.f32.gmra.mrb[36].mxu0 %v24252_v1  ;;  %6342 = vmatmul.mubr.f32.gmra.mrb[36].mxu1 %v24252_v1  ;;  %24265 = vst [vmem:[#allocation209_spill] sm:$0xff] %v19386_v15 }
 0x48d   : > { %3973 = vmatprep.mubr.f32.mxu0 %v23737_v57  ;;  %6347 = vmatprep.mubr.f32.mxu1 %v23737_v57 }
 0x490   : > { %3975 = vmatmul.mubr.f32.gmra.mrb[38].mxu0 %v24253_v59  ;;  %6349 = vmatmul.mubr.f32.gmra.mrb[38].mxu1 %v24253_v59  ;;  %v23188_v59 = vand.u32 4294901760, %v19324_v29 }
 0x491   : > { %3980 = vmatprep.mubr.f32.mxu0 %v23737_v57  ;;  %6354 = vmatprep.mubr.f32.mxu1 %v23737_v57 }
 0x492   : > { %v19351_v1 = vsub.f32 %v19324_v29, %v23188_v59  ;;  %v24261_v59 = vand.u32 4294901760, %v19332_v24 }
 0x494   : > { %3982 = vmatmul.mubr.f32.gmra.mrb[40].mxu0 %v24256_v5  ;;  %6356 = vmatmul.mubr.f32.gmra.mrb[40].mxu1 %v24256_v5  ;;  %24257 = vst [vmem:[#allocation34_spill] sm:$0xff] %v19351_v1  ;;  %v19372_v1 = vsub.f32 %v19332_v24, %v24261_v59  ;;  %v19379_v5 = vsub.f32 %v19358_v34, %v23194_v31  ;;  %v24266_v59 = vld [vmem:[#allocation118_spill] sm:$0xff]  ;;  %v24267_v31 = vld [vmem:[#allocation249_spill] sm:$0xff] }
 0x495   : > { %3987 = vmatprep.mubr.f32.mxu0 %v23737_v57  ;;  %6361 = vmatprep.mubr.f32.mxu1 %v23737_v57 }
 0x496   : > { %24262 = vst [vmem:[#allocation191_spill] sm:$0xff] %v19372_v1  ;;  %24263 = vst [vmem:[#allocation201_spill] sm:$0xff] %v19379_v5  ;;  %v19396_v5 = vld [vmem:[#allocation7 + $0x158] sm:$0xff]  ;;  %v23212_v1 = vand.u32 4294901760, %v19398_v16 }
 0x497   : > { %v23210_v15 = vand.u32 4294901760, %v19396_v5 }
 0x498   : > { %3989 = vmatmul.mubr.f32.gmra.mrb[42].mxu0 %v24264_v36  ;;  %6363 = vmatmul.mubr.f32.gmra.mrb[42].mxu1 %v24264_v36  ;;  %v19408_v36 = vld [vmem:[#allocation7 + $0x150] sm:$0xff]  ;;  %v19422_v3 = vsub.f32 %v19398_v16, %v23212_v1  ;;  %v19438_v1 = vld [vmem:[#allocation7 + $0x180] sm:$0xff] }
 0x499   : > { %3994 = vmatprep.mubr.f32.mxu0 %v23737_v57  ;;  %6368 = vmatprep.mubr.f32.mxu1 %v23737_v57  ;;  %24271 = vst [vmem:[#allocation218_spill] sm:$0xff] %v19408_v36  ;;  %v19417_v11 = vsub.f32 %v19396_v5, %v23210_v15  ;;  %v23219_v46 = vand.u32 4294901760, %v19408_v36  ;;  %24279 = vst [vmem:[#allocation241_spill] sm:$0xff] %v19438_v1  ;;  %v24294_v16 = vld [vmem:[#allocation267_spill] sm:$0xff] }
 0x49a   : > { %24274 = vst [vmem:[#allocation64_spill] sm:$0xff] %v19422_v3  ;;  %v19440_v3 = vld [vmem:[#allocation7 + $0x1a0] sm:$0xff] }
 0x49b   : > { %24273 = vst [vmem:[#allocation71_spill] sm:$0xff] %v19417_v11  ;;  %24280 = vst [vmem:[#allocation114_spill] sm:$0xff] %v19440_v3  ;;  %v19447_v53 = vsub.f32 %v19408_v36, %v23219_v46 }
 0x49c   : > { %3996 = vmatmul.mubr.f32.gmra.mrb[44].mxu0 %v24266_v59  ;;  %6370 = vmatmul.mubr.f32.gmra.mrb[44].mxu1 %v24266_v59  ;;  %v19406_v59 = vld [vmem:[#allocation7 + $0x1a8] sm:$0xff] }
 0x49d   : > { %4001 = vmatprep.mubr.f32.mxu0 %v23737_v57  ;;  %6375 = vmatprep.mubr.f32.mxu1 %v23737_v57  ;;  %24270 = vst [vmem:[#allocation219_spill] sm:$0xff] %v19406_v59  ;;  %v24277_v15 = vand.u32 4294901760, %v19406_v59  ;;  %24281 = vst [vmem:[#allocation251_spill] sm:$0xff] %v19447_v53  ;;  %v19484_v53 = vld [vmem:[#allocation7 + $0x1c8] sm:$0xff] }
 0x49f   : > { %v19436_v11 = vsub.f32 %v19406_v59, %v24277_v15  ;;  %v23220_v15 = vand.u32 4294901760, %v19438_v1 }
 0x4a0   : > { %4003 = vmatmul.mubr.f32.gmra.mrb[46].mxu0 %v24267_v31  ;;  %6377 = vmatmul.mubr.f32.gmra.mrb[46].mxu1 %v24267_v31  ;;  %v23214_v31 = vand.u32 4294901760, %v19404_v62 }
 0x4a1   : > { %4008 = vmatprep.mubr.f32.mxu0 %v23737_v57  ;;  %6382 = vmatprep.mubr.f32.mxu1 %v23737_v57  ;;  %24278 = vst [vmem:[#allocation242_spill] sm:$0xff] %v19436_v11  ;;  %v23222_v11 = vand.u32 4294901760, %v19440_v3 }
 0x4a2   : > { %v19431_v19 = vsub.f32 %v19404_v62, %v23214_v31  ;;  %v24282_v31 = vand.u32 4294901760, %v19412_v17 }
 0x4a3   : > { %v19466_v46 = vsub.f32 %v19440_v3, %v23222_v11  ;;  %v19478_v11 = vld [vmem:[#allocation7 + $0x1b8] sm:$0xff] }
 0x4a4   : > { %4010 = vmatmul.mubr.f32.gmra.mrb[48].mxu0 %v24275_v20  ;;  %6384 = vmatmul.mubr.f32.gmra.mrb[48].mxu1 %v24275_v20  ;;  %24276 = vst [vmem:[#allocation235_spill] sm:$0xff] %v19431_v19  ;;  %v19452_v19 = vsub.f32 %v19412_v17, %v24282_v31  ;;  %v19459_v20 = vsub.f32 %v19438_v1, %v23220_v15  ;;  %v24287_v31 = vld [vmem:[#allocation261_spill] sm:$0xff]  ;;  %v24288_v15 = vld [vmem:[#allocation260_spill] sm:$0xff]  ;;  %v19492_v1 = vld [vmem:[#allocation7 + $0x1b0] sm:$0xff] }
 0x4a5   : > { %4015 = vmatprep.mubr.f32.mxu0 %v23737_v57  ;;  %6389 = vmatprep.mubr.f32.mxu1 %v23737_v57  ;;  %24286 = vst [vmem:[#allocation263_spill] sm:$0xff] %v19466_v46  ;;  %24291 = vst [vmem:[#allocation159_spill] sm:$0xff] %v19492_v1 }
 0x4a6   : > { %24283 = vst [vmem:[#allocation250_spill] sm:$0xff] %v19452_v19  ;;  %24284 = vst [vmem:[#allocation256_spill] sm:$0xff] %v19459_v20  ;;  %v19476_v20 = vld [vmem:[#allocation7 + $0x198] sm:$0xff]  ;;  %v23238_v19 = vand.u32 4294901760, %v19478_v11 }
 0x4a7   : > { %v23236_v46 = vand.u32 4294901760, %v19476_v20 }
 0x4a8   : > { %4017 = vmatmul.mubr.f32.gmra.mrb[50].mxu0 %v24285_v41  ;;  %6391 = vmatmul.mubr.f32.gmra.mrb[50].mxu1 %v24285_v41  ;;  %v19488_v41 = vld [vmem:[#allocation7 + $0x190] sm:$0xff]  ;;  %v19502_v36 = vsub.f32 %v19478_v11, %v23238_v19  ;;  %v19518_v19 = vld [vmem:[#allocation7 + $0x1c0] sm:$0xff] }
 0x4a9   : > { %4022 = vmatprep.mubr.f32.mxu0 %v23737_v57  ;;  %6396 = vmatprep.mubr.f32.mxu1 %v23737_v57  ;;  %24290 = vst [vmem:[#allocation162_spill] sm:$0xff] %v19488_v41  ;;  %v19497_v17 = vsub.f32 %v19476_v20, %v23236_v46  ;;  %v23245_v59 = vand.u32 4294901760, %v19488_v41  ;;  %24298 = vst [vmem:[#allocation76_spill] sm:$0xff] %v19518_v19 }
 0x4aa   : > { %24293 = vst [vmem:[#allocation83_spill] sm:$0xff] %v19502_v36  ;;  %v19520_v36 = vld [vmem:[#allocation7 + $0x1e0] sm:$0xff] }
 0x4ab   : > { %24292 = vst [vmem:[#allocation164_spill] sm:$0xff] %v19497_v17  ;;  %24299 = vst [vmem:[#allocation169_spill] sm:$0xff] %v19520_v36  ;;  %v19527_v62 = vsub.f32 %v19488_v41, %v23245_v59 }
 0x4ac   : > { %4024 = vmatmul.mubr.f32.gmra.mrb[52].mxu0 %v24287_v31  ;;  %6398 = vmatmul.mubr.f32.gmra.mrb[52].mxu1 %v24287_v31  ;;  %v19486_v31 = vld [vmem:[#allocation7 + $0x1e8] sm:$0xff] }
 0x4ad   : > { %4029 = vmatprep.mubr.f32.mxu0 %v23737_v57  ;;  %6403 = vmatprep.mubr.f32.mxu1 %v23737_v57  ;;  %24289 = vst [vmem:[#allocation262_spill] sm:$0xff] %v19486_v31  ;;  %v24296_v46 = vand.u32 4294901760, %v19486_v31  ;;  %24300 = vst [vmem:[#allocation91_spill] sm:$0xff] %v19527_v62 }
 0x4af   : > { %v19516_v17 = vsub.f32 %v19486_v31, %v24296_v46  ;;  %v23247_v46 = vand.u32 4294901760, %v19518_v19  ;;  %v24304_v31 = vld [vmem:[#allocation273_spill] sm:$0xff] }
 0x4b0   : > { %4031 = vmatmul.mubr.f32.gmra.mrb[54].mxu0 %v24288_v15  ;;  %6405 = vmatmul.mubr.f32.gmra.mrb[54].mxu1 %v24288_v15  ;;  %v23240_v15 = vand.u32 4294901760, %v19484_v53 }
 0x4b1   : > { %4036 = vmatprep.mubr.f32.mxu0 %v23737_v57  ;;  %6410 = vmatprep.mubr.f32.mxu1 %v23737_v57  ;;  %24297 = vst [vmem:[#allocation75_spill] sm:$0xff] %v19516_v17  ;;  %v23249_v17 = vand.u32 4294901760, %v19520_v36 }
 0x4b2   : > { %v19511_v3 = vsub.f32 %v19484_v53, %v23240_v15  ;;  %v24301_v15 = vand.u32 4294901760, %v19492_v1 }
 0x4b3   : > { %v19546_v59 = vsub.f32 %v19520_v36, %v23249_v17  ;;  %v19560_v17 = vld [vmem:[#allocation7 + $0x1f0] sm:$0xff]  ;;  %v24309_v36 = vld [vmem:[#allocation278_spill] sm:$0xff] }
 0x4b4   : > { %4038 = vmatmul.mubr.f32.gmra.mrb[56].mxu0 %v24294_v16  ;;  %6412 = vmatmul.mubr.f32.gmra.mrb[56].mxu1 %v24294_v16  ;;  %24295 = vst [vmem:[#allocation84_spill] sm:$0xff] %v19511_v3  ;;  %v19532_v3 = vsub.f32 %v19492_v1, %v24301_v15  ;;  %v19539_v16 = vsub.f32 %v19518_v19, %v23247_v46  ;;  %v24306_v15 = vld [vmem:[#allocation272_spill] sm:$0xff] }
 0x4b5   : > { %4043 = vmatprep.mubr.f32.mxu0 %v23737_v57  ;;  %6417 = vmatprep.mubr.f32.mxu1 %v23737_v57  ;;  %24305 = vst [vmem:[#allocation87_spill] sm:$0xff] %v19546_v59  ;;  %v19554_v46 = vld [vmem:[#allocation7 + $0x1f8] sm:$0xff] }
 0x4b6   : > { %24302 = vst [vmem:[#allocation92_spill] sm:$0xff] %v19532_v3  ;;  %24303 = vst [vmem:[#allocation86_spill] sm:$0xff] %v19539_v16  ;;  %v19552_v3 = vld [vmem:[#allocation7 + $0x1d8] sm:$0xff]  ;;  %v19558_v16 = vld [vmem:[#allocation7 + $0x1d0] sm:$0xff]  ;;  %v23261_v62 = vand.u32 4294901760, %v19554_v46 }
 0x4b7   : > { %24307 = vst [vmem:[#allocation174_spill] sm:$0xff] %v19552_v3  ;;  %24308 = vst [vmem:[#allocation95_spill] sm:$0xff] %v19554_v46  ;;  %v23259_v59 = vand.u32 4294901760, %v19552_v3 }
 0x4b8   : > { %4045 = vmatmul.mubr.f32.gmra.mrb[58].mxu0 %v24304_v31  ;;  %6419 = vmatmul.mubr.f32.gmra.mrb[58].mxu1 %v24304_v31  ;;  %v19576_v1 = vsub.f32 %v19554_v46, %v23261_v62  ;;  %v24313_v31 = vand.u32 4294901760, %v18926_v13  ;;  %v24318_v46 = vand.u32 4294901760, %v18973_v44  ;;  %v24321_v13 = vand.u32 4294901760, %v18981_v30 }
 0x4b9   : > { %4050 = vmatprep.mubr.f32.mxu0 %v23737_v57  ;;  %6424 = vmatprep.mubr.f32.mxu1 %v23737_v57  ;;  %v19571_v19 = vsub.f32 %v19552_v3, %v23259_v59  ;;  %v24324_v44 = vand.u32 4294901760, %v19011_v35  ;;  %v24326_v30 = vand.u32 4294901760, %v19065_v9  ;;  %v24333_v35 = vand.u32 4294901760, %v19089_v14 }
 0x4ba   : > { %24311 = vst [vmem:[#allocation93_spill] sm:$0xff] %v19576_v1  ;;  %v24317_v1 = vand.u32 4294901760, %v18971_v48  ;;  %v24323_v48 = vand.u32 4294901760, %v19009_v63  ;;  %v24332_v63 = vand.u32 4294901760, %v19077_v61  ;;  %v24335_v9 = vand.u32 4294901760, %v19117_v2 }
 0x4bb   : > { %24310 = vst [vmem:[#allocation96_spill] sm:$0xff] %v19571_v19  ;;  %v24316_v19 = vand.u32 4294901760, %v19560_v17  ;;  %v24339_v61 = vand.u32 4294901760, %v19158_v60  ;;  %v24344_v2 = vand.u32 4294901760, %v19168_v26  ;;  %v24348_v26 = vand.u32 4294901760, %v19200_v40 }
 0x4bc   : > { %4052 = vmatmul.mubr.f32.gmra.mrb[60].mxu0 %v24306_v15  ;;  %6426 = vmatmul.mubr.f32.gmra.mrb[60].mxu1 %v24306_v15  ;;  %v24312_v15 = vand.u32 4294901760, %v18924_v4  ;;  %v19600_v3 = vpack.c.bf16 %v24318_v46, %v24317_v1  ;;  %v24320_v4 = vand.u32 4294901760, %v18975_v8  ;;  %v19618_v8 = vpack.c.bf16 %v24324_v44, %v24323_v48 }
 0x4bd   : > { %4057 = vmatprep.mubr.f32.mxu0 %v23737_v57  ;;  %6431 = vmatprep.mubr.f32.mxu1 %v23737_v57  ;;  %v19594_v62 = vsub.f32 %v19560_v17, %v24316_v19  ;;  %v24327_v19 = vand.u32 4294901760, %v19067_v12  ;;  %v24330_v1 = vand.u32 4294901760, %v19075_v58  ;;  %v24336_v12 = vand.u32 4294901760, %v19119_v43 }
 0x4be   : > { %v19584_v41 = vpack.c.bf16 %v24313_v31, %v24312_v15  ;;  %24319 = vst [vmem:[#allocation99_spill] sm:$0xff] %v19600_v3  ;;  %v19606_v31 = vpack.c.bf16 %v24321_v13, %v24320_v4  ;;  %24325 = vst [vmem:[#allocation97_spill] sm:$0xff] %v19618_v8  ;;  %v19637_v15 = vpack.c.bf16 %v24333_v35, %v24332_v63  ;;  %v24338_v58 = vand.u32 4294901760, %v19156_v47  ;;  %v24375_v35 = vld [vmem:[#allocation208_spill] sm:$0xff] }
 0x4bf   : > { %v24342_v4 = vand.u32 4294901760, %v19166_v18  ;;  %v24345_v43 = vand.u32 4294901760, %v19172_v50  ;;  %v24347_v18 = vand.u32 4294901760, %v19198_v6  ;;  %v24350_v50 = vand.u32 4294901760, %v19236_v39 }
 0x4c0   : > { %4059 = vmatmul.mubr.f32.gmra.mrb[62].mxu0 %v24309_v36  ;;  %6433 = vmatmul.mubr.f32.gmra.mrb[62].mxu1 %v24309_v36  ;;  %24314 = vst [vmem:[#allocation94_spill] sm:$0xff] %v19584_v41  ;;  %v24315_v36 = vand.u32 4294901760, %v19558_v16  ;;  %24322 = vst [vmem:[#allocation100_spill] sm:$0xff] %v19606_v31  ;;  %v19655_v14 = vpack.c.bf16 %v24339_v61, %v24338_v58  ;;  %v24351_v47 = vand.u32 4294901760, %v19238_v10  ;;  %v24354_v44 = vand.u32 4294901760, %v19246_v28  ;;  %v24380_v61 = vld [vmem:[#allocation219_spill] sm:$0xff] }
 0x4c1   : > { %4161 = vmatprep.mubr.f32.mxu0 %v23737_v57  ;;  %6535 = vmatprep.mubr.f32.mxu1 %v23737_v57  ;;  %24334 = vst [vmem:[#allocation113_spill] sm:$0xff] %v19637_v15  ;;  %v19669_v48 = vpack.c.bf16 %v24345_v43, %v24344_v2  ;;  %v24356_v40 = vand.u32 4294901760, %v19248_v27  ;;  %v24357_v6 = vand.u32 4294901760, %v19252_v7  ;;  %v24359_v10 = vand.u32 4294901760, %v19278_v23  ;;  %v24384_v2 = vld [vmem:[#allocation55_spill] sm:$0xff] }
 0x4c2   : > { %v19589_v59 = vsub.f32 %v19558_v16, %v24315_v36  ;;  %v19624_v36 = vpack.c.bf16 %v24327_v19, %v24326_v30  ;;  %24340 = vst [vmem:[#allocation109_spill] sm:$0xff] %v19655_v14  ;;  %v19687_v60 = vpack.c.bf16 %v24351_v47, %v24350_v50  ;;  %v24362_v7 = vand.u32 4294901760, %v19316_v56 }
 0x4c3   : > { %24346 = vst [vmem:[#allocation185_spill] sm:$0xff] %v19669_v48  ;;  %v19701_v19 = vpack.c.bf16 %v24357_v6, %v24356_v40  ;;  %v24363_v27 = vand.u32 4294901760, %v19318_v51  ;;  %v24368_v23 = vand.u32 4294901760, %v19328_v42  ;;  %v23270_v56 = vand.u32 4294901760, %v18917_v37  ;;  %v24390_v40 = vld [vmem:[#allocation170_spill] sm:$0xff]  ;;  %v24391_v6 = vld [vmem:[#allocation241_spill] sm:$0xff] }
 0x4c4   : > { %4163 = vmatmul.mubr.f32.vlgmr.msra.gmra.mrb[0].mxu0 %v24170_v21  ;;  %6537 = vmatmul.mubr.f32.vlgmr.msra.gmra.mrb[0].mxu1 %v24170_v21  ;;  %24328 = vst [vmem:[#allocation98_spill] sm:$0xff] %v19624_v36  ;;  %v24329_v21 = vand.u32 4294901760, %v19073_v52  ;;  %v19649_v52 = vpack.c.bf16 %v24336_v12, %v24335_v9  ;;  %24352 = vst [vmem:[#allocation194_spill] sm:$0xff] %v19687_v60  ;;  %v23267_v51 = vand.u32 4294901760, %v18922_v33  ;;  %v24372_v42 = vand.u32 4294901760, %v19360_v32 }
 0x4c5   : > { %13601 = vmatpush1.bf16.msra.mxu0 %v19584_v41  ;;  %4168 = vmatprep.mubr.f32.mxu0 %v23737_v57  ;;  %24358 = vst [vmem:[#allocation210_spill] sm:$0xff] %v19701_v19  ;;  %v19719_v28 = vpack.c.bf16 %v24363_v27, %v24362_v7  ;;  %v24376_v9 = vand.u32 4294901760, %v24375_v35  ;;  %v23265_v43 = vand.u32 4294901760, %v24384_v2 }
 0x4c6   : > { %6542 = vmatprep.mubr.f32.mxu1 %v23737_v57  ;;  %13603 = vmatprep.subr.bf16.mxu0 %v19600_v3  ;;  %v19631_v46 = vpack.c.bf16 %v24330_v1, %v24329_v21  ;;  %24337 = vst [vmem:[#allocation108_spill] sm:$0xff] %v19649_v52  ;;  %v24366_v21 = vand.u32 4294901760, %v19326_v0  ;;  %v24371_v0 = vand.u32 4294901760, %v19358_v34  ;;  %v24383_v34 = vld [vmem:[#allocation53_spill] sm:$0xff] }
 0x4c7   : > { %13793 = vmatpush1.bf16.msra.mxu1 %v19606_v31  ;;  %24364 = vst [vmem:[#allocation217_spill] sm:$0xff] %v19719_v28  ;;  %v23266_v32 = vand.u32 4294901760, %v24383_v34  ;;  %v24493_v31 = vld [vmem:[#allocation260_spill] sm:$0xff] }
 0x4c8   : > { %24331 = vst [vmem:[#allocation177_spill] sm:$0xff] %v19631_v46  ;;  %4170 = vmatmul.mubr.f32.gmra.mrb[2].mxu0 %v24173_v22  ;;  %6544 = vmatmul.mubr.f32.gmra.mrb[2].mxu1 %v24173_v22  ;;  %v24341_v22 = vand.u32 4294901760, %v19164_v54  ;;  %v19681_v54 = vpack.c.bf16 %v24348_v26, %v24347_v18  ;;  %v24385_v18 = vld [vmem:[#allocation218_spill] sm:$0xff]  ;;  %v24387_v26 = vld [vmem:[#allocation227_spill] sm:$0xff] }
 0x4c9   : > { %4175 = vmatprep.mubr.f32.mxu0 %v23737_v57  ;;  %6549 = vmatprep.mubr.f32.mxu1 %v23737_v57  ;;  %v24388_v50 = vand.u32 4294901760, %v24387_v26 }
 0x4ca   : > { %13605 = vmatpush1.bf16.msra.mxu0 %v19618_v8  ;;  %13795 = vmatprep.subr.bf16.mxu1 %v19624_v36  ;;  %v19663_v13 = vpack.c.bf16 %v24342_v4, %v24341_v22  ;;  %24349 = vst [vmem:[#allocation193_spill] sm:$0xff] %v19681_v54  ;;  %v24381_v22 = vand.u32 4294901760, %v24380_v61  ;;  %v24497_v8 = vld [vmem:[#allocation158_spill] sm:$0xff] }
 0x4cb   : > { %13607 = vmatprep.subr.bf16.mxu0 %v19631_v46  ;;  %13797 = vmatpush1.bf16.msra.mxu1 %v19637_v15  ;;  %v24483_v15 = vld [vmem:[#allocation261_spill] sm:$0xff] }
 0x4cc   : > { %24343 = vst [vmem:[#allocation179_spill] sm:$0xff] %v19663_v13  ;;  %4177 = vmatmul.mubr.f32.gmra.mrb[4].mxu0 %v24178_v25  ;;  %6551 = vmatmul.mubr.f32.gmra.mrb[4].mxu1 %v24178_v25  ;;  %v24353_v25 = vand.u32 4294901760, %v19244_v38  ;;  %v24360_v38 = vand.u32 4294901760, %v19280_v55  ;;  %v24369_v55 = vand.u32 4294901760, %v19332_v24  ;;  %v24374_v24 = vand.u32 4294901760, %v19396_v5 }
 0x4cd   : > { %4182 = vmatprep.mubr.f32.mxu0 %v23737_v57  ;;  %6556 = vmatprep.mubr.f32.mxu1 %v23737_v57  ;;  %v24386_v5 = vand.u32 4294901760, %v24385_v18 }
 0x4ce   : > { %13609 = vmatpush1.bf16.msra.mxu0 %v19649_v52  ;;  %13799 = vmatprep.subr.bf16.mxu1 %v19655_v14  ;;  %v19695_v30 = vpack.c.bf16 %v24354_v44, %v24353_v25  ;;  %v19713_v39 = vpack.c.bf16 %v24360_v38, %v24359_v10  ;;  %v19733_v63 = vpack.c.bf16 %v24369_v55, %v24368_v23  ;;  %v24392_v10 = vand.u32 4294901760, %v24391_v6  ;;  %v24393_v38 = vld [vmem:[#allocation114_spill] sm:$0xff] }
 0x4cf   : > { %13611 = vmatprep.subr.bf16.mxu0 %v19663_v13  ;;  %13801 = vmatpush1.bf16.msra.mxu1 %v19669_v48  ;;  %v19753_v12 = vpack.c.bf16 %v24376_v9, %v24374_v24  ;;  %v19769_v47 = vpack.c.bf16 %v24388_v50, %v24386_v5  ;;  %v7212_v25 = vsub.f32 %v18917_v37, %v23270_v56  ;;  %v24394_v7 = vand.u32 4294901760, %v24393_v38  ;;  %v24400_v24 = vld [vmem:[#allocation262_spill] sm:$0xff]  ;;  %v24408_v5 = vld [vmem:[#allocation172_spill] sm:$0xff]  ;;  %v24411_v50 = vld [vmem:[#allocation169_spill] sm:$0xff] }
 0x4d0   : > { %24355 = vst [vmem:[#allocation202_spill] sm:$0xff] %v19695_v30  ;;  %4184 = vmatmul.mubr.f32.gmra.mrb[6].mxu0 %v24183_v45  ;;  %6558 = vmatmul.mubr.f32.gmra.mrb[6].mxu1 %v24183_v45  ;;  %24361 = vst [vmem:[#allocation211_spill] sm:$0xff] %v19713_v39  ;;  %v24365_v45 = vand.u32 4294901760, %v19324_v29  ;;  %v19745_v29 = vpack.c.bf16 %v24372_v42, %v24371_v0  ;;  %v7224_v44 = vsub.f32 %v18922_v33, %v23267_v51  ;;  %v24454_v51 = vld [vmem:[#allocation249_spill] sm:$0xff]  ;;  %v24480_v48 = vld [vmem:[#allocation115_spill] sm:$0xff] }
 0x4d1   : > { %4189 = vmatprep.mubr.f32.mxu0 %v23737_v57  ;;  %6563 = vmatprep.mubr.f32.mxu1 %v23737_v57  ;;  %24370 = vst [vmem:[#allocation220_spill] sm:$0xff] %v19733_v63  ;;  %24377 = vst [vmem:[#allocation229_spill] sm:$0xff] %v19753_v12  ;;  %v19785_v27 = vpack.c.bf16 %v24394_v7, %v24392_v10  ;;  %v9586_v55 = vsub.f32 %v24383_v34, %v23266_v32  ;;  %v24399_v42 = vand.u32 4294901760, %v19484_v53  ;;  %v24409_v53 = vld [vmem:[#allocation76_spill] sm:$0xff]  ;;  %v24416_v10 = vld [vmem:[#allocation95_spill] sm:$0xff] }
 0x4d2   : > { %13613 = vmatpush1.bf16.msra.mxu0 %v19681_v54  ;;  %13803 = vmatprep.subr.bf16.mxu1 %v19687_v60  ;;  %v19727_v1 = vpack.c.bf16 %v24366_v21, %v24365_v45  ;;  %24373 = vst [vmem:[#allocation228_spill] sm:$0xff] %v19745_v29  ;;  %24389 = vst [vmem:[#allocation236_spill] sm:$0xff] %v19769_v47  ;;  %v24396_v45 = vand.u32 4294901760, %v19476_v20  ;;  %v24397_v21 = vand.u32 4294901760, %v19478_v11  ;;  %v24401_v20 = vand.u32 4294901760, %v24400_v24  ;;  %v24403_v11 = vld [vmem:[#allocation162_spill] sm:$0xff] }
 0x4d3   : > { %13615 = vmatprep.subr.bf16.mxu0 %v19695_v30  ;;  %13805 = vmatpush1.bf16.msra.mxu1 %v19701_v19  ;;  %24395 = vst [vmem:[#allocation243_spill] sm:$0xff] %v19785_v27  ;;  %v9598_v0 = vsub.f32 %v24384_v2, %v23265_v43  ;;  %v24404_v9 = vand.u32 4294901760, %v24403_v11  ;;  %v7225_v18 = vand.u32 4294901760, %v7224_v44  ;;  %v24410_v26 = vand.u32 4294901760, %v24409_v53  ;;  %v24431_v53 = vld [vmem:[#allocation225_spill] sm:$0xff] }
 0x4d4   : > { %24367 = vst [vmem:[#allocation49_spill] sm:$0xff] %v19727_v1  ;;  %4191 = vmatmul.mubr.f32.gmra.mrb[8].mxu0 %v24190_v49  ;;  %6565 = vmatmul.mubr.f32.gmra.mrb[8].mxu1 %v24190_v49  ;;  %v24378_v49 = vld [vmem:[#allocation216_spill] sm:$0xff]  ;;  %v19793_v23 = vpack.c.bf16 %v24397_v21, %v24396_v45  ;;  %v19807_v35 = vpack.c.bf16 %v24401_v20, %v24399_v42  ;;  %v24417_v38 = vand.u32 4294901760, %v24416_v10  ;;  %v9587_v45 = vand.u32 4294901760, %v9586_v55  ;;  %v24457_v32 = vld [vmem:[#allocation61_spill] sm:$0xff] }
 0x4d5   : > { %4196 = vmatprep.mubr.f32.mxu0 %v23737_v57  ;;  %6570 = vmatprep.mubr.f32.mxu1 %v23737_v57  ;;  %v24379_v58 = vand.u32 4294901760, %v24378_v49  ;;  %v24405_v49 = vld [vmem:[#allocation159_spill] sm:$0xff]  ;;  %v9599_v21 = vand.u32 4294901760, %v9598_v0  ;;  %v24419_v42 = vand.u32 4294901760, %v19558_v16  ;;  %v24420_v24 = vand.u32 4294901760, %v19560_v17  ;;  %v24423_v16 = vld [vmem:[#allocation189_spill] sm:$0xff] }
 0x4d6   : > { %13617 = vmatpush1.bf16.msra.mxu0 %v19713_v39  ;;  %13807 = vmatprep.subr.bf16.mxu1 %v19719_v28  ;;  %24398 = vst [vmem:[#allocation244_spill] sm:$0xff] %v19793_v23  ;;  %24402 = vst [vmem:[#allocation245_spill] sm:$0xff] %v19807_v35  ;;  %v24424_v17 = vld [vmem:[#allocation188_spill] sm:$0xff]  ;;  %v24425_v0 = vld [vmem:[#allocation199_spill] sm:$0xff] }
 0x4d7   : > { %v19759_v4 = vpack.c.bf16 %v24381_v22, %v24379_v58  ;;  %13619 = vmatprep.subr.bf16.mxu0 %v19727_v1  ;;  %13809 = vmatpush1.bf16.msra.mxu1 %v19733_v63  ;;  %v24406_v58 = vand.u32 4294901760, %v24405_v49  ;;  %v7213_v22 = vand.u32 4294901760, %v7212_v25  ;;  %v24414_v25 = vld [vmem:[#allocation174_spill] sm:$0xff]  ;;  %v19839_v20 = vpack.c.bf16 %v24420_v24, %v24419_v42  ;;  %v24435_v10 = vld [vmem:[#allocation240_spill] sm:$0xff]  ;;  %v1856_v24 = vld [vmem:[%s19897_s22 + $0x20] sm:$0xff] }
 0x4d8   : > { %4198 = vmatmul.mubr.f32.gmra.mrb[10].mxu0 %v24390_v40  ;;  %6572 = vmatmul.mubr.f32.gmra.mrb[10].mxu1 %v24390_v40  ;;  %v24412_v40 = vand.u32 4294901760, %v24411_v50  ;;  %v24415_v44 = vand.u32 4294901760, %v24414_v25  ;;  %v13822_v55 = vpack.c.bf16 %v9599_v21, %v9587_v45  ;;  %v24426_v49 = vld [vmem:[#allocation206_spill] sm:$0xff]  ;;  %v1852_v25 = vld [vmem:[%s19897_s22] sm:$0xff]  ;;  %v1854_v21 = vld [vmem:[%s19897_s22 + $0x10] sm:$0xff] }
 0x4d9   : > { %24382 = vst [vmem:[#allocation230_spill] sm:$0xff] %v19759_v4  ;;  %4203 = vmatprep.mubr.f32.mxu0 %v23737_v57  ;;  %6577 = vmatprep.mubr.f32.mxu1 %v23737_v57  ;;  %v19813_v61 = vpack.c.bf16 %v24406_v58, %v24404_v9  ;;  %24421 = vst [vmem:[#allocation264_spill] sm:$0xff] %v19839_v20  ;;  %v13630_v11 = vpack.c.bf16 %v7225_v18, %v7213_v22  ;;  %v24422_v9 = vld [vmem:[#allocation182_spill] sm:$0xff]  ;;  %v24427_v58 = vld [vmem:[#allocation205_spill] sm:$0xff] }
 0x4da   : > { %13621 = vmatpush1.bf16.msra.mxu0 %v19745_v29  ;;  %13811 = vmatprep.subr.bf16.mxu1 %v19753_v12  ;;  %v19825_v6 = vpack.c.bf16 %v24412_v40, %v24410_v26  ;;  %v19831_v7 = vpack.c.bf16 %v24417_v38, %v24415_v44  ;;  %v24428_v22 = vld [vmem:[#allocation36_spill] sm:$0xff]  ;;  %v24432_v26 = vld [vmem:[#allocation67_spill] sm:$0xff]  ;;  %v24433_v50 = vld [vmem:[#allocation66_spill] sm:$0xff]  ;;  %v19907_v38 = vand.u32 4294901760, %v1852_v25 }
 0x4db   : > { %13623 = vmatprep.subr.bf16.mxu0 %v19759_v4  ;;  %13813 = vmatpush1.bf16.msra.mxu1 %v19769_v47  ;;  %24407 = vst [vmem:[#allocation252_spill] sm:$0xff] %v19813_v61  ;;  %v24429_v18 = vld [vmem:[#allocation40_spill] sm:$0xff]  ;;  %v24434_v40 = vld [vmem:[#allocation234_spill] sm:$0xff]  ;;  %v24470_v19 = vld [vmem:[#allocation105_spill] sm:$0xff] }
 0x4dc   : > { %4205 = vmatmul.mubr.f32.gmra.mrb[12].mxu0 %v24408_v5  ;;  %6579 = vmatmul.mubr.f32.gmra.mrb[12].mxu1 %v24408_v5  ;;  %24413 = vst [vmem:[#allocation253_spill] sm:$0xff] %v19825_v6  ;;  %24418 = vst [vmem:[#allocation257_spill] sm:$0xff] %v19831_v7  ;;  %v24430_v5 = vld [vmem:[#allocation39_spill] sm:$0xff]  ;;  %v1853_v44 = vld [vmem:[%s19897_s22 + $0x8] sm:$0xff] }
 0x4dd   : > { %4210 = vmatprep.mubr.f32.mxu0 %v23737_v57  ;;  %6584 = vmatprep.mubr.f32.mxu1 %v23737_v57  ;;  %24436 = vst [vmem:[#allocation265_spill] sm:$0xff] %v19907_v38  ;;  %v19909_v45 = vand.u32 4294901760, %v1853_v44  ;;  %v1855_v42 = vld [vmem:[%s19897_s22 + $0x18] sm:$0xff] }
 0x4de   : > { %13625 = vmatpush1.bf16.msra.mxu0 %v19785_v27  ;;  %13815 = vmatprep.subr.bf16.mxu1 %v19793_v23  ;;  %v24463_v23 = vld [vmem:[#allocation248_spill] sm:$0xff] }
 0x4df   : > { %13627 = vmatprep.subr.bf16.mxu0 %v19807_v35  ;;  %13817 = vmatpush1.bf16.msra.mxu1 %v19813_v61  ;;  %24437 = vst [vmem:[#allocation268_spill] sm:$0xff] %v19909_v45  ;;  %v24465_v47 = vld [vmem:[#allocation68_spill] sm:$0xff] }
 0x4e0   : > { %4212 = vmatmul.mubr.f32.gmra.mrb[14].mxu0 %v24422_v9  ;;  %6586 = vmatmul.mubr.f32.gmra.mrb[14].mxu1 %v24422_v9  ;;  %v19919_v9 = vsub.f32 %v1852_v25, %v19907_v38  ;;  %v1859_v4 = vld [vmem:[%s19897_s22 + $0x38] sm:$0xff] }
 0x4e1   : > { %4217 = vmatprep.mubr.f32.mxu0 %v23737_v57  ;;  %6591 = vmatprep.mubr.f32.mxu1 %v23737_v57 }
 0x4e2   : > { %13629 = vmatpush1.bf16.msra.mxu0 %v19825_v6  ;;  %13819 = vmatprep.subr.bf16.mxu1 %v19831_v7  ;;  %24439 = vst [vmem:[#allocation274_spill] sm:$0xff] %v19919_v9 }
 0x4e3   : > { %13821 = vmatpush1.bf16.msra.mxu1 %v19839_v20  ;;  %13631 = vmatprep.subr.bf16.mxu0 %v13630_v11  ;;  %v24438_v11 = vld [vmem:[#allocation239_spill] sm:$0xff] }
 0x4e4   : > { %4219 = vmatmul.mubr.f32.gmra.mrb[16].mxu0 %v24423_v16  ;;  %6593 = vmatmul.mubr.f32.gmra.mrb[16].mxu1 %v24423_v16  ;;  %v19926_v16 = vand.u32 4294901760, %v1854_v21 }
 0x4e5   : > { %4224 = vmatprep.mubr.f32.mxu0 %v23737_v57  ;;  %6598 = vmatprep.mubr.f32.mxu1 %v23737_v57 }
 0x4e6   : > { %13823 = vmatprep.subr.bf16.mxu1 %v13822_v55  ;;  %v19922_v55 = vsub.f32 %v1853_v44, %v19909_v45  ;;  %24441 = vst [vmem:[#allocation279_spill] sm:$0xff] %v19926_v16 }
 0x4e8   : > { %4226 = vmatmul.mubr.f32.gmra.mrb[18].mxu0 %v24424_v17  ;;  %6600 = vmatmul.mubr.f32.gmra.mrb[18].mxu1 %v24424_v17  ;;  %24440 = vst [vmem:[#allocation275_spill] sm:$0xff] %v19922_v55  ;;  %v24442_v17 = vld [vmem:[#allocation45_spill] sm:$0xff] }
 0x4e9   : > { %4231 = vmatprep.mubr.f32.mxu0 %v23737_v57  ;;  %6605 = vmatprep.mubr.f32.mxu1 %v23737_v57 }
 0x4ec   : > { %4233 = vmatmul.mubr.f32.gmra.mrb[20].mxu0 %v24425_v0  ;;  %6607 = vmatmul.mubr.f32.gmra.mrb[20].mxu1 %v24425_v0  ;;  %v23268_v0 = vand.u32 4294901760, %v24442_v17 }
 0x4ed   : > { %4238 = vmatprep.mubr.f32.mxu0 %v23737_v57  ;;  %6612 = vmatprep.mubr.f32.mxu1 %v23737_v57 }
 0x4f0   : > { %4240 = vmatmul.mubr.f32.gmra.mrb[22].mxu0 %v24426_v49  ;;  %6614 = vmatmul.mubr.f32.gmra.mrb[22].mxu1 %v24426_v49  ;;  %v24443_v49 = vld [vmem:[#allocation46_spill] sm:$0xff] }
 0x4f1   : > { %4245 = vmatprep.mubr.f32.mxu0 %v23737_v57  ;;  %6619 = vmatprep.mubr.f32.mxu1 %v23737_v57 }
 0x4f4   : > { %4247 = vmatmul.mubr.f32.gmra.mrb[24].mxu0 %v24427_v58  ;;  %6621 = vmatmul.mubr.f32.gmra.mrb[24].mxu1 %v24427_v58  ;;  %v23269_v58 = vand.u32 4294901760, %v24443_v49 }
 0x4f5   : > { %4252 = vmatprep.mubr.f32.mxu0 %v23737_v57  ;;  %6626 = vmatprep.mubr.f32.mxu1 %v23737_v57 }
 0x4f6   : > { %v7230_v25 = vsub.f32 %v24443_v49, %v23269_v58 }
 0x4f8   : > { %4254 = vmatmul.mubr.f32.gmra.mrb[26].mxu0 %v24428_v22  ;;  %6628 = vmatmul.mubr.f32.gmra.mrb[26].mxu1 %v24428_v22  ;;  %v19930_v22 = vand.u32 4294901760, %v1855_v42  ;;  %v7231_v6 = vand.u32 4294901760, %v7230_v25  ;;  %v24464_v25 = vld [vmem:[#allocation73_spill] sm:$0xff] }
 0x4f9   : > { %4259 = vmatprep.mubr.f32.mxu0 %v23737_v57  ;;  %6633 = vmatprep.mubr.f32.mxu1 %v23737_v57 }
 0x4fa   : > { %24444 = vst [vmem:[#allocation157_spill] sm:$0xff] %v19930_v22  ;;  %v19954_v44 = vsub.f32 %v1855_v42, %v19930_v22 }
 0x4fc   : > { %4261 = vmatmul.mubr.f32.gmra.mrb[28].mxu0 %v24429_v18  ;;  %6635 = vmatmul.mubr.f32.gmra.mrb[28].mxu1 %v24429_v18  ;;  %v19932_v18 = vand.u32 4294901760, %v1856_v24  ;;  %24450 = vst [vmem:[#allocation50_spill] sm:$0xff] %v19954_v44 }
 0x4fd   : > { %4266 = vmatprep.mubr.f32.mxu0 %v23737_v57  ;;  %6640 = vmatprep.mubr.f32.mxu1 %v23737_v57 }
 0x4fe   : > { %24445 = vst [vmem:[#allocation151_spill] sm:$0xff] %v19932_v18 }
 0x500   : > { %4268 = vmatmul.mubr.f32.gmra.mrb[30].mxu0 %v24430_v5  ;;  %6642 = vmatmul.mubr.f32.gmra.mrb[30].mxu1 %v24430_v5  ;;  %v24446_v5 = vld [vmem:[#allocation118_spill] sm:$0xff] }
 0x501   : > { %4273 = vmatprep.mubr.f32.mxu0 %v23737_v57  ;;  %6647 = vmatprep.mubr.f32.mxu1 %v23737_v57 }
 0x504   : > { %4275 = vmatmul.mubr.f32.gmra.mrb[32].mxu0 %v24431_v53  ;;  %6649 = vmatmul.mubr.f32.gmra.mrb[32].mxu1 %v24431_v53  ;;  %v19937_v53 = vand.u32 4294901760, %v19919_v9 }
 0x505   : > { %4280 = vmatprep.mubr.f32.mxu0 %v23737_v57  ;;  %6654 = vmatprep.mubr.f32.mxu1 %v23737_v57 }
 0x506   : > { %24447 = vst [vmem:[#allocation48_spill] sm:$0xff] %v19937_v53 }
 0x508   : > { %4282 = vmatmul.mubr.f32.gmra.mrb[34].mxu0 %v24432_v26  ;;  %6656 = vmatmul.mubr.f32.gmra.mrb[34].mxu1 %v24432_v26  ;;  %v19940_v26 = vand.u32 4294901760, %v19922_v55 }
 0x509   : > { %4287 = vmatprep.mubr.f32.mxu0 %v23737_v57  ;;  %6661 = vmatprep.mubr.f32.mxu1 %v23737_v57 }
 0x50a   : > { %24448 = vst [vmem:[#allocation44_spill] sm:$0xff] %v19940_v26  ;;  %v6871_v58 = vsub.f32 %v19922_v55, %v19940_v26  ;;  %v24492_v55 = vld [vmem:[#allocation121_spill] sm:$0xff] }
 0x50c   : > { %4289 = vmatmul.mubr.f32.gmra.mrb[36].mxu0 %v24433_v50  ;;  %6663 = vmatmul.mubr.f32.gmra.mrb[36].mxu1 %v24433_v50  ;;  %v19945_v50 = vsub.f32 %v1854_v21, %v19926_v16  ;;  %v24453_v21 = vld [vmem:[#allocation52_spill] sm:$0xff]  ;;  %v24502_v16 = vld [vmem:[#allocation267_spill] sm:$0xff] }
 0x50d   : > { %4294 = vmatprep.mubr.f32.mxu0 %v23737_v57  ;;  %6668 = vmatprep.mubr.f32.mxu1 %v23737_v57  ;;  %v24462_v56 = vand.u32 4294901760, %v24453_v21 }
 0x50e   : > { %24449 = vst [vmem:[#allocation54_spill] sm:$0xff] %v19945_v50  ;;  %v19971_v42 = vand.u32 4294901760, %v19945_v50 }
 0x50f   : > { %v7248_v43 = vsub.f32 %v24453_v21, %v24462_v56 }
 0x510   : > { %4296 = vmatmul.mubr.f32.gmra.mrb[38].mxu0 %v24434_v40  ;;  %6670 = vmatmul.mubr.f32.gmra.mrb[38].mxu1 %v24434_v40  ;;  %v7218_v40 = vsub.f32 %v24442_v17, %v23268_v0  ;;  %v6860_v0 = vsub.f32 %v19919_v9, %v19937_v53  ;;  %24455 = vst [vmem:[#allocation59_spill] sm:$0xff] %v19971_v42  ;;  %v19979_v53 = vand.u32 4294901760, %v19954_v44 }
 0x511   : > { %4301 = vmatprep.mubr.f32.mxu0 %v23737_v57  ;;  %6675 = vmatprep.mubr.f32.mxu1 %v23737_v57  ;;  %v6882_v1 = vsub.f32 %v19945_v50, %v19971_v42  ;;  %v7249_v39 = vand.u32 4294901760, %v7248_v43  ;;  %v24474_v42 = vand.u32 4294901760, %v24465_v47  ;;  %v20033_v43 = vand.u32 4294901760, %v1859_v4 }
 0x512   : > { %v7219_v7 = vand.u32 4294901760, %v7218_v40  ;;  %24459 = vst [vmem:[#allocation65_spill] sm:$0xff] %v19979_v53  ;;  %v19992_v40 = vand.u32 4294901760, %v6860_v0 }
 0x513   : > { %24475 = vst [vmem:[#allocation69_spill] sm:$0xff] %v20033_v43 }
 0x514   : > { %4303 = vmatmul.mubr.f32.gmra.mrb[40].mxu0 %v24435_v10  ;;  %6677 = vmatmul.mubr.f32.gmra.mrb[40].mxu1 %v24435_v10  ;;  %v19957_v10 = vsub.f32 %v1856_v24, %v19932_v18  ;;  %v24456_v24 = vld [vmem:[#allocation60_spill] sm:$0xff]  ;;  %v20012_v63 = vpack.c.bf16 %v7231_v6, %v7219_v7  ;;  %v24473_v6 = vand.u32 4294901760, %v24464_v25 }
 0x515   : > { %4308 = vmatprep.mubr.f32.mxu0 %v23737_v57  ;;  %6682 = vmatprep.mubr.f32.mxu1 %v23737_v57  ;;  %v24467_v56 = vand.u32 4294901760, %v24456_v24 }
 0x516   : > { %24451 = vst [vmem:[#allocation155_spill] sm:$0xff] %v19957_v10  ;;  %v19982_v26 = vand.u32 4294901760, %v19957_v10  ;;  %v7242_v7 = vsub.f32 %v24464_v25, %v24473_v6  ;;  %v24477_v6 = vld [vmem:[#allocation102_spill] sm:$0xff] }
 0x517   : > { %v9592_v29 = vsub.f32 %v24456_v24, %v24467_v56 }
 0x518   : > { %4310 = vmatmul.mubr.f32.gmra.mrb[42].mxu0 %v24438_v11  ;;  %6684 = vmatmul.mubr.f32.gmra.mrb[42].mxu1 %v24438_v11  ;;  %v1857_v11 = vld [vmem:[%s19897_s22 + $0x28] sm:$0xff]  ;;  %24460 = vst [vmem:[#allocation62_spill] sm:$0xff] %v19982_v26  ;;  %v6904_v28 = vsub.f32 %v19957_v10, %v19982_v26  ;;  %v20041_v10 = vand.u32 4294901760, %v6882_v1  ;;  %v1860_v1 = vld [vmem:[%s19897_s22 + $0x40] sm:$0xff] }
 0x519   : > { %4315 = vmatprep.mubr.f32.mxu0 %v23737_v57  ;;  %6689 = vmatprep.mubr.f32.mxu1 %v23737_v57  ;;  %v19975_v20 = vand.u32 4294901760, %v1857_v11 }
 0x51b   : > { %24458 = vst [vmem:[#allocation57_spill] sm:$0xff] %v19975_v20  ;;  %v20009_v27 = vsub.f32 %v1857_v11, %v19975_v20  ;;  %v24472_v11 = vld [vmem:[#allocation255_spill] sm:$0xff]  ;;  %v24506_v20 = vld [vmem:[#allocation160_spill] sm:$0xff] }
 0x51c   : > { %4317 = vmatmul.mubr.f32.gmra.mrb[44].mxu0 %v24446_v5  ;;  %6691 = vmatmul.mubr.f32.gmra.mrb[44].mxu1 %v24446_v5  ;;  %v24452_v5 = vld [vmem:[#allocation51_spill] sm:$0xff] }
 0x51d   : > { %4322 = vmatprep.mubr.f32.mxu0 %v23737_v57  ;;  %6696 = vmatprep.mubr.f32.mxu1 %v23737_v57  ;;  %v24461_v61 = vand.u32 4294901760, %v24452_v5  ;;  %24469 = vst [vmem:[#allocation72_spill] sm:$0xff] %v20009_v27  ;;  %v20038_v60 = vand.u32 4294901760, %v20009_v27 }
 0x51f   : > { %v7236_v35 = vsub.f32 %v24452_v5, %v24461_v61  ;;  %v20000_v61 = vand.u32 4294901760, %v6871_v58  ;;  %v6893_v58 = vsub.f32 %v19954_v44, %v19979_v53  ;;  %v7254_v53 = vsub.f32 %v24465_v47, %v24474_v42  ;;  %24476 = vst [vmem:[#allocation77_spill] sm:$0xff] %v20038_v60  ;;  %v24478_v42 = vld [vmem:[#allocation103_spill] sm:$0xff] }
 0x520   : > { %4324 = vmatmul.mubr.f32.gmra.mrb[46].mxu0 %v24454_v51  ;;  %6698 = vmatmul.mubr.f32.gmra.mrb[46].mxu1 %v24454_v51  ;;  %v1858_v51 = vld [vmem:[%s19897_s22 + $0x30] sm:$0xff]  ;;  %v7243_v44 = vand.u32 4294901760, %v7242_v7  ;;  %v24487_v7 = vand.u32 4294901760, %v24478_v42 }
 0x521   : > { %4329 = vmatprep.mubr.f32.mxu0 %v23737_v57  ;;  %6703 = vmatprep.mubr.f32.mxu1 %v23737_v57  ;;  %v19996_v12 = vand.u32 4294901760, %v1858_v51  ;;  %v7237_v56 = vand.u32 4294901760, %v7236_v35  ;;  %v9593_v35 = vand.u32 4294901760, %v9592_v29  ;;  %v20046_v14 = vand.u32 4294901760, %v6893_v58 }
 0x522   : > { %v24481_v29 = vand.u32 4294901760, %v24470_v19  ;;  %v7255_v54 = vand.u32 4294901760, %v7254_v53 }
 0x523   : > { %24466 = vst [vmem:[#allocation163_spill] sm:$0xff] %v19996_v12  ;;  %v20031_v26 = vsub.f32 %v1858_v51, %v19996_v12  ;;  %v24479_v51 = vld [vmem:[#allocation112_spill] sm:$0xff]  ;;  %v20048_v52 = vpack.c.bf16 %v7249_v39, %v7237_v56  ;;  %v20063_v39 = vsub.f32 %v1859_v4, %v20033_v43  ;;  %v7272_v4 = vsub.f32 %v24478_v42, %v24487_v7 }
 0x524   : > { %4331 = vmatmul.mubr.f32.gmra.mrb[48].mxu0 %v24463_v23  ;;  %6705 = vmatmul.mubr.f32.gmra.mrb[48].mxu1 %v24463_v23  ;;  %v24468_v23 = vand.u32 4294901760, %v24457_v32  ;;  %v24488_v13 = vand.u32 4294901760, %v24479_v51  ;;  %v20091_v7 = vpack.c.bf16 %v7255_v54, %v7243_v44 }
 0x525   : > { %4336 = vmatprep.mubr.f32.mxu0 %v23737_v57  ;;  %6710 = vmatprep.mubr.f32.mxu1 %v23737_v57  ;;  %v20060_v58 = vand.u32 4294901760, %v20031_v26  ;;  %24485 = vst [vmem:[#allocation165_spill] sm:$0xff] %v20063_v39  ;;  %v20096_v3 = vand.u32 4294901760, %v20063_v39  ;;  %v7273_v44 = vand.u32 4294901760, %v7272_v4 }
 0x526   : > { %v9604_v0 = vsub.f32 %v24457_v32, %v24468_v23  ;;  %v24471_v23 = vld [vmem:[#allocation106_spill] sm:$0xff]  ;;  %v9616_v46 = vsub.f32 %v24479_v51, %v24488_v13  ;;  %v24499_v13 = vld [vmem:[#allocation41_spill] sm:$0xff] }
 0x527   : > { %v24482_v50 = vand.u32 4294901760, %v24471_v23  ;;  %24484 = vst [vmem:[#allocation74_spill] sm:$0xff] %v20060_v58  ;;  %24494 = vst [vmem:[#allocation78_spill] sm:$0xff] %v20096_v3  ;;  %v24513_v51 = vld [vmem:[#allocation173_spill] sm:$0xff] }
 0x528   : > { %4338 = vmatmul.mubr.f32.gmra.mrb[50].mxu0 %v24472_v11  ;;  %6712 = vmatmul.mubr.f32.gmra.mrb[50].mxu1 %v24472_v11  ;;  %v9605_v11 = vand.u32 4294901760, %v9604_v0  ;;  %v9610_v0 = vsub.f32 %v24470_v19, %v24481_v29  ;;  %v6915_v29 = vsub.f32 %v20009_v27, %v20038_v60  ;;  %v24491_v27 = vld [vmem:[#allocation120_spill] sm:$0xff]  ;;  %v9617_v43 = vand.u32 4294901760, %v9616_v46  ;;  %v24530_v19 = vld [vmem:[#allocation33_spill] sm:$0xff] }
 0x529   : > { %4343 = vmatprep.mubr.f32.mxu0 %v23737_v57  ;;  %6717 = vmatprep.mubr.f32.mxu1 %v23737_v57  ;;  %v9622_v30 = vsub.f32 %v24471_v23, %v24482_v50  ;;  %v20069_v50 = vand.u32 4294901760, %v6904_v28  ;;  %v24500_v22 = vand.u32 4294901760, %v24491_v27  ;;  %v24525_v23 = vld [vmem:[#allocation272_spill] sm:$0xff] }
 0x52a   : > { %v20067_v56 = vpack.c.bf16 %v9605_v11, %v9593_v35  ;;  %v24489_v35 = vand.u32 4294901760, %v24480_v48  ;;  %v20085_v11 = vand.u32 4294901760, %v1860_v1  ;;  %v9611_v36 = vand.u32 4294901760, %v9610_v0  ;;  %v24496_v0 = vld [vmem:[#allocation32_spill] sm:$0xff] }
 0x52b   : > { %v9623_v60 = vand.u32 4294901760, %v9622_v30 }
 0x52c   : > { %4345 = vmatmul.mubr.f32.gmra.mrb[52].mxu0 %v24483_v15  ;;  %6719 = vmatmul.mubr.f32.gmra.mrb[52].mxu1 %v24483_v15  ;;  %v24486_v15 = vand.u32 4294901760, %v24477_v6  ;;  %v9628_v28 = vsub.f32 %v24480_v48, %v24489_v35  ;;  %24490 = vst [vmem:[#allocation79_spill] sm:$0xff] %v20085_v11  ;;  %v24495_v35 = vld [vmem:[#allocation30_spill] sm:$0xff]  ;;  %v20108_v41 = vsub.f32 %v1860_v1, %v20085_v11  ;;  %v24505_v1 = vld [vmem:[#allocation153_spill] sm:$0xff]  ;;  %v24508_v11 = vand.u32 4294901760, %v24497_v8 }
 0x52d   : > { %4350 = vmatprep.mubr.f32.mxu0 %v23737_v57  ;;  %6724 = vmatprep.mubr.f32.mxu1 %v23737_v57  ;;  %v20105_v18 = vpack.c.bf16 %v9623_v60, %v9611_v36  ;;  %v24503_v46 = vand.u32 4294901760, %v24495_v35  ;;  %v24504_v60 = vld [vmem:[#allocation38_spill] sm:$0xff] }
 0x52e   : > { %v7260_v53 = vsub.f32 %v24477_v6, %v24486_v15  ;;  %v9629_v12 = vand.u32 4294901760, %v9628_v28  ;;  %v24501_v15 = vand.u32 4294901760, %v24492_v55  ;;  %v24515_v6 = vld [vmem:[#allocation273_spill] sm:$0xff] }
 0x52f   : > { %v9634_v36 = vsub.f32 %v24495_v35, %v24503_v46  ;;  %v7284_v46 = vsub.f32 %v24497_v8, %v24508_v11  ;;  %v24514_v11 = vld [vmem:[#allocation176_spill] sm:$0xff] }
 0x530   : > { %4352 = vmatmul.mubr.f32.gmra.mrb[54].mxu0 %v24493_v31  ;;  %6726 = vmatmul.mubr.f32.gmra.mrb[54].mxu1 %v24493_v31  ;;  %v7261_v30 = vand.u32 4294901760, %v7260_v53  ;;  %v24498_v31 = vld [vmem:[#allocation35_spill] sm:$0xff]  ;;  %v7266_v53 = vsub.f32 %v24491_v27, %v24500_v22  ;;  %v7278_v9 = vsub.f32 %v24492_v55, %v24501_v15  ;;  %v20126_v22 = vand.u32 4294901760, %v6915_v29  ;;  %v24511_v27 = vld [vmem:[#allocation166_spill] sm:$0xff] }
 0x531   : > { %4357 = vmatprep.mubr.f32.mxu0 %v23737_v57  ;;  %6731 = vmatprep.mubr.f32.mxu1 %v23737_v57  ;;  %v24507_v15 = vand.u32 4294901760, %v24496_v0  ;;  %v24509_v4 = vand.u32 4294901760, %v24498_v31  ;;  %v20139_v54 = vpack.c.bf16 %v9629_v12, %v9617_v43  ;;  %v24510_v55 = vand.u32 4294901760, %v24499_v13 }
 0x532   : > { %v20137_v35 = vpack.c.bf16 %v7273_v44, %v7261_v30  ;;  %v23386_v45 = vand.u32 4294901760, %v24511_v27  ;;  %v7267_v48 = vand.u32 4294901760, %v7266_v53  ;;  %v7279_v30 = vand.u32 4294901760, %v7278_v9 }
 0x533   : > { %v7296_v28 = vsub.f32 %v24498_v31, %v24509_v4  ;;  %v9640_v29 = vsub.f32 %v24499_v13, %v24510_v55  ;;  %v24516_v12 = vand.u32 4294901760, %v24504_v60  ;;  %v24517_v55 = vand.u32 4294901760, %v24505_v1 }
 0x534   : > { %4359 = vmatmul.mubr.f32.gmra.mrb[56].mxu0 %v24502_v16  ;;  %6733 = vmatmul.mubr.f32.gmra.mrb[56].mxu1 %v24502_v16  ;;  %v9646_v16 = vsub.f32 %v24496_v0, %v24507_v15  ;;  %v24512_v15 = vld [vmem:[#allocation168_spill] sm:$0xff]  ;;  %v24518_v53 = vand.u32 4294901760, %v24506_v20  ;;  %v9635_v8 = vand.u32 4294901760, %v9634_v36 }
 0x535   : > { %4364 = vmatprep.mubr.f32.mxu0 %v23737_v57  ;;  %6738 = vmatprep.mubr.f32.mxu1 %v23737_v57  ;;  %v9652_v43 = vsub.f32 %v24504_v60, %v24516_v12  ;;  %v7290_v44 = vsub.f32 %v24505_v1, %v24517_v55  ;;  %v7297_v9 = vand.u32 4294901760, %v7296_v28  ;;  %v9641_v0 = vand.u32 4294901760, %v9640_v29  ;;  %v24519_v60 = vld [vmem:[#allocation29_spill] sm:$0xff]  ;;  %v24520_v55 = vld [vmem:[#allocation31_spill] sm:$0xff] }
 0x536   : > { %v7302_v4 = vsub.f32 %v24506_v20, %v24518_v53  ;;  %v9647_v42 = vand.u32 4294901760, %v9646_v16  ;;  %v9658_v12 = vsub.f32 %v24511_v27, %v23386_v45  ;;  %v24521_v31 = vand.u32 4294901760, %v24512_v15  ;;  %v24526_v27 = vld [vmem:[#allocation116_spill] sm:$0xff]  ;;  %v24527_v29 = vld [vmem:[#allocation111_spill] sm:$0xff] }
 0x537   : > { %v24522_v20 = vand.u32 4294901760, %v24513_v51  ;;  %v24523_v16 = vand.u32 4294901760, %v24514_v11  ;;  %v9653_v45 = vand.u32 4294901760, %v9652_v43  ;;  %v7291_v1 = vand.u32 4294901760, %v7290_v44 }
 0x538   : > { %4366 = vmatmul.mubr.f32.gmra.mrb[58].mxu0 %v24515_v6  ;;  %6740 = vmatmul.mubr.f32.gmra.mrb[58].mxu1 %v24515_v6  ;;  %v7285_v6 = vand.u32 4294901760, %v7284_v46  ;;  %v9670_v53 = vsub.f32 %v24512_v15, %v24521_v31  ;;  %v24524_v46 = vld [vmem:[#allocation184_spill] sm:$0xff]  ;;  %v7303_v13 = vand.u32 4294901760, %v7302_v4  ;;  %v20183_v31 = vpack.c.bf16 %v9647_v42, %v9635_v8  ;;  %v24534_v15 = vld [vmem:[#allocation34_spill] sm:$0xff] }
 0x539   : > { %4371 = vmatprep.mubr.f32.mxu0 %v23737_v57  ;;  %6745 = vmatprep.mubr.f32.mxu1 %v23737_v57  ;;  %v7308_v36 = vsub.f32 %v24513_v51, %v24522_v20  ;;  %v7320_v28 = vsub.f32 %v24514_v11, %v24523_v16  ;;  %v20181_v20 = vpack.c.bf16 %v7279_v30, %v7267_v48  ;;  %v23400_v11 = vand.u32 4294901760, %v24527_v29 }
 0x53a   : > { %v20185_v16 = vpack.c.bf16 %v7297_v9, %v7285_v6  ;;  %v9659_v51 = vand.u32 4294901760, %v9658_v12  ;;  %v24529_v44 = vand.u32 4294901760, %v24520_v55  ;;  %v9671_v47 = vand.u32 4294901760, %v9670_v53  ;;  %v24532_v6 = vld [vmem:[#allocation278_spill] sm:$0xff]  ;;  %v24539_v53 = vld [vmem:[#allocation201_spill] sm:$0xff] }
 0x53b   : > { %v7309_v48 = vand.u32 4294901760, %v7308_v36  ;;  %v7321_v30 = vand.u32 4294901760, %v7320_v28  ;;  %v24531_v8 = vand.u32 4294901760, %v24524_v46  ;;  %v20200_v9 = vpack.c.bf16 %v9653_v45, %v9641_v0  ;;  %v24535_v28 = vld [vmem:[#allocation119_spill] sm:$0xff]  ;;  %v24536_v45 = vld [vmem:[#allocation192_spill] sm:$0xff] }
 0x53c   : > { %4373 = vmatmul.mubr.f32.gmra.mrb[60].mxu0 %v24525_v23  ;;  %6747 = vmatmul.mubr.f32.gmra.mrb[60].mxu1 %v24525_v23  ;;  %v24528_v23 = vand.u32 4294901760, %v24519_v60  ;;  %v9676_v4 = vsub.f32 %v24520_v55, %v24529_v44  ;;  %v20202_v12 = vpack.c.bf16 %v7303_v13, %v7291_v1  ;;  %v9682_v36 = vsub.f32 %v24527_v29, %v23400_v11  ;;  %v24537_v13 = vld [vmem:[#allocation191_spill] sm:$0xff]  ;;  %v24540_v55 = vld [vmem:[#allocation209_spill] sm:$0xff] }
 0x53d   : > { %4378 = vmatprep.mubr.f32.mxu0 %v23737_v57  ;;  %6752 = vmatprep.mubr.f32.mxu1 %v23737_v57  ;;  %v7314_v42 = vsub.f32 %v24524_v46, %v24531_v8  ;;  %v24538_v46 = vand.u32 4294901760, %v24530_v19  ;;  %v20221_v25 = vpack.c.bf16 %v9671_v47, %v9659_v51  ;;  %v20223_v38 = vpack.c.bf16 %v7321_v30, %v7309_v48  ;;  %v20235_v47 = vld [vmem:[%s19897_s22 + $0x48] sm:$0xff]  ;;  %v24548_v29 = vld [vmem:[#allocation235_spill] sm:$0xff] }
 0x53e   : > { %v9664_v43 = vsub.f32 %v24519_v60, %v24528_v23  ;;  %v24533_v23 = vand.u32 4294901760, %v24526_v27  ;;  %v23406_v60 = vand.u32 4294901760, %v24540_v55  ;;  %v9677_v11 = vand.u32 4294901760, %v9676_v4 }
 0x53f   : > { %v7315_v8 = vand.u32 4294901760, %v7314_v42  ;;  %v24541_v1 = vand.u32 4294901760, %v24534_v15  ;;  %v9683_v51 = vand.u32 4294901760, %v9682_v36  ;;  %v24544_v4 = vand.u32 4294901760, %v24535_v28 }
 0x540   : > { %4380 = vmatmul.mubr.f32.gmra.mrb[62].mxu0 %v24532_v6  ;;  %6754 = vmatmul.mubr.f32.gmra.mrb[62].mxu1 %v24532_v6  ;;  %v7326_v44 = vsub.f32 %v24526_v27, %v24533_v23  ;;  %v9665_v6 = vand.u32 4294901760, %v9664_v43  ;;  %v9694_v23 = vsub.f32 %v24530_v19, %v24538_v46  ;;  %v24542_v46 = vld [vmem:[#allocation71_spill] sm:$0xff]  ;;  %v24543_v27 = vld [vmem:[#allocation64_spill] sm:$0xff]  ;;  %v24545_v48 = vand.u32 4294901760, %v24536_v45 }
 0x541   : > { %6856 = vmatprep.mubr.f32.mxu0 %v23737_v57  ;;  %9230 = vmatprep.mubr.f32.mxu1 %v23737_v57  ;;  %v7332_v0 = vsub.f32 %v24534_v15, %v24541_v1  ;;  %v24546_v42 = vand.u32 4294901760, %v24537_v13  ;;  %v24547_v36 = vand.u32 4294901760, %v24539_v53 }
 0x542   : > { %v7327_v43 = vand.u32 4294901760, %v7326_v44  ;;  %v9688_v30 = vsub.f32 %v24536_v45, %v24545_v48  ;;  %v20256_v19 = vpack.c.bf16 %v9677_v11, %v9665_v6  ;;  %v24550_v45 = vld [vmem:[#allocation251_spill] sm:$0xff]  ;;  %v24554_v6 = vand.u32 4294901760, %v24543_v27 }
 0x543   : > { %v9700_v44 = vsub.f32 %v24537_v13, %v24546_v42  ;;  %v7338_v1 = vsub.f32 %v24539_v53, %v24547_v36  ;;  %v24549_v42 = vld [vmem:[#allocation242_spill] sm:$0xff]  ;;  %v20264_v36 = vand.u32 4294901760, %v20235_v47 }
 0x544   : > { %6862 = vmatmul.mubr.f32.vlgmr.msra.gmra.mrb[0].mxu0 %v19992_v40  ;;  %9236 = vmatmul.mubr.f32.vlgmr.msra.gmra.mrb[0].mxu1 %v19992_v40  ;;  %v7344_v40 = vsub.f32 %v24535_v28, %v24544_v4  ;;  %v7350_v4 = vsub.f32 %v24540_v55, %v23406_v60  ;;  %v20267_v60 = vld [vmem:[%s19897_s22 + $0x50] sm:$0xff]  ;;  %v20269_v48 = vpack.c.bf16 %v7327_v43, %v7315_v8  ;;  %v9689_v13 = vand.u32 4294901760, %v9688_v30 }
 0x545   : > { %13633 = vmatpush1.bf16.msra.mxu0 %v20012_v63  ;;  %6867 = vmatprep.mubr.f32.mxu0 %v23737_v57  ;;  %v9695_v63 = vand.u32 4294901760, %v9694_v23  ;;  %24552 = vst [vmem:[#allocation81_spill] sm:$0xff] %v20264_v36  ;;  %v9718_v28 = vsub.f32 %v24543_v27, %v24554_v6  ;;  %v9701_v55 = vand.u32 4294901760, %v9700_v44  ;;  %v7339_v43 = vand.u32 4294901760, %v7338_v1  ;;  %v24561_v1 = vld [vmem:[#allocation263_spill] sm:$0xff]  ;;  %v24567_v27 = vld [vmem:[#allocation92_spill] sm:$0xff] }
 0x546   : > { %9241 = vmatprep.mubr.f32.mxu1 %v23737_v57  ;;  %13635 = vmatprep.subr.bf16.mxu0 %v20048_v52  ;;  %v24551_v52 = vld [vmem:[#allocation250_spill] sm:$0xff]  ;;  %v7345_v23 = vand.u32 4294901760, %v7344_v40  ;;  %v24557_v40 = vand.u32 4294901760, %v24549_v42 }
 0x547   : > { %13825 = vmatpush1.bf16.msra.mxu1 %v20067_v56  ;;  %v24553_v56 = vand.u32 4294901760, %v24542_v46  ;;  %v20281_v8 = vpack.c.bf16 %v9695_v63, %v9683_v51  ;;  %v24559_v30 = vand.u32 4294901760, %v24551_v52 }
 0x548   : > { %6873 = vmatmul.mubr.f32.gmra.mrb[2].mxu0 %v20000_v61  ;;  %9247 = vmatmul.mubr.f32.gmra.mrb[2].mxu1 %v20000_v61  ;;  %v7333_v61 = vand.u32 4294901760, %v7332_v0  ;;  %v20289_v0 = vand.u32 4294901760, %v20267_v60 }
 0x549   : > { %v9706_v11 = vsub.f32 %v24542_v46, %v24553_v56  ;;  %6878 = vmatprep.mubr.f32.mxu0 %v23737_v57  ;;  %9252 = vmatprep.mubr.f32.mxu1 %v23737_v57  ;;  %v7351_v56 = vand.u32 4294901760, %v7350_v4  ;;  %v24555_v46 = vand.u32 4294901760, %v24548_v29  ;;  %v9724_v44 = vsub.f32 %v24551_v52, %v24559_v30  ;;  %v24564_v30 = vld [vmem:[#allocation84_spill] sm:$0xff]  ;;  %v24565_v4 = vld [vmem:[#allocation75_spill] sm:$0xff] }
 0x54a   : > { %13637 = vmatpush1.bf16.msra.mxu0 %v20091_v7  ;;  %13827 = vmatprep.subr.bf16.mxu1 %v20105_v18  ;;  %24556 = vst [vmem:[#allocation80_spill] sm:$0xff] %v20289_v0  ;;  %v7368_v7 = vsub.f32 %v24549_v42, %v24557_v40  ;;  %v24558_v18 = vand.u32 4294901760, %v24550_v45  ;;  %v13650_v40 = vpack.c.bf16 %v7345_v23, %v7333_v61  ;;  %v24563_v42 = vld [vmem:[#allocation83_spill] sm:$0xff]  ;;  %v23414_v63 = vand.u32 4294901760, %v24565_v4 }
 0x54b   : > { %v7356_v6 = vsub.f32 %v24548_v29, %v24555_v46  ;;  %13639 = vmatprep.subr.bf16.mxu0 %v20137_v35  ;;  %13829 = vmatpush1.bf16.msra.mxu1 %v20139_v54  ;;  %v9707_v35 = vand.u32 4294901760, %v9706_v11  ;;  %v9719_v54 = vand.u32 4294901760, %v9718_v28  ;;  %v24560_v46 = vld [vmem:[#allocation256_spill] sm:$0xff]  ;;  %v20311_v28 = vpack.c.bf16 %v7351_v56, %v7339_v43  ;;  %v24576_v29 = vld [vmem:[#allocation93_spill] sm:$0xff] }
 0x54c   : > { %v9712_v51 = vsub.f32 %v24550_v45, %v24558_v18  ;;  %6884 = vmatmul.mubr.f32.gmra.mrb[4].mxu0 %v20041_v10  ;;  %9258 = vmatmul.mubr.f32.gmra.mrb[4].mxu1 %v20041_v10  ;;  %v24562_v18 = vld [vmem:[#allocation164_spill] sm:$0xff]  ;;  %v13840_v10 = vpack.c.bf16 %v9701_v55, %v9689_v13  ;;  %v7369_v23 = vand.u32 4294901760, %v7368_v7  ;;  %v24566_v45 = vld [vmem:[#allocation91_spill] sm:$0xff]  ;;  %v24572_v7 = vand.u32 4294901760, %v24564_v30 }
 0x54d   : > { %6889 = vmatprep.mubr.f32.mxu0 %v23737_v57  ;;  %9263 = vmatprep.mubr.f32.mxu1 %v23737_v57  ;;  %v7357_v11 = vand.u32 4294901760, %v7356_v6  ;;  %v13842_v55 = vpack.c.bf16 %v9719_v54, %v9707_v35  ;;  %v24570_v43 = vand.u32 4294901760, %v24562_v18  ;;  %v7392_v54 = vsub.f32 %v24565_v4, %v23414_v63 }
 0x54e   : > { %13641 = vmatpush1.bf16.msra.mxu0 %v20181_v20  ;;  %13831 = vmatprep.subr.bf16.mxu1 %v20183_v31  ;;  %v9713_v61 = vand.u32 4294901760, %v9712_v51  ;;  %v9725_v20 = vand.u32 4294901760, %v9724_v44  ;;  %v24568_v31 = vand.u32 4294901760, %v24560_v46  ;;  %v7380_v51 = vsub.f32 %v24564_v30, %v24572_v7  ;;  %v24573_v44 = vld [vmem:[#allocation86_spill] sm:$0xff] }
 0x54f   : > { %13643 = vmatprep.subr.bf16.mxu0 %v20185_v16  ;;  %13833 = vmatpush1.bf16.msra.mxu1 %v20200_v9  ;;  %v24569_v16 = vand.u32 4294901760, %v24561_v1  ;;  %v9730_v56 = vsub.f32 %v24562_v18, %v24570_v43  ;;  %v24575_v43 = vld [vmem:[#allocation96_spill] sm:$0xff]  ;;  %v24577_v7 = vand.u32 4294901760, %v24566_v45 }
 0x550   : > { %6895 = vmatmul.mubr.f32.gmra.mrb[6].mxu0 %v20046_v14  ;;  %9269 = vmatmul.mubr.f32.gmra.mrb[6].mxu1 %v20046_v14  ;;  %v7362_v13 = vsub.f32 %v24560_v46, %v24568_v31  ;;  %v24571_v14 = vand.u32 4294901760, %v24563_v42  ;;  %v24574_v31 = vld [vmem:[#allocation87_spill] sm:$0xff]  ;;  %v7381_v4 = vand.u32 4294901760, %v7380_v51 }
 0x551   : > { %v7374_v9 = vsub.f32 %v24561_v1, %v24569_v16  ;;  %6900 = vmatprep.mubr.f32.mxu0 %v23737_v57  ;;  %9274 = vmatprep.mubr.f32.mxu1 %v23737_v57  ;;  %v23417_v16 = vand.u32 4294901760, %v19594_v62 }
 0x552   : > { %v9742_v6 = vsub.f32 %v24563_v42, %v24571_v14  ;;  %13645 = vmatpush1.bf16.msra.mxu0 %v20202_v12  ;;  %13835 = vmatprep.subr.bf16.mxu1 %v20221_v25  ;;  %v9736_v12 = vsub.f32 %v24566_v45, %v24577_v7  ;;  %v24578_v25 = vand.u32 4294901760, %v24567_v27  ;;  %v13654_v14 = vpack.c.bf16 %v7369_v23, %v7357_v11 }
 0x553   : > { %13647 = vmatprep.subr.bf16.mxu0 %v20223_v38  ;;  %13837 = vmatpush1.bf16.msra.mxu1 %v20256_v19  ;;  %v13844_v38 = vpack.c.bf16 %v9725_v20, %v9713_v61  ;;  %v7363_v52 = vand.u32 4294901760, %v7362_v13  ;;  %v7375_v19 = vand.u32 4294901760, %v7374_v9  ;;  %v9731_v7 = vand.u32 4294901760, %v9730_v56 }
 0x554   : > { %v9748_v35 = vsub.f32 %v24567_v27, %v24578_v25  ;;  %6906 = vmatmul.mubr.f32.gmra.mrb[8].mxu0 %v20069_v50  ;;  %9280 = vmatmul.mubr.f32.gmra.mrb[8].mxu1 %v20069_v50  ;;  %v9743_v45 = vand.u32 4294901760, %v9742_v6  ;;  %v24579_v25 = vand.u32 4294901760, %v24573_v44  ;;  %v7393_v50 = vand.u32 4294901760, %v7392_v54 }
 0x555   : > { %6911 = vmatprep.mubr.f32.mxu0 %v23737_v57  ;;  %9285 = vmatprep.mubr.f32.mxu1 %v23737_v57  ;;  %v24580_v11 = vand.u32 4294901760, %v24574_v31  ;;  %v24581_v61 = vand.u32 4294901760, %v24575_v43  ;;  %v24582_v13 = vand.u32 4294901760, %v24576_v29  ;;  %v9737_v56 = vand.u32 4294901760, %v9736_v12  ;;  %v1863_v12 = vld [vmem:[%s19897_s22 + $0x58] sm:$0xff] }
 0x556   : > { %v7386_v63 = vsub.f32 %v24573_v44, %v24579_v25  ;;  %13649 = vmatpush1.bf16.msra.mxu0 %v20269_v48  ;;  %13839 = vmatprep.subr.bf16.mxu1 %v20281_v8  ;;  %v9749_v48 = vand.u32 4294901760, %v9748_v35  ;;  %v24583_v8 = vand.u32 4294901760, %v19589_v59  ;;  %v9772_v51 = vsub.f32 %v19594_v62, %v23417_v16 }
 0x557   : > { %v7398_v23 = vsub.f32 %v24574_v31, %v24580_v11  ;;  %v9754_v20 = vsub.f32 %v24575_v43, %v24581_v61  ;;  %v9766_v9 = vsub.f32 %v24576_v29, %v24582_v13  ;;  %13651 = vmatprep.subr.bf16.mxu0 %v13650_v40  ;;  %13841 = vmatpush1.bf16.msra.mxu1 %v13840_v10  ;;  %v20388_v10 = vand.u32 4294901760, %v20108_v41 }
 0x558   : > { %v9760_v6 = vsub.f32 %v19589_v59, %v24583_v8  ;;  %6917 = vmatmul.mubr.f32.gmra.mrb[10].mxu0 %v20126_v22  ;;  %9291 = vmatmul.mubr.f32.gmra.mrb[10].mxu1 %v20126_v22  ;;  %v24584_v54 = vsub.f32 %v20031_v26, %v20060_v58  ;;  %v6937_v40 = vsub.f32 %v20063_v39, %v20096_v3  ;;  %v7387_v13 = vand.u32 4294901760, %v7386_v63 }
 0x559   : > { %24585 = vst [vmem:[#allocation88_spill] sm:$0xff] %v20388_v10  ;;  %v20392_v35 = vsub.f32 %v20235_v47, %v20264_v36  ;;  %6922 = vmatprep.mubr.f32.mxu0 %v23737_v57  ;;  %9296 = vmatprep.mubr.f32.mxu1 %v23737_v57  ;;  %v20398_v22 = vsub.f32 %v20267_v60, %v20289_v0  ;;  %v7399_v8 = vand.u32 4294901760, %v7398_v23  ;;  %v9767_v47 = vand.u32 4294901760, %v9766_v9 }
 0x55a   : > { %v6927_v25 = vand.u32 4294901760, %v24584_v54  ;;  %v13656_v11 = vpack.c.bf16 %v7375_v19, %v7363_v52  ;;  %v13846_v61 = vpack.c.bf16 %v9743_v45, %v9731_v7  ;;  %13653 = vmatpush1.bf16.msra.mxu0 %v20311_v28  ;;  %13843 = vmatprep.subr.bf16.mxu1 %v13842_v55  ;;  %v9755_v54 = vand.u32 4294901760, %v9754_v20  ;;  %v1864_v28 = vld [vmem:[%s19897_s22 + $0x60] sm:$0xff] }
 0x55b   : > { %13655 = vmatprep.subr.bf16.mxu0 %v13654_v14  ;;  %13845 = vmatpush1.bf16.msra.mxu1 %v13844_v38  ;;  %v13658_v16 = vpack.c.bf16 %v7393_v50, %v7381_v4  ;;  %v13848_v3 = vpack.c.bf16 %v9749_v48, %v9737_v56  ;;  %v9761_v58 = vand.u32 4294901760, %v9760_v6  ;;  %v9773_v39 = vand.u32 4294901760, %v9772_v51  ;;  %v1866_v6 = vld [vmem:[%s19897_s22 + $0x70] sm:$0xff] }
 0x55c   : > { %6928 = vmatmul.mubr.f32.gmra.mrb[12].mxu0 %v6927_v25  ;;  %9302 = vmatmul.mubr.f32.gmra.mrb[12].mxu1 %v6927_v25  ;;  %v6938_v60 = vand.u32 4294901760, %v6937_v40  ;;  %v6948_v45 = vsub.f32 %v20108_v41, %v20388_v10  ;;  %v20405_v52 = vand.u32 4294901760, %v20392_v35  ;;  %v20407_v63 = vand.u32 4294901760, %v1863_v12 }
 0x55d   : > { %6933 = vmatprep.mubr.f32.mxu0 %v23737_v57  ;;  %9307 = vmatprep.mubr.f32.mxu1 %v23737_v57  ;;  %v13660_v4 = vpack.c.bf16 %v7399_v8, %v7387_v13  ;;  %v13850_v55 = vpack.c.bf16 %v9767_v47, %v9755_v54  ;;  %v20413_v14 = vand.u32 4294901760, %v20398_v22  ;;  %v13852_v38 = vpack.c.bf16 %v9773_v39, %v9761_v58 }
 0x55e   : > { %24586 = vst [vmem:[#allocation82_spill] sm:$0xff] %v20405_v52  ;;  %24587 = vst [vmem:[#allocation90_spill] sm:$0xff] %v20407_v63  ;;  %13657 = vmatpush1.bf16.msra.mxu0 %v13656_v11  ;;  %13847 = vmatprep.subr.bf16.mxu1 %v13846_v61  ;;  %v13662_v19 = vpack.c.bf16 %v18922_v33, %v18917_v37  ;;  %v6949_v7 = vand.u32 4294901760, %v6948_v45  ;;  %v6959_v50 = vsub.f32 %v20392_v35, %v20405_v52  ;;  %v1867_v61 = vld [vmem:[%s19897_s22 + $0x78] sm:$0xff]  ;;  %v1868_v45 = vld [vmem:[%s19897_s22 + $0x80] sm:$0xff] }
 0x55f   : > { %24588 = vst [vmem:[#allocation89_spill] sm:$0xff] %v20413_v14  ;;  %13659 = vmatprep.subr.bf16.mxu0 %v13658_v16  ;;  %13849 = vmatpush1.bf16.msra.mxu1 %v13848_v3  ;;  %v20420_v23 = vsub.f32 %v1863_v12, %v20407_v63  ;;  %v20422_v20 = vand.u32 4294901760, %v1864_v28  ;;  %v1865_v3 = vld [vmem:[%s19897_s22 + $0x68] sm:$0xff]  ;;  %v13854_v58 = vpack.c.bf16 %v24384_v2, %v24383_v34  ;;  %v20450_v11 = vand.u32 4294901760, %v1866_v6  ;;  %v1875_v52 = vld [vmem:[%s19897_s22 + $0xb8] sm:$0xff] }
 0x560   : > { %6939 = vmatmul.mubr.f32.gmra.mrb[14].mxu0 %v6938_v60  ;;  %9313 = vmatmul.mubr.f32.gmra.mrb[14].mxu1 %v6938_v60  ;;  %v6970_v39 = vsub.f32 %v20398_v22, %v20413_v14  ;;  %v6960_v16 = vand.u32 4294901760, %v6959_v50  ;;  %v20437_v48 = vand.u32 4294901760, %v1865_v3  ;;  %v20455_v13 = vand.u32 4294901760, %v1867_v61 }
 0x561   : > { %24589 = vst [vmem:[#allocation104_spill] sm:$0xff] %v20420_v23  ;;  %24590 = vst [vmem:[#allocation101_spill] sm:$0xff] %v20422_v20  ;;  %6944 = vmatprep.mubr.f32.mxu0 %v23737_v57  ;;  %9318 = vmatprep.mubr.f32.mxu1 %v23737_v57  ;;  %v20432_v9 = vand.u32 4294901760, %v20420_v23  ;;  %v20435_v56 = vsub.f32 %v1864_v28, %v20422_v20  ;;  %v20463_v60 = vsub.f32 %v1866_v6, %v20450_v11  ;;  %v1870_v6 = vld [vmem:[%s19897_s22 + $0x90] sm:$0xff] }
 0x562   : > { %13661 = vmatpush1.bf16.msra.mxu0 %v13660_v4  ;;  %13851 = vmatprep.subr.bf16.mxu1 %v13850_v55  ;;  %24593 = vst [vmem:[#allocation208_spill] sm:$0xff] %v20437_v48  ;;  %v6971_v51 = vand.u32 4294901760, %v6970_v39  ;;  %v20448_v12 = vsub.f32 %v1865_v3, %v20437_v48  ;;  %24596 = vst [vmem:[#allocation53_spill] sm:$0xff] %v20450_v11  ;;  %v20469_v28 = vsub.f32 %v1867_v61, %v20455_v13 }
 0x563   : > { %13853 = vmatpush1.bf16.msra.mxu1 %v13852_v38  ;;  %13663 = vmatprep.subr.bf16.mxu0 %v13662_v19  ;;  %24591 = vst [vmem:[#allocation110_spill] sm:$0xff] %v20432_v9  ;;  %24592 = vst [vmem:[#allocation107_spill] sm:$0xff] %v20435_v56  ;;  %v6981_v25 = vsub.f32 %v20420_v23, %v20432_v9  ;;  %v20445_v40 = vand.u32 4294901760, %v20435_v56  ;;  %v20474_v38 = vand.u32 4294901760, %v20463_v60  ;;  %v20476_v19 = vand.u32 4294901760, %v1868_v45  ;;  %v1874_v9 = vld [vmem:[%s19897_s22 + $0xb0] sm:$0xff] }
 0x564   : > { %6950 = vmatmul.mubr.f32.gmra.mrb[16].mxu0 %v6949_v7  ;;  %9324 = vmatmul.mubr.f32.gmra.mrb[16].mxu1 %v6949_v7  ;;  %24595 = vst [vmem:[#allocation219_spill] sm:$0xff] %v20448_v12  ;;  %24597 = vst [vmem:[#allocation55_spill] sm:$0xff] %v20455_v13  ;;  %v20460_v47 = vand.u32 4294901760, %v20448_v12  ;;  %v1869_v7 = vld [vmem:[%s19897_s22 + $0x88] sm:$0xff]  ;;  %v20482_v50 = vand.u32 4294901760, %v20469_v28  ;;  %v20559_v10 = vand.u32 4294901760, %v1875_v52 }
 0x565   : > { %6955 = vmatprep.mubr.f32.mxu0 %v23737_v57  ;;  %9329 = vmatprep.mubr.f32.mxu1 %v23737_v57  ;;  %24594 = vst [vmem:[#allocation216_spill] sm:$0xff] %v20445_v40  ;;  %v6982_v8 = vand.u32 4294901760, %v6981_v25  ;;  %v6992_v54 = vsub.f32 %v20435_v56, %v20445_v40  ;;  %24599 = vst [vmem:[#allocation227_spill] sm:$0xff] %v20463_v60  ;;  %v20487_v39 = vsub.f32 %v1868_v45, %v20476_v19  ;;  %v1871_v45 = vld [vmem:[%s19897_s22 + $0x98] sm:$0xff] }
 0x566   : > { %13855 = vmatprep.subr.bf16.mxu1 %v13854_v58  ;;  %24598 = vst [vmem:[#allocation218_spill] sm:$0xff] %v20460_v47  ;;  %24600 = vst [vmem:[#allocation170_spill] sm:$0xff] %v20469_v28  ;;  %v7003_v55 = vsub.f32 %v20448_v12, %v20460_v47  ;;  %v7014_v58 = vsub.f32 %v20463_v60, %v20474_v38  ;;  %v1873_v47 = vld [vmem:[%s19897_s22 + $0xa8] sm:$0xff]  ;;  %v1882_v12 = vld [vmem:[%s19897_s22 + $0xf0] sm:$0xff] }
 0x567   : > { %v6993_v4 = vand.u32 4294901760, %v6992_v54  ;;  %24601 = vst [vmem:[#allocation241_spill] sm:$0xff] %v20474_v38  ;;  %24602 = vst [vmem:[#allocation114_spill] sm:$0xff] %v20476_v19  ;;  %v20497_v61 = vand.u32 4294901760, %v20487_v39  ;;  %v20502_v54 = vand.u32 4294901760, %v1870_v6  ;;  %v20541_v40 = vand.u32 4294901760, %v1873_v47 }
 0x568   : > { %6961 = vmatmul.mubr.f32.gmra.mrb[18].mxu0 %v6960_v16  ;;  %9335 = vmatmul.mubr.f32.gmra.mrb[18].mxu1 %v6960_v16  ;;  %24603 = vst [vmem:[#allocation262_spill] sm:$0xff] %v20482_v50  ;;  %v7004_v3 = vand.u32 4294901760, %v7003_v55  ;;  %24604 = vst [vmem:[#allocation162_spill] sm:$0xff] %v20487_v39  ;;  %v20489_v16 = vand.u32 4294901760, %v1869_v7  ;;  %v7015_v25 = vand.u32 4294901760, %v7014_v58 }
 0x569   : > { %6966 = vmatprep.mubr.f32.mxu0 %v23737_v57  ;;  %9340 = vmatprep.mubr.f32.mxu1 %v23737_v57  ;;  %24606 = vst [vmem:[#allocation172_spill] sm:$0xff] %v20497_v61  ;;  %24608 = vst [vmem:[#allocation169_spill] sm:$0xff] %v20502_v54 }
 0x56a   : > { %24605 = vst [vmem:[#allocation159_spill] sm:$0xff] %v20489_v16  ;;  %24617 = vst [vmem:[#allocation36_spill] sm:$0xff] %v20541_v40 }
 0x56b   : > { %24621 = vst [vmem:[#allocation67_spill] sm:$0xff] %v20559_v10 }
 0x56c   : > { %6972 = vmatmul.mubr.f32.gmra.mrb[20].mxu0 %v6971_v51  ;;  %9346 = vmatmul.mubr.f32.gmra.mrb[20].mxu1 %v6971_v51  ;;  %v7025_v51 = vsub.f32 %v20469_v28, %v20482_v50  ;;  %v1872_v50 = vld [vmem:[%s19897_s22 + $0xa0] sm:$0xff] }
 0x56d   : > { %6977 = vmatprep.mubr.f32.mxu0 %v23737_v57  ;;  %9351 = vmatprep.mubr.f32.mxu1 %v23737_v57 }
 0x56e   : > { %v7026_v55 = vand.u32 4294901760, %v7025_v51 }
 0x570   : > { %6983 = vmatmul.mubr.f32.gmra.mrb[22].mxu0 %v6982_v8  ;;  %9357 = vmatmul.mubr.f32.gmra.mrb[22].mxu1 %v6982_v8  ;;  %v20500_v8 = vsub.f32 %v1869_v7, %v20489_v16  ;;  %v20515_v7 = vsub.f32 %v1870_v6, %v20502_v54  ;;  %v20528_v6 = vand.u32 4294901760, %v1872_v50 }
 0x571   : > { %6988 = vmatprep.mubr.f32.mxu0 %v23737_v57  ;;  %9362 = vmatprep.mubr.f32.mxu1 %v23737_v57 }
 0x572   : > { %24607 = vst [vmem:[#allocation76_spill] sm:$0xff] %v20500_v8  ;;  %v20512_v58 = vand.u32 4294901760, %v20500_v8  ;;  %24611 = vst [vmem:[#allocation182_spill] sm:$0xff] %v20515_v7 }
 0x573   : > { %24614 = vst [vmem:[#allocation199_spill] sm:$0xff] %v20528_v6 }
 0x574   : > { %6994 = vmatmul.mubr.f32.gmra.mrb[24].mxu0 %v6993_v4  ;;  %9368 = vmatmul.mubr.f32.gmra.mrb[24].mxu1 %v6993_v4  ;;  %v20507_v4 = vand.u32 4294901760, %v1871_v45  ;;  %24610 = vst [vmem:[#allocation95_spill] sm:$0xff] %v20512_v58 }
 0x575   : > { %6999 = vmatprep.mubr.f32.mxu0 %v23737_v57  ;;  %9373 = vmatprep.mubr.f32.mxu1 %v23737_v57 }
 0x576   : > { %24609 = vst [vmem:[#allocation174_spill] sm:$0xff] %v20507_v4  ;;  %v20521_v38 = vsub.f32 %v1871_v45, %v20507_v4 }
 0x578   : > { %7005 = vmatmul.mubr.f32.gmra.mrb[26].mxu0 %v7004_v3  ;;  %9379 = vmatmul.mubr.f32.gmra.mrb[26].mxu1 %v7004_v3  ;;  %v7036_v3 = vsub.f32 %v20487_v39, %v20497_v61  ;;  %24612 = vst [vmem:[#allocation189_spill] sm:$0xff] %v20521_v38  ;;  %v20526_v61 = vand.u32 4294901760, %v20515_v7  ;;  %v20534_v45 = vand.u32 4294901760, %v20521_v38 }
 0x579   : > { %7010 = vmatprep.mubr.f32.mxu0 %v23737_v57  ;;  %9384 = vmatprep.mubr.f32.mxu1 %v23737_v57 }
 0x57a   : > { %v7037_v51 = vand.u32 4294901760, %v7036_v3  ;;  %24613 = vst [vmem:[#allocation188_spill] sm:$0xff] %v20526_v61  ;;  %24615 = vst [vmem:[#allocation206_spill] sm:$0xff] %v20534_v45  ;;  %v7058_v3 = vsub.f32 %v20515_v7, %v20526_v61  ;;  %v7069_v14 = vsub.f32 %v20521_v38, %v20534_v45  ;;  %v20554_v61 = vand.u32 4294901760, %v1874_v9  ;;  %v1876_v38 = vld [vmem:[%s19897_s22 + $0xc0] sm:$0xff] }
 0x57b   : > { %v20573_v7 = vsub.f32 %v1875_v52, %v20559_v10 }
 0x57c   : > { %7016 = vmatmul.mubr.f32.gmra.mrb[28].mxu0 %v7015_v25  ;;  %9390 = vmatmul.mubr.f32.gmra.mrb[28].mxu1 %v7015_v25  ;;  %v7047_v25 = vsub.f32 %v20500_v8, %v20512_v58  ;;  %v20539_v58 = vsub.f32 %v1872_v50, %v20528_v6  ;;  %v20552_v50 = vsub.f32 %v1873_v47, %v20541_v40  ;;  %v1878_v8 = vld [vmem:[%s19897_s22 + $0xd0] sm:$0xff] }
 0x57d   : > { %7021 = vmatprep.mubr.f32.mxu0 %v23737_v57  ;;  %9395 = vmatprep.mubr.f32.mxu1 %v23737_v57  ;;  %24620 = vst [vmem:[#allocation225_spill] sm:$0xff] %v20554_v61  ;;  %v20567_v47 = vsub.f32 %v1874_v9, %v20554_v61  ;;  %24624 = vst [vmem:[#allocation240_spill] sm:$0xff] %v20573_v7  ;;  %v20580_v9 = vand.u32 4294901760, %v1876_v38  ;;  %v20586_v52 = vand.u32 4294901760, %v20573_v7 }
 0x57e   : > { %24616 = vst [vmem:[#allocation205_spill] sm:$0xff] %v20539_v58  ;;  %24619 = vst [vmem:[#allocation39_spill] sm:$0xff] %v20552_v50  ;;  %v20564_v45 = vand.u32 4294901760, %v20552_v50 }
 0x57f   : > { %24623 = vst [vmem:[#allocation234_spill] sm:$0xff] %v20567_v47  ;;  %24626 = vst [vmem:[#allocation118_spill] sm:$0xff] %v20580_v9  ;;  %v7113_v39 = vsub.f32 %v20573_v7, %v20586_v52  ;;  %v1880_v7 = vld [vmem:[%s19897_s22 + $0xe0] sm:$0xff] }
 0x580   : > { %7027 = vmatmul.mubr.f32.gmra.mrb[30].mxu0 %v7026_v55  ;;  %9401 = vmatmul.mubr.f32.gmra.mrb[30].mxu1 %v7026_v55  ;;  %v7048_v55 = vand.u32 4294901760, %v7047_v25  ;;  %v20549_v25 = vand.u32 4294901760, %v20539_v58  ;;  %24622 = vst [vmem:[#allocation66_spill] sm:$0xff] %v20564_v45  ;;  %24627 = vst [vmem:[#allocation249_spill] sm:$0xff] %v20586_v52 }
 0x581   : > { %7032 = vmatprep.mubr.f32.mxu0 %v23737_v57  ;;  %9406 = vmatprep.mubr.f32.mxu1 %v23737_v57 }
 0x582   : > { %24618 = vst [vmem:[#allocation40_spill] sm:$0xff] %v20549_v25 }
 0x584   : > { %7038 = vmatmul.mubr.f32.gmra.mrb[32].mxu0 %v7037_v51  ;;  %9412 = vmatmul.mubr.f32.gmra.mrb[32].mxu1 %v7037_v51  ;;  %v7059_v51 = vand.u32 4294901760, %v7058_v3  ;;  %v7080_v3 = vsub.f32 %v20539_v58, %v20549_v25  ;;  %v20578_v25 = vand.u32 4294901760, %v20567_v47  ;;  %v1877_v58 = vld [vmem:[%s19897_s22 + $0xc8] sm:$0xff] }
 0x585   : > { %7043 = vmatprep.mubr.f32.mxu0 %v23737_v57  ;;  %9417 = vmatprep.mubr.f32.mxu1 %v23737_v57 }
 0x586   : > { %24625 = vst [vmem:[#allocation239_spill] sm:$0xff] %v20578_v25 }
 0x588   : > { %7049 = vmatmul.mubr.f32.gmra.mrb[34].mxu0 %v7048_v55  ;;  %9423 = vmatmul.mubr.f32.gmra.mrb[34].mxu1 %v7048_v55  ;;  %v7070_v55 = vand.u32 4294901760, %v7069_v14  ;;  %v7081_v14 = vand.u32 4294901760, %v7080_v3  ;;  %v7102_v3 = vsub.f32 %v20567_v47, %v20578_v25  ;;  %v20606_v25 = vand.u32 4294901760, %v1878_v8  ;;  %v1879_v47 = vld [vmem:[%s19897_s22 + $0xd8] sm:$0xff] }
 0x589   : > { %7054 = vmatprep.mubr.f32.mxu0 %v23737_v57  ;;  %9428 = vmatprep.mubr.f32.mxu1 %v23737_v57  ;;  %v20611_v28 = vand.u32 4294901760, %v1879_v47 }
 0x58a   : > { %24632 = vst [vmem:[#allocation267_spill] sm:$0xff] %v20606_v25 }
 0x58b   : > { %24633 = vst [vmem:[#allocation273_spill] sm:$0xff] %v20611_v28  ;;  %v20625_v60 = vsub.f32 %v1879_v47, %v20611_v28 }
 0x58c   : > { %7060 = vmatmul.mubr.f32.gmra.mrb[36].mxu0 %v7059_v51  ;;  %9434 = vmatmul.mubr.f32.gmra.mrb[36].mxu1 %v7059_v51  ;;  %v7091_v51 = vsub.f32 %v20552_v50, %v20564_v45  ;;  %v20591_v45 = vsub.f32 %v1876_v38, %v20580_v9  ;;  %v20593_v50 = vand.u32 4294901760, %v1877_v58 }
 0x58d   : > { %7065 = vmatprep.mubr.f32.mxu0 %v23737_v57  ;;  %9439 = vmatprep.mubr.f32.mxu1 %v23737_v57  ;;  %v20638_v47 = vand.u32 4294901760, %v20625_v60 }
 0x58e   : > { %24628 = vst [vmem:[#allocation248_spill] sm:$0xff] %v20591_v45  ;;  %24629 = vst [vmem:[#allocation255_spill] sm:$0xff] %v20593_v50  ;;  %v20604_v38 = vsub.f32 %v1877_v58, %v20593_v50  ;;  %v20619_v58 = vsub.f32 %v1878_v8, %v20606_v25  ;;  %v20632_v8 = vand.u32 4294901760, %v1880_v7 }
 0x58f   : > { %24638 = vst [vmem:[#allocation263_spill] sm:$0xff] %v20638_v47  ;;  %v7157_v56 = vsub.f32 %v20625_v60, %v20638_v47 }
 0x590   : > { %7071 = vmatmul.mubr.f32.gmra.mrb[38].mxu0 %v7070_v55  ;;  %9445 = vmatmul.mubr.f32.gmra.mrb[38].mxu1 %v7070_v55  ;;  %v7092_v55 = vand.u32 4294901760, %v7091_v51  ;;  %v20601_v51 = vand.u32 4294901760, %v20591_v45  ;;  %24631 = vst [vmem:[#allocation260_spill] sm:$0xff] %v20604_v38  ;;  %v20616_v52 = vand.u32 4294901760, %v20604_v38  ;;  %24635 = vst [vmem:[#allocation278_spill] sm:$0xff] %v20619_v58 }
 0x591   : > { %7076 = vmatprep.mubr.f32.mxu0 %v23737_v57  ;;  %9450 = vmatprep.mubr.f32.mxu1 %v23737_v57  ;;  %24637 = vst [vmem:[#allocation256_spill] sm:$0xff] %v20632_v8  ;;  %v7158_v23 = vand.u32 4294901760, %v7157_v56 }
 0x592   : > { %24630 = vst [vmem:[#allocation261_spill] sm:$0xff] %v20601_v51  ;;  %24634 = vst [vmem:[#allocation272_spill] sm:$0xff] %v20616_v52 }
 0x594   : > { %7082 = vmatmul.mubr.f32.gmra.mrb[40].mxu0 %v7081_v14  ;;  %9456 = vmatmul.mubr.f32.gmra.mrb[40].mxu1 %v7081_v14  ;;  %v7103_v14 = vand.u32 4294901760, %v7102_v3  ;;  %v7124_v3 = vsub.f32 %v20591_v45, %v20601_v51  ;;  %v20630_v51 = vand.u32 4294901760, %v20619_v58  ;;  %v1881_v45 = vld [vmem:[%s19897_s22 + $0xe8] sm:$0xff] }
 0x595   : > { %7087 = vmatprep.mubr.f32.mxu0 %v23737_v57  ;;  %9461 = vmatprep.mubr.f32.mxu1 %v23737_v57 }
 0x596   : > { %24636 = vst [vmem:[#allocation201_spill] sm:$0xff] %v20630_v51 }
 0x598   : > { %7093 = vmatmul.mubr.f32.gmra.mrb[42].mxu0 %v7092_v55  ;;  %9467 = vmatmul.mubr.f32.gmra.mrb[42].mxu1 %v7092_v55  ;;  %v7114_v55 = vand.u32 4294901760, %v7113_v39  ;;  %v7125_v39 = vand.u32 4294901760, %v7124_v3  ;;  %v7146_v3 = vsub.f32 %v20619_v58, %v20630_v51  ;;  %v1883_v58 = vld [vmem:[%s19897_s22 + $0xf8] sm:$0xff] }
 0x599   : > { %7098 = vmatprep.mubr.f32.mxu0 %v23737_v57  ;;  %9472 = vmatprep.mubr.f32.mxu1 %v23737_v57 }
 0x59c   : > { %7104 = vmatmul.mubr.f32.gmra.mrb[44].mxu0 %v7103_v14  ;;  %9478 = vmatmul.mubr.f32.gmra.mrb[44].mxu1 %v7103_v14  ;;  %v7135_v14 = vsub.f32 %v20604_v38, %v20616_v52  ;;  %v20643_v52 = vsub.f32 %v1880_v7, %v20632_v8  ;;  %v20645_v38 = vand.u32 4294901760, %v1881_v45  ;;  %v20658_v7 = vand.u32 4294901760, %v1882_v12 }
 0x59d   : > { %7109 = vmatprep.mubr.f32.mxu0 %v23737_v57  ;;  %9483 = vmatprep.mubr.f32.mxu1 %v23737_v57 }
 0x59e   : > { %24639 = vst [vmem:[#allocation164_spill] sm:$0xff] %v20643_v52  ;;  %24640 = vst [vmem:[#allocation83_spill] sm:$0xff] %v20645_v38  ;;  %v20656_v51 = vsub.f32 %v1881_v45, %v20645_v38  ;;  %v20669_v47 = vsub.f32 %v1882_v12, %v20658_v7  ;;  %v20671_v45 = vand.u32 4294901760, %v1883_v58 }
 0x59f   : > { %24643 = vst [vmem:[#allocation86_spill] sm:$0xff] %v20658_v7 }
 0x5a0   : > { %7115 = vmatmul.mubr.f32.gmra.mrb[46].mxu0 %v7114_v55  ;;  %9489 = vmatmul.mubr.f32.gmra.mrb[46].mxu1 %v7114_v55  ;;  %v7136_v55 = vand.u32 4294901760, %v7135_v14  ;;  %v20653_v14 = vand.u32 4294901760, %v20643_v52  ;;  %24642 = vst [vmem:[#allocation92_spill] sm:$0xff] %v20656_v51  ;;  %24645 = vst [vmem:[#allocation96_spill] sm:$0xff] %v20669_v47 }
 0x5a1   : > { %7120 = vmatprep.mubr.f32.mxu0 %v23737_v57  ;;  %9494 = vmatprep.mubr.f32.mxu1 %v23737_v57  ;;  %24646 = vst [vmem:[#allocation93_spill] sm:$0xff] %v20671_v45 }
 0x5a2   : > { %24641 = vst [vmem:[#allocation84_spill] sm:$0xff] %v20653_v14 }
 0x5a4   : > { %7126 = vmatmul.mubr.f32.gmra.mrb[48].mxu0 %v7125_v39  ;;  %9500 = vmatmul.mubr.f32.gmra.mrb[48].mxu1 %v7125_v39  ;;  %v7147_v39 = vand.u32 4294901760, %v7146_v3  ;;  %v20666_v3 = vand.u32 4294901760, %v20656_v51 }
 0x5a5   : > { %7131 = vmatprep.mubr.f32.mxu0 %v23737_v57  ;;  %9505 = vmatprep.mubr.f32.mxu1 %v23737_v57 }
 0x5a6   : > { %24644 = vst [vmem:[#allocation87_spill] sm:$0xff] %v20666_v3 }
 0x5a8   : > { %7137 = vmatmul.mubr.f32.gmra.mrb[50].mxu0 %v7136_v55  ;;  %9511 = vmatmul.mubr.f32.gmra.mrb[50].mxu1 %v7136_v55  ;;  %v7168_v55 = vsub.f32 %v20643_v52, %v20653_v14  ;;  %v20678_v14 = vand.u32 4294901760, %v20669_v47  ;;  %v20681_v52 = vsub.f32 %v1883_v58, %v20671_v45 }
 0x5a9   : > { %7142 = vmatprep.mubr.f32.mxu0 %v23737_v57  ;;  %9516 = vmatprep.mubr.f32.mxu1 %v23737_v57 }
 0x5aa   : > { %v7169_v56 = vand.u32 4294901760, %v7168_v55  ;;  %24647 = vst [vmem:[#allocation280_spill] sm:$0xff] %v20678_v14  ;;  %24648 = vst [vmem:[#allocation281_spill] sm:$0xff] %v20681_v52  ;;  %v20688_v55 = vand.u32 4294901760, %v20681_v52 }
 0x5ac   : > { %7148 = vmatmul.mubr.f32.gmra.mrb[52].mxu0 %v7147_v39  ;;  %9522 = vmatmul.mubr.f32.gmra.mrb[52].mxu1 %v7147_v39  ;;  %v7179_v39 = vsub.f32 %v20656_v51, %v20666_v3  ;;  %24649 = vst [vmem:[#allocation282_spill] sm:$0xff] %v20688_v55  ;;  %v7201_v3 = vsub.f32 %v20681_v52, %v20688_v55  ;;  %v24658_v52 = vld [vmem:[#allocation115_spill] sm:$0xff] }
 0x5ad   : > { %7153 = vmatprep.mubr.f32.mxu0 %v23737_v57  ;;  %9527 = vmatprep.mubr.f32.mxu1 %v23737_v57  ;;  %v24668_v51 = vld [vmem:[#allocation279_spill] sm:$0xff] }
 0x5ae   : > { %v7180_v12 = vand.u32 4294901760, %v7179_v39  ;;  %v13664_v39 = vpack.c.bf16 %v24443_v49, %v24442_v17  ;;  %v24654_v49 = vld [vmem:[#allocation106_spill] sm:$0xff] }
 0x5b0   : > { %7159 = vmatmul.mubr.f32.gmra.mrb[54].mxu0 %v7158_v23  ;;  %9533 = vmatmul.mubr.f32.gmra.mrb[54].mxu1 %v7158_v23  ;;  %v7190_v23 = vsub.f32 %v20669_v47, %v20678_v14  ;;  %v24653_v14 = vld [vmem:[#allocation105_spill] sm:$0xff] }
 0x5b1   : > { %7164 = vmatprep.mubr.f32.mxu0 %v23737_v57  ;;  %9538 = vmatprep.mubr.f32.mxu1 %v23737_v57  ;;  %v13858_v17 = vpack.c.bf16 %v24654_v49, %v24653_v14  ;;  %v24663_v14 = vld [vmem:[#allocation32_spill] sm:$0xff] }
 0x5b2   : > { %v7191_v58 = vand.u32 4294901760, %v7190_v23  ;;  %v13856_v23 = vpack.c.bf16 %v24457_v32, %v24456_v24  ;;  %v24657_v24 = vld [vmem:[#allocation112_spill] sm:$0xff] }
 0x5b3   : > { %v13860_v47 = vpack.c.bf16 %v24658_v52, %v24657_v24  ;;  %v24665_v52 = vld [vmem:[#allocation35_spill] sm:$0xff] }
 0x5b4   : > { %7170 = vmatmul.mubr.f32.gmra.mrb[56].mxu0 %v7169_v56  ;;  %9544 = vmatmul.mubr.f32.gmra.mrb[56].mxu1 %v7169_v56  ;;  %v7202_v56 = vand.u32 4294901760, %v7201_v3  ;;  %v24650_v3 = vld [vmem:[#allocation265_spill] sm:$0xff] }
 0x5b5   : > { %7175 = vmatprep.mubr.f32.mxu0 %v23737_v57  ;;  %9549 = vmatprep.mubr.f32.mxu1 %v23737_v57 }
 0x5b8   : > { %7181 = vmatmul.mubr.f32.gmra.mrb[58].mxu0 %v7180_v12  ;;  %9555 = vmatmul.mubr.f32.gmra.mrb[58].mxu1 %v7180_v12  ;;  %v13666_v12 = vpack.c.bf16 %v24453_v21, %v24452_v5  ;;  %v24655_v21 = vld [vmem:[#allocation102_spill] sm:$0xff]  ;;  %v24656_v5 = vld [vmem:[#allocation103_spill] sm:$0xff] }
 0x5b9   : > { %7186 = vmatprep.mubr.f32.mxu0 %v23737_v57  ;;  %9560 = vmatprep.mubr.f32.mxu1 %v23737_v57  ;;  %v13670_v32 = vpack.c.bf16 %v24656_v5, %v24655_v21  ;;  %v24664_v5 = vld [vmem:[#allocation158_spill] sm:$0xff]  ;;  %v24666_v21 = vld [vmem:[#allocation41_spill] sm:$0xff] }
 0x5ba   : > { %v13674_v24 = vpack.c.bf16 %v24665_v52, %v24664_v5  ;;  %v24673_v52 = vld [vmem:[#allocation173_spill] sm:$0xff] }
 0x5bb   : > { %v24675_v5 = vld [vmem:[#allocation29_spill] sm:$0xff] }
 0x5bc   : > { %7192 = vmatmul.mubr.f32.gmra.mrb[60].mxu0 %v7191_v58  ;;  %9566 = vmatmul.mubr.f32.gmra.mrb[60].mxu1 %v7191_v58  ;;  %v24651_v58 = vld [vmem:[#allocation73_spill] sm:$0xff] }
 0x5bd   : > { %7197 = vmatprep.mubr.f32.mxu0 %v23737_v57  ;;  %9571 = vmatprep.mubr.f32.mxu1 %v23737_v57 }
 0x5c0   : > { %7203 = vmatmul.mubr.f32.gmra.mrb[62].mxu0 %v7202_v56  ;;  %9577 = vmatmul.mubr.f32.gmra.mrb[62].mxu1 %v7202_v56  ;;  %v24652_v56 = vld [vmem:[#allocation68_spill] sm:$0xff] }
 0x5c1   : > { %7433 = vmatprep.mubr.f32.mxu0 %v23737_v57  ;;  %9807 = vmatprep.mubr.f32.mxu1 %v23737_v57  ;;  %v13668_v55 = vpack.c.bf16 %v24652_v56, %v24651_v58  ;;  %v24667_v58 = vld [vmem:[#allocation38_spill] sm:$0xff] }
 0x5c4   : > { %7435 = vmatmul.mubr.f32.vlgmr.msra.gmra.mrb[0].mxu0 %v24650_v3  ;;  %9809 = vmatmul.mubr.f32.vlgmr.msra.gmra.mrb[0].mxu1 %v24650_v3  ;;  %v24659_v3 = vld [vmem:[#allocation268_spill] sm:$0xff] }
 0x5c5   : > { %13665 = vmatpush1.bf16.msra.mxu0 %v13664_v39  ;;  %7440 = vmatprep.mubr.f32.mxu0 %v23737_v57  ;;  %v24660_v39 = vld [vmem:[#allocation120_spill] sm:$0xff] }
 0x5c6   : > { %9814 = vmatprep.mubr.f32.mxu1 %v23737_v57  ;;  %13667 = vmatprep.subr.bf16.mxu0 %v13666_v12  ;;  %v24661_v12 = vld [vmem:[#allocation121_spill] sm:$0xff] }
 0x5c7   : > { %13857 = vmatpush1.bf16.msra.mxu1 %v13856_v23  ;;  %v13672_v49 = vpack.c.bf16 %v24661_v12, %v24660_v39  ;;  %v24662_v23 = vld [vmem:[#allocation30_spill] sm:$0xff]  ;;  %v24676_v12 = vld [vmem:[#allocation31_spill] sm:$0xff]  ;;  %v24677_v39 = vld [vmem:[#allocation157_spill] sm:$0xff] }
 0x5c8   : > { %7442 = vmatmul.mubr.f32.gmra.mrb[2].mxu0 %v24659_v3  ;;  %9816 = vmatmul.mubr.f32.gmra.mrb[2].mxu1 %v24659_v3  ;;  %v13862_v56 = vpack.c.bf16 %v24663_v14, %v24662_v23  ;;  %v13864_v3 = vpack.c.bf16 %v24667_v58, %v24666_v21  ;;  %v24672_v14 = vld [vmem:[#allocation168_spill] sm:$0xff] }
 0x5c9   : > { %7447 = vmatprep.mubr.f32.mxu0 %v23737_v57  ;;  %9821 = vmatprep.mubr.f32.mxu1 %v23737_v57  ;;  %v24674_v58 = vld [vmem:[#allocation176_spill] sm:$0xff] }
 0x5ca   : > { %13669 = vmatpush1.bf16.msra.mxu0 %v13668_v55  ;;  %13859 = vmatprep.subr.bf16.mxu1 %v13858_v17  ;;  %v24669_v17 = vld [vmem:[#allocation153_spill] sm:$0xff]  ;;  %v24670_v55 = vld [vmem:[#allocation160_spill] sm:$0xff]  ;;  %v13678_v21 = vpack.c.bf16 %v24674_v58, %v24673_v52  ;;  %v24684_v52 = vld [vmem:[#allocation191_spill] sm:$0xff] }
 0x5cb   : > { %13671 = vmatprep.subr.bf16.mxu0 %v13670_v32  ;;  %13861 = vmatpush1.bf16.msra.mxu1 %v13860_v47  ;;  %v13676_v32 = vpack.c.bf16 %v24670_v55, %v24669_v17  ;;  %v24671_v47 = vld [vmem:[#allocation166_spill] sm:$0xff]  ;;  %v24683_v58 = vld [vmem:[#allocation192_spill] sm:$0xff]  ;;  %v24685_v55 = vld [vmem:[#allocation151_spill] sm:$0xff] }
 0x5cc   : > { %7449 = vmatmul.mubr.f32.gmra.mrb[4].mxu0 %v24668_v51  ;;  %9823 = vmatmul.mubr.f32.gmra.mrb[4].mxu1 %v24668_v51  ;;  %v13866_v23 = vpack.c.bf16 %v24672_v14, %v24671_v47  ;;  %v13868_v51 = vpack.c.bf16 %v24676_v12, %v24675_v5  ;;  %v24681_v14 = vld [vmem:[#allocation33_spill] sm:$0xff]  ;;  %v24682_v12 = vld [vmem:[#allocation119_spill] sm:$0xff] }
 0x5cd   : > { %7454 = vmatprep.mubr.f32.mxu0 %v23737_v57  ;;  %9828 = vmatprep.mubr.f32.mxu1 %v23737_v57  ;;  %v13682_v5 = vpack.c.bf16 %v24682_v12, %v24534_v15  ;;  %v24689_v12 = vld [vmem:[#allocation235_spill] sm:$0xff] }
 0x5ce   : > { %13673 = vmatpush1.bf16.msra.mxu0 %v13672_v49  ;;  %13863 = vmatprep.subr.bf16.mxu1 %v13862_v56  ;;  %v24678_v49 = vld [vmem:[#allocation184_spill] sm:$0xff]  ;;  %v24691_v15 = vld [vmem:[#allocation251_spill] sm:$0xff] }
 0x5cf   : > { %13675 = vmatprep.subr.bf16.mxu0 %v13674_v24  ;;  %13865 = vmatpush1.bf16.msra.mxu1 %v13864_v3  ;;  %v24679_v56 = vld [vmem:[#allocation116_spill] sm:$0xff]  ;;  %v24680_v3 = vld [vmem:[#allocation111_spill] sm:$0xff] }
 0x5d0   : > { %7456 = vmatmul.mubr.f32.gmra.mrb[6].mxu0 %v24677_v39  ;;  %9830 = vmatmul.mubr.f32.gmra.mrb[6].mxu1 %v24677_v39  ;;  %v13680_v24 = vpack.c.bf16 %v24679_v56, %v24678_v49  ;;  %v13870_v47 = vpack.c.bf16 %v24681_v14, %v24680_v3  ;;  %v13872_v39 = vpack.c.bf16 %v24684_v52, %v24683_v58  ;;  %v24690_v52 = vld [vmem:[#allocation242_spill] sm:$0xff]  ;;  %v24693_v56 = vld [vmem:[#allocation57_spill] sm:$0xff] }
 0x5d1   : > { %7461 = vmatprep.mubr.f32.mxu0 %v23737_v57  ;;  %9835 = vmatprep.mubr.f32.mxu1 %v23737_v57  ;;  %v13686_v58 = vpack.c.bf16 %v24690_v52, %v24689_v12  ;;  %v24692_v3 = vld [vmem:[#allocation250_spill] sm:$0xff] }
 0x5d2   : > { %13677 = vmatpush1.bf16.msra.mxu0 %v13676_v32  ;;  %13867 = vmatprep.subr.bf16.mxu1 %v13866_v23  ;;  %v24686_v23 = vld [vmem:[#allocation209_spill] sm:$0xff]  ;;  %v24688_v32 = vld [vmem:[#allocation64_spill] sm:$0xff] }
 0x5d3   : > { %13679 = vmatprep.subr.bf16.mxu0 %v13678_v21  ;;  %13869 = vmatpush1.bf16.msra.mxu1 %v13868_v51  ;;  %v13684_v21 = vpack.c.bf16 %v24686_v23, %v24539_v53  ;;  %v24687_v51 = vld [vmem:[#allocation71_spill] sm:$0xff] }
 0x5d4   : > { %7463 = vmatmul.mubr.f32.gmra.mrb[8].mxu0 %v24685_v55  ;;  %9837 = vmatmul.mubr.f32.gmra.mrb[8].mxu1 %v24685_v55  ;;  %v13874_v14 = vpack.c.bf16 %v24688_v32, %v24687_v51  ;;  %v13876_v55 = vpack.c.bf16 %v24692_v3, %v24691_v15  ;;  %v24695_v3 = vld [vmem:[#allocation91_spill] sm:$0xff] }
 0x5d5   : > { %7468 = vmatprep.mubr.f32.mxu0 %v23737_v57  ;;  %9842 = vmatprep.mubr.f32.mxu1 %v23737_v57  ;;  %v24696_v15 = vld [vmem:[#allocation163_spill] sm:$0xff] }
 0x5d6   : > { %13681 = vmatpush1.bf16.msra.mxu0 %v13680_v24  ;;  %13871 = vmatprep.subr.bf16.mxu1 %v13870_v47  ;;  %v24694_v47 = vld [vmem:[#allocation75_spill] sm:$0xff] }
 0x5d7   : > { %13683 = vmatprep.subr.bf16.mxu0 %v13682_v5  ;;  %13873 = vmatpush1.bf16.msra.mxu1 %v13872_v39  ;;  %v13688_v5 = vpack.c.bf16 %v24561_v1, %v24560_v46  ;;  %v13878_v39 = vpack.c.bf16 %v24563_v42, %v24562_v18  ;;  %v13690_v24 = vpack.c.bf16 %v24694_v47, %v24564_v30 }
 0x5d8   : > { %7470 = vmatmul.mubr.f32.gmra.mrb[10].mxu0 %v24693_v56  ;;  %9844 = vmatmul.mubr.f32.gmra.mrb[10].mxu1 %v24693_v56  ;;  %v13880_v56 = vpack.c.bf16 %v24567_v27, %v24695_v3 }
 0x5d9   : > { %7475 = vmatprep.mubr.f32.mxu0 %v23737_v57  ;;  %9849 = vmatprep.mubr.f32.mxu1 %v23737_v57 }
 0x5da   : > { %13685 = vmatpush1.bf16.msra.mxu0 %v13684_v21  ;;  %13875 = vmatprep.subr.bf16.mxu1 %v13874_v14  ;;  %v13692_v14 = vpack.c.bf16 %v24574_v31, %v24573_v44  ;;  %v24697_v21 = vld [vmem:[#allocation69_spill] sm:$0xff] }
 0x5db   : > { %13687 = vmatprep.subr.bf16.mxu0 %v13686_v58  ;;  %13877 = vmatpush1.bf16.msra.mxu1 %v13876_v55  ;;  %v13882_v58 = vpack.c.bf16 %v24576_v29, %v24575_v43  ;;  %v13884_v55 = vpack.c.bf16 %v19594_v62, %v19589_v59 }
 0x5dc   : > { %7477 = vmatmul.mubr.f32.gmra.mrb[12].mxu0 %v24696_v15  ;;  %9851 = vmatmul.mubr.f32.gmra.mrb[12].mxu1 %v24696_v15 }
 0x5dd   : > { %7482 = vmatprep.mubr.f32.mxu0 %v23737_v57  ;;  %9856 = vmatprep.mubr.f32.mxu1 %v23737_v57 }
 0x5de   : > { %13689 = vmatpush1.bf16.msra.mxu0 %v13688_v5  ;;  %13879 = vmatprep.subr.bf16.mxu1 %v13878_v39  ;;  %v24698_v5 = vld [vmem:[#allocation70_spill] sm:$0xff]  ;;  %v24699_v39 = vld [vmem:[#allocation79_spill] sm:$0xff] }
 0x5df   : > { %13691 = vmatprep.subr.bf16.mxu0 %v13690_v24  ;;  %13881 = vmatpush1.bf16.msra.mxu1 %v13880_v56  ;;  %v24700_v56 = vld [vmem:[#allocation85_spill] sm:$0xff]  ;;  %v24701_v24 = vld [vmem:[#allocation274_spill] sm:$0xff] }
 0x5e0   : > { %7484 = vmatmul.mubr.f32.gmra.mrb[14].mxu0 %v24697_v21  ;;  %9858 = vmatmul.mubr.f32.gmra.mrb[14].mxu1 %v24697_v21  ;;  %v24735_v21 = vand.u32 4294901760, %v18922_v33  ;;  %v24742_v33 = vld [vmem:[#allocation104_spill] sm:$0xff] }
 0x5e1   : > { %7489 = vmatprep.mubr.f32.mxu0 %v23737_v57  ;;  %9863 = vmatprep.mubr.f32.mxu1 %v23737_v57 }
 0x5e2   : > { %13693 = vmatpush1.bf16.msra.mxu0 %v13692_v14  ;;  %13883 = vmatprep.subr.bf16.mxu1 %v13882_v58  ;;  %v24702_v14 = vld [vmem:[#allocation94_spill] sm:$0xff]  ;;  %v24703_v58 = vld [vmem:[#allocation99_spill] sm:$0xff] }
 0x5e3   : > { %13885 = vmatpush1.bf16.msra.mxu1 %v13884_v55  ;;  %13695 = vmatprep.subr.bf16.mxu0 %v24698_v5  ;;  %v24704_v55 = vld [vmem:[#allocation100_spill] sm:$0xff] }
 0x5e4   : > { %7491 = vmatmul.mubr.f32.gmra.mrb[16].mxu0 %v24699_v39  ;;  %9865 = vmatmul.mubr.f32.gmra.mrb[16].mxu1 %v24699_v39  ;;  %v24734_v39 = vand.u32 4294901760, %v18917_v37 }
 0x5e5   : > { %7496 = vmatprep.mubr.f32.mxu0 %v23737_v57  ;;  %9870 = vmatprep.mubr.f32.mxu1 %v23737_v57 }
 0x5e6   : > { %13887 = vmatprep.subr.bf16.mxu1 %v24700_v56  ;;  %v13726_v15 = vpack.c.bf16 %v24735_v21, %v24734_v39  ;;  %v24752_v21 = vld [vmem:[#allocation39_spill] sm:$0xff]  ;;  %v24753_v39 = vld [vmem:[#allocation234_spill] sm:$0xff] }
 0x5e8   : > { %7498 = vmatmul.mubr.f32.gmra.mrb[18].mxu0 %v20264_v36  ;;  %9872 = vmatmul.mubr.f32.gmra.mrb[18].mxu1 %v20264_v36  ;;  %v24733_v36 = vld [vmem:[#allocation252_spill] sm:$0xff] }
 0x5e9   : > { %7503 = vmatprep.mubr.f32.mxu0 %v23737_v57  ;;  %9877 = vmatprep.mubr.f32.mxu1 %v23737_v57 }
 0x5ec   : > { %7505 = vmatmul.mubr.f32.gmra.mrb[20].mxu0 %v20289_v0  ;;  %9879 = vmatmul.mubr.f32.gmra.mrb[20].mxu1 %v20289_v0  ;;  %v24732_v0 = vld [vmem:[#allocation245_spill] sm:$0xff] }
 0x5ed   : > { %7510 = vmatprep.mubr.f32.mxu0 %v23737_v57  ;;  %9884 = vmatprep.mubr.f32.mxu1 %v23737_v57 }
 0x5f0   : > { %7512 = vmatmul.mubr.f32.gmra.mrb[22].mxu0 %v20407_v63  ;;  %9886 = vmatmul.mubr.f32.gmra.mrb[22].mxu1 %v20407_v63  ;;  %v24731_v63 = vld [vmem:[#allocation244_spill] sm:$0xff] }
 0x5f1   : > { %7517 = vmatprep.mubr.f32.mxu0 %v23737_v57  ;;  %9891 = vmatprep.mubr.f32.mxu1 %v23737_v57 }
 0x5f4   : > { %7519 = vmatmul.mubr.f32.gmra.mrb[24].mxu0 %v20422_v20  ;;  %9893 = vmatmul.mubr.f32.gmra.mrb[24].mxu1 %v20422_v20  ;;  %v24729_v20 = vld [vmem:[#allocation236_spill] sm:$0xff] }
 0x5f5   : > { %7524 = vmatprep.mubr.f32.mxu0 %v23737_v57  ;;  %9898 = vmatprep.mubr.f32.mxu1 %v23737_v57 }
 0x5f8   : > { %7526 = vmatmul.mubr.f32.gmra.mrb[26].mxu0 %v20437_v48  ;;  %9900 = vmatmul.mubr.f32.gmra.mrb[26].mxu1 %v20437_v48  ;;  %v24728_v48 = vld [vmem:[#allocation230_spill] sm:$0xff] }
 0x5f9   : > { %7531 = vmatprep.mubr.f32.mxu0 %v23737_v57  ;;  %9905 = vmatprep.mubr.f32.mxu1 %v23737_v57 }
 0x5fc   : > { %7533 = vmatmul.mubr.f32.gmra.mrb[28].mxu0 %v20450_v11  ;;  %9907 = vmatmul.mubr.f32.gmra.mrb[28].mxu1 %v20450_v11  ;;  %v24727_v11 = vld [vmem:[#allocation229_spill] sm:$0xff] }
 0x5fd   : > { %7538 = vmatprep.mubr.f32.mxu0 %v23737_v57  ;;  %9912 = vmatprep.mubr.f32.mxu1 %v23737_v57 }
 0x600   : > { %7540 = vmatmul.mubr.f32.gmra.mrb[30].mxu0 %v20455_v13  ;;  %9914 = vmatmul.mubr.f32.gmra.mrb[30].mxu1 %v20455_v13  ;;  %v24725_v13 = vld [vmem:[#allocation72_spill] sm:$0xff] }
 0x601   : > { %7545 = vmatprep.mubr.f32.mxu0 %v23737_v57  ;;  %9919 = vmatprep.mubr.f32.mxu1 %v23737_v57 }
 0x604   : > { %7547 = vmatmul.mubr.f32.gmra.mrb[32].mxu0 %v20476_v19  ;;  %9921 = vmatmul.mubr.f32.gmra.mrb[32].mxu1 %v20476_v19  ;;  %v24724_v19 = vld [vmem:[#allocation220_spill] sm:$0xff] }
 0x605   : > { %7552 = vmatprep.mubr.f32.mxu0 %v23737_v57  ;;  %9926 = vmatprep.mubr.f32.mxu1 %v23737_v57 }
 0x608   : > { %7554 = vmatmul.mubr.f32.gmra.mrb[34].mxu0 %v20489_v16  ;;  %9928 = vmatmul.mubr.f32.gmra.mrb[34].mxu1 %v20489_v16  ;;  %v24723_v16 = vld [vmem:[#allocation49_spill] sm:$0xff] }
 0x609   : > { %7559 = vmatprep.mubr.f32.mxu0 %v23737_v57  ;;  %9933 = vmatprep.mubr.f32.mxu1 %v23737_v57 }
 0x60c   : > { %7561 = vmatmul.mubr.f32.gmra.mrb[36].mxu0 %v20502_v54  ;;  %9935 = vmatmul.mubr.f32.gmra.mrb[36].mxu1 %v20502_v54  ;;  %v24722_v54 = vld [vmem:[#allocation217_spill] sm:$0xff] }
 0x60d   : > { %7566 = vmatprep.mubr.f32.mxu0 %v23737_v57  ;;  %9940 = vmatprep.mubr.f32.mxu1 %v23737_v57 }
 0x610   : > { %7568 = vmatmul.mubr.f32.gmra.mrb[38].mxu0 %v20507_v4  ;;  %9942 = vmatmul.mubr.f32.gmra.mrb[38].mxu1 %v20507_v4  ;;  %v24720_v4 = vld [vmem:[#allocation155_spill] sm:$0xff] }
 0x611   : > { %7573 = vmatprep.mubr.f32.mxu0 %v23737_v57  ;;  %9947 = vmatprep.mubr.f32.mxu1 %v23737_v57 }
 0x614   : > { %7575 = vmatmul.mubr.f32.gmra.mrb[40].mxu0 %v20528_v6  ;;  %9949 = vmatmul.mubr.f32.gmra.mrb[40].mxu1 %v20528_v6  ;;  %v24719_v6 = vld [vmem:[#allocation210_spill] sm:$0xff] }
 0x615   : > { %7580 = vmatprep.mubr.f32.mxu0 %v23737_v57  ;;  %9954 = vmatprep.mubr.f32.mxu1 %v23737_v57 }
 0x618   : > { %7582 = vmatmul.mubr.f32.gmra.mrb[42].mxu0 %v20541_v40  ;;  %9956 = vmatmul.mubr.f32.gmra.mrb[42].mxu1 %v20541_v40  ;;  %v24718_v40 = vld [vmem:[#allocation202_spill] sm:$0xff] }
 0x619   : > { %7587 = vmatprep.mubr.f32.mxu0 %v23737_v57  ;;  %9961 = vmatprep.mubr.f32.mxu1 %v23737_v57 }
 0x61c   : > { %7589 = vmatmul.mubr.f32.gmra.mrb[44].mxu0 %v20554_v61  ;;  %9963 = vmatmul.mubr.f32.gmra.mrb[44].mxu1 %v20554_v61  ;;  %v24717_v61 = vld [vmem:[#allocation194_spill] sm:$0xff] }
 0x61d   : > { %7594 = vmatprep.mubr.f32.mxu0 %v23737_v57  ;;  %9968 = vmatprep.mubr.f32.mxu1 %v23737_v57 }
 0x620   : > { %7596 = vmatmul.mubr.f32.gmra.mrb[46].mxu0 %v20559_v10  ;;  %9970 = vmatmul.mubr.f32.gmra.mrb[46].mxu1 %v20559_v10  ;;  %v24715_v10 = vld [vmem:[#allocation50_spill] sm:$0xff] }
 0x621   : > { %7601 = vmatprep.mubr.f32.mxu0 %v23737_v57  ;;  %9975 = vmatprep.mubr.f32.mxu1 %v23737_v57 }
 0x624   : > { %7603 = vmatmul.mubr.f32.gmra.mrb[48].mxu0 %v20580_v9  ;;  %9977 = vmatmul.mubr.f32.gmra.mrb[48].mxu1 %v20580_v9  ;;  %v24714_v9 = vld [vmem:[#allocation185_spill] sm:$0xff] }
 0x625   : > { %7608 = vmatprep.mubr.f32.mxu0 %v23737_v57  ;;  %9982 = vmatprep.mubr.f32.mxu1 %v23737_v57 }
 0x628   : > { %7610 = vmatmul.mubr.f32.gmra.mrb[50].mxu0 %v20593_v50  ;;  %9984 = vmatmul.mubr.f32.gmra.mrb[50].mxu1 %v20593_v50  ;;  %v24713_v50 = vld [vmem:[#allocation179_spill] sm:$0xff] }
 0x629   : > { %7615 = vmatprep.mubr.f32.mxu0 %v23737_v57  ;;  %9989 = vmatprep.mubr.f32.mxu1 %v23737_v57 }
 0x62c   : > { %7617 = vmatmul.mubr.f32.gmra.mrb[52].mxu0 %v20606_v25  ;;  %9991 = vmatmul.mubr.f32.gmra.mrb[52].mxu1 %v20606_v25  ;;  %v24712_v25 = vld [vmem:[#allocation109_spill] sm:$0xff] }
 0x62d   : > { %7622 = vmatprep.mubr.f32.mxu0 %v23737_v57  ;;  %9996 = vmatprep.mubr.f32.mxu1 %v23737_v57 }
 0x630   : > { %7624 = vmatmul.mubr.f32.gmra.mrb[54].mxu0 %v20611_v28  ;;  %9998 = vmatmul.mubr.f32.gmra.mrb[54].mxu1 %v20611_v28  ;;  %v24710_v28 = vld [vmem:[#allocation54_spill] sm:$0xff] }
 0x631   : > { %7629 = vmatprep.mubr.f32.mxu0 %v23737_v57  ;;  %10003 = vmatprep.mubr.f32.mxu1 %v23737_v57 }
 0x634   : > { %7631 = vmatmul.mubr.f32.gmra.mrb[56].mxu0 %v20632_v8  ;;  %10005 = vmatmul.mubr.f32.gmra.mrb[56].mxu1 %v20632_v8  ;;  %v24709_v8 = vld [vmem:[#allocation113_spill] sm:$0xff] }
 0x635   : > { %7636 = vmatprep.mubr.f32.mxu0 %v23737_v57  ;;  %10010 = vmatprep.mubr.f32.mxu1 %v23737_v57 }
 0x638   : > { %7638 = vmatmul.mubr.f32.gmra.mrb[58].mxu0 %v20645_v38  ;;  %10012 = vmatmul.mubr.f32.gmra.mrb[58].mxu1 %v20645_v38  ;;  %v24708_v38 = vld [vmem:[#allocation177_spill] sm:$0xff] }
 0x639   : > { %7643 = vmatprep.mubr.f32.mxu0 %v23737_v57  ;;  %10017 = vmatprep.mubr.f32.mxu1 %v23737_v57 }
 0x63c   : > { %7645 = vmatmul.mubr.f32.gmra.mrb[60].mxu0 %v20658_v7  ;;  %10019 = vmatmul.mubr.f32.gmra.mrb[60].mxu1 %v20658_v7  ;;  %v24705_v7 = vld [vmem:[#allocation275_spill] sm:$0xff] }
 0x63d   : > { %7650 = vmatprep.mubr.f32.mxu0 %v23737_v57  ;;  %10024 = vmatprep.mubr.f32.mxu1 %v23737_v57 }
 0x640   : > { %7652 = vmatmul.mubr.f32.gmra.mrb[62].mxu0 %v20671_v45  ;;  %10026 = vmatmul.mubr.f32.gmra.mrb[62].mxu1 %v20671_v45  ;;  %v24706_v45 = vld [vmem:[#allocation97_spill] sm:$0xff] }
 0x641   : > { %7786 = vmatprep.mubr.f32.mxu0 %v23737_v57  ;;  %10160 = vmatprep.mubr.f32.mxu1 %v23737_v57 }
 0x644   : > { %7789 = vmatmul.mubr.f32.vlgmr.msra.gmra.mrb[0].mxu0 %v24701_v24  ;;  %10163 = vmatmul.mubr.f32.vlgmr.msra.gmra.mrb[0].mxu1 %v24701_v24  ;;  %v24707_v24 = vld [vmem:[#allocation98_spill] sm:$0xff] }
 0x645   : > { %13697 = vmatpush1.bf16.msra.mxu0 %v24702_v14  ;;  %7794 = vmatprep.mubr.f32.mxu0 %v23737_v57 }
 0x646   : > { %10168 = vmatprep.mubr.f32.mxu1 %v23737_v57  ;;  %13699 = vmatprep.subr.bf16.mxu0 %v24703_v58 }
 0x647   : > { %13889 = vmatpush1.bf16.msra.mxu1 %v24704_v55 }
 0x648   : > { %7797 = vmatmul.mubr.f32.gmra.mrb[2].mxu0 %v24705_v7  ;;  %10171 = vmatmul.mubr.f32.gmra.mrb[2].mxu1 %v24705_v7  ;;  %v24711_v7 = vld [vmem:[#allocation108_spill] sm:$0xff] }
 0x649   : > { %7802 = vmatprep.mubr.f32.mxu0 %v23737_v57  ;;  %10176 = vmatprep.mubr.f32.mxu1 %v23737_v57 }
 0x64a   : > { %13701 = vmatpush1.bf16.msra.mxu0 %v24706_v45  ;;  %13891 = vmatprep.subr.bf16.mxu1 %v24707_v24 }
 0x64b   : > { %13703 = vmatprep.subr.bf16.mxu0 %v24708_v38  ;;  %13893 = vmatpush1.bf16.msra.mxu1 %v24709_v8 }
 0x64c   : > { %7805 = vmatmul.mubr.f32.gmra.mrb[4].mxu0 %v24710_v28  ;;  %10179 = vmatmul.mubr.f32.gmra.mrb[4].mxu1 %v24710_v28  ;;  %v24716_v28 = vld [vmem:[#allocation193_spill] sm:$0xff] }
 0x64d   : > { %7810 = vmatprep.mubr.f32.mxu0 %v23737_v57  ;;  %10184 = vmatprep.mubr.f32.mxu1 %v23737_v57 }
 0x64e   : > { %13705 = vmatpush1.bf16.msra.mxu0 %v24711_v7  ;;  %13895 = vmatprep.subr.bf16.mxu1 %v24712_v25 }
 0x64f   : > { %13707 = vmatprep.subr.bf16.mxu0 %v24713_v50  ;;  %13897 = vmatpush1.bf16.msra.mxu1 %v24714_v9 }
 0x650   : > { %7813 = vmatmul.mubr.f32.gmra.mrb[6].mxu0 %v24715_v10  ;;  %10187 = vmatmul.mubr.f32.gmra.mrb[6].mxu1 %v24715_v10  ;;  %v24721_v10 = vld [vmem:[#allocation211_spill] sm:$0xff] }
 0x651   : > { %7818 = vmatprep.mubr.f32.mxu0 %v23737_v57  ;;  %10192 = vmatprep.mubr.f32.mxu1 %v23737_v57 }
 0x652   : > { %13709 = vmatpush1.bf16.msra.mxu0 %v24716_v28  ;;  %13899 = vmatprep.subr.bf16.mxu1 %v24717_v61 }
 0x653   : > { %13711 = vmatprep.subr.bf16.mxu0 %v24718_v40  ;;  %13901 = vmatpush1.bf16.msra.mxu1 %v24719_v6 }
 0x654   : > { %7821 = vmatmul.mubr.f32.gmra.mrb[8].mxu0 %v24720_v4  ;;  %10195 = vmatmul.mubr.f32.gmra.mrb[8].mxu1 %v24720_v4  ;;  %v24726_v4 = vld [vmem:[#allocation228_spill] sm:$0xff] }
 0x655   : > { %7826 = vmatprep.mubr.f32.mxu0 %v23737_v57  ;;  %10200 = vmatprep.mubr.f32.mxu1 %v23737_v57 }
 0x656   : > { %13713 = vmatpush1.bf16.msra.mxu0 %v24721_v10  ;;  %13903 = vmatprep.subr.bf16.mxu1 %v24722_v54 }
 0x657   : > { %13715 = vmatprep.subr.bf16.mxu0 %v24723_v16  ;;  %13905 = vmatpush1.bf16.msra.mxu1 %v24724_v19  ;;  %v24808_v16 = vld [vmem:[#allocation59_spill] sm:$0xff] }
 0x658   : > { %7829 = vmatmul.mubr.f32.gmra.mrb[10].mxu0 %v24725_v13  ;;  %10203 = vmatmul.mubr.f32.gmra.mrb[10].mxu1 %v24725_v13  ;;  %v24730_v13 = vld [vmem:[#allocation243_spill] sm:$0xff] }
 0x659   : > { %7834 = vmatprep.mubr.f32.mxu0 %v23737_v57  ;;  %10208 = vmatprep.mubr.f32.mxu1 %v23737_v57 }
 0x65a   : > { %13717 = vmatpush1.bf16.msra.mxu0 %v24726_v4  ;;  %13907 = vmatprep.subr.bf16.mxu1 %v24727_v11  ;;  %v24789_v4 = vld [vmem:[#allocation115_spill] sm:$0xff] }
 0x65b   : > { %13719 = vmatprep.subr.bf16.mxu0 %v24728_v48  ;;  %13909 = vmatpush1.bf16.msra.mxu1 %v24729_v20  ;;  %v24736_v20 = vld [vmem:[#allocation165_spill] sm:$0xff]  ;;  %v24787_v48 = vld [vmem:[#allocation112_spill] sm:$0xff] }
 0x65c   : > { %7837 = vmatmul.mubr.f32.gmra.mrb[12].mxu0 %v20031_v26  ;;  %10211 = vmatmul.mubr.f32.gmra.mrb[12].mxu1 %v20031_v26  ;;  %v24737_v26 = vld [vmem:[#allocation253_spill] sm:$0xff]  ;;  %v24788_v11 = vand.u32 4294901760, %v24787_v48 }
 0x65d   : > { %7842 = vmatprep.mubr.f32.mxu0 %v23737_v57  ;;  %10216 = vmatprep.mubr.f32.mxu1 %v23737_v57 }
 0x65e   : > { %13721 = vmatpush1.bf16.msra.mxu0 %v24730_v13  ;;  %13911 = vmatprep.subr.bf16.mxu1 %v24731_v63  ;;  %v24738_v63 = vld [vmem:[#allocation257_spill] sm:$0xff]  ;;  %v24741_v13 = vld [vmem:[#allocation264_spill] sm:$0xff] }
 0x65f   : > { %13723 = vmatprep.subr.bf16.mxu0 %v24732_v0  ;;  %13913 = vmatpush1.bf16.msra.mxu1 %v24733_v36  ;;  %v24739_v0 = vand.u32 4294901760, %v24383_v34  ;;  %v24740_v36 = vand.u32 4294901760, %v24384_v2  ;;  %v24744_v34 = vld [vmem:[#allocation219_spill] sm:$0xff] }
 0x660   : > { %7845 = vmatmul.mubr.f32.gmra.mrb[14].mxu0 %v24736_v20  ;;  %10219 = vmatmul.mubr.f32.gmra.mrb[14].mxu1 %v24736_v20  ;;  %v24745_v2 = vld [vmem:[#allocation227_spill] sm:$0xff]  ;;  %v24751_v20 = vld [vmem:[#allocation205_spill] sm:$0xff] }
 0x661   : > { %7850 = vmatprep.mubr.f32.mxu0 %v23737_v57  ;;  %10224 = vmatprep.mubr.f32.mxu1 %v23737_v57  ;;  %v13918_v37 = vpack.c.bf16 %v24740_v36, %v24739_v0  ;;  %v24747_v36 = vld [vmem:[#allocation162_spill] sm:$0xff]  ;;  %v24748_v0 = vld [vmem:[#allocation76_spill] sm:$0xff] }
 0x662   : > { %13725 = vmatpush1.bf16.msra.mxu0 %v24737_v26  ;;  %13915 = vmatprep.subr.bf16.mxu1 %v24738_v63 }
 0x663   : > { %13917 = vmatpush1.bf16.msra.mxu1 %v24741_v13  ;;  %13727 = vmatprep.subr.bf16.mxu0 %v13726_v15  ;;  %v24746_v15 = vld [vmem:[#allocation170_spill] sm:$0xff] }
 0x664   : > { %7853 = vmatmul.mubr.f32.gmra.mrb[16].mxu0 %v20108_v41  ;;  %10227 = vmatmul.mubr.f32.gmra.mrb[16].mxu1 %v20108_v41  ;;  %v24743_v41 = vld [vmem:[#allocation107_spill] sm:$0xff] }
 0x665   : > { %7858 = vmatprep.mubr.f32.mxu0 %v23737_v57  ;;  %10232 = vmatprep.mubr.f32.mxu1 %v23737_v57 }
 0x666   : > { %13919 = vmatprep.subr.bf16.mxu1 %v13918_v37  ;;  %v24754_v37 = vld [vmem:[#allocation240_spill] sm:$0xff] }
 0x668   : > { %7861 = vmatmul.mubr.f32.gmra.mrb[18].mxu0 %v20392_v35  ;;  %10235 = vmatmul.mubr.f32.gmra.mrb[18].mxu1 %v20392_v35  ;;  %v24749_v35 = vld [vmem:[#allocation182_spill] sm:$0xff] }
 0x669   : > { %7866 = vmatprep.mubr.f32.mxu0 %v23737_v57  ;;  %10240 = vmatprep.mubr.f32.mxu1 %v23737_v57 }
 0x66c   : > { %7869 = vmatmul.mubr.f32.gmra.mrb[20].mxu0 %v20398_v22  ;;  %10243 = vmatmul.mubr.f32.gmra.mrb[20].mxu1 %v20398_v22  ;;  %v24750_v22 = vld [vmem:[#allocation189_spill] sm:$0xff] }
 0x66d   : > { %7874 = vmatprep.mubr.f32.mxu0 %v23737_v57  ;;  %10248 = vmatprep.mubr.f32.mxu1 %v23737_v57 }
 0x670   : > { %7877 = vmatmul.mubr.f32.gmra.mrb[22].mxu0 %v24742_v33  ;;  %10251 = vmatmul.mubr.f32.gmra.mrb[22].mxu1 %v24742_v33  ;;  %v24755_v33 = vld [vmem:[#allocation248_spill] sm:$0xff] }
 0x671   : > { %7882 = vmatprep.mubr.f32.mxu0 %v23737_v57  ;;  %10256 = vmatprep.mubr.f32.mxu1 %v23737_v57 }
 0x674   : > { %7885 = vmatmul.mubr.f32.gmra.mrb[24].mxu0 %v24743_v41  ;;  %10259 = vmatmul.mubr.f32.gmra.mrb[24].mxu1 %v24743_v41  ;;  %v24756_v41 = vld [vmem:[#allocation260_spill] sm:$0xff] }
 0x675   : > { %7890 = vmatprep.mubr.f32.mxu0 %v23737_v57  ;;  %10264 = vmatprep.mubr.f32.mxu1 %v23737_v57 }
 0x678   : > { %7893 = vmatmul.mubr.f32.gmra.mrb[26].mxu0 %v24744_v34  ;;  %10267 = vmatmul.mubr.f32.gmra.mrb[26].mxu1 %v24744_v34  ;;  %v24757_v34 = vld [vmem:[#allocation278_spill] sm:$0xff] }
 0x679   : > { %7898 = vmatprep.mubr.f32.mxu0 %v23737_v57  ;;  %10272 = vmatprep.mubr.f32.mxu1 %v23737_v57 }
 0x67c   : > { %7901 = vmatmul.mubr.f32.gmra.mrb[28].mxu0 %v24745_v2  ;;  %10275 = vmatmul.mubr.f32.gmra.mrb[28].mxu1 %v24745_v2  ;;  %v24758_v2 = vld [vmem:[#allocation164_spill] sm:$0xff] }
 0x67d   : > { %7906 = vmatprep.mubr.f32.mxu0 %v23737_v57  ;;  %10280 = vmatprep.mubr.f32.mxu1 %v23737_v57 }
 0x680   : > { %7909 = vmatmul.mubr.f32.gmra.mrb[30].mxu0 %v24746_v15  ;;  %10283 = vmatmul.mubr.f32.gmra.mrb[30].mxu1 %v24746_v15  ;;  %v24759_v15 = vld [vmem:[#allocation92_spill] sm:$0xff] }
 0x681   : > { %7914 = vmatprep.mubr.f32.mxu0 %v23737_v57  ;;  %10288 = vmatprep.mubr.f32.mxu1 %v23737_v57 }
 0x684   : > { %7917 = vmatmul.mubr.f32.gmra.mrb[32].mxu0 %v24747_v36  ;;  %10291 = vmatmul.mubr.f32.gmra.mrb[32].mxu1 %v24747_v36  ;;  %v24761_v36 = vld [vmem:[#allocation281_spill] sm:$0xff] }
 0x685   : > { %7922 = vmatprep.mubr.f32.mxu0 %v23737_v57  ;;  %10296 = vmatprep.mubr.f32.mxu1 %v23737_v57 }
 0x688   : > { %7925 = vmatmul.mubr.f32.gmra.mrb[34].mxu0 %v24748_v0  ;;  %10299 = vmatmul.mubr.f32.gmra.mrb[34].mxu1 %v24748_v0  ;;  %v24762_v0 = vld [vmem:[#allocation45_spill] sm:$0xff] }
 0x689   : > { %7930 = vmatprep.mubr.f32.mxu0 %v23737_v57  ;;  %10304 = vmatprep.mubr.f32.mxu1 %v23737_v57 }
 0x68c   : > { %7933 = vmatmul.mubr.f32.gmra.mrb[36].mxu0 %v24749_v35  ;;  %10307 = vmatmul.mubr.f32.gmra.mrb[36].mxu1 %v24749_v35  ;;  %v24763_v35 = vand.u32 4294901760, %v24762_v0  ;;  %v24775_v0 = vld [vmem:[#allocation73_spill] sm:$0xff] }
 0x68d   : > { %7938 = vmatprep.mubr.f32.mxu0 %v23737_v57  ;;  %10312 = vmatprep.mubr.f32.mxu1 %v23737_v57 }
 0x690   : > { %7941 = vmatmul.mubr.f32.gmra.mrb[38].mxu0 %v24750_v22  ;;  %10315 = vmatmul.mubr.f32.gmra.mrb[38].mxu1 %v24750_v22  ;;  %v24764_v22 = vld [vmem:[#allocation46_spill] sm:$0xff] }
 0x691   : > { %7946 = vmatprep.mubr.f32.mxu0 %v23737_v57  ;;  %10320 = vmatprep.mubr.f32.mxu1 %v23737_v57 }
 0x694   : > { %7949 = vmatmul.mubr.f32.gmra.mrb[40].mxu0 %v24751_v20  ;;  %10323 = vmatmul.mubr.f32.gmra.mrb[40].mxu1 %v24751_v20  ;;  %v24765_v20 = vand.u32 4294901760, %v24764_v22  ;;  %v24777_v22 = vld [vmem:[#allocation68_spill] sm:$0xff] }
 0x695   : > { %7954 = vmatprep.mubr.f32.mxu0 %v23737_v57  ;;  %10328 = vmatprep.mubr.f32.mxu1 %v23737_v57 }
 0x698   : > { %7957 = vmatmul.mubr.f32.gmra.mrb[42].mxu0 %v24752_v21  ;;  %10331 = vmatmul.mubr.f32.gmra.mrb[42].mxu1 %v24752_v21  ;;  %v13728_v21 = vpack.c.bf16 %v24765_v20, %v24763_v35  ;;  %v24776_v35 = vand.u32 4294901760, %v24775_v0  ;;  %v24778_v20 = vand.u32 4294901760, %v24777_v22  ;;  %v24791_v0 = vld [vmem:[#allocation44_spill] sm:$0xff]  ;;  %v24794_v22 = vld [vmem:[#allocation121_spill] sm:$0xff] }
 0x699   : > { %7962 = vmatprep.mubr.f32.mxu0 %v23737_v57  ;;  %10336 = vmatprep.mubr.f32.mxu1 %v23737_v57 }
 0x69c   : > { %7965 = vmatmul.mubr.f32.gmra.mrb[44].mxu0 %v24753_v39  ;;  %10339 = vmatmul.mubr.f32.gmra.mrb[44].mxu1 %v24753_v39  ;;  %v24766_v39 = vld [vmem:[#allocation51_spill] sm:$0xff] }
 0x69d   : > { %7970 = vmatprep.mubr.f32.mxu0 %v23737_v57  ;;  %10344 = vmatprep.mubr.f32.mxu1 %v23737_v57 }
 0x6a0   : > { %7973 = vmatmul.mubr.f32.gmra.mrb[46].mxu0 %v24754_v37  ;;  %10347 = vmatmul.mubr.f32.gmra.mrb[46].mxu1 %v24754_v37  ;;  %v24767_v37 = vand.u32 4294901760, %v24766_v39  ;;  %v13732_v39 = vpack.c.bf16 %v24778_v20, %v24776_v35  ;;  %v24795_v20 = vand.u32 4294901760, %v24794_v22 }
 0x6a1   : > { %7978 = vmatprep.mubr.f32.mxu0 %v23737_v57  ;;  %10352 = vmatprep.mubr.f32.mxu1 %v23737_v57 }
 0x6a4   : > { %7981 = vmatmul.mubr.f32.gmra.mrb[48].mxu0 %v24755_v33  ;;  %10355 = vmatmul.mubr.f32.gmra.mrb[48].mxu1 %v24755_v33  ;;  %v24768_v33 = vld [vmem:[#allocation52_spill] sm:$0xff] }
 0x6a5   : > { %7986 = vmatprep.mubr.f32.mxu0 %v23737_v57  ;;  %10360 = vmatprep.mubr.f32.mxu1 %v23737_v57 }
 0x6a8   : > { %7989 = vmatmul.mubr.f32.gmra.mrb[50].mxu0 %v24756_v41  ;;  %10363 = vmatmul.mubr.f32.gmra.mrb[50].mxu1 %v24756_v41  ;;  %v24769_v41 = vand.u32 4294901760, %v24768_v33 }
 0x6a9   : > { %7994 = vmatprep.mubr.f32.mxu0 %v23737_v57  ;;  %10368 = vmatprep.mubr.f32.mxu1 %v23737_v57 }
 0x6ac   : > { %7997 = vmatmul.mubr.f32.gmra.mrb[52].mxu0 %v24757_v34  ;;  %10371 = vmatmul.mubr.f32.gmra.mrb[52].mxu1 %v24757_v34  ;;  %v13730_v34 = vpack.c.bf16 %v24769_v41, %v24767_v37  ;;  %v24779_v37 = vld [vmem:[#allocation105_spill] sm:$0xff]  ;;  %v24781_v41 = vld [vmem:[#allocation106_spill] sm:$0xff] }
 0x6ad   : > { %8002 = vmatprep.mubr.f32.mxu0 %v23737_v57  ;;  %10376 = vmatprep.mubr.f32.mxu1 %v23737_v57  ;;  %v24780_v33 = vand.u32 4294901760, %v24779_v37 }
 0x6b0   : > { %8005 = vmatmul.mubr.f32.gmra.mrb[54].mxu0 %v20625_v60  ;;  %10379 = vmatmul.mubr.f32.gmra.mrb[54].mxu1 %v20625_v60  ;;  %v24760_v60 = vld [vmem:[#allocation96_spill] sm:$0xff] }
 0x6b1   : > { %8010 = vmatprep.mubr.f32.mxu0 %v23737_v57  ;;  %10384 = vmatprep.mubr.f32.mxu1 %v23737_v57 }
 0x6b4   : > { %8013 = vmatmul.mubr.f32.gmra.mrb[56].mxu0 %v24758_v2  ;;  %10387 = vmatmul.mubr.f32.gmra.mrb[56].mxu1 %v24758_v2  ;;  %v24770_v2 = vld [vmem:[#allocation60_spill] sm:$0xff] }
 0x6b5   : > { %8018 = vmatprep.mubr.f32.mxu0 %v23737_v57  ;;  %10392 = vmatprep.mubr.f32.mxu1 %v23737_v57 }
 0x6b8   : > { %8021 = vmatmul.mubr.f32.gmra.mrb[58].mxu0 %v24759_v15  ;;  %10395 = vmatmul.mubr.f32.gmra.mrb[58].mxu1 %v24759_v15  ;;  %v24771_v15 = vand.u32 4294901760, %v24770_v2  ;;  %v24782_v2 = vand.u32 4294901760, %v24781_v41  ;;  %v24798_v41 = vld [vmem:[#allocation32_spill] sm:$0xff] }
 0x6b9   : > { %8026 = vmatprep.mubr.f32.mxu0 %v23737_v57  ;;  %10400 = vmatprep.mubr.f32.mxu1 %v23737_v57 }
 0x6bc   : > { %8029 = vmatmul.mubr.f32.gmra.mrb[60].mxu0 %v24760_v60  ;;  %10403 = vmatmul.mubr.f32.gmra.mrb[60].mxu1 %v24760_v60  ;;  %v24772_v60 = vld [vmem:[#allocation61_spill] sm:$0xff] }
 0x6bd   : > { %8034 = vmatprep.mubr.f32.mxu0 %v23737_v57  ;;  %10408 = vmatprep.mubr.f32.mxu1 %v23737_v57  ;;  %v24773_v13 = vand.u32 4294901760, %v24772_v60 }
 0x6bf   : > { %v13920_v63 = vpack.c.bf16 %v24773_v13, %v24771_v15  ;;  %v13922_v13 = vpack.c.bf16 %v24782_v2, %v24780_v33  ;;  %v24783_v15 = vld [vmem:[#allocation102_spill] sm:$0xff] }
 0x6c0   : > { %8037 = vmatmul.mubr.f32.gmra.mrb[62].mxu0 %v24761_v36  ;;  %10411 = vmatmul.mubr.f32.gmra.mrb[62].mxu1 %v24761_v36  ;;  %v24774_v36 = vld [vmem:[#allocation48_spill] sm:$0xff]  ;;  %v24784_v60 = vand.u32 4294901760, %v24783_v15  ;;  %v24796_v33 = vld [vmem:[#allocation30_spill] sm:$0xff] }
 0x6c1   : > { %8139 = vmatprep.mubr.f32.mxu0 %v23737_v57  ;;  %10513 = vmatprep.mubr.f32.mxu1 %v23737_v57  ;;  %v24797_v48 = vand.u32 4294901760, %v24796_v33  ;;  %v24800_v2 = vld [vmem:[#allocation158_spill] sm:$0xff] }
 0x6c2   : > { %v24801_v15 = vand.u32 4294901760, %v24800_v2  ;;  %v24816_v2 = vld [vmem:[#allocation173_spill] sm:$0xff] }
 0x6c4   : > { %8143 = vmatmul.mubr.f32.vlgmr.msra.gmra.mrb[0].mxu0 %v24774_v36  ;;  %10517 = vmatmul.mubr.f32.vlgmr.msra.gmra.mrb[0].mxu1 %v24774_v36  ;;  %v24785_v36 = vld [vmem:[#allocation103_spill] sm:$0xff] }
 0x6c5   : > { %13729 = vmatpush1.bf16.msra.mxu0 %v13728_v21  ;;  %8148 = vmatprep.mubr.f32.mxu0 %v23737_v57  ;;  %v24786_v21 = vand.u32 4294901760, %v24785_v36 }
 0x6c6   : > { %10522 = vmatprep.mubr.f32.mxu1 %v23737_v57  ;;  %13731 = vmatprep.subr.bf16.mxu0 %v13730_v34  ;;  %v24790_v34 = vand.u32 4294901760, %v24789_v4  ;;  %v24799_v4 = vand.u32 4294901760, %v24798_v41 }
 0x6c7   : > { %13921 = vmatpush1.bf16.msra.mxu1 %v13920_v63  ;;  %v13734_v26 = vpack.c.bf16 %v24786_v21, %v24784_v60  ;;  %v24792_v63 = vld [vmem:[#allocation120_spill] sm:$0xff]  ;;  %v24802_v60 = vld [vmem:[#allocation35_spill] sm:$0xff] }
 0x6c8   : > { %v13924_v19 = vpack.c.bf16 %v24790_v34, %v24788_v11  ;;  %8152 = vmatmul.mubr.f32.gmra.mrb[2].mxu0 %v24791_v0  ;;  %10526 = vmatmul.mubr.f32.gmra.mrb[2].mxu1 %v24791_v0  ;;  %v24793_v35 = vand.u32 4294901760, %v24792_v63  ;;  %v13926_v11 = vpack.c.bf16 %v24799_v4, %v24797_v48  ;;  %v24803_v36 = vand.u32 4294901760, %v24802_v60  ;;  %v24804_v34 = vld [vmem:[#allocation41_spill] sm:$0xff]  ;;  %v24814_v48 = vld [vmem:[#allocation168_spill] sm:$0xff] }
 0x6c9   : > { %8157 = vmatprep.mubr.f32.mxu0 %v23737_v57  ;;  %10531 = vmatprep.mubr.f32.mxu1 %v23737_v57  ;;  %v24815_v41 = vand.u32 4294901760, %v24814_v48 }
 0x6ca   : > { %13733 = vmatpush1.bf16.msra.mxu0 %v13732_v39  ;;  %13923 = vmatprep.subr.bf16.mxu1 %v13922_v13  ;;  %v13736_v37 = vpack.c.bf16 %v24795_v20, %v24793_v35  ;;  %v13738_v21 = vpack.c.bf16 %v24803_v36, %v24801_v15  ;;  %v24805_v39 = vand.u32 4294901760, %v24804_v34  ;;  %v24806_v13 = vld [vmem:[#allocation38_spill] sm:$0xff]  ;;  %v24818_v15 = vld [vmem:[#allocation176_spill] sm:$0xff]  ;;  %v24820_v34 = vld [vmem:[#allocation29_spill] sm:$0xff] }
 0x6cb   : > { %13735 = vmatprep.subr.bf16.mxu0 %v13734_v26  ;;  %13925 = vmatpush1.bf16.msra.mxu1 %v13924_v19  ;;  %v24807_v0 = vand.u32 4294901760, %v24806_v13  ;;  %v24809_v19 = vand.u32 4294901760, %v24669_v17  ;;  %v24810_v26 = vld [vmem:[#allocation160_spill] sm:$0xff]  ;;  %v24812_v20 = vld [vmem:[#allocation166_spill] sm:$0xff]  ;;  %v24819_v60 = vand.u32 4294901760, %v24818_v15  ;;  %v24824_v13 = vld [vmem:[#allocation65_spill] sm:$0xff] }
 0x6cc   : > { %8161 = vmatmul.mubr.f32.gmra.mrb[4].mxu0 %v24808_v16  ;;  %10535 = vmatmul.mubr.f32.gmra.mrb[4].mxu1 %v24808_v16  ;;  %v24811_v35 = vand.u32 4294901760, %v24810_v26  ;;  %v24813_v33 = vand.u32 4294901760, %v24812_v20  ;;  %v24817_v16 = vand.u32 4294901760, %v24816_v2  ;;  %v24828_v26 = vld [vmem:[#allocation111_spill] sm:$0xff]  ;;  %v24830_v20 = vld [vmem:[#allocation33_spill] sm:$0xff] }
 0x6cd   : > { %v13928_v63 = vpack.c.bf16 %v24807_v0, %v24805_v39  ;;  %8166 = vmatprep.mubr.f32.mxu0 %v23737_v57  ;;  %10540 = vmatprep.mubr.f32.mxu1 %v23737_v57  ;;  %v24826_v0 = vld [vmem:[#allocation116_spill] sm:$0xff] }
 0x6ce   : > { %13737 = vmatpush1.bf16.msra.mxu0 %v13736_v37  ;;  %13927 = vmatprep.subr.bf16.mxu1 %v13926_v11  ;;  %v13740_v22 = vpack.c.bf16 %v24811_v35, %v24809_v19  ;;  %v13930_v4 = vpack.c.bf16 %v24815_v41, %v24813_v33  ;;  %v13742_v36 = vpack.c.bf16 %v24819_v60, %v24817_v16  ;;  %v24821_v37 = vand.u32 4294901760, %v24820_v34  ;;  %v24822_v11 = vld [vmem:[#allocation31_spill] sm:$0xff]  ;;  %v24832_v41 = vld [vmem:[#allocation34_spill] sm:$0xff]  ;;  %v24836_v34 = vld [vmem:[#allocation192_spill] sm:$0xff] }
 0x6cf   : > { %13739 = vmatprep.subr.bf16.mxu0 %v13738_v21  ;;  %13929 = vmatpush1.bf16.msra.mxu1 %v13928_v63  ;;  %v24823_v39 = vand.u32 4294901760, %v24822_v11  ;;  %v24825_v21 = vand.u32 4294901760, %v24678_v49  ;;  %v24827_v63 = vand.u32 4294901760, %v24826_v0  ;;  %v24829_v35 = vand.u32 4294901760, %v24828_v26  ;;  %v24834_v16 = vld [vmem:[#allocation119_spill] sm:$0xff]  ;;  %v24840_v11 = vld [vmem:[#allocation62_spill] sm:$0xff] }
 0x6d0   : > { %8170 = vmatmul.mubr.f32.gmra.mrb[6].mxu0 %v24824_v13  ;;  %10544 = vmatmul.mubr.f32.gmra.mrb[6].mxu1 %v24824_v13  ;;  %v24831_v33 = vand.u32 4294901760, %v24830_v20  ;;  %v24833_v2 = vand.u32 4294901760, %v24832_v41  ;;  %v24835_v15 = vand.u32 4294901760, %v24834_v16  ;;  %v24843_v13 = vand.u32 4294901760, %v24687_v51  ;;  %v24847_v20 = vld [vmem:[#allocation251_spill] sm:$0xff]  ;;  %v24851_v41 = vld [vmem:[#allocation77_spill] sm:$0xff] }
 0x6d1   : > { %v13932_v17 = vpack.c.bf16 %v24823_v39, %v24821_v37  ;;  %8175 = vmatprep.mubr.f32.mxu0 %v23737_v57  ;;  %10549 = vmatprep.mubr.f32.mxu1 %v23737_v57  ;;  %v13744_v19 = vpack.c.bf16 %v24827_v63, %v24825_v21  ;;  %v24842_v39 = vand.u32 4294901760, %v24686_v23  ;;  %v24844_v21 = vand.u32 4294901760, %v24688_v32 }
 0x6d2   : > { %13741 = vmatpush1.bf16.msra.mxu0 %v13740_v22  ;;  %13931 = vmatprep.subr.bf16.mxu1 %v13930_v4  ;;  %v13934_v48 = vpack.c.bf16 %v24831_v33, %v24829_v35  ;;  %v13746_v60 = vpack.c.bf16 %v24835_v15, %v24833_v2  ;;  %v24837_v22 = vand.u32 4294901760, %v24836_v34  ;;  %v24838_v4 = vld [vmem:[#allocation191_spill] sm:$0xff]  ;;  %v24845_v63 = vand.u32 4294901760, %v24689_v12  ;;  %v24849_v33 = vld [vmem:[#allocation250_spill] sm:$0xff] }
 0x6d3   : > { %13743 = vmatprep.subr.bf16.mxu0 %v13742_v36  ;;  %13933 = vmatpush1.bf16.msra.mxu1 %v13932_v17  ;;  %v24839_v37 = vand.u32 4294901760, %v24838_v4  ;;  %v24841_v36 = vand.u32 4294901760, %v24539_v53  ;;  %v13938_v0 = vpack.c.bf16 %v24844_v21, %v24843_v13  ;;  %v24846_v26 = vand.u32 4294901760, %v24690_v52  ;;  %v24860_v4 = vld [vmem:[#allocation74_spill] sm:$0xff]  ;;  %v24880_v21 = vld [vmem:[#allocation40_spill] sm:$0xff] }
 0x6d4   : > { %8179 = vmatmul.mubr.f32.gmra.mrb[8].mxu0 %v24840_v11  ;;  %10553 = vmatmul.mubr.f32.gmra.mrb[8].mxu1 %v24840_v11  ;;  %v24852_v12 = vand.u32 4294901760, %v24560_v46  ;;  %v24853_v52 = vand.u32 4294901760, %v24561_v1  ;;  %v24854_v51 = vand.u32 4294901760, %v24562_v18  ;;  %v24855_v32 = vand.u32 4294901760, %v24563_v42  ;;  %v24867_v11 = vld [vmem:[#allocation78_spill] sm:$0xff] }
 0x6d5   : > { %v13936_v49 = vpack.c.bf16 %v24839_v37, %v24837_v22  ;;  %8184 = vmatprep.mubr.f32.mxu0 %v23737_v57  ;;  %10558 = vmatprep.mubr.f32.mxu1 %v23737_v57  ;;  %v13748_v17 = vpack.c.bf16 %v24842_v39, %v24841_v36  ;;  %v13750_v35 = vpack.c.bf16 %v24846_v26, %v24845_v63  ;;  %v24856_v16 = vand.u32 4294901760, %v24564_v30  ;;  %v24876_v36 = vld [vmem:[#allocation172_spill] sm:$0xff]  ;;  %v24877_v39 = vld [vmem:[#allocation95_spill] sm:$0xff]  ;;  %v24879_v13 = vld [vmem:[#allocation206_spill] sm:$0xff] }
 0x6d6   : > { %13745 = vmatpush1.bf16.msra.mxu0 %v13744_v19  ;;  %13935 = vmatprep.subr.bf16.mxu1 %v13934_v48  ;;  %v24848_v19 = vand.u32 4294901760, %v24847_v20  ;;  %v24850_v48 = vand.u32 4294901760, %v24849_v33  ;;  %v13752_v23 = vpack.c.bf16 %v24853_v52, %v24852_v12  ;;  %v13942_v2 = vpack.c.bf16 %v24855_v32, %v24854_v51  ;;  %v24882_v63 = vld [vmem:[#allocation239_spill] sm:$0xff]  ;;  %v24883_v26 = vld [vmem:[#allocation249_spill] sm:$0xff]  ;;  %v24885_v20 = vld [vmem:[#allocation272_spill] sm:$0xff] }
 0x6d7   : > { %13747 = vmatprep.subr.bf16.mxu0 %v13746_v60  ;;  %13937 = vmatpush1.bf16.msra.mxu1 %v13936_v49  ;;  %v24857_v15 = vand.u32 4294901760, %v24694_v47  ;;  %v24858_v34 = vand.u32 4294901760, %v24695_v3  ;;  %v24859_v22 = vand.u32 4294901760, %v24567_v27  ;;  %v24861_v42 = vand.u32 4294901760, %v24573_v44  ;;  %v24871_v44 = vld [vmem:[#allocation110_spill] sm:$0xff]  ;;  %v24887_v33 = vld [vmem:[#allocation263_spill] sm:$0xff] }
 0x6d8   : > { %v13940_v53 = vpack.c.bf16 %v24850_v48, %v24848_v19  ;;  %8188 = vmatmul.mubr.f32.gmra.mrb[10].mxu0 %v24851_v41  ;;  %10562 = vmatmul.mubr.f32.gmra.mrb[10].mxu1 %v24851_v41  ;;  %v24862_v1 = vand.u32 4294901760, %v24574_v31  ;;  %v24863_v30 = vand.u32 4294901760, %v24575_v43  ;;  %v24864_v27 = vand.u32 4294901760, %v24576_v29  ;;  %v24868_v29 = vld [vmem:[#allocation88_spill] sm:$0xff]  ;;  %v24873_v43 = vld [vmem:[#allocation218_spill] sm:$0xff]  ;;  %v24886_v19 = vld [vmem:[#allocation201_spill] sm:$0xff] }
 0x6d9   : > { %8193 = vmatprep.mubr.f32.mxu0 %v23737_v57  ;;  %10567 = vmatprep.mubr.f32.mxu1 %v23737_v57  ;;  %v13754_v60 = vpack.c.bf16 %v24857_v15, %v24856_v16  ;;  %v13944_v46 = vpack.c.bf16 %v24859_v22, %v24858_v34  ;;  %v24865_v47 = vand.u32 4294901760, %v19589_v59  ;;  %v24866_v37 = vand.u32 4294901760, %v19594_v62  ;;  %v24869_v62 = vld [vmem:[#allocation82_spill] sm:$0xff]  ;;  %v24870_v59 = vld [vmem:[#allocation89_spill] sm:$0xff]  ;;  %v24872_v31 = vld [vmem:[#allocation216_spill] sm:$0xff] }
 0x6da   : > { %13749 = vmatpush1.bf16.msra.mxu0 %v13748_v17  ;;  %13939 = vmatprep.subr.bf16.mxu1 %v13938_v0  ;;  %v13756_v18 = vpack.c.bf16 %v24862_v1, %v24861_v42  ;;  %v13946_v3 = vpack.c.bf16 %v24864_v27, %v24863_v30  ;;  %v24878_v17 = vld [vmem:[#allocation188_spill] sm:$0xff]  ;;  %v24881_v0 = vld [vmem:[#allocation66_spill] sm:$0xff]  ;;  %v24892_v52 = vld [vmem:[#allocation265_spill] sm:$0xff] }
 0x6db   : > { %13751 = vmatprep.subr.bf16.mxu0 %v13750_v35  ;;  %13941 = vmatpush1.bf16.msra.mxu1 %v13940_v53  ;;  %v13948_v49 = vpack.c.bf16 %v24866_v37, %v24865_v47  ;;  %v24884_v35 = vld [vmem:[#allocation261_spill] sm:$0xff]  ;;  %v24888_v48 = vld [vmem:[#allocation84_spill] sm:$0xff]  ;;  %v24889_v53 = vld [vmem:[#allocation87_spill] sm:$0xff] }
 0x6dc   : > { %8197 = vmatmul.mubr.f32.gmra.mrb[12].mxu0 %v24860_v4  ;;  %10571 = vmatmul.mubr.f32.gmra.mrb[12].mxu1 %v24860_v4  ;;  %v24890_v41 = vld [vmem:[#allocation280_spill] sm:$0xff]  ;;  %v24891_v12 = vld [vmem:[#allocation282_spill] sm:$0xff]  ;;  %v24911_v51 = vld [vmem:[#allocation257_spill] sm:$0xff] }
 0x6dd   : > { %8202 = vmatprep.mubr.f32.mxu0 %v23737_v57  ;;  %10576 = vmatprep.mubr.f32.mxu1 %v23737_v57  ;;  %v24912_v32 = vld [vmem:[#allocation264_spill] sm:$0xff]  ;;  %v24914_v16 = vld [vmem:[#allocation81_spill] sm:$0xff]  ;;  %v24920_v4 = vld [vmem:[#allocation55_spill] sm:$0xff] }
 0x6de   : > { %13753 = vmatpush1.bf16.msra.mxu0 %v13752_v23  ;;  %13943 = vmatprep.subr.bf16.mxu1 %v13942_v2  ;;  %v24893_v23 = vld [vmem:[#allocation268_spill] sm:$0xff]  ;;  %v24913_v2 = vld [vmem:[#allocation79_spill] sm:$0xff]  ;;  %v24917_v34 = vld [vmem:[#allocation101_spill] sm:$0xff] }
 0x6df   : > { %13755 = vmatprep.subr.bf16.mxu0 %v13754_v60  ;;  %13945 = vmatpush1.bf16.msra.mxu1 %v13944_v46  ;;  %v24915_v15 = vld [vmem:[#allocation80_spill] sm:$0xff]  ;;  %v24916_v60 = vld [vmem:[#allocation90_spill] sm:$0xff]  ;;  %v24919_v46 = vld [vmem:[#allocation53_spill] sm:$0xff] }
 0x6e0   : > { %8206 = vmatmul.mubr.f32.gmra.mrb[14].mxu0 %v24867_v11  ;;  %10580 = vmatmul.mubr.f32.gmra.mrb[14].mxu1 %v24867_v11  ;;  %v24918_v22 = vld [vmem:[#allocation208_spill] sm:$0xff]  ;;  %v24921_v42 = vld [vmem:[#allocation114_spill] sm:$0xff]  ;;  %v24922_v1 = vld [vmem:[#allocation159_spill] sm:$0xff] }
 0x6e1   : > { %8211 = vmatprep.mubr.f32.mxu0 %v23737_v57  ;;  %10585 = vmatprep.mubr.f32.mxu1 %v23737_v57  ;;  %v24924_v30 = vld [vmem:[#allocation174_spill] sm:$0xff]  ;;  %v24925_v27 = vld [vmem:[#allocation199_spill] sm:$0xff]  ;;  %v24927_v47 = vld [vmem:[#allocation225_spill] sm:$0xff] }
 0x6e2   : > { %13757 = vmatpush1.bf16.msra.mxu0 %v13756_v18  ;;  %13947 = vmatprep.subr.bf16.mxu1 %v13946_v3  ;;  %v24923_v18 = vld [vmem:[#allocation169_spill] sm:$0xff]  ;;  %v24926_v3 = vld [vmem:[#allocation36_spill] sm:$0xff]  ;;  %v24928_v37 = vld [vmem:[#allocation67_spill] sm:$0xff] }
 0x6e3   : > { %13949 = vmatpush1.bf16.msra.mxu1 %v13948_v49  ;;  %13759 = vmatprep.subr.bf16.mxu0 %v24698_v5  ;;  %v24874_v5 = vld [vmem:[#allocation241_spill] sm:$0xff]  ;;  %v24929_v49 = vld [vmem:[#allocation118_spill] sm:$0xff]  ;;  %v24930_v11 = vld [vmem:[#allocation255_spill] sm:$0xff] }
 0x6e4   : > { %8215 = vmatmul.mubr.f32.gmra.mrb[16].mxu0 %v24868_v29  ;;  %10589 = vmatmul.mubr.f32.gmra.mrb[16].mxu1 %v24868_v29  ;;  %v24931_v29 = vld [vmem:[#allocation267_spill] sm:$0xff] }
 0x6e5   : > { %8220 = vmatprep.mubr.f32.mxu0 %v23737_v57  ;;  %10594 = vmatprep.mubr.f32.mxu1 %v23737_v57 }
 0x6e6   : > { %13951 = vmatprep.subr.bf16.mxu1 %v24700_v56  ;;  %v24875_v56 = vld [vmem:[#allocation262_spill] sm:$0xff] }
 0x6e8   : > { %8224 = vmatmul.mubr.f32.gmra.mrb[18].mxu0 %v24869_v62  ;;  %10598 = vmatmul.mubr.f32.gmra.mrb[18].mxu1 %v24869_v62  ;;  %v24932_v62 = vld [vmem:[#allocation273_spill] sm:$0xff] }
 0x6e9   : > { %8229 = vmatprep.mubr.f32.mxu0 %v23737_v57  ;;  %10603 = vmatprep.mubr.f32.mxu1 %v23737_v57 }
 0x6ec   : > { %8233 = vmatmul.mubr.f32.gmra.mrb[20].mxu0 %v24870_v59  ;;  %10607 = vmatmul.mubr.f32.gmra.mrb[20].mxu1 %v24870_v59  ;;  %v24933_v59 = vld [vmem:[#allocation256_spill] sm:$0xff] }
 0x6ed   : > { %8238 = vmatprep.mubr.f32.mxu0 %v23737_v57  ;;  %10612 = vmatprep.mubr.f32.mxu1 %v23737_v57 }
 0x6f0   : > { %8242 = vmatmul.mubr.f32.gmra.mrb[22].mxu0 %v24871_v44  ;;  %10616 = vmatmul.mubr.f32.gmra.mrb[22].mxu1 %v24871_v44  ;;  %v16329_v44 = vmov 4  }
 0x6f1   : > { %8247 = vmatprep.mubr.f32.mxu0 %v23737_v57  ;;  %10621 = vmatprep.mubr.f32.mxu1 %v23737_v57 }
 0x6f2   : > { %15590 = vset.pattern.permute.xlu0 %v16329_v44  ;;  %15591 = vset.pattern.permute.xlu1 %v16329_v44 }
 0x6f4   : > { %8251 = vmatmul.mubr.f32.gmra.mrb[24].mxu0 %v24872_v31  ;;  %10625 = vmatmul.mubr.f32.gmra.mrb[24].mxu1 %v24872_v31  ;;  %v16108_v31 = vld [vmem:[%s16583_s13] sm:$0xff] }
 0x6f5   : > { %8256 = vmatprep.mubr.f32.mxu0 %v23737_v57  ;;  %10630 = vmatprep.mubr.f32.mxu1 %v23737_v57 }
 0x6f6   : > { %12363 = vperm.xlu0 %15590, %v16108_v31  }
 0x6f8   : > { %8260 = vmatmul.mubr.f32.gmra.mrb[26].mxu0 %v24873_v43  ;;  %10634 = vmatmul.mubr.f32.gmra.mrb[26].mxu1 %v24873_v43  ;;  %v16109_v43 = vld [vmem:[%s16583_s13 + $0x8] sm:$0xff] }
 0x6f9   : > { %8265 = vmatprep.mubr.f32.mxu0 %v23737_v57  ;;  %10639 = vmatprep.mubr.f32.mxu1 %v23737_v57 }
 0x6fa   : > { %12367 = vperm.xlu1 %15591, %v16109_v43  }
 0x6fc   : > { %8269 = vmatmul.mubr.f32.gmra.mrb[28].mxu0 %v24874_v5  ;;  %10643 = vmatmul.mubr.f32.gmra.mrb[28].mxu1 %v24874_v5  ;;  %v24934_v5 = vld [vmem:[#allocation83_spill] sm:$0xff] }
 0x6fd   : > { %8274 = vmatprep.mubr.f32.mxu0 %v23737_v57  ;;  %10648 = vmatprep.mubr.f32.mxu1 %v23737_v57 }
 0x700   : > { %8278 = vmatmul.mubr.f32.gmra.mrb[30].mxu0 %v24875_v56  ;;  %10652 = vmatmul.mubr.f32.gmra.mrb[30].mxu1 %v24875_v56  ;;  %v16110_v56 = vld [vmem:[%s16583_s13 + $0x18] sm:$0xff] }
 0x701   : > { %8283 = vmatprep.mubr.f32.mxu0 %v23737_v57  ;;  %10657 = vmatprep.mubr.f32.mxu1 %v23737_v57 }
 0x702   : > { %12375 = vperm.xlu0 %15590, %v16110_v56  }
 0x704   : > { %8287 = vmatmul.mubr.f32.gmra.mrb[32].mxu0 %v24876_v36  ;;  %10661 = vmatmul.mubr.f32.gmra.mrb[32].mxu1 %v24876_v36  ;;  %v16111_v36 = vld [vmem:[%s16583_s13 + $0x10] sm:$0xff] }
 0x705   : > { %8292 = vmatprep.mubr.f32.mxu0 %v23737_v57  ;;  %10666 = vmatprep.mubr.f32.mxu1 %v23737_v57 }
 0x706   : > { %12371 = vperm.xlu1 %15591, %v16111_v36  }
 0x708   : > { %8296 = vmatmul.mubr.f32.gmra.mrb[34].mxu0 %v24877_v39  ;;  %10670 = vmatmul.mubr.f32.gmra.mrb[34].mxu1 %v24877_v39  ;;  %v24935_v39 = vld [vmem:[#allocation86_spill] sm:$0xff] }
 0x709   : > { %8301 = vmatprep.mubr.f32.mxu0 %v23737_v57  ;;  %10675 = vmatprep.mubr.f32.mxu1 %v23737_v57 }
 0x70c   : > { %8305 = vmatmul.mubr.f32.gmra.mrb[36].mxu0 %v24878_v17  ;;  %10679 = vmatmul.mubr.f32.gmra.mrb[36].mxu1 %v24878_v17  ;;  %v16112_v17 = vld [vmem:[%s16583_s13 + $0x28] sm:$0xff] }
 0x70d   : > { %8310 = vmatprep.mubr.f32.mxu0 %v23737_v57  ;;  %10684 = vmatprep.mubr.f32.mxu1 %v23737_v57 }
 0x70e   : > { %12383 = vperm.xlu0 %15590, %v16112_v17  }
 0x710   : > { %8314 = vmatmul.mubr.f32.gmra.mrb[38].mxu0 %v24879_v13  ;;  %10688 = vmatmul.mubr.f32.gmra.mrb[38].mxu1 %v24879_v13  ;;  %v16113_v13 = vld [vmem:[%s16583_s13 + $0x20] sm:$0xff] }
 0x711   : > { %8319 = vmatprep.mubr.f32.mxu0 %v23737_v57  ;;  %10693 = vmatprep.mubr.f32.mxu1 %v23737_v57 }
 0x712   : > { %12379 = vperm.xlu1 %15591, %v16113_v13  }
 0x714   : > { %8323 = vmatmul.mubr.f32.gmra.mrb[40].mxu0 %v24880_v21  ;;  %10697 = vmatmul.mubr.f32.gmra.mrb[40].mxu1 %v24880_v21  ;;  %v24936_v21 = vld [vmem:[#allocation93_spill] sm:$0xff] }
 0x715   : > { %8328 = vmatprep.mubr.f32.mxu0 %v23737_v57  ;;  %10702 = vmatprep.mubr.f32.mxu1 %v23737_v57 }
 0x718   : > { %8332 = vmatmul.mubr.f32.gmra.mrb[42].mxu0 %v24881_v0  ;;  %10706 = vmatmul.mubr.f32.gmra.mrb[42].mxu1 %v24881_v0  ;;  %v16114_v0 = vld [vmem:[%s16583_s13 + $0x38] sm:$0xff] }
 0x719   : > { %8337 = vmatprep.mubr.f32.mxu0 %v23737_v57  ;;  %10711 = vmatprep.mubr.f32.mxu1 %v23737_v57 }
 0x71a   : > { %12391 = vperm.xlu0 %15590, %v16114_v0  }
 0x71c   : > { %8341 = vmatmul.mubr.f32.gmra.mrb[44].mxu0 %v24882_v63  ;;  %10715 = vmatmul.mubr.f32.gmra.mrb[44].mxu1 %v24882_v63  ;;  %v16115_v63 = vld [vmem:[%s16583_s13 + $0x30] sm:$0xff] }
 0x71d   : > { %8346 = vmatprep.mubr.f32.mxu0 %v23737_v57  ;;  %10720 = vmatprep.mubr.f32.mxu1 %v23737_v57 }
 0x71e   : > { %12387 = vperm.xlu1 %15591, %v16115_v63   ;;  %v12946_v63 = vld [vmem:[%s16558_s23 + $0x100] sm:$0xff] }
 0x720   : > { %8350 = vmatmul.mubr.f32.gmra.mrb[46].mxu0 %v24883_v26  ;;  %10724 = vmatmul.mubr.f32.gmra.mrb[46].mxu1 %v24883_v26  ;;  %v16116_v26 = vld [vmem:[%s16583_s13 + $0x48] sm:$0xff] }
 0x721   : > { %8355 = vmatprep.mubr.f32.mxu0 %v23737_v57  ;;  %10729 = vmatprep.mubr.f32.mxu1 %v23737_v57 }
 0x722   : > { %12399 = vperm.xlu0 %15590, %v16116_v26   ;;  %v790_v26 = vld [vmem:[%s16558_s23] sm:$0xff] }
 0x724   : > { %8359 = vmatmul.mubr.f32.gmra.mrb[48].mxu0 %v24884_v35  ;;  %10733 = vmatmul.mubr.f32.gmra.mrb[48].mxu1 %v24884_v35  ;;  %v16117_v35 = vld [vmem:[%s16583_s13 + $0x40] sm:$0xff] }
 0x725   : > { %8364 = vmatprep.mubr.f32.mxu0 %v23737_v57  ;;  %10738 = vmatprep.mubr.f32.mxu1 %v23737_v57 }
 0x726   : > { %12395 = vperm.xlu1 %15591, %v16117_v35  }
 0x728   : > { %8368 = vmatmul.mubr.f32.gmra.mrb[50].mxu0 %v24885_v20  ;;  %10742 = vmatmul.mubr.f32.gmra.mrb[50].mxu1 %v24885_v20  ;;  %v16118_v20 = vld [vmem:[%s16583_s13 + $0x58] sm:$0xff] }
 0x729   : > { %8373 = vmatprep.mubr.f32.mxu0 %v23737_v57  ;;  %10747 = vmatprep.mubr.f32.mxu1 %v23737_v57 }
 0x72a   : > { %12407 = vperm.xlu0 %15590, %v16118_v20  }
 0x72c   : > { %8377 = vmatmul.mubr.f32.gmra.mrb[52].mxu0 %v24886_v19  ;;  %10751 = vmatmul.mubr.f32.gmra.mrb[52].mxu1 %v24886_v19  ;;  %v16119_v19 = vld [vmem:[%s16583_s13 + $0x50] sm:$0xff] }
 0x72d   : > { %8382 = vmatprep.mubr.f32.mxu0 %v23737_v57  ;;  %10756 = vmatprep.mubr.f32.mxu1 %v23737_v57 }
 0x72e   : > { %12403 = vperm.xlu1 %15591, %v16119_v19  }
 0x730   : > { %8386 = vmatmul.mubr.f32.gmra.mrb[54].mxu0 %v24887_v33  ;;  %10760 = vmatmul.mubr.f32.gmra.mrb[54].mxu1 %v24887_v33  ;;  %v16120_v33 = vld [vmem:[%s16583_s13 + $0x68] sm:$0xff] }
 0x731   : > { %8391 = vmatprep.mubr.f32.mxu0 %v23737_v57  ;;  %10765 = vmatprep.mubr.f32.mxu1 %v23737_v57 }
 0x732   : > { %12415 = vperm.xlu0 %15590, %v16120_v33  }
 0x734   : > { %8395 = vmatmul.mubr.f32.gmra.mrb[56].mxu0 %v24888_v48  ;;  %10769 = vmatmul.mubr.f32.gmra.mrb[56].mxu1 %v24888_v48  ;;  %v16121_v48 = vld [vmem:[%s16583_s13 + $0x60] sm:$0xff] }
 0x735   : > { %8400 = vmatprep.mubr.f32.mxu0 %v23737_v57  ;;  %10774 = vmatprep.mubr.f32.mxu1 %v23737_v57 }
 0x736   : > { %12411 = vperm.xlu1 %15591, %v16121_v48  }
 0x738   : > { %8404 = vmatmul.mubr.f32.gmra.mrb[58].mxu0 %v24889_v53  ;;  %10778 = vmatmul.mubr.f32.gmra.mrb[58].mxu1 %v24889_v53  ;;  %v16122_v53 = vld [vmem:[%s16583_s13 + $0x78] sm:$0xff] }
 0x739   : > { %8409 = vmatprep.mubr.f32.mxu0 %v23737_v57  ;;  %10783 = vmatprep.mubr.f32.mxu1 %v23737_v57 }
 0x73a   : > { %12423 = vperm.xlu0 %15590, %v16122_v53  }
 0x73c   : > { %8413 = vmatmul.mubr.f32.gmra.mrb[60].mxu0 %v24890_v41  ;;  %10787 = vmatmul.mubr.f32.gmra.mrb[60].mxu1 %v24890_v41  ;;  %v16123_v41 = vld [vmem:[%s16583_s13 + $0x70] sm:$0xff] }
 0x73d   : > { %8418 = vmatprep.mubr.f32.mxu0 %v23737_v57  ;;  %10792 = vmatprep.mubr.f32.mxu1 %v23737_v57 }
 0x73e   : > { %12419 = vperm.xlu1 %15591, %v16123_v41  }
 0x740   : > { %8422 = vmatmul.mubr.f32.gmra.mrb[62].mxu0 %v24891_v12  ;;  %10796 = vmatmul.mubr.f32.gmra.mrb[62].mxu1 %v24891_v12  ;;  %v16124_v12 = vld [vmem:[%s16583_s13 + $0x88] sm:$0xff] }
 0x741   : > { %8588 = vmatprep.mubr.f32.mxu0 %v23737_v57  ;;  %10962 = vmatprep.mubr.f32.mxu1 %v23737_v57 }
 0x742   : > { %12431 = vperm.xlu0 %15590, %v16124_v12  }
 0x744   : > { %8590 = vmatmul.mubr.f32.vlgmr.msra.gmra.mrb[0].mxu0 %v24892_v52  ;;  %10964 = vmatmul.mubr.f32.vlgmr.msra.gmra.mrb[0].mxu1 %v24892_v52 }
 0x745   : > { %13761 = vmatpush1.bf16.msra.mxu0 %v24702_v14  ;;  %8595 = vmatprep.mubr.f32.mxu0 %v23737_v57  ;;  %v24894_v14 = vld [vmem:[#allocation279_spill] sm:$0xff] }
 0x746   : > { %10969 = vmatprep.mubr.f32.mxu1 %v23737_v57  ;;  %13763 = vmatprep.subr.bf16.mxu0 %v24703_v58  ;;  %v24905_v58 = vld [vmem:[#allocation243_spill] sm:$0xff] }
 0x747   : > { %13953 = vmatpush1.bf16.msra.mxu1 %v24704_v55  ;;  %v24906_v55 = vld [vmem:[#allocation244_spill] sm:$0xff] }
 0x748   : > { %8597 = vmatmul.mubr.f32.gmra.mrb[2].mxu0 %v24893_v23  ;;  %10971 = vmatmul.mubr.f32.gmra.mrb[2].mxu1 %v24893_v23 }
 0x749   : > { %8602 = vmatprep.mubr.f32.mxu0 %v23737_v57  ;;  %10976 = vmatprep.mubr.f32.mxu1 %v23737_v57 }
 0x74a   : > { %13765 = vmatpush1.bf16.msra.mxu0 %v24706_v45  ;;  %13955 = vmatprep.subr.bf16.mxu1 %v24707_v24  ;;  %v24895_v45 = vld [vmem:[#allocation157_spill] sm:$0xff] }
 0x74b   : > { %13767 = vmatprep.subr.bf16.mxu0 %v24708_v38  ;;  %13957 = vmatpush1.bf16.msra.mxu1 %v24709_v8  ;;  %v24902_v38 = vld [vmem:[#allocation230_spill] sm:$0xff]  ;;  %v24903_v8 = vld [vmem:[#allocation236_spill] sm:$0xff]  ;;  %v24907_v24 = vld [vmem:[#allocation245_spill] sm:$0xff] }
 0x74c   : > { %8604 = vmatmul.mubr.f32.gmra.mrb[4].mxu0 %v24894_v14  ;;  %10978 = vmatmul.mubr.f32.gmra.mrb[4].mxu1 %v24894_v14 }
 0x74d   : > { %8609 = vmatprep.mubr.f32.mxu0 %v23737_v57  ;;  %10983 = vmatprep.mubr.f32.mxu1 %v23737_v57 }
 0x74e   : > { %13769 = vmatpush1.bf16.msra.mxu0 %v24711_v7  ;;  %13959 = vmatprep.subr.bf16.mxu1 %v24712_v25  ;;  %v24896_v25 = vld [vmem:[#allocation151_spill] sm:$0xff]  ;;  %v24908_v7 = vld [vmem:[#allocation252_spill] sm:$0xff] }
 0x74f   : > { %13771 = vmatprep.subr.bf16.mxu0 %v24713_v50  ;;  %13961 = vmatpush1.bf16.msra.mxu1 %v24714_v9  ;;  %v24897_v50 = vld [vmem:[#allocation49_spill] sm:$0xff]  ;;  %v24898_v9 = vld [vmem:[#allocation220_spill] sm:$0xff] }
 0x750   : > { %8611 = vmatmul.mubr.f32.gmra.mrb[6].mxu0 %v24895_v45  ;;  %10985 = vmatmul.mubr.f32.gmra.mrb[6].mxu1 %v24895_v45 }
 0x751   : > { %8616 = vmatprep.mubr.f32.mxu0 %v23737_v57  ;;  %10990 = vmatprep.mubr.f32.mxu1 %v23737_v57 }
 0x752   : > { %13773 = vmatpush1.bf16.msra.mxu0 %v24716_v28  ;;  %13963 = vmatprep.subr.bf16.mxu1 %v24717_v61  ;;  %v24899_v61 = vld [vmem:[#allocation57_spill] sm:$0xff] }
 0x753   : > { %13775 = vmatprep.subr.bf16.mxu0 %v24718_v40  ;;  %13965 = vmatpush1.bf16.msra.mxu1 %v24719_v6  ;;  %v24900_v40 = vld [vmem:[#allocation228_spill] sm:$0xff]  ;;  %v24901_v6 = vld [vmem:[#allocation229_spill] sm:$0xff] }
 0x754   : > { %8618 = vmatmul.mubr.f32.gmra.mrb[8].mxu0 %v24896_v25  ;;  %10992 = vmatmul.mubr.f32.gmra.mrb[8].mxu1 %v24896_v25  ;;  %v24909_v28 = vld [vmem:[#allocation69_spill] sm:$0xff] }
 0x755   : > { %8623 = vmatprep.mubr.f32.mxu0 %v23737_v57  ;;  %10997 = vmatprep.mubr.f32.mxu1 %v23737_v57 }
 0x756   : > { %13777 = vmatpush1.bf16.msra.mxu0 %v24721_v10  ;;  %13967 = vmatprep.subr.bf16.mxu1 %v24722_v54  ;;  %v24904_v54 = vld [vmem:[#allocation163_spill] sm:$0xff]  ;;  %v24910_v10 = vld [vmem:[#allocation253_spill] sm:$0xff] }
 0x757   : > { %13779 = vmatprep.subr.bf16.mxu0 %v24897_v50  ;;  %13969 = vmatpush1.bf16.msra.mxu1 %v24898_v9  ;;  %v16130_v50 = vld [vmem:[%s16583_s13 + $0xb8] sm:$0xff]  ;;  %v16131_v9 = vld [vmem:[%s16583_s13 + $0xb0] sm:$0xff] }
 0x758   : > { %8625 = vmatmul.mubr.f32.gmra.mrb[10].mxu0 %v24899_v61  ;;  %10999 = vmatmul.mubr.f32.gmra.mrb[10].mxu1 %v24899_v61 }
 0x759   : > { %8630 = vmatprep.mubr.f32.mxu0 %v23737_v57  ;;  %11004 = vmatprep.mubr.f32.mxu1 %v23737_v57 }
 0x75a   : > { %13781 = vmatpush1.bf16.msra.mxu0 %v24900_v40  ;;  %13971 = vmatprep.subr.bf16.mxu1 %v24901_v6  ;;  %v16133_v40 = vld [vmem:[%s16583_s13 + $0xc0] sm:$0xff]  ;;  %v16134_v6 = vld [vmem:[%s16583_s13 + $0xd8] sm:$0xff] }
 0x75b   : > { %13783 = vmatprep.subr.bf16.mxu0 %v24902_v38  ;;  %13973 = vmatpush1.bf16.msra.mxu1 %v24903_v8  ;;  %v16135_v38 = vld [vmem:[%s16583_s13 + $0xd0] sm:$0xff]  ;;  %v16136_v8 = vld [vmem:[%s16583_s13 + $0xe8] sm:$0xff] }
 0x75c   : > { %8632 = vmatmul.mubr.f32.gmra.mrb[12].mxu0 %v24904_v54  ;;  %11006 = vmatmul.mubr.f32.gmra.mrb[12].mxu1 %v24904_v54 }
 0x75d   : > { %8637 = vmatprep.mubr.f32.mxu0 %v23737_v57  ;;  %11011 = vmatprep.mubr.f32.mxu1 %v23737_v57 }
 0x75e   : > { %13785 = vmatpush1.bf16.msra.mxu0 %v24905_v58  ;;  %13975 = vmatprep.subr.bf16.mxu1 %v24906_v55  ;;  %v16138_v58 = vld [vmem:[%s16583_s13 + $0xf8] sm:$0xff]  ;;  %v16139_v55 = vld [vmem:[%s16583_s13 + $0xf0] sm:$0xff] }
 0x75f   : > { %13787 = vmatprep.subr.bf16.mxu0 %v24907_v24  ;;  %13977 = vmatpush1.bf16.msra.mxu1 %v24908_v7  ;;  %v11510_v24 = vlaneseq }
 0x760   : > { %8639 = vmatmul.mubr.f32.gmra.mrb[14].mxu0 %v24909_v28  ;;  %11013 = vmatmul.mubr.f32.gmra.mrb[14].mxu1 %v24909_v28 }
 0x761   : > { %8644 = vmatprep.mubr.f32.mxu0 %v23737_v57  ;;  %11018 = vmatprep.mubr.f32.mxu1 %v23737_v57  ;;  %v11511_v7 = vshrl.u32 %v11510_v24, 7  ;;  %v13010_v24 = vld [vmem:[%s16558_s23 + $0x200] sm:$0xff] }
 0x762   : > { %13789 = vmatpush1.bf16.msra.mxu0 %v24910_v10  ;;  %13979 = vmatprep.subr.bf16.mxu1 %v24911_v51  ;;  %v11508_v10 = vld [vmem:[%s22599_s6] sm:$0xf] }
 0x763   : > { %13981 = vmatpush1.bf16.msra.mxu1 %v24912_v32  ;;  %v11516_v51 = vsub.s32 1, %v11511_v7  ;;  %v11520_v32 = vsub.s32 2, %v11511_v7 }
 0x764   : > { %8646 = vmatmul.mubr.f32.gmra.mrb[16].mxu0 %v24913_v2  ;;  %11020 = vmatmul.mubr.f32.gmra.mrb[16].mxu1 %v24913_v2 }
 0x765   : > { %8651 = vmatprep.mubr.f32.mxu0 %v23737_v57  ;;  %11025 = vmatprep.mubr.f32.mxu1 %v23737_v57 }
 0x768   : > { %8653 = vmatmul.mubr.f32.gmra.mrb[18].mxu0 %v24914_v16  ;;  %11027 = vmatmul.mubr.f32.gmra.mrb[18].mxu1 %v24914_v16 }
 0x769   : > { %8658 = vmatprep.mubr.f32.mxu0 %v23737_v57  ;;  %11032 = vmatprep.mubr.f32.mxu1 %v23737_v57 }
 0x76c   : > { %8660 = vmatmul.mubr.f32.gmra.mrb[20].mxu0 %v24915_v15  ;;  %11034 = vmatmul.mubr.f32.gmra.mrb[20].mxu1 %v24915_v15 }
 0x76d   : > { %8665 = vmatprep.mubr.f32.mxu0 %v23737_v57  ;;  %11039 = vmatprep.mubr.f32.mxu1 %v23737_v57 }
 0x770   : > { %8667 = vmatmul.mubr.f32.gmra.mrb[22].mxu0 %v24916_v60  ;;  %11041 = vmatmul.mubr.f32.gmra.mrb[22].mxu1 %v24916_v60 }
 0x771   : > { %8672 = vmatprep.mubr.f32.mxu0 %v23737_v57  ;;  %11046 = vmatprep.mubr.f32.mxu1 %v23737_v57 }
 0x774   : > { %8674 = vmatmul.mubr.f32.gmra.mrb[24].mxu0 %v24917_v34  ;;  %11048 = vmatmul.mubr.f32.gmra.mrb[24].mxu1 %v24917_v34 }
 0x775   : > { %8679 = vmatprep.mubr.f32.mxu0 %v23737_v57  ;;  %11053 = vmatprep.mubr.f32.mxu1 %v23737_v57 }
 0x778   : > { %8681 = vmatmul.mubr.f32.gmra.mrb[26].mxu0 %v24918_v22  ;;  %11055 = vmatmul.mubr.f32.gmra.mrb[26].mxu1 %v24918_v22 }
 0x779   : > { %8686 = vmatprep.mubr.f32.mxu0 %v23737_v57  ;;  %11060 = vmatprep.mubr.f32.mxu1 %v23737_v57 }
 0x77c   : > { %8688 = vmatmul.mubr.f32.gmra.mrb[28].mxu0 %v24919_v46  ;;  %11062 = vmatmul.mubr.f32.gmra.mrb[28].mxu1 %v24919_v46 }
 0x77d   : > { %8693 = vmatprep.mubr.f32.mxu0 %v23737_v57  ;;  %11067 = vmatprep.mubr.f32.mxu1 %v23737_v57 }
 0x780   : > { %8695 = vmatmul.mubr.f32.gmra.mrb[30].mxu0 %v24920_v4  ;;  %11069 = vmatmul.mubr.f32.gmra.mrb[30].mxu1 %v24920_v4 }
 0x781   : > { %8700 = vmatprep.mubr.f32.mxu0 %v23737_v57  ;;  %11074 = vmatprep.mubr.f32.mxu1 %v23737_v57 }
 0x784   : > { %8702 = vmatmul.mubr.f32.gmra.mrb[32].mxu0 %v24921_v42  ;;  %11076 = vmatmul.mubr.f32.gmra.mrb[32].mxu1 %v24921_v42 }
 0x785   : > { %8707 = vmatprep.mubr.f32.mxu0 %v23737_v57  ;;  %11081 = vmatprep.mubr.f32.mxu1 %v23737_v57 }
 0x788   : > { %8709 = vmatmul.mubr.f32.gmra.mrb[34].mxu0 %v24922_v1  ;;  %11083 = vmatmul.mubr.f32.gmra.mrb[34].mxu1 %v24922_v1 }
 0x789   : > { %8714 = vmatprep.mubr.f32.mxu0 %v23737_v57  ;;  %11088 = vmatprep.mubr.f32.mxu1 %v23737_v57 }
 0x78c   : > { %8716 = vmatmul.mubr.f32.gmra.mrb[36].mxu0 %v24923_v18  ;;  %11090 = vmatmul.mubr.f32.gmra.mrb[36].mxu1 %v24923_v18 }
 0x78d   : > { %8721 = vmatprep.mubr.f32.mxu0 %v23737_v57  ;;  %11095 = vmatprep.mubr.f32.mxu1 %v23737_v57 }
 0x790   : > { %8723 = vmatmul.mubr.f32.gmra.mrb[38].mxu0 %v24924_v30  ;;  %11097 = vmatmul.mubr.f32.gmra.mrb[38].mxu1 %v24924_v30 }
 0x791   : > { %8728 = vmatprep.mubr.f32.mxu0 %v23737_v57  ;;  %11102 = vmatprep.mubr.f32.mxu1 %v23737_v57 }
 0x794   : > { %8730 = vmatmul.mubr.f32.gmra.mrb[40].mxu0 %v24925_v27  ;;  %11104 = vmatmul.mubr.f32.gmra.mrb[40].mxu1 %v24925_v27 }
 0x795   : > { %8735 = vmatprep.mubr.f32.mxu0 %v23737_v57  ;;  %11109 = vmatprep.mubr.f32.mxu1 %v23737_v57 }
 0x798   : > { %8737 = vmatmul.mubr.f32.gmra.mrb[42].mxu0 %v24926_v3  ;;  %11111 = vmatmul.mubr.f32.gmra.mrb[42].mxu1 %v24926_v3 }
 0x799   : > { %8742 = vmatprep.mubr.f32.mxu0 %v23737_v57  ;;  %11116 = vmatprep.mubr.f32.mxu1 %v23737_v57 }
 0x79c   : > { %8744 = vmatmul.mubr.f32.gmra.mrb[44].mxu0 %v24927_v47  ;;  %11118 = vmatmul.mubr.f32.gmra.mrb[44].mxu1 %v24927_v47 }
 0x79d   : > { %8749 = vmatprep.mubr.f32.mxu0 %v23737_v57  ;;  %11123 = vmatprep.mubr.f32.mxu1 %v23737_v57 }
 0x7a0   : > { %8751 = vmatmul.mubr.f32.gmra.mrb[46].mxu0 %v24928_v37  ;;  %11125 = vmatmul.mubr.f32.gmra.mrb[46].mxu1 %v24928_v37 }
 0x7a1   : > { %8756 = vmatprep.mubr.f32.mxu0 %v23737_v57  ;;  %11130 = vmatprep.mubr.f32.mxu1 %v23737_v57 }
 0x7a4   : > { %8758 = vmatmul.mubr.f32.gmra.mrb[48].mxu0 %v24929_v49  ;;  %11132 = vmatmul.mubr.f32.gmra.mrb[48].mxu1 %v24929_v49 }
 0x7a5   : > { %8763 = vmatprep.mubr.f32.mxu0 %v23737_v57  ;;  %11137 = vmatprep.mubr.f32.mxu1 %v23737_v57 }
 0x7a8   : > { %8765 = vmatmul.mubr.f32.gmra.mrb[50].mxu0 %v24930_v11  ;;  %11139 = vmatmul.mubr.f32.gmra.mrb[50].mxu1 %v24930_v11 }
 0x7a9   : > { %8770 = vmatprep.mubr.f32.mxu0 %v23737_v57  ;;  %11144 = vmatprep.mubr.f32.mxu1 %v23737_v57 }
 0x7ac   : > { %8772 = vmatmul.mubr.f32.gmra.mrb[52].mxu0 %v24931_v29  ;;  %11146 = vmatmul.mubr.f32.gmra.mrb[52].mxu1 %v24931_v29 }
 0x7ad   : > { %8777 = vmatprep.mubr.f32.mxu0 %v23737_v57  ;;  %11151 = vmatprep.mubr.f32.mxu1 %v23737_v57 }
 0x7b0   : > { %8779 = vmatmul.mubr.f32.gmra.mrb[54].mxu0 %v24932_v62  ;;  %11153 = vmatmul.mubr.f32.gmra.mrb[54].mxu1 %v24932_v62 }
 0x7b1   : > { %8784 = vmatprep.mubr.f32.mxu0 %v23737_v57  ;;  %11158 = vmatprep.mubr.f32.mxu1 %v23737_v57 }
 0x7b4   : > { %8786 = vmatmul.mubr.f32.gmra.mrb[56].mxu0 %v24933_v59  ;;  %11160 = vmatmul.mubr.f32.gmra.mrb[56].mxu1 %v24933_v59 }
 0x7b5   : > { %8791 = vmatprep.mubr.f32.mxu0 %v23737_v57  ;;  %11165 = vmatprep.mubr.f32.mxu1 %v23737_v57 }
 0x7b8   : > { %8793 = vmatmul.mubr.f32.gmra.mrb[58].mxu0 %v24934_v5  ;;  %11167 = vmatmul.mubr.f32.gmra.mrb[58].mxu1 %v24934_v5 }
 0x7b9   : > { %8798 = vmatprep.mubr.f32.mxu0 %v23737_v57  ;;  %11172 = vmatprep.mubr.f32.mxu1 %v23737_v57 }
 0x7bc   : > { %8800 = vmatmul.mubr.f32.gmra.mrb[60].mxu0 %v24935_v39  ;;  %11174 = vmatmul.mubr.f32.gmra.mrb[60].mxu1 %v24935_v39 }
 0x7bd   : > { %8805 = vmatprep.mubr.f32.mxu0 %v23737_v57  ;;  %11179 = vmatprep.mubr.f32.mxu1 %v23737_v57 }
 0x7c0   : > { %8807 = vmatmul.mubr.f32.gmra.mrb[62].mxu0 %v24936_v21  ;;  %11181 = vmatmul.mubr.f32.gmra.mrb[62].mxu1 %v24936_v21 }
 0x7c1   : > { %8909 = vmatprep.mubr.f32.mxu0 %v23737_v57  ;;  %11283 = vmatprep.mubr.f32.mxu1 %v23737_v57 }
 0x7c4   : > { %8911 = vmatmul.mubr.f32.vlgmr.msra.gmra.mrb[0].mxu0 %v24892_v52  ;;  %11285 = vmatmul.mubr.f32.vlgmr.msra.gmra.mrb[0].mxu1 %v24892_v52  ;;  %v16125_v52 = vld [vmem:[%s16583_s13 + $0x80] sm:$0xff] }
 0x7c5   : > { %8916 = vmatprep.mubr.f32.mxu0 %v23737_v57  ;;  %11290 = vmatprep.mubr.f32.mxu1 %v23737_v57 }
 0x7c6   : > { %12427 = vperm.xlu1 %15591, %v16125_v52   ;;  %v12947_v52 = vld [vmem:[%s16558_s23 + $0x108] sm:$0xff] }
 0x7c8   : > { %8918 = vmatmul.mubr.f32.gmra.mrb[2].mxu0 %v24893_v23  ;;  %11292 = vmatmul.mubr.f32.gmra.mrb[2].mxu1 %v24893_v23  ;;  %v16126_v23 = vld [vmem:[%s16583_s13 + $0x98] sm:$0xff] }
 0x7c9   : > { %8923 = vmatprep.mubr.f32.mxu0 %v23737_v57  ;;  %11297 = vmatprep.mubr.f32.mxu1 %v23737_v57 }
 0x7ca   : > { %12439 = vperm.xlu0 %15590, %v16126_v23   ;;  %v24937_v23 = vld [vmem:[#allocation135_spill] sm:$0xff] }
 0x7cc   : > { %8925 = vmatmul.mubr.f32.gmra.mrb[4].mxu0 %v24894_v14  ;;  %11299 = vmatmul.mubr.f32.gmra.mrb[4].mxu1 %v24894_v14  ;;  %v16127_v14 = vld [vmem:[%s16583_s13 + $0x90] sm:$0xff] }
 0x7cd   : > { %8930 = vmatprep.mubr.f32.mxu0 %v23737_v57  ;;  %11304 = vmatprep.mubr.f32.mxu1 %v23737_v57 }
 0x7ce   : > { %12435 = vperm.xlu1 %15591, %v16127_v14   ;;  %v1144_v14 = vmul.f32 %v12946_v63, %v24937_v23 }
 0x7d0   : > { %8932 = vmatmul.mubr.f32.gmra.mrb[6].mxu0 %v24895_v45  ;;  %11306 = vmatmul.mubr.f32.gmra.mrb[6].mxu1 %v24895_v45  ;;  %v16128_v45 = vld [vmem:[%s16583_s13 + $0xa8] sm:$0xff] }
 0x7d1   : > { %8937 = vmatprep.mubr.f32.mxu0 %v23737_v57  ;;  %11311 = vmatprep.mubr.f32.mxu1 %v23737_v57 }
 0x7d2   : > { %12447 = vperm.xlu0 %15590, %v16128_v45   ;;  %v24938_v45 = vld [vmem:[#allocation149_spill] sm:$0xff] }
 0x7d4   : > { %8939 = vmatmul.mubr.f32.gmra.mrb[8].mxu0 %v24896_v25  ;;  %11313 = vmatmul.mubr.f32.gmra.mrb[8].mxu1 %v24896_v25  ;;  %v16129_v25 = vld [vmem:[%s16583_s13 + $0xa0] sm:$0xff] }
 0x7d5   : > { %8944 = vmatprep.mubr.f32.mxu0 %v23737_v57  ;;  %11318 = vmatprep.mubr.f32.mxu1 %v23737_v57 }
 0x7d6   : > { %12443 = vperm.xlu1 %15591, %v16129_v25   ;;  %12455 = vperm.xlu0 %15590, %v16130_v50   ;;  %v822_v25 = vmul.f32 %v790_v26, %v24938_v45  ;;  %v13075_v26 = vld [vmem:[%s16558_s23 + $0x308] sm:$0xff]  ;;  %v24946_v45 = vld [vmem:[#allocation131_spill] sm:$0xff] }
 0x7d8   : > { %8946 = vmatmul.mubr.f32.gmra.mrb[10].mxu0 %v24899_v61  ;;  %11320 = vmatmul.mubr.f32.gmra.mrb[10].mxu1 %v24899_v61  ;;  %v16132_v61 = vld [vmem:[%s16583_s13 + $0xc8] sm:$0xff] }
 0x7d9   : > { %8951 = vmatprep.mubr.f32.mxu0 %v23737_v57  ;;  %11325 = vmatprep.mubr.f32.mxu1 %v23737_v57 }
 0x7da   : > { %12451 = vperm.xlu1 %15591, %v16131_v9   ;;  %12463 = vperm.xlu0 %15590, %v16132_v61   ;;  %v791_v9 = vld [vmem:[%s16558_s23 + $0x8] sm:$0xff] }
 0x7dc   : > { %8953 = vmatmul.mubr.f32.gmra.mrb[12].mxu0 %v24904_v54  ;;  %11327 = vmatmul.mubr.f32.gmra.mrb[12].mxu1 %v24904_v54  ;;  %v16137_v54 = vld [vmem:[%s16583_s13 + $0xe0] sm:$0xff]  ;;  %s16200_s13 = sshll.u32 %s16330_s24, 4  ;;  %s16201_s13 = int_to_ptr.vmem [resolvable:$false] %s16200_s13 }
 0x7dd   : > { %8958 = vmatprep.mubr.f32.mxu0 %v23737_v57  ;;  %11332 = vmatprep.mubr.f32.mxu1 %v23737_v57  ;;  %s16202_s25 = scalar_lea.vmem %s16201_s13, 8192  ;;  %p16203_p1 = scmp.lt.s32.totalorder %s22505_s15, %s16201_s13 }
 0x7de   : > { %12459 = vperm.xlu1 %15591, %v16133_v40   ;;  %12471 = vperm.xlu0 %15590, %v16134_v6   ;;  %p16204_p2 = scmp.lt.s32.totalorder %s16202_s25, %s16196_s18 }
 0x7e0   : > { %8960 = vmatmul.mubr.f32.gmra.mrb[14].mxu0 %v24909_v28  ;;  %11334 = vmatmul.mubr.f32.gmra.mrb[14].mxu1 %v24909_v28  ;;  %v11512_v28 = vsub.s32 0, %v11511_v7  ;;  %p16205_p3 = por %p16204_p2, %p16203_p1 }
 0x7e1   : > { %8965 = vmatprep.mubr.f32.mxu0 %v23737_v57  ;;  %11339 = vmatprep.mubr.f32.mxu1 %v23737_v57 }
 0x7e2   : > { %12467 = vperm.xlu1 %15591, %v16135_v38   ;;  %12479 = vperm.xlu0 %15590, %v16136_v8   ;;  %v13011_v38 = vld [vmem:[%s16558_s23 + $0x208] sm:$0xff]  ;;  %p16206_p5 = pnand %p16205_p3, %p16199_p10 }
 0x7e4   : > { %8967 = vmatmul.mubr.f32.gmra.mrb[16].mxu0 %v24913_v2  ;;  %11341 = vmatmul.mubr.f32.gmra.mrb[16].mxu1 %v24913_v2  ;;  %v21625_v2 = vrot.slane %v11508_v10, %v11512_v28  ;;  %v24939_v28 = vld [vmem:[#allocation127_spill] sm:$0xff] }
 0x7e5   : > { %8972 = vmatprep.mubr.f32.mxu0 %v23737_v57  ;;  %11346 = vmatprep.mubr.f32.mxu1 %v23737_v57 }
 0x7e6   : > { %12475 = vperm.xlu1 %15591, %v16137_v54   ;;  %12487 = vperm.xlu0 %15590, %v16138_v58  }
 0x7e8   : > { %8974 = vmatmul.mubr.f32.gmra.mrb[18].mxu0 %v24914_v16  ;;  %11348 = vmatmul.mubr.f32.gmra.mrb[18].mxu1 %v24914_v16  ;;  %v21627_v16 = vrot.slane %v11508_v10, %v11516_v51 }
 0x7e9   : > { %8979 = vmatprep.mubr.f32.mxu0 %v23737_v57  ;;  %11353 = vmatprep.mubr.f32.mxu1 %v23737_v57 }
 0x7ea   : > { %12483 = vperm.xlu1 %15591, %v16139_v55  }
 0x7ec   : > { %8981 = vmatmul.mubr.f32.gmra.mrb[20].mxu0 %v24915_v15  ;;  %11355 = vmatmul.mubr.f32.gmra.mrb[20].mxu1 %v24915_v15  ;;  %v11524_v15 = vsub.s32 3, %v11511_v7  ;;  %v13013_v7 = vld [vmem:[%s16558_s23 + $0x218] sm:$0xff] }
 0x7ed   : > { %8986 = vmatprep.mubr.f32.mxu0 %v23737_v57  ;;  %11360 = vmatprep.mubr.f32.mxu1 %v23737_v57 }
 0x7f0   : > { %8988 = vmatmul.mubr.f32.gmra.mrb[22].mxu0 %v24916_v60  ;;  %11362 = vmatmul.mubr.f32.gmra.mrb[22].mxu1 %v24916_v60 }
 0x7f1   : > { %8993 = vmatprep.mubr.f32.mxu0 %v23737_v57  ;;  %11367 = vmatprep.mubr.f32.mxu1 %v23737_v57 }
 0x7f4   : > { %8995 = vmatmul.mubr.f32.gmra.mrb[24].mxu0 %v24917_v34  ;;  %11369 = vmatmul.mubr.f32.gmra.mrb[24].mxu1 %v24917_v34  ;;  %v21629_v34 = vrot.slane %v11508_v10, %v11520_v32 }
 0x7f5   : > { %9000 = vmatprep.mubr.f32.mxu0 %v23737_v57  ;;  %11374 = vmatprep.mubr.f32.mxu1 %v23737_v57 }
 0x7f8   : > { %9002 = vmatmul.mubr.f32.gmra.mrb[26].mxu0 %v24918_v22  ;;  %11376 = vmatmul.mubr.f32.gmra.mrb[26].mxu1 %v24918_v22 }
 0x7f9   : > { %9007 = vmatprep.mubr.f32.mxu0 %v23737_v57  ;;  %11381 = vmatprep.mubr.f32.mxu1 %v23737_v57 }
 0x7fc   : > { %9009 = vmatmul.mubr.f32.gmra.mrb[28].mxu0 %v24919_v46  ;;  %11383 = vmatmul.mubr.f32.gmra.mrb[28].mxu1 %v24919_v46 }
 0x7fd   : > { %9014 = vmatprep.mubr.f32.mxu0 %v23737_v57  ;;  %11388 = vmatprep.mubr.f32.mxu1 %v23737_v57 }
 0x800   : > { %9016 = vmatmul.mubr.f32.gmra.mrb[30].mxu0 %v24920_v4  ;;  %11390 = vmatmul.mubr.f32.gmra.mrb[30].mxu1 %v24920_v4 }
 0x801   : > { %9021 = vmatprep.mubr.f32.mxu0 %v23737_v57  ;;  %11395 = vmatprep.mubr.f32.mxu1 %v23737_v57 }
 0x804   : > { %9023 = vmatmul.mubr.f32.gmra.mrb[32].mxu0 %v24921_v42  ;;  %11397 = vmatmul.mubr.f32.gmra.mrb[32].mxu1 %v24921_v42 }
 0x805   : > { %9028 = vmatprep.mubr.f32.mxu0 %v23737_v57  ;;  %11402 = vmatprep.mubr.f32.mxu1 %v23737_v57 }
 0x808   : > { %9030 = vmatmul.mubr.f32.gmra.mrb[34].mxu0 %v24922_v1  ;;  %11404 = vmatmul.mubr.f32.gmra.mrb[34].mxu1 %v24922_v1  ;;  %v21633_v1 = vrot.slane %v11508_v10, %v11524_v15  ;;  %v1145_v10 = vmul.f32 %v12947_v52, %v24939_v28 }
 0x809   : > { %9035 = vmatprep.mubr.f32.mxu0 %v23737_v57  ;;  %11409 = vmatprep.mubr.f32.mxu1 %v23737_v57 }
 0x80c   : > { %9037 = vmatmul.mubr.f32.gmra.mrb[36].mxu0 %v24923_v18  ;;  %11411 = vmatmul.mubr.f32.gmra.mrb[36].mxu1 %v24923_v18 }
 0x80d   : > { %9042 = vmatprep.mubr.f32.mxu0 %v23737_v57  ;;  %11416 = vmatprep.mubr.f32.mxu1 %v23737_v57 }
 0x810   : > { %9044 = vmatmul.mubr.f32.gmra.mrb[38].mxu0 %v24924_v30  ;;  %11418 = vmatmul.mubr.f32.gmra.mrb[38].mxu1 %v24924_v30 }
 0x811   : > { %9049 = vmatprep.mubr.f32.mxu0 %v23737_v57  ;;  %11423 = vmatprep.mubr.f32.mxu1 %v23737_v57 }
 0x814   : > { %9051 = vmatmul.mubr.f32.gmra.mrb[40].mxu0 %v24925_v27  ;;  %11425 = vmatmul.mubr.f32.gmra.mrb[40].mxu1 %v24925_v27 }
 0x815   : > { %9056 = vmatprep.mubr.f32.mxu0 %v23737_v57  ;;  %11430 = vmatprep.mubr.f32.mxu1 %v23737_v57 }
 0x818   : > { %9058 = vmatmul.mubr.f32.gmra.mrb[42].mxu0 %v24926_v3  ;;  %11432 = vmatmul.mubr.f32.gmra.mrb[42].mxu1 %v24926_v3 }
 0x819   : > { %9063 = vmatprep.mubr.f32.mxu0 %v23737_v57  ;;  %11437 = vmatprep.mubr.f32.mxu1 %v23737_v57 }
 0x81c   : > { %9065 = vmatmul.mubr.f32.gmra.mrb[44].mxu0 %v24927_v47  ;;  %11439 = vmatmul.mubr.f32.gmra.mrb[44].mxu1 %v24927_v47 }
 0x81d   : > { %9070 = vmatprep.mubr.f32.mxu0 %v23737_v57  ;;  %11444 = vmatprep.mubr.f32.mxu1 %v23737_v57 }
 0x820   : > { %9072 = vmatmul.mubr.f32.gmra.mrb[46].mxu0 %v24928_v37  ;;  %11446 = vmatmul.mubr.f32.gmra.mrb[46].mxu1 %v24928_v37 }
 0x821   : > { %9077 = vmatprep.mubr.f32.mxu0 %v23737_v57  ;;  %11451 = vmatprep.mubr.f32.mxu1 %v23737_v57 }
 0x824   : > { %9079 = vmatmul.mubr.f32.gmra.mrb[48].mxu0 %v24929_v49  ;;  %11453 = vmatmul.mubr.f32.gmra.mrb[48].mxu1 %v24929_v49 }
 0x825   : > { %9084 = vmatprep.mubr.f32.mxu0 %v23737_v57  ;;  %11458 = vmatprep.mubr.f32.mxu1 %v23737_v57 }
 0x828   : > { %9086 = vmatmul.mubr.f32.gmra.mrb[50].mxu0 %v24930_v11  ;;  %11460 = vmatmul.mubr.f32.gmra.mrb[50].mxu1 %v24930_v11 }
 0x829   : > { %9091 = vmatprep.mubr.f32.mxu0 %v23737_v57  ;;  %11465 = vmatprep.mubr.f32.mxu1 %v23737_v57 }
 0x82c   : > { %9093 = vmatmul.mubr.f32.gmra.mrb[52].mxu0 %v24931_v29  ;;  %11467 = vmatmul.mubr.f32.gmra.mrb[52].mxu1 %v24931_v29 }
 0x82d   : > { %9098 = vmatprep.mubr.f32.mxu0 %v23737_v57  ;;  %11472 = vmatprep.mubr.f32.mxu1 %v23737_v57 }
 0x830   : > { %9100 = vmatmul.mubr.f32.gmra.mrb[54].mxu0 %v24932_v62  ;;  %11474 = vmatmul.mubr.f32.gmra.mrb[54].mxu1 %v24932_v62 }
 0x831   : > { %9105 = vmatprep.mubr.f32.mxu0 %v23737_v57  ;;  %11479 = vmatprep.mubr.f32.mxu1 %v23737_v57 }
 0x834   : > { %9107 = vmatmul.mubr.f32.gmra.mrb[56].mxu0 %v24933_v59  ;;  %11481 = vmatmul.mubr.f32.gmra.mrb[56].mxu1 %v24933_v59 }
 0x835   : > { %9112 = vmatprep.mubr.f32.mxu0 %v23737_v57  ;;  %11486 = vmatprep.mubr.f32.mxu1 %v23737_v57 }
 0x838   : > { %9114 = vmatmul.mubr.f32.gmra.mrb[58].mxu0 %v24934_v5  ;;  %11488 = vmatmul.mubr.f32.gmra.mrb[58].mxu1 %v24934_v5 }
 0x839   : > { %9119 = vmatprep.mubr.f32.mxu0 %v23737_v57  ;;  %11493 = vmatprep.mubr.f32.mxu1 %v23737_v57 }
 0x83c   : > { %9121 = vmatmul.mubr.f32.gmra.mrb[60].mxu0 %v24935_v39  ;;  %11495 = vmatmul.mubr.f32.gmra.mrb[60].mxu1 %v24935_v39 }
 0x83d   : > { %9126 = vmatprep.mubr.f32.mxu0 %v23737_v57  ;;  %11500 = vmatprep.mubr.f32.mxu1 %v23737_v57 }
 0x840   : > { %9128 = vmatmul.mubr.f32.gmra.mrb[62].mxu0 %v24936_v21  ;;  %11502 = vmatmul.mubr.f32.gmra.mrb[62].mxu1 %v24936_v21 }
 0x897   : > { %v8912_v60 = vpop.f32.mrb[0].mxu0  ;;  %v11286_v57 = vpop.f32.mrb[0].mxu1 }
 0x898   : > { %v11530_v22 = vadd.f32 %v21625_v2, %v8912_v60  ;;  %v8914_v46 = vpop.f32.mrb[1].mxu0  ;;  %v11288_v4 = vpop.f32.mrb[1].mxu1  ;;  %v11532_v30 = vadd.f32 %v21629_v34, %v11286_v57  ;;  %v24940_v57 = vld [vmem:[#allocation125_spill] sm:$0xff] }
 0x899   : > { %v11531_v42 = vadd.f32 %v21627_v16, %v8914_v46  ;;  %v11533_v29 = vadd.f32 %v21633_v1, %v11288_v4 }
 0x89a   : > { %v13106_v18 = vmul.f32 -1.442695, %v11530_v22  ;;  %v13108_v31 = vmul.f32 -1.442695, %v11532_v30  ;;  %v823_v22 = vmul.f32 %v791_v9, %v24940_v57 }
 0x89b   : > { %v13107_v27 = vmul.f32 -1.442695, %v11531_v42  ;;  %v8919_v3 = vpop.f32.mrb[2].mxu0  ;;  %v11293_v47 = vpop.f32.mrb[2].mxu1  ;;  %v13074_v42 = vld [vmem:[%s16558_s23 + $0x300] sm:$0xff] }
 0x89c   : > { %15592 = vpow2.f32 %v13106_v18  ;;  %v11534_v37 = vadd.f32 %v21625_v2, %v8919_v3  ;;  %v8921_v49 = vpop.f32.mrb[3].mxu0  ;;  %v11295_v11 = vpop.f32.mrb[3].mxu1  ;;  %v11536_v62 = vadd.f32 %v21629_v34, %v11293_v47  ;;  %v24941_v18 = vld [vmem:[#allocation129_spill] sm:$0xff]  ;;  %v1176_v3 = vadd.f32 %v1144_v14, %v822_v25 }
 0x89d   : > { %v11535_v59 = vadd.f32 %v21627_v16, %v8921_v49  ;;  %15594 = vpow2.f32 %v13107_v27  ;;  %v11537_v61 = vadd.f32 %v21633_v1, %v11295_v11  ;;  %v1467_v30 = vmul.f32 %v13011_v38, %v24941_v18  ;;  %v12948_v27 = vld [vmem:[%s16558_s23 + $0x110] sm:$0xff]  ;;  %v24942_v49 = vld [vmem:[#allocation122_spill] sm:$0xff]  ;;  %v24947_v38 = vld [vmem:[#allocation133_spill] sm:$0xff] }
 0x89e   : > { %v13109_v44 = vmul.f32 -1.442695, %v11534_v37  ;;  %v13111_v21 = vmul.f32 -1.442695, %v11536_v62  ;;  %v1466_v11 = vmul.f32 %v13010_v24, %v24942_v49 }
 0x89f   : > { %v13110_v43 = vmul.f32 -1.442695, %v11535_v59  ;;  %v8926_v5 = vpop.f32.mrb[4].mxu0  ;;  %v11300_v56 = vpop.f32.mrb[4].mxu1 }
 0x8a0   : > { %15596 = vpow2.f32 %v13109_v44  ;;  %v11538_v36 = vadd.f32 %v21625_v2, %v8926_v5  ;;  %v11540_v39 = vadd.f32 %v21629_v34, %v11300_v56  ;;  %v8928_v17 = vpop.f32.mrb[5].mxu0  ;;  %v11302_v13 = vpop.f32.mrb[5].mxu1  ;;  %v1177_v5 = vadd.f32 %v1145_v10, %v823_v22  ;;  %v792_v56 = vld [vmem:[%s16558_s23 + $0x10] sm:$0xff]  ;;  %v13077_v22 = vld [vmem:[%s16558_s23 + $0x318] sm:$0xff] }
 0x8a1   : > { %15598 = vtanh.f32 %v11533_v29  ;;  %v11539_v0 = vadd.f32 %v21627_v16, %v8928_v17  ;;  %v11541_v51 = vadd.f32 %v21633_v1, %v11302_v13  ;;  %v24943_v29 = vld [vmem:[#allocation123_spill] sm:$0xff]  ;;  %v1498_v52 = vadd.f32 %v1466_v11, %v1176_v3 }
 0x8a2   : > { %15600 = vpow2.f32 %v13110_v43  ;;  %v13112_v35 = vmul.f32 -1.442695, %v11538_v36  ;;  %v13114_v20 = vmul.f32 -1.442695, %v11540_v39  ;;  %v21670_v62 = vmul.f32 %v13013_v7, %v24943_v29  ;;  %v12949_v29 = vld [vmem:[%s16558_s23 + $0x118] sm:$0xff] }
 0x8a3   : > { %15602 = vpow2.f32 %v13108_v31  ;;  %v13113_v19 = vmul.f32 -1.442695, %v11539_v0  ;;  %v8933_v33 = vpop.f32.mrb[6].mxu0  ;;  %v11307_v48 = vpop.f32.mrb[6].mxu1  ;;  %v24944_v0 = vld [vmem:[#allocation126_spill] sm:$0xff]  ;;  %v824_v25 = vmul.f32 %v792_v56, %v24946_v45 }
 0x8a4   : > { %15604 = vpow2.f32 %v13112_v35  ;;  %v11542_v53 = vadd.f32 %v21625_v2, %v8933_v33  ;;  %v8935_v41 = vpop.f32.mrb[7].mxu0  ;;  %v11309_v12 = vpop.f32.mrb[7].mxu1  ;;  %v11544_v6 = vadd.f32 %v21629_v34, %v11307_v48  ;;  %v1788_v63 = vmul.f32 %v13074_v42, %v24944_v0  ;;  %v13012_v35 = vld [vmem:[%s16558_s23 + $0x210] sm:$0xff] }
 0x8a5   : > { %15606 = vpow2.f32 %v13111_v21  ;;  %v11543_v32 = vadd.f32 %v21627_v16, %v8935_v41  ;;  %v13076_v41 = vld [vmem:[%s16558_s23 + $0x310] sm:$0xff]  ;;  %v11545_v23 = vadd.f32 %v21633_v1, %v11309_v12 }
 0x8a6   : > { %v15593_v50 = vpop.eup %15592  ;;  %15608 = vpow2.f32 %v13113_v19  ;;  %v13115_v40 = vmul.f32 -1.442695, %v11542_v53  ;;  %v13117_v47 = vmul.f32 -1.442695, %v11544_v6  ;;  %v1499_v53 = vadd.f32 %v1467_v30, %v1177_v5 }
 0x8a7   : > { %v11946_v8 = vadd.f32 1.0, %v15593_v50  ;;  %15610 = vpow2.f32 %v13114_v20  ;;  %v8940_v54 = vpop.f32.mrb[8].mxu0  ;;  %v21653_v58 = vpop.f32.mrb[8].mxu1  ;;  %v13116_v36 = vmul.f32 -1.442695, %v11543_v32  ;;  %v24945_v20 = vld [vmem:[#allocation137_spill] sm:$0xff]  ;;  %v1820_v42 = vadd.f32 %v1788_v63, %v1498_v52 }
 0x8a8   : > { %v15595_v55 = vpop.eup %15594  ;;  %15612 = vpow2.f32 %v13115_v40  ;;  %v8942_v15 = vpop.f32.mrb[9].mxu0  ;;  %v11546_v39 = vadd.f32 %v21625_v2, %v8940_v54  ;;  %v1146_v19 = vmul.f32 %v12948_v27, %v24945_v20  ;;  %v24948_v54 = vld [vmem:[#allocation136_spill] sm:$0xff]  ;;  %v11548_v27 = vadd.f32 %v21629_v34, %v21653_v58 }
 0x8a9   : > { %v21660_v60 = vpop.f32.mrb[9].mxu1  ;;  %15614 = vrcp.f32 %v11946_v8  ;;  %v11947_v46 = vadd.f32 1.0, %v15595_v55  ;;  %v11547_v9 = vadd.f32 %v21627_v16, %v8942_v15  ;;  %v1789_v8 = vmul.f32 %v13075_v26, %v24947_v38 }
 0x8aa   : > { %v15597_v4 = vpop.eup %15596  ;;  %15616 = vtanh.f32 %v11537_v61  ;;  %v1468_v55 = vmul.f32 %v13012_v35, %v24948_v54  ;;  %v13118_v24 = vmul.f32 -1.442695, %v11546_v39  ;;  %v1178_v10 = vadd.f32 %v1146_v19, %v824_v25  ;;  %v793_v35 = vld [vmem:[%s16558_s23 + $0x18] sm:$0xff] }
 0x8ab   : > { %v21666_v37 = vpop.eup %15598  ;;  %15618 = vrcp.f32 %v11947_v46  ;;  %v11949_v59 = vadd.f32 1.0, %v15597_v4  ;;  %v8947_v44 = vpop.f32.mrb[10].mxu0  ;;  %v13119_v3 = vmul.f32 -1.442695, %v11547_v9  ;;  %v24952_v54 = vld [vmem:[#allocation152_spill] sm:$0xff] }
 0x8ac   : > { %v21672_v31 = vpop.f32.mrb[10].mxu1  ;;  %v15601_v43 = vpop.eup %15600  ;;  %15620 = vtanh.f32 %v11541_v51  ;;  %v24949_v51 = vld [vmem:[#allocation140_spill] sm:$0xff]  ;;  %v11550_v4 = vadd.f32 %v21625_v2, %v8947_v44  ;;  %v1500_v26 = vadd.f32 %v1468_v55, %v1178_v10  ;;  %v825_v55 = vmul.f32 %v793_v35, %v24952_v54  ;;  %v12950_v10 = vld [vmem:[%s16558_s23 + $0x120] sm:$0xff] }
 0x8ad   : > { %v8949_v17 = vpop.f32.mrb[11].mxu0  ;;  %v21676_v13 = vpop.f32.mrb[11].mxu1  ;;  %15622 = vrcp.f32 %v11949_v59  ;;  %v11950_v33 = vadd.f32 1.0, %v15601_v43  ;;  %v1790_v32 = vmul.f32 %v13076_v41, %v24949_v51  ;;  %v13120_v41 = vmul.f32 -1.442695, %v11548_v27 }
 0x8ae   : > { %v15603_v21 = vpop.eup %15602  ;;  %15624 = vpow2.f32 %v13117_v47  ;;  %v11551_v44 = vadd.f32 %v21627_v16, %v8949_v17  ;;  %v13121_v20 = vmul.f32 -1.442695, %v11550_v4  ;;  %v21715_v17 = vpop.permute.xlu0 %12363  ;;  %v11552_v51 = vadd.f32 %v21629_v34, %v21672_v31  ;;  %v24953_v31 = vld [vmem:[#allocation142_spill] sm:$0xff] }
 0x8af   : > { %v15605_v48 = vpop.eup %15604  ;;  %15626 = vrcp.f32 %v11950_v33  ;;  %v8954_v61 = vpop.f32.mrb[12].mxu0  ;;  %v11948_v46 = vadd.f32 1.0, %v15603_v21  ;;  %v1821_v21 = vadd.f32 %v1789_v8, %v1499_v53  ;;  %v1822_v45 = vadd.f32 %v1790_v32, %v1500_v26  ;;  %v794_v8 = vld [vmem:[%s16558_s23 + $0x20] sm:$0xff] }
 0x8b0   : > { %v15607_v14 = vpop.eup %15606  ;;  %v11952_v50 = vadd.f32 1.0, %v15605_v48  ;;  %v21686_v40 = vpop.f32.mrb[12].mxu1  ;;  %15628 = vpow2.f32 %v13116_v36  ;;  %v24950_v36 = vld [vmem:[#allocation128_spill] sm:$0xff]  ;;  %v24951_v48 = vld [vmem:[#allocation138_spill] sm:$0xff]  ;;  %v11554_v52 = vadd.f32 %v21625_v2, %v8954_v61  ;;  %v13122_v25 = vmul.f32 -1.442695, %v11551_v44 }
 0x8b1   : > { %v15609_v6 = vpop.eup %15608  ;;  %v21690_v7 = vpop.f32.mrb[13].mxu0  ;;  %v11951_v59 = vadd.f32 1.0, %v15607_v14  ;;  %v21711_v39 = vmul.f32 %v13077_v22, %v24950_v36  ;;  %v11549_v61 = vadd.f32 %v21633_v1, %v21660_v60  ;;  %v826_v27 = vmul.f32 %v794_v8, %v24953_v31  ;;  %v12951_v44 = vld [vmem:[%s16558_s23 + $0x128] sm:$0xff]  ;;  %v13014_v26 = vld [vmem:[%s16558_s23 + $0x220] sm:$0xff] }
 0x8b2   : > { %v21692_v12 = vpop.f32.mrb[13].mxu1  ;;  %v15611_v28 = vpop.eup %15610  ;;  %15630 = vrcp.f32 %v11952_v50  ;;  %v11953_v15 = vadd.f32 1.0, %v15609_v6  ;;  %v11555_v32 = vadd.f32 %v21627_v16, %v21690_v7  ;;  %v13124_v60 = vmul.f32 -1.442695, %v11554_v52 }
 0x8b3   : > { %v15613_v57 = vpop.eup %15612  ;;  %15632 = vtanh.f32 %v11545_v23  ;;  %v21699_v47 = vpop.f32.mrb[14].mxu0  ;;  %v11954_v0 = vadd.f32 1.0, %v15611_v28  ;;  %v13123_v35 = vmul.f32 -1.442695, %v11552_v51  ;;  %v11553_v51 = vadd.f32 %v21633_v1, %v21676_v13 }
 0x8b4   : > { %v15615_v18 = vpop.eup %15614  ;;  %15634 = vrcp.f32 %v11953_v15  ;;  %v11955_v30 = vadd.f32 1.0, %v15613_v57  ;;  %v21701_v49 = vpop.f32.mrb[14].mxu1 }
 0x8b5   : > { %v15617_v11 = vpop.eup %15616  ;;  %15636 = vpow2.f32 %v13118_v24  ;;  %v21705_v43 = vpop.f32.mrb[15].mxu0  ;;  %v12298_v56 = vmul.f32 %v15615_v18, %v21666_v37  ;;  %v1147_v37 = vmul.f32 %v12949_v29, %v24951_v48 }
 0x8b6   : > { %v21707_v5 = vpop.f32.mrb[15].mxu1  ;;  %v15619_v58 = vpop.eup %15618  ;;  %15638 = vrcp.f32 %v11955_v30 }
 0x8b7   : > { %v15621_v63 = vpop.eup %15620  ;;  %15640 = vrcp.f32 %v11948_v46  ;;  %v12266_v19 = vmul.f32 %v15619_v58, %v1820_v42  ;;  %v21719_v53 = vpop.f32.mrb[16].mxu0  ;;  %v1179_v36 = vadd.f32 %v1147_v37, %v825_v55 }
 0x8b8   : > { %v15623_v33 = vpop.eup %15622  ;;  %15642 = vpow2.f32 %v13119_v3  ;;  %v21721_v23 = vpop.f32.mrb[16].mxu1 }
 0x8b9   : > { %v15625_v14 = vpop.eup %15624  ;;  %15644 = vrcp.f32 %v11951_v59  ;;  %v12330_v50 = vadd.f32 %v12298_v56, %v12266_v19  ;;  %v21723_v9 = vpop.f32.mrb[17].mxu0  ;;  %v12299_v24 = vmul.f32 %v15623_v33, %v15617_v11  ;;  %v24954_v56 = vld [vmem:[#allocation144_spill] sm:$0xff]  ;;  %v11558_v19 = vadd.f32 %v21625_v2, %v21699_v47 }
 0x8ba   : > { %v21725_v6 = vpop.f32.mrb[17].mxu1  ;;  %v15627_v38 = vpop.eup %15626  ;;  %15646 = vrcp.f32 %v11954_v0  ;;  %v11957_v7 = vadd.f32 1.0, %v15625_v14  ;;  %v1148_v58 = vmul.f32 %v12950_v10, %v24954_v56  ;;  %v11556_v47 = vadd.f32 %v21629_v34, %v21686_v40 }
 0x8bb   : > { %v15629_v28 = vpop.eup %15628  ;;  %15648 = vpow2.f32 %v13121_v20  ;;  %v21737_v15 = vmul.f32 %v21715_v17, %v12330_v50  ;;  %v21739_v57 = vpop.permute.xlu1 %12367  ;;  %v12267_v18 = vmul.f32 %v15627_v38, %v1821_v21  ;;  %v13125_v20 = vmul.f32 -1.442695, %v11555_v32  ;;  %v795_v38 = vld [vmem:[%s16558_s23 + $0x28] sm:$0xff] }
 0x8bc   : > { %v15631_v22 = vpop.eup %15630  ;;  %v11956_v46 = vadd.f32 1.0, %v15629_v28  ;;  %15650 = vpow2.f32 %v13120_v41  ;;  %v21741_v4 = vpop.f32.mrb[18].mxu0  ;;  %v24956_v28 = vld [vmem:[#allocation147_spill] sm:$0xff]  ;;  %v1501_v40 = vadd.f32 %v21670_v62, %v1179_v36 }
 0x8bd   : > { %v21743_v42 = vpop.f32.mrb[18].mxu1  ;;  %v15633_v30 = vpop.eup %15632  ;;  %15652 = vpow2.f32 %v13122_v25  ;;  %12650 = vst [vmem:[%s21748_s10] sm:$0xff] %v21737_v15  ;;  %v12300_v29 = vmul.f32 %v15631_v22, %v15621_v63  ;;  %v12331_v21 = vadd.f32 %v12299_v24, %v12267_v18  ;;  %v24955_v25 = vld [vmem:[#allocation139_spill] sm:$0xff]  ;;  %v1180_v24 = vadd.f32 %v1148_v58, %v826_v27 }
 0x8be   : > { %v21752_v3 = vpop.f32.mrb[19].mxu0  ;;  %v21754_v11 = vpop.f32.mrb[19].mxu1  ;;  %15654 = vrcp.f32 %v11956_v46  ;;  %v1149_v50 = vmul.f32 %v12951_v44, %v24955_v25  ;;  %v1470_v10 = vmul.f32 %v13014_v26, %v24956_v28  ;;  %v13127_v46 = vmul.f32 -1.442695, %v11558_v19  ;;  %v24958_v44 = vld [vmem:[#allocation150_spill] sm:$0xff]  ;;  %v796_v19 = vld [vmem:[%s16558_s23 + $0x30] sm:$0xff] }
 0x8bf   : > { %v15635_v59 = vpop.eup %15634  ;;  %15656 = vtanh.f32 %v11549_v61  ;;  %v21762_v63 = vmul.f32 %v21739_v57, %v12331_v21  ;;  %v21764_v41 = vpop.f32.mrb[20].mxu0  ;;  %v11559_v27 = vadd.f32 %v21627_v16, %v21705_v43  ;;  %v13126_v58 = vmul.f32 -1.442695, %v11556_v47 }
 0x8c0   : > { %v15637_v0 = vpop.eup %15636  ;;  %15658 = vpow2.f32 %v13124_v60  ;;  %v21766_v37 = vpop.f32.mrb[20].mxu1  ;;  %v12268_v52 = vmul.f32 %v15635_v59, %v1822_v45  ;;  %v13078_v45 = vld [vmem:[%s16558_s23 + $0x320] sm:$0xff]  ;;  %v1502_v26 = vadd.f32 %v1470_v10, %v1180_v24 }
 0x8c1   : > { %v15639_v33 = vpop.eup %15638  ;;  %v11958_v48 = vadd.f32 1.0, %v15637_v0  ;;  %15660 = vrcp.f32 %v11957_v7  ;;  %v21776_v54 = vpop.f32.mrb[21].mxu0  ;;  %12651 = vst [vmem:[%s21748_s10 + $0x8] sm:$0xff] %v21762_v63  ;;  %v1792_v56 = vmul.f32 %v13078_v45, %v24958_v44 }
 0x8c2   : > { %v21768_v14 = vpop.eup %15640  ;;  %v21774_v8 = vmul.f32 %v15639_v33, %v15633_v30  ;;  %v21778_v55 = vpop.f32.mrb[21].mxu1  ;;  %v24957_v30 = vld [vmem:[#allocation148_spill] sm:$0xff]  ;;  %v12332_v13 = vadd.f32 %v12300_v29, %v12268_v52  ;;  %v11557_v33 = vadd.f32 %v21633_v1, %v21692_v12  ;;  %v1823_v52 = vadd.f32 %v21711_v39, %v1501_v40  ;;  %v12952_v12 = vld [vmem:[%s16558_s23 + $0x130] sm:$0xff] }
 0x8c3   : > { %v15643_v61 = vpop.eup %15642  ;;  %15662 = vrcp.f32 %v11958_v48  ;;  %v21789_v60 = vpop.permute.xlu1 %12371  ;;  %v827_v31 = vmul.f32 %v795_v38, %v24957_v30  ;;  %v11560_v48 = vadd.f32 %v21629_v34, %v21701_v49  ;;  %v1824_v45 = vadd.f32 %v1792_v56, %v1502_v26  ;;  %v24961_v26 = vld [vmem:[#allocation161_spill] sm:$0xff] }
 0x8c4   : > { %v21786_v32 = vpop.eup %15644  ;;  %v11959_v22 = vadd.f32 1.0, %v15643_v61  ;;  %15664 = vpow2.f32 %v13125_v20  ;;  %v21796_v7 = vpop.f32.mrb[22].mxu0  ;;  %v21806_v29 = vmul.f32 %v21789_v60, %v12332_v13  ;;  %v13015_v20 = vld [vmem:[%s16558_s23 + $0x228] sm:$0xff]  ;;  %v13128_v61 = vmul.f32 -1.442695, %v11559_v27 }
 0x8c5   : > { %v21791_v18 = vpop.eup %15646  ;;  %15666 = vpow2.f32 %v13123_v35  ;;  %v21798_v59 = vpop.f32.mrb[22].mxu1  ;;  %v1181_v38 = vadd.f32 %v1149_v50, %v827_v31  ;;  %v11562_v49 = vadd.f32 %v21625_v2, %v21719_v53  ;;  %v24960_v31 = vld [vmem:[#allocation156_spill] sm:$0xff]  ;;  %v13129_v56 = vmul.f32 -1.442695, %v11560_v48 }
 0x8c6   : > { %v15649_v62 = vpop.eup %15648  ;;  %15668 = vrcp.f32 %v11959_v22  ;;  %v21801_v36 = vpop.f32.mrb[23].mxu0  ;;  %12652 = vst [vmem:[%s21748_s10 + $0x10] sm:$0xff] %v21806_v29  ;;  %v828_v27 = vmul.f32 %v796_v19, %v24960_v31 }
 0x8c7   : > { %v21803_v21 = vpop.f32.mrb[23].mxu1  ;;  %v15651_v0 = vpop.eup %15650  ;;  %v11961_v43 = vadd.f32 1.0, %v15649_v62  ;;  %15670 = vtanh.f32 %v11553_v51  ;;  %v13079_v51 = vld [vmem:[%s16558_s23 + $0x328] sm:$0xff] }
 0x8c8   : > { %v15653_v35 = vpop.eup %15652  ;;  %15672 = vpow2.f32 %v13127_v46  ;;  %v21817_v24 = vpop.f32.mrb[24].mxu0  ;;  %v24959_v46 = vld [vmem:[#allocation154_spill] sm:$0xff]  ;;  %v11960_v13 = vadd.f32 1.0, %v15651_v0 }
 0x8c9   : > { %v15655_v25 = vpop.eup %15654  ;;  %15674 = vrcp.f32 %v11961_v43  ;;  %v11962_v47 = vadd.f32 1.0, %v15653_v35  ;;  %v21819_v28 = vpop.f32.mrb[24].mxu1  ;;  %v1471_v30 = vmul.f32 %v13015_v20, %v24959_v46  ;;  %v1150_v43 = vmul.f32 %v12952_v12, %v24961_v26  ;;  %v24962_v35 = vld [vmem:[#allocation167_spill] sm:$0xff] }
 0x8ca   : > { %v15657_v10 = vpop.eup %15656  ;;  %15676 = vpow2.f32 %v13126_v58  ;;  %v12269_v39 = vmul.f32 %v15655_v25, %v1823_v52  ;;  %v21825_v40 = vpop.f32.mrb[25].mxu0  ;;  %v1793_v52 = vmul.f32 %v13079_v51, %v24962_v35  ;;  %v11563_v20 = vadd.f32 %v21627_v16, %v21723_v9  ;;  %v13080_v35 = vld [vmem:[%s16558_s23 + $0x330] sm:$0xff] }
 0x8cb   : > { %v21827_v50 = vpop.f32.mrb[25].mxu1  ;;  %v15659_v22 = vpop.eup %15658  ;;  %15678 = vrcp.f32 %v11962_v47  ;;  %v13016_v47 = vld [vmem:[%s16558_s23 + $0x230] sm:$0xff]  ;;  %v1503_v31 = vadd.f32 %v1471_v30, %v1181_v38  ;;  %v1182_v38 = vadd.f32 %v1150_v43, %v828_v27  ;;  %v11567_v27 = vadd.f32 %v21627_v16, %v21752_v3 }
 0x8cc   : > { %v21831_v62 = vpop.eup %15660  ;;  %v11964_v44 = vadd.f32 1.0, %v15659_v22  ;;  %15680 = vtanh.f32 %v11557_v33  ;;  %v12333_v53 = vadd.f32 %v21774_v8, %v12269_v39  ;;  %v21838_v19 = vpop.permute.xlu0 %12375  ;;  %v13130_v33 = vmul.f32 -1.442695, %v11562_v49 }
 0x8cd   : > { %v15663_v58 = vpop.eup %15662  ;;  %15682 = vpow2.f32 %v13128_v61  ;;  %v21840_v0 = vpop.f32.mrb[26].mxu0  ;;  %v11561_v39 = vadd.f32 %v21633_v1, %v21707_v5  ;;  %v11564_v22 = vadd.f32 %v21629_v34, %v21721_v23  ;;  %v1825_v30 = vadd.f32 %v1793_v52, %v1503_v31 }
 0x8ce   : > { %v15665_v25 = vpop.eup %15664  ;;  %15684 = vrcp.f32 %v11964_v44  ;;  %v21844_v8 = vmul.f32 %v21838_v19, %v12333_v53  ;;  %v12302_v48 = vmul.f32 %v15663_v58, %v15657_v10  ;;  %v21846_v12 = vpop.f32.mrb[26].mxu1  ;;  %v11566_v10 = vadd.f32 %v21625_v2, %v21741_v4  ;;  %v24965_v44 = vld [vmem:[#allocation124_spill] sm:$0xff] }
 0x8cf   : > { %24963 = vst [vmem:[#allocation153_spill] sm:$0xff] %v21846_v12  ;;  %v21848_v51 = vpop.f32.mrb[27].mxu0  ;;  %v15667_v61 = vpop.eup %15666  ;;  %15686 = vrcp.f32 %v11960_v13  ;;  %v11965_v9 = vadd.f32 1.0, %v15665_v25  ;;  %v1472_v53 = vmul.f32 %v13016_v47, %v24965_v44  ;;  %v797_v12 = vld [vmem:[%s16558_s23 + $0x38] sm:$0xff] }
 0x8d0   : > { %v21854_v46 = vpop.f32.mrb[27].mxu1  ;;  %v15669_v49 = vpop.eup %15668  ;;  %15688 = vpow2.f32 %v13129_v56  ;;  %12653 = vst [vmem:[%s21748_s10 + $0x18] sm:$0xff] %v21844_v8  ;;  %v13131_v56 = vmul.f32 -1.442695, %v11563_v20  ;;  %v12953_v44 = vld [vmem:[%s16558_s23 + $0x138] sm:$0xff] }
 0x8d1   : > { %24964 = vst [vmem:[#allocation184_spill] sm:$0xff] %v21854_v46  ;;  %v15671_v13 = vpop.eup %15670  ;;  %15690 = vrcp.f32 %v11965_v9  ;;  %v12270_v58 = vmul.f32 %v15669_v49, %v1824_v45  ;;  %v21861_v5 = vpop.f32.mrb[28].mxu0  ;;  %v13132_v45 = vmul.f32 -1.442695, %v11564_v22 }
 0x8d2   : > { %v21863_v26 = vpop.f32.mrb[28].mxu1  ;;  %v15673_v23 = vpop.eup %15672  ;;  %15692 = vpow2.f32 %v13130_v33  ;;  %v24968_v33 = vld [vmem:[#allocation130_spill] sm:$0xff] }
 0x8d3   : > { %24966 = vst [vmem:[#allocation209_spill] sm:$0xff] %v21863_v26  ;;  %v21866_v4 = vpop.f32.mrb[29].mxu0  ;;  %v21868_v25 = vpop.f32.mrb[29].mxu1  ;;  %v11967_v47 = vadd.f32 1.0, %v15673_v23  ;;  %15694 = vtanh.f32 %v11561_v39  ;;  %v12334_v9 = vadd.f32 %v12302_v48, %v12270_v58  ;;  %v13133_v26 = vmul.f32 -1.442695, %v11566_v10 }
 0x8d4   : > { %24967 = vst [vmem:[#allocation71_spill] sm:$0xff] %v21868_v25  ;;  %v15675_v46 = vpop.eup %15674  ;;  %15696 = vtanh.f32 %v21737_v15  ;;  %v21875_v52 = vpop.permute.xlu1 %12379  ;;  %v1794_v31 = vmul.f32 %v13080_v35, %v24968_v33  ;;  %v11963_v25 = vadd.f32 1.0, %v15667_v61  ;;  %v1504_v10 = vadd.f32 %v1472_v53, %v1182_v38  ;;  %v24970_v58 = vld [vmem:[#allocation171_spill] sm:$0xff] }
 0x8d5   : > { %v15677_v49 = vpop.eup %15676  ;;  %v12303_v43 = vmul.f32 %v15675_v46, %v15671_v13  ;;  %15698 = vrcp.f32 %v11967_v47  ;;  %v21879_v39 = vmul.f32 %v21875_v52, %v12334_v9  ;;  %v21881_v48 = vpop.f32.mrb[30].mxu0  ;;  %v829_v3 = vmul.f32 %v797_v12, %v24970_v58  ;;  %v24972_v35 = vld [vmem:[#allocation175_spill] sm:$0xff]  ;;  %v13017_v58 = vld [vmem:[%s16558_s23 + $0x238] sm:$0xff] }
 0x8d6   : > { %v15679_v20 = vpop.eup %15678  ;;  %v21883_v22 = vpop.f32.mrb[30].mxu1  ;;  %15700 = vpow2.f32 %v13131_v56  ;;  %v1151_v47 = vmul.f32 %v12953_v44, %v24972_v35  ;;  %v11966_v9 = vadd.f32 1.0, %v15677_v49  ;;  %v11568_v33 = vadd.f32 %v21629_v34, %v21743_v42 }
 0x8d7   : > { %24969 = vst [vmem:[#allocation64_spill] sm:$0xff] %v21883_v22  ;;  %v15681_v15 = vpop.eup %15680  ;;  %v12271_v46 = vmul.f32 %v15679_v20, %v1825_v30  ;;  %v21886_v13 = vpop.f32.mrb[31].mxu0  ;;  %15702 = vpow2.f32 %v13132_v45  ;;  %12654 = vst [vmem:[%s21748_s10 + $0x20] sm:$0xff] %v21879_v39  ;;  %v13134_v38 = vmul.f32 -1.442695, %v11567_v27  ;;  %v11565_v45 = vadd.f32 %v21633_v1, %v21725_v6  ;;  %v13081_v27 = vld [vmem:[%s16558_s23 + $0x338] sm:$0xff] }
 0x8d8   : > { %v21888_v23 = vpop.f32.mrb[31].mxu1  ;;  %v15683_v61 = vpop.eup %15682  ;;  %15704 = vpow2.f32 %v13133_v26  ;;  %v11570_v42 = vadd.f32 %v21625_v2, %v21764_v41  ;;  %v13135_v22 = vmul.f32 -1.442695, %v11568_v33  ;;  %v11569_v33 = vadd.f32 %v21633_v1, %v21754_v11 }
 0x8d9   : > { %24971 = vst [vmem:[#allocation235_spill] sm:$0xff] %v21888_v23  ;;  %v15685_v53 = vpop.eup %15684  ;;  %v11968_v12 = vadd.f32 1.0, %v15683_v61  ;;  %v21895_v30 = vpop.permute.xlu0 %12383  ;;  %v12335_v56 = vadd.f32 %v12303_v43, %v12271_v46  ;;  %15706 = vrcp.f32 %v11963_v25  ;;  %v1826_v46 = vadd.f32 %v1794_v31, %v1504_v10 }
 0x8da   : > { %v21897_v20 = vpop.eup %15686  ;;  %v12304_v49 = vmul.f32 %v15685_v53, %v15681_v15  ;;  %v21904_v44 = vpop.f32.mrb[32].mxu0  ;;  %v1183_v23 = vadd.f32 %v1151_v47, %v829_v3  ;;  %v24976_v15 = vld [vmem:[#allocation178_spill] sm:$0xff] }
 0x8db   : > { %v21906_v61 = vpop.f32.mrb[32].mxu1  ;;  %v15689_v26 = vpop.eup %15688  ;;  %15708 = vrcp.f32 %v11968_v12  ;;  %v21910_v43 = vmul.f32 %v21895_v30, %v12335_v56  ;;  %v1473_v53 = vmul.f32 %v13017_v58, %v24976_v15  ;;  %v24977_v56 = vld [vmem:[#allocation181_spill] sm:$0xff] }
 0x8dc   : > { %24973 = vst [vmem:[#allocation242_spill] sm:$0xff] %v21906_v61  ;;  %v21912_v25 = vpop.f32.mrb[33].mxu0  ;;  %v21914_v35 = vpop.f32.mrb[33].mxu1  ;;  %15710 = vrcp.f32 %v11966_v9  ;;  %v1795_v31 = vmul.f32 %v13081_v27, %v24977_v56  ;;  %v12954_v9 = vld [vmem:[%s16558_s23 + $0x140] sm:$0xff] }
 0x8dd   : > { %24974 = vst [vmem:[#allocation75_spill] sm:$0xff] %v21912_v25  ;;  %24975 = vst [vmem:[#allocation91_spill] sm:$0xff] %v21914_v35  ;;  %v15691_v6 = vpop.eup %15690  ;;  %15712 = vpow2.f32 %v13134_v38  ;;  %v13136_v25 = vmul.f32 -1.442695, %v11570_v42  ;;  %v21920_v35 = vpop.f32.mrb[34].mxu0  ;;  %v11571_v38 = vadd.f32 %v21627_v16, %v21776_v54  ;;  %v798_v42 = vld [vmem:[%s16558_s23 + $0x40] sm:$0xff]  ;;  %v1505_v11 = vadd.f32 %v1473_v53, %v1183_v23 }
 0x8de   : > { %v15693_v41 = vpop.eup %15692  ;;  %12655 = vst [vmem:[%s21748_s10 + $0x28] sm:$0xff] %v21910_v43  ;;  %v12272_v12 = vmul.f32 %v15691_v6, %v1826_v46  ;;  %15714 = vtanh.f32 %v11565_v45  ;;  %v21922_v3 = vpop.f32.mrb[34].mxu1 }
 0x8df   : > { %v15695_v61 = vpop.eup %15694  ;;  %v11970_v10 = vadd.f32 1.0, %v15693_v41  ;;  %24978 = vst [vmem:[#allocation70_spill] sm:$0xff] %v21922_v3  ;;  %15716 = vtanh.f32 %v21762_v63  ;;  %v21930_v46 = vpop.f32.mrb[35].mxu0 }
 0x8e0   : > { %v15697_v47 = vpop.eup %15696  ;;  %v12336_v58 = vadd.f32 %v12304_v49, %v12272_v12  ;;  %v21932_v27 = vpop.f32.mrb[35].mxu1  ;;  %v24980_v12 = vld [vmem:[#allocation141_spill] sm:$0xff] }
 0x8e1   : > { %24979 = vst [vmem:[#allocation85_spill] sm:$0xff] %v21932_v27  ;;  %v15699_v45 = vpop.eup %15698  ;;  %15718 = vrcp.f32 %v11970_v10  ;;  %v12554_v6 = vmul.f32 %v15697_v47, %v21768_v14  ;;  %v21936_v41 = vpop.permute.xlu1 %12387  ;;  %v1152_v56 = vmul.f32 %v12954_v9, %v24980_v12 }
 0x8e2   : > { %v15701_v15 = vpop.eup %15700  ;;  %15720 = vpow2.f32 %v13135_v22  ;;  %v12305_v63 = vmul.f32 %v15699_v45, %v15695_v61  ;;  %v21939_v54 = vmul.f32 %v21936_v41, %v12336_v58  ;;  %v21943_v14 = vpop.f32.mrb[36].mxu0  ;;  %v24982_v22 = vld [vmem:[#allocation180_spill] sm:$0xff]  ;;  %v1827_v61 = vadd.f32 %v1795_v31, %v1505_v11  ;;  %v13018_v45 = vld [vmem:[%s16558_s23 + $0x240] sm:$0xff]  ;;  %v24985_v11 = vld [vmem:[#allocation183_spill] sm:$0xff] }
 0x8e3   : > { %v15703_v49 = vpop.eup %15702  ;;  %v12586_v27 = vmul.f32 %v12554_v6, %v21715_v17  ;;  %v11971_v10 = vadd.f32 1.0, %v15701_v15  ;;  %15722 = vpow2.f32 %v13136_v25  ;;  %v21945_v47 = vpop.f32.mrb[36].mxu1  ;;  %v830_v53 = vmul.f32 %v798_v42, %v24982_v22  ;;  %v13082_v25 = vld [vmem:[%s16558_s23 + $0x340] sm:$0xff] }
 0x8e4   : > { %24981 = vst [vmem:[#allocation274_spill] sm:$0xff] %v21945_v47  ;;  %v15705_v23 = vpop.eup %15704  ;;  %15724 = vtanh.f32 %v11569_v33  ;;  %v13137_v58 = vmul.f32 -1.442695, %v11571_v38  ;;  %12656 = vst [vmem:[%s21748_s10 + $0x30] sm:$0xff] %v21939_v54  ;;  %v21951_v9 = vpop.f32.mrb[37].mxu0  ;;  %v11969_v6 = vadd.f32 1.0, %v15689_v26  ;;  %v11574_v33 = vadd.f32 %v21625_v2, %v21796_v7 }
 0x8e5   : > { %24983 = vst [vmem:[#allocation94_spill] sm:$0xff] %v21951_v9  ;;  %v21953_v12 = vpop.f32.mrb[37].mxu1  ;;  %v21955_v17 = vpop.eup %15706  ;;  %12618 = vst [vmem:[%s21960_s12] sm:$0xff] %v12586_v27  ;;  %15726 = vrcp.f32 %v11971_v10  ;;  %v11973_v31 = vadd.f32 1.0, %v15705_v23  ;;  %v11972_v42 = vadd.f32 1.0, %v15703_v49  ;;  %v1474_v22 = vmul.f32 %v13018_v45, %v24985_v11  ;;  %v24986_v23 = vld [vmem:[#allocation187_spill] sm:$0xff]  ;;  %v13083_v45 = vld [vmem:[%s16558_s23 + $0x348] sm:$0xff] }
 0x8e6   : > { %24984 = vst [vmem:[#allocation99_spill] sm:$0xff] %v21953_v12  ;;  %v15709_v38 = vpop.eup %15708  ;;  %15728 = vtanh.f32 %v21844_v8  ;;  %v21969_v12 = vpop.f32.mrb[38].mxu0  ;;  %v1184_v10 = vadd.f32 %v1152_v56, %v830_v53  ;;  %v1796_v9 = vmul.f32 %v13082_v25, %v24986_v23  ;;  %v11572_v7 = vadd.f32 %v21629_v34, %v21766_v37 }
 0x8e7   : > { %v21966_v15 = vpop.eup %15710  ;;  %15730 = vrcp.f32 %v11973_v31  ;;  %v12273_v26 = vmul.f32 %v15709_v38, %v1827_v61  ;;  %v21971_v47 = vpop.f32.mrb[38].mxu1  ;;  %v13139_v31 = vmul.f32 -1.442695, %v11574_v33  ;;  %v11573_v56 = vadd.f32 %v21633_v1, %v21778_v55 }
 0x8e8   : > { %v15713_v27 = vpop.eup %15712  ;;  %15732 = vpow2.f32 %v13137_v58  ;;  %v21976_v49 = vpop.f32.mrb[39].mxu0  ;;  %v11575_v53 = vadd.f32 %v21627_v16, %v21801_v36  ;;  %v1506_v25 = vadd.f32 %v1474_v22, %v1184_v10 }
 0x8e9   : > { %v21978_v8 = vpop.f32.mrb[39].mxu1  ;;  %v15715_v3 = vpop.eup %15714  ;;  %15734 = vrcp.f32 %v11969_v6  ;;  %v11974_v61 = vadd.f32 1.0, %v15713_v27  ;;  %v12337_v38 = vadd.f32 %v12305_v63, %v12273_v26 }
 0x8ea   : > { %24987 = vst [vmem:[#allocation100_spill] sm:$0xff] %v21978_v8  ;;  %v15717_v11 = vpop.eup %15716  ;;  %15736 = vrcp.f32 %v11972_v42  ;;  %v21985_v37 = vpop.permute.xlu0 %12391  ;;  %v24989_v42 = vld [vmem:[#allocation132_spill] sm:$0xff]  ;;  %v1828_v10 = vadd.f32 %v1796_v9, %v1506_v25 }
 0x8eb   : > { %v15719_v58 = vpop.eup %15718  ;;  %15738 = vrcp.f32 %v11974_v61  ;;  %v12555_v23 = vmul.f32 %v15717_v11, %v21786_v32  ;;  %v21989_v6 = vmul.f32 %v21985_v37, %v12337_v38  ;;  %v21991_v63 = vpop.f32.mrb[40].mxu0  ;;  %v1797_v26 = vmul.f32 %v13083_v45, %v24989_v42  ;;  %v12956_v61 = vld [vmem:[%s16558_s23 + $0x150] sm:$0xff] }
 0x8ec   : > { %v21993_v33 = vpop.f32.mrb[40].mxu1  ;;  %v15721_v55 = vpop.eup %15720  ;;  %15740 = vtanh.f32 %v21806_v29  ;;  %v12306_v36 = vmul.f32 %v15719_v58, %v15715_v3  ;;  %v13138_v11 = vmul.f32 -1.442695, %v11572_v7  ;;  %v13140_v45 = vmul.f32 -1.442695, %v11575_v53 }
 0x8ed   : > { %24988 = vst [vmem:[#allocation275_spill] sm:$0xff] %v21993_v33  ;;  %v21997_v27 = vpop.f32.mrb[41].mxu0  ;;  %v21999_v22 = vpop.f32.mrb[41].mxu1  ;;  %v12587_v38 = vmul.f32 %v12555_v23, %v21739_v57  ;;  %15742 = vpow2.f32 %v13139_v31  ;;  %12657 = vst [vmem:[%s21748_s10 + $0x38] sm:$0xff] %v21989_v6  ;;  %v11578_v29 = vadd.f32 %v21625_v2, %v21817_v24  ;;  %v11975_v58 = vadd.f32 1.0, %v15721_v55  ;;  %v24991_v31 = vld [vmem:[#allocation186_spill] sm:$0xff] }
 0x8ee   : > { %v15723_v32 = vpop.eup %15722  ;;  %15744 = vtanh.f32 %v11573_v56  ;;  %v22009_v9 = vpop.f32.mrb[42].mxu0  ;;  %v1829_v25 = vadd.f32 %v1797_v26, %v24991_v31  ;;  %v24992_v23 = vld [vmem:[#allocation195_spill] sm:$0xff] }
 0x8ef   : > { %v15725_v33 = vpop.eup %15724  ;;  %v11976_v8 = vadd.f32 1.0, %v15723_v32  ;;  %12619 = vst [vmem:[%s21960_s12 + $0x8] sm:$0xff] %v12587_v38  ;;  %15746 = vtanh.f32 %v21910_v43  ;;  %v22011_v57 = vpop.f32.mrb[42].mxu1  ;;  %v1154_v42 = vmul.f32 %v12956_v61, %v24992_v23  ;;  %v800_v55 = vld [vmem:[%s16558_s23 + $0x50] sm:$0xff]  ;;  %v11576_v38 = vadd.f32 %v21629_v34, %v21798_v59 }
 0x8f0   : > { %v15727_v3 = vpop.eup %15726  ;;  %24990 = vst [vmem:[#allocation97_spill] sm:$0xff] %v22011_v57  ;;  %v22015_v53 = vpop.f32.mrb[43].mxu0  ;;  %v11579_v57 = vadd.f32 %v21627_v16, %v21825_v40  ;;  %v11577_v59 = vadd.f32 %v21633_v1, %v21803_v21 }
 0x8f1   : > { %v15729_v7 = vpop.eup %15728  ;;  %15748 = vrcp.f32 %v11976_v8  ;;  %v12274_v56 = vmul.f32 %v15727_v3, %v1828_v10  ;;  %v22017_v32 = vpop.f32.mrb[43].mxu1  ;;  %v13142_v8 = vmul.f32 -1.442695, %v11578_v29  ;;  %v13020_v29 = vld [vmem:[%s16558_s23 + $0x250] sm:$0xff] }
 0x8f2   : > { %24993 = vst [vmem:[#allocation98_spill] sm:$0xff] %v22017_v32  ;;  %v15731_v24 = vpop.eup %15730  ;;  %15750 = vpow2.f32 %v13138_v11  ;;  %v12557_v43 = vmul.f32 %v15729_v7, %v21831_v62  ;;  %v22025_v3 = vpop.permute.xlu1 %12395 }
 0x8f3   : > { %v15733_v26 = vpop.eup %15732  ;;  %15752 = vpow2.f32 %v13140_v45  ;;  %v12307_v10 = vmul.f32 %v15731_v24, %v15725_v33  ;;  %v12338_v61 = vadd.f32 %v12306_v36, %v12274_v56  ;;  %v22032_v7 = vpop.f32.mrb[44].mxu0  ;;  %v24995_v33 = vld [vmem:[#allocation190_spill] sm:$0xff]  ;;  %v13143_v24 = vmul.f32 -1.442695, %v11579_v57 }
 0x8f4   : > { %v22027_v31 = vpop.eup %15734  ;;  %15754 = vrcp.f32 %v11975_v58  ;;  %v12589_v62 = vmul.f32 %v12557_v43, %v21838_v19  ;;  %v11977_v11 = vadd.f32 1.0, %v15733_v26  ;;  %v22034_v40 = vpop.f32.mrb[44].mxu1  ;;  %v832_v36 = vmul.f32 %v800_v55, %v24995_v33  ;;  %v13084_v26 = vld [vmem:[%s16558_s23 + $0x350] sm:$0xff]  ;;  %v12957_v33 = vld [vmem:[%s16558_s23 + $0x158] sm:$0xff] }
 0x8f5   : > { %24994 = vst [vmem:[#allocation177_spill] sm:$0xff] %v22034_v40  ;;  %v22036_v45 = vpop.eup %15736  ;;  %15756 = vtanh.f32 %v21879_v39  ;;  %v11580_v19 = vadd.f32 %v21629_v34, %v21819_v28  ;;  %v22044_v58 = vmul.f32 %v22025_v3, %v12338_v61  ;;  %v22046_v21 = vpop.f32.mrb[45].mxu0  ;;  %v11582_v28 = vadd.f32 %v21625_v2, %v21840_v0  ;;  %v24998_v40 = vld [vmem:[#allocation196_spill] sm:$0xff] }
 0x8f6   : > { %24996 = vst [vmem:[#allocation113_spill] sm:$0xff] %v22046_v21  ;;  %v22048_v23 = vpop.f32.mrb[45].mxu1  ;;  %v15739_v56 = vpop.eup %15738  ;;  %12621 = vst [vmem:[%s21960_s12 + $0x18] sm:$0xff] %v12589_v62  ;;  %15758 = vrcp.f32 %v11977_v11  ;;  %v1186_v43 = vadd.f32 %v1154_v42, %v832_v36  ;;  %v1476_v32 = vmul.f32 %v13020_v29, %v24998_v40  ;;  %v13141_v62 = vmul.f32 -1.442695, %v11576_v38 }
 0x8f7   : > { %24997 = vst [vmem:[#allocation54_spill] sm:$0xff] %v22048_v23  ;;  %v15741_v55 = vpop.eup %15740  ;;  %15760 = vpow2.f32 %v13142_v8  ;;  %v12275_v39 = vmul.f32 %v15739_v56, %v1829_v25  ;;  %12658 = vst [vmem:[%s21748_s10 + $0x40] sm:$0xff] %v22044_v58  ;;  %v22059_v57 = vpop.f32.mrb[46].mxu0  ;;  %v801_v8 = vld [vmem:[%s16558_s23 + $0x58] sm:$0xff]  ;;  %v13144_v21 = vmul.f32 -1.442695, %v11580_v19 }
 0x8f8   : > { %v15743_v61 = vpop.eup %15742  ;;  %v12556_v23 = vmul.f32 %v15741_v55, %v21791_v18  ;;  %15762 = vtanh.f32 %v11577_v59  ;;  %v22061_v11 = vpop.f32.mrb[46].mxu1  ;;  %v25001_v18 = vld [vmem:[#allocation198_spill] sm:$0xff]  ;;  %v11583_v55 = vadd.f32 %v21627_v16, %v21848_v51 }
 0x8f9   : > { %24999 = vst [vmem:[#allocation108_spill] sm:$0xff] %v22061_v11  ;;  %v15745_v42 = vpop.eup %15744  ;;  %v11979_v36 = vadd.f32 1.0, %v15743_v61  ;;  %15764 = vtanh.f32 %v21989_v6  ;;  %v12339_v0 = vadd.f32 %v12307_v10, %v12275_v39  ;;  %v22065_v25 = vpop.f32.mrb[47].mxu0  ;;  %v1798_v38 = vmul.f32 %v13084_v26, %v25001_v18  ;;  %v25003_v26 = vld [vmem:[#allocation197_spill] sm:$0xff] }
 0x8fa   : > { %v22067_v56 = vpop.f32.mrb[47].mxu1  ;;  %v15747_v40 = vpop.eup %15746  ;;  %v12588_v59 = vmul.f32 %v12556_v23, %v21789_v60  ;;  %15766 = vpow2.f32 %v13143_v24  ;;  %v13145_v10 = vmul.f32 -1.442695, %v11582_v28  ;;  %v833_v18 = vmul.f32 %v801_v8, %v25003_v26 }
 0x8fb   : > { %25000 = vst [vmem:[#allocation109_spill] sm:$0xff] %v22067_v56  ;;  %v22071_v29 = vpop.permute.xlu0 %12399  ;;  %v15749_v19 = vpop.eup %15748  ;;  %15768 = vrcp.f32 %v11979_v36  ;;  %v12559_v6 = vmul.f32 %v15747_v40, %v21955_v17  ;;  %v25002_v56 = vld [vmem:[#allocation143_spill] sm:$0xff]  ;;  %v1508_v36 = vadd.f32 %v1476_v32, %v1186_v43  ;;  %v11581_v28 = vadd.f32 %v21633_v1, %v21827_v50  ;;  %v13021_v40 = vld [vmem:[%s16558_s23 + $0x258] sm:$0xff] }
 0x8fc   : > { %v12499_v39 = vmul.f32 %v22071_v29, %v12339_v0  ;;  %v15751_v61 = vpop.eup %15750  ;;  %v1155_v11 = vmul.f32 %v12957_v33, %v25002_v56  ;;  %12620 = vst [vmem:[%s21960_s12 + $0x10] sm:$0xff] %v12588_v59  ;;  %15770 = vpow2.f32 %v13141_v62  ;;  %v12308_v60 = vmul.f32 %v15749_v19, %v15745_v42  ;;  %v22080_v23 = vpop.f32.mrb[48].mxu0  ;;  %v25005_v0 = vld [vmem:[#allocation153_spill] sm:$0xff] }
 0x8fd   : > { %v22082_v51 = vpop.f32.mrb[48].mxu1  ;;  %v15753_v24 = vpop.eup %15752  ;;  %v12591_v17 = vmul.f32 %v12559_v6, %v21895_v30  ;;  %15772 = vpow2.f32 %v13144_v21  ;;  %v11584_v32 = vadd.f32 %v21629_v34, %v25005_v0  ;;  %v1830_v21 = vadd.f32 %v1798_v38, %v1508_v36  ;;  %v25006_v0 = vld [vmem:[#allocation200_spill] sm:$0xff] }
 0x8fe   : > { %12659 = vst [vmem:[%s21748_s10 + $0x48] sm:$0xff] %v12499_v39  ;;  %v22088_v33 = vpop.f32.mrb[49].mxu0  ;;  %v22090_v8 = vpop.f32.mrb[49].mxu1  ;;  %v11980_v42 = vadd.f32 1.0, %v15753_v24  ;;  %15774 = vtanh.f32 %v21939_v54  ;;  %v13146_v43 = vmul.f32 -1.442695, %v11583_v55  ;;  %v1187_v56 = vadd.f32 %v1155_v11, %v833_v18 }
 0x8ff   : > { %25004 = vst [vmem:[#allocation179_spill] sm:$0xff] %v22090_v8  ;;  %v22092_v62 = vpop.eup %15754  ;;  %12623 = vst [vmem:[%s21960_s12 + $0x28] sm:$0xff] %v12591_v17  ;;  %15776 = vpow2.f32 %v13145_v10  ;;  %v22100_v19 = vpop.f32.mrb[50].mxu0  ;;  %v13085_v54 = vld [vmem:[%s16558_s23 + $0x358] sm:$0xff]  ;;  %v11978_v24 = vadd.f32 1.0, %v15751_v61  ;;  %v11586_v38 = vadd.f32 %v21625_v2, %v21861_v5  ;;  %v11587_v61 = vadd.f32 %v21627_v16, %v21866_v4 }
 0x900   : > { %v15757_v30 = vpop.eup %15756  ;;  %15778 = vrcp.f32 %v11980_v42  ;;  %v22102_v6 = vpop.f32.mrb[50].mxu1  ;;  %v13147_v17 = vmul.f32 -1.442695, %v11584_v32 }
 0x901   : > { %v15759_v50 = vpop.eup %15758  ;;  %v12558_v59 = vmul.f32 %v15757_v30, %v21897_v20  ;;  %15780 = vtanh.f32 %v11581_v28  ;;  %v22107_v55 = vpop.f32.mrb[51].mxu0  ;;  %v1477_v30 = vmul.f32 %v13021_v40, %v25006_v0 }
 0x902   : > { %v15761_v26 = vpop.eup %15760  ;;  %v12276_v36 = vmul.f32 %v15759_v50, %v1830_v21  ;;  %v22109_v11 = vpop.f32.mrb[51].mxu1  ;;  %15782 = vtanh.f32 %v12499_v39  ;;  %v25007_v50 = vld [vmem:[#allocation204_spill] sm:$0xff] }
 0x903   : > { %v15763_v10 = vpop.eup %15762  ;;  %v12590_v20 = vmul.f32 %v12558_v59, %v21875_v52  ;;  %v11982_v18 = vadd.f32 1.0, %v15761_v26  ;;  %15784 = vpow2.f32 %v13146_v43  ;;  %v22115_v28 = vpop.permute.xlu1 %12403  ;;  %v1799_v8 = vmul.f32 %v13085_v54, %v25007_v50  ;;  %v25008_v59 = vld [vmem:[#allocation184_spill] sm:$0xff] }
 0x904   : > { %v15765_v42 = vpop.eup %15764  ;;  %v12340_v5 = vadd.f32 %v12308_v60, %v12276_v36  ;;  %v11585_v39 = vadd.f32 %v21633_v1, %v25008_v59  ;;  %v22122_v32 = vpop.f32.mrb[52].mxu0  ;;  %v13148_v60 = vmul.f32 -1.442695, %v11586_v38  ;;  %v13149_v38 = vmul.f32 -1.442695, %v11587_v61 }
 0x905   : > { %v15767_v21 = vpop.eup %15766  ;;  %12622 = vst [vmem:[%s21960_s12 + $0x20] sm:$0xff] %v12590_v20  ;;  %15786 = vrcp.f32 %v11982_v18  ;;  %v12561_v52 = vmul.f32 %v15765_v42, %v22027_v31  ;;  %v22124_v40 = vpop.f32.mrb[52].mxu1  ;;  %v25010_v18 = vld [vmem:[#allocation209_spill] sm:$0xff] }
 0x906   : > { %v15769_v43 = vpop.eup %15768  ;;  %15788 = vrcp.f32 %v11978_v24  ;;  %v11983_v4 = vadd.f32 1.0, %v15767_v21  ;;  %v22127_v26 = vmul.f32 %v22115_v28, %v12340_v5  ;;  %v22129_v54 = vpop.f32.mrb[53].mxu0  ;;  %v11588_v42 = vadd.f32 %v21629_v34, %v25010_v18  ;;  %v803_v18 = vld [vmem:[%s16558_s23 + $0x68] sm:$0xff] }
 0x907   : > { %v22131_v36 = vpop.f32.mrb[53].mxu1  ;;  %v15771_v31 = vpop.eup %15770  ;;  %v12593_v20 = vmul.f32 %v12561_v52, %v21985_v37  ;;  %15790 = vpow2.f32 %v13147_v17  ;;  %v12309_v24 = vmul.f32 %v15769_v43, %v15763_v10  ;;  %v1509_v21 = vadd.f32 %v1477_v30, %v1187_v56  ;;  %v13086_v52 = vld [vmem:[%s16558_s23 + $0x360] sm:$0xff] }
 0x908   : > { %25009 = vst [vmem:[#allocation185_spill] sm:$0xff] %v22131_v36  ;;  %v15773_v0 = vpop.eup %15772  ;;  %15792 = vrcp.f32 %v11983_v4  ;;  %12660 = vst [vmem:[%s21748_s10 + $0x50] sm:$0xff] %v22127_v26  ;;  %v22140_v50 = vpop.f32.mrb[54].mxu0  ;;  %v11981_v10 = vadd.f32 1.0, %v15771_v31  ;;  %v12959_v4 = vld [vmem:[%s16558_s23 + $0x168] sm:$0xff]  ;;  %v25016_v36 = vld [vmem:[#allocation207_spill] sm:$0xff] }
 0x909   : > { %v15775_v5 = vpop.eup %15774  ;;  %12625 = vst [vmem:[%s21960_s12 + $0x38] sm:$0xff] %v12593_v20  ;;  %15794 = vtanh.f32 %v22044_v58  ;;  %25011 = vst [vmem:[#allocation50_spill] sm:$0xff] %v22140_v50  ;;  %v22142_v37 = vpop.f32.mrb[54].mxu1  ;;  %v1831_v59 = vadd.f32 %v1799_v8, %v1509_v21  ;;  %v13150_v58 = vmul.f32 -1.442695, %v11588_v42  ;;  %v25018_v50 = vld [vmem:[#allocation212_spill] sm:$0xff] }
 0x90a   : > { %25012 = vst [vmem:[#allocation193_spill] sm:$0xff] %v22142_v37  ;;  %v15777_v17 = vpop.eup %15776  ;;  %v12560_v56 = vmul.f32 %v15775_v5, %v21966_v15  ;;  %15796 = vpow2.f32 %v13148_v60  ;;  %v22147_v30 = vpop.f32.mrb[55].mxu0  ;;  %v11590_v37 = vadd.f32 %v21625_v2, %v21881_v48  ;;  %v25015_v60 = vld [vmem:[#allocation134_spill] sm:$0xff] }
 0x90b   : > { %25013 = vst [vmem:[#allocation194_spill] sm:$0xff] %v22147_v30  ;;  %v22149_v61 = vpop.f32.mrb[55].mxu1  ;;  %v15779_v43 = vpop.eup %15778  ;;  %v11985_v20 = vadd.f32 1.0, %v15777_v17  ;;  %15798 = vtanh.f32 %v11585_v39  ;;  %v1800_v5 = vmul.f32 %v13086_v52, %v25015_v60  ;;  %v11591_v17 = vadd.f32 %v21627_v16, %v21886_v13  ;;  %v12960_v30 = vld [vmem:[%s16558_s23 + $0x170] sm:$0xff] }
 0x90c   : > { %25014 = vst [vmem:[#allocation202_spill] sm:$0xff] %v22149_v61  ;;  %v15781_v8 = vpop.eup %15780  ;;  %v12592_v31 = vmul.f32 %v12560_v56, %v21936_v41  ;;  %v12277_v21 = vmul.f32 %v15779_v43, %v1831_v59  ;;  %15800 = vpow2.f32 %v13149_v38  ;;  %v835_v61 = vmul.f32 %v803_v18, %v25016_v36  ;;  %v22159_v39 = vpop.f32.mrb[56].mxu0 }
 0x90d   : > { %v15783_v15 = vpop.eup %15782  ;;  %15802 = vrcp.f32 %v11985_v20  ;;  %v22161_v42 = vpop.f32.mrb[56].mxu1  ;;  %v1157_v41 = vmul.f32 %v12959_v4, %v25018_v50  ;;  %v11984_v18 = vadd.f32 1.0, %v15773_v0  ;;  %v13151_v20 = vmul.f32 -1.442695, %v11590_v37  ;;  %v13023_v50 = vld [vmem:[%s16558_s23 + $0x268] sm:$0xff]  ;;  %v25021_v0 = vld [vmem:[#allocation145_spill] sm:$0xff] }
 0x90e   : > { %25017 = vst [vmem:[#allocation210_spill] sm:$0xff] %v22161_v42  ;;  %v15785_v48 = vpop.eup %15784  ;;  %15804 = vrcp.f32 %v11981_v10  ;;  %12624 = vst [vmem:[%s21960_s12 + $0x30] sm:$0xff] %v12592_v31  ;;  %v12563_v38 = vmul.f32 %v15783_v15, %v22092_v62  ;;  %v12341_v52 = vadd.f32 %v12309_v24, %v12277_v21  ;;  %v22167_v36 = vpop.f32.mrb[57].mxu0  ;;  %v804_v10 = vld [vmem:[%s16558_s23 + $0x70] sm:$0xff]  ;;  %v1158_v21 = vmul.f32 %v12960_v30, %v25021_v0  ;;  %v13087_v0 = vld [vmem:[%s16558_s23 + $0x368] sm:$0xff] }
 0x90f   : > { %25019 = vst [vmem:[#allocation155_spill] sm:$0xff] %v22167_v36  ;;  %v22169_v59 = vpop.f32.mrb[57].mxu1  ;;  %v15787_v13 = vpop.eup %15786  ;;  %v11986_v56 = vadd.f32 1.0, %v15785_v48  ;;  %15806 = vpow2.f32 %v13150_v58  ;;  %v25022_v58 = vld [vmem:[#allocation203_spill] sm:$0xff]  ;;  %v13152_v37 = vmul.f32 -1.442695, %v11591_v17  ;;  %v1189_v36 = vadd.f32 %v1157_v41, %v835_v61 }
 0x910   : > { %25020 = vst [vmem:[#allocation211_spill] sm:$0xff] %v22169_v59  ;;  %v22171_v43 = vpop.permute.xlu0 %12407  ;;  %v22173_v60 = vpop.eup %15788  ;;  %v12595_v62 = vmul.f32 %v12563_v38, %v22071_v29  ;;  %15808 = vtanh.f32 %v22127_v26  ;;  %v12310_v4 = vmul.f32 %v15787_v13, %v15781_v8  ;;  %v1832_v15 = vadd.f32 %v1800_v5, %v25022_v58  ;;  %v25024_v29 = vld [vmem:[#allocation71_spill] sm:$0xff]  ;;  %v25027_v38 = vld [vmem:[#allocation213_spill] sm:$0xff]  ;;  %v25028_v13 = vld [vmem:[#allocation214_spill] sm:$0xff] }
 0x911   : > { %v12501_v24 = vmul.f32 %v22171_v43, %v12341_v52  ;;  %v15791_v31 = vpop.eup %15790  ;;  %15810 = vrcp.f32 %v11986_v56  ;;  %v22182_v48 = vpop.f32.mrb[58].mxu0  ;;  %v11589_v26 = vadd.f32 %v21633_v1, %v25024_v29  ;;  %v11594_v30 = vadd.f32 %v21625_v2, %v21904_v44  ;;  %v25029_v58 = vld [vmem:[#allocation64_spill] sm:$0xff] }
 0x912   : > { %v22184_v59 = vpop.f32.mrb[58].mxu1  ;;  %v15793_v42 = vpop.eup %15792  ;;  %12627 = vst [vmem:[%s21960_s12 + $0x48] sm:$0xff] %v12595_v62  ;;  %v1479_v52 = vmul.f32 %v13023_v50, %v25027_v38  ;;  %v836_v56 = vmul.f32 %v804_v10, %v25028_v13  ;;  %v11987_v62 = vadd.f32 1.0, %v15791_v31  ;;  %v11592_v44 = vadd.f32 %v21629_v34, %v25029_v58  ;;  %v25030_v50 = vld [vmem:[#allocation75_spill] sm:$0xff] }
 0x913   : > { %25023 = vst [vmem:[#allocation217_spill] sm:$0xff] %v22184_v59  ;;  %15812 = vtanh.f32 %v12501_v24  ;;  %12661 = vst [vmem:[%s21748_s10 + $0x58] sm:$0xff] %v12501_v24  ;;  %v22192_v8 = vpop.f32.mrb[59].mxu0  ;;  %v22194_v5 = vpop.f32.mrb[59].mxu1  ;;  %v12278_v61 = vmul.f32 %v15793_v42, %v1832_v15  ;;  %v11595_v10 = vadd.f32 %v21627_v16, %v25030_v50  ;;  %v13154_v15 = vmul.f32 -1.442695, %v11594_v30 }
 0x914   : > { %25025 = vst [vmem:[#allocation72_spill] sm:$0xff] %v22192_v8  ;;  %25026 = vst [vmem:[#allocation165_spill] sm:$0xff] %v22194_v5  ;;  %v15795_v17 = vpop.eup %15794  ;;  %15814 = vpow2.f32 %v13151_v20  ;;  %v22202_v29 = vpop.permute.xlu1 %12411  ;;  %v25032_v20 = vld [vmem:[#allocation215_spill] sm:$0xff]  ;;  %v1511_v50 = vadd.f32 %v1479_v52, %v1189_v36 }
 0x915   : > { %v15797_v41 = vpop.eup %15796  ;;  %15816 = vrcp.f32 %v11984_v18  ;;  %v12562_v24 = vmul.f32 %v15795_v17, %v22036_v45  ;;  %v12342_v8 = vadd.f32 %v12310_v4, %v12278_v61  ;;  %v22206_v38 = vpop.f32.mrb[60].mxu0  ;;  %v1801_v45 = vmul.f32 %v13087_v0, %v25032_v20  ;;  %v13024_v0 = vld [vmem:[%s16558_s23 + $0x270] sm:$0xff] }
 0x916   : > { %v15799_v59 = vpop.eup %15798  ;;  %v11988_v5 = vadd.f32 1.0, %v15797_v41  ;;  %15818 = vpow2.f32 %v13152_v37  ;;  %v22208_v42 = vpop.f32.mrb[60].mxu1  ;;  %v11598_v41 = vadd.f32 %v21625_v2, %v21920_v35  ;;  %v25035_v35 = vld [vmem:[#allocation235_spill] sm:$0xff] }
 0x917   : > { %25031 = vst [vmem:[#allocation104_spill] sm:$0xff] %v22208_v42  ;;  %v15801_v18 = vpop.eup %15800  ;;  %v12594_v31 = vmul.f32 %v12562_v24, %v22025_v3  ;;  %15820 = vtanh.f32 %v11589_v26  ;;  %v22212_v17 = vpop.f32.mrb[61].mxu0  ;;  %v12502_v61 = vmul.f32 %v22202_v29, %v12342_v8  ;;  %v13153_v3 = vmul.f32 -1.442695, %v11592_v44  ;;  %v25037_v44 = vld [vmem:[#allocation37_spill] sm:$0xff] }
 0x918   : > { %v22214_v4 = vpop.f32.mrb[61].mxu1  ;;  %v15803_v37 = vpop.eup %15802  ;;  %15822 = vrcp.f32 %v11988_v5  ;;  %v11989_v13 = vadd.f32 1.0, %v15801_v18  ;;  %v13155_v24 = vmul.f32 -1.442695, %v11595_v10  ;;  %v1190_v18 = vadd.f32 %v1158_v21, %v836_v56  ;;  %v25038_v56 = vld [vmem:[#allocation242_spill] sm:$0xff] }
 0x919   : > { %25033 = vst [vmem:[#allocation107_spill] sm:$0xff] %v22214_v4  ;;  %v15805_v58 = vpop.eup %15804  ;;  %15824 = vrcp.f32 %v11987_v62  ;;  %12626 = vst [vmem:[%s21960_s12 + $0x40] sm:$0xff] %v12594_v31  ;;  %v12311_v26 = vmul.f32 %v15803_v37, %v15799_v59  ;;  %v22222_v20 = vpop.f32.mrb[62].mxu0  ;;  %v1833_v42 = vadd.f32 %v1801_v45, %v1511_v50  ;;  %v11593_v36 = vadd.f32 %v21633_v1, %v25035_v35  ;;  %v13088_v37 = vld [vmem:[%s16558_s23 + $0x370] sm:$0xff] }
 0x91a   : > { %v15807_v30 = vpop.eup %15806  ;;  %15826 = vrcp.f32 %v11989_v13  ;;  %12662 = vst [vmem:[%s21748_s10 + $0x60] sm:$0xff] %v12502_v61  ;;  %v22224_v5 = vpop.f32.mrb[62].mxu1  ;;  %v1480_v31 = vmul.f32 %v13024_v0, %v25037_v44  ;;  %v13157_v13 = vmul.f32 -1.442695, %v11598_v41  ;;  %v11596_v45 = vadd.f32 %v21629_v34, %v25038_v56  ;;  %v25049_v4 = vld [vmem:[#allocation43_spill] sm:$0xff] }
 0x91b   : > { %25034 = vst [vmem:[#allocation219_spill] sm:$0xff] %v22224_v5  ;;  %v15809_v8 = vpop.eup %15808  ;;  %15828 = vtanh.f32 %v12502_v61  ;;  %v22228_v52 = vpop.f32.mrb[63].mxu0  ;;  %v11599_v61 = vadd.f32 %v21627_v16, %v21930_v46  ;;  %v11990_v35 = vadd.f32 1.0, %v15807_v30 }
 0x91c   : > { %v22230_v62 = vpop.f32.mrb[63].mxu1  ;;  %v15811_v59 = vpop.eup %15810  ;;  %v12564_v10 = vmul.f32 %v15809_v8, %v22173_v60  ;;  %15830 = vpow2.f32 %v13154_v15  ;;  %v25039_v60 = vld [vmem:[#allocation42_spill] sm:$0xff] }
 0x91d   : > { %25036 = vst [vmem:[#allocation227_spill] sm:$0xff] %v22230_v62  ;;  %v15813_v5 = vpop.eup %15812  ;;  %15832 = vpow2.f32 %v13153_v3  ;;  %v12279_v21 = vmul.f32 %v15811_v59, %v1833_v42  ;;  %v1802_v15 = vmul.f32 %v13088_v37, %v25039_v60  ;;  %v1512_v3 = vadd.f32 %v1480_v31, %v1190_v18  ;;  %v22243_v46 = vpop.permute.xlu0 %12415 }
 0x91e   : > { %v15815_v50 = vpop.eup %15814  ;;  %v12565_v62 = vmul.f32 %v15813_v5, %v15805_v58  ;;  %v12596_v0 = vmul.f32 %v12564_v10, %v22115_v28  ;;  %15834 = vpow2.f32 %v13155_v24  ;;  %v11602_v28 = vadd.f32 %v21625_v2, %v21943_v14 }
 0x91f   : > { %v15817_v44 = vpop.eup %15816  ;;  %v11991_v41 = vadd.f32 1.0, %v15815_v50  ;;  %v12343_v8 = vadd.f32 %v12311_v26, %v12279_v21  ;;  %15836 = vtanh.f32 %v11593_v36  ;;  %v13156_v26 = vmul.f32 -1.442695, %v11596_v45  ;;  %v25041_v50 = vld [vmem:[#allocation70_spill] sm:$0xff] }
 0x920   : > { %v15819_v42 = vpop.eup %15818  ;;  %v12597_v59 = vmul.f32 %v12565_v62, %v22171_v43  ;;  %12628 = vst [vmem:[%s21960_s12 + $0x50] sm:$0xff] %v12596_v0  ;;  %15838 = vpow2.f32 %v13157_v13  ;;  %v13158_v18 = vmul.f32 -1.442695, %v11599_v61  ;;  %v1834_v43 = vadd.f32 %v1802_v15, %v1512_v3  ;;  %v25040_v62 = vld [vmem:[#allocation91_spill] sm:$0xff] }
 0x921   : > { %v15821_v58 = vpop.eup %15820  ;;  %15840 = vrcp.f32 %v11991_v41  ;;  %v12503_v30 = vmul.f32 %v22243_v46, %v12343_v8  ;;  %v11992_v24 = vadd.f32 1.0, %v15819_v42  ;;  %v11597_v31 = vadd.f32 %v21633_v1, %v25040_v62  ;;  %v25043_v8 = vld [vmem:[#allocation94_spill] sm:$0xff] }
 0x922   : > { %v15823_v5 = vpop.eup %15822  ;;  %15842 = vrcp.f32 %v11990_v35  ;;  %12629 = vst [vmem:[%s21960_s12 + $0x58] sm:$0xff] %v12597_v59  ;;  %v13160_v14 = vmul.f32 -1.442695, %v11602_v28  ;;  %v11600_v61 = vadd.f32 %v21629_v34, %v25041_v50  ;;  %v25042_v35 = vld [vmem:[#allocation85_spill] sm:$0xff]  ;;  %v11603_v42 = vadd.f32 %v21627_v16, %v25043_v8  ;;  %v22260_v28 = vpop.permute.xlu1 %12419 }
 0x923   : > { %v15825_v36 = vpop.eup %15824  ;;  %15844 = vtanh.f32 %v12503_v30  ;;  %12663 = vst [vmem:[%s21748_s10 + $0x68] sm:$0xff] %v12503_v30  ;;  %v12312_v37 = vmul.f32 %v15823_v5, %v15821_v58  ;;  %v11601_v0 = vadd.f32 %v21633_v1, %v25042_v35  ;;  %v12962_v59 = vld [vmem:[%s16558_s23 + $0x180] sm:$0xff] }
 0x924   : > { %v15827_v10 = vpop.eup %15826  ;;  %15846 = vrcp.f32 %v11992_v24  ;;  %v13159_v62 = vmul.f32 -1.442695, %v11600_v61  ;;  %v25046_v61 = vld [vmem:[#allocation146_spill] sm:$0xff]  ;;  %v13090_v8 = vld [vmem:[%s16558_s23 + $0x380] sm:$0xff] }
 0x925   : > { %v15829_v13 = vpop.eup %15828  ;;  %15848 = vpow2.f32 %v13156_v26  ;;  %v12280_v21 = vmul.f32 %v15827_v10, %v1834_v43  ;;  %v11606_v26 = vadd.f32 %v21625_v2, %v21969_v12  ;;  %v806_v43 = vld [vmem:[%s16558_s23 + $0x80] sm:$0xff] }
 0x926   : > { %v15831_v56 = vpop.eup %15830  ;;  %v12566_v45 = vmul.f32 %v15829_v13, %v15817_v44  ;;  %15850 = vpow2.f32 %v13158_v18  ;;  %v12963_v18 = vld [vmem:[%s16558_s23 + $0x188] sm:$0xff]  ;;  %v25045_v10 = vld [vmem:[#allocation221_spill] sm:$0xff] }
 0x927   : > { %v15833_v60 = vpop.eup %15832  ;;  %v11994_v15 = vadd.f32 1.0, %v15831_v56  ;;  %15852 = vtanh.f32 %v11597_v31  ;;  %v12344_v41 = vadd.f32 %v12312_v37, %v12280_v21  ;;  %v13026_v13 = vld [vmem:[%s16558_s23 + $0x280] sm:$0xff]  ;;  %v13161_v56 = vmul.f32 -1.442695, %v11603_v42 }
 0x928   : > { %v15835_v3 = vpop.eup %15834  ;;  %v12598_v44 = vmul.f32 %v12566_v45, %v22202_v29  ;;  %15854 = vpow2.f32 %v13160_v14  ;;  %v25044_v29 = vld [vmem:[#allocation274_spill] sm:$0xff]  ;;  %v1160_v14 = vmul.f32 %v12962_v59, %v25045_v10  ;;  %v11993_v12 = vadd.f32 1.0, %v15833_v60 }
 0x929   : > { %v15837_v58 = vpop.eup %15836  ;;  %15856 = vrcp.f32 %v11994_v15  ;;  %v11995_v30 = vadd.f32 1.0, %v15835_v3  ;;  %v12504_v24 = vmul.f32 %v22260_v28, %v12344_v41  ;;  %v11604_v31 = vadd.f32 %v21629_v34, %v25044_v29  ;;  %v25047_v15 = vld [vmem:[#allocation47_spill] sm:$0xff]  ;;  %v25048_v59 = vld [vmem:[#allocation222_spill] sm:$0xff] }
 0x92a   : > { %v15839_v5 = vpop.eup %15838  ;;  %12630 = vst [vmem:[%s21960_s12 + $0x60] sm:$0xff] %v12598_v44  ;;  %15858 = vtanh.f32 %v11601_v0  ;;  %v1161_v0 = vmul.f32 %v12963_v18, %v25046_v61  ;;  %v838_v41 = vmul.f32 %v806_v43, %v25047_v15  ;;  %v13163_v3 = vmul.f32 -1.442695, %v11606_v26  ;;  %v807_v60 = vld [vmem:[%s16558_s23 + $0x88] sm:$0xff]  ;;  %v25050_v43 = vld [vmem:[#allocation224_spill] sm:$0xff] }
 0x92b   : > { %v15841_v37 = vpop.eup %15840  ;;  %15860 = vrcp.f32 %v11995_v30  ;;  %12664 = vst [vmem:[%s21748_s10 + $0x70] sm:$0xff] %v12504_v24  ;;  %v11997_v21 = vadd.f32 1.0, %v15839_v5  ;;  %v1482_v29 = vmul.f32 %v13026_v13, %v25048_v59  ;;  %v13162_v5 = vmul.f32 -1.442695, %v11604_v31  ;;  %v13027_v61 = vld [vmem:[%s16558_s23 + $0x288] sm:$0xff] }
 0x92c   : > { %v15843_v45 = vpop.eup %15842  ;;  %v12313_v50 = vmul.f32 %v15841_v37, %v15837_v58  ;;  %15862 = vtanh.f32 %v12504_v24  ;;  %v1192_v10 = vadd.f32 %v1160_v14, %v838_v41  ;;  %v11607_v24 = vadd.f32 %v21627_v16, %v21976_v49 }
 0x92d   : > { %v15845_v35 = vpop.eup %15844  ;;  %15864 = vrcp.f32 %v11997_v21  ;;  %v1804_v26 = vmul.f32 %v13090_v8, %v25050_v43 }
 0x92e   : > { %v15847_v44 = vpop.eup %15846  ;;  %v12567_v30 = vmul.f32 %v15845_v35, %v15825_v36  ;;  %15866 = vpow2.f32 %v13159_v62  ;;  %v25051_v36 = vld [vmem:[#allocation99_spill] sm:$0xff] }
 0x92f   : > { %v15849_v42 = vpop.eup %15848  ;;  %v12281_v58 = vmul.f32 %v15847_v44, %v25049_v4  ;;  %15868 = vpow2.f32 %v13161_v56  ;;  %v11605_v62 = vadd.f32 %v21633_v1, %v25051_v36  ;;  %v11610_v4 = vadd.f32 %v21625_v2, %v21991_v63  ;;  %v25052_v35 = vld [vmem:[#allocation223_spill] sm:$0xff] }
 0x930   : > { %v15851_v18 = vpop.eup %15850  ;;  %15870 = vrcp.f32 %v11993_v12  ;;  %v12599_v37 = vmul.f32 %v12567_v30, %v22243_v46  ;;  %v1514_v56 = vadd.f32 %v1482_v29, %v1192_v10  ;;  %v839_v49 = vmul.f32 %v807_v60, %v25052_v35  ;;  %v22290_v12 = vpop.permute.xlu0 %12423  ;;  %v25053_v30 = vld [vmem:[#allocation226_spill] sm:$0xff]  ;;  %v25056_v35 = vld [vmem:[#allocation275_spill] sm:$0xff] }
 0x931   : > { %v15853_v31 = vpop.eup %15852  ;;  %v12345_v14 = vadd.f32 %v12313_v50, %v12281_v58  ;;  %v11998_v13 = vadd.f32 1.0, %v15851_v18  ;;  %15872 = vpow2.f32 %v13163_v3  ;;  %v11608_v46 = vadd.f32 %v21629_v34, %v21971_v47  ;;  %v13091_v60 = vld [vmem:[%s16558_s23 + $0x388] sm:$0xff] }
 0x932   : > { %v15855_v21 = vpop.eup %15854  ;;  %12631 = vst [vmem:[%s21960_s12 + $0x68] sm:$0xff] %v12599_v37  ;;  %15874 = vpow2.f32 %v13162_v5  ;;  %v13164_v63 = vmul.f32 -1.442695, %v11607_v24  ;;  %v1836_v3 = vadd.f32 %v1804_v26, %v1514_v56  ;;  %v11996_v44 = vadd.f32 1.0, %v15849_v42  ;;  %v25054_v24 = vld [vmem:[#allocation100_spill] sm:$0xff] }
 0x933   : > { %v15857_v50 = vpop.eup %15856  ;;  %v12505_v15 = vmul.f32 %v22290_v12, %v12345_v14  ;;  %15876 = vrcp.f32 %v11998_v13  ;;  %v12000_v41 = vadd.f32 1.0, %v15855_v21  ;;  %v1483_v10 = vmul.f32 %v13027_v61, %v25053_v30 }
 0x934   : > { %v15859_v8 = vpop.eup %15858  ;;  %v12314_v59 = vmul.f32 %v15857_v50, %v15853_v31  ;;  %15878 = vtanh.f32 %v11605_v62  ;;  %v13166_v5 = vmul.f32 -1.442695, %v11610_v4  ;;  %v1193_v47 = vadd.f32 %v1161_v0, %v839_v49  ;;  %v25055_v31 = vld [vmem:[#allocation56_spill] sm:$0xff] }
 0x935   : > { %v15861_v29 = vpop.eup %15860  ;;  %15880 = vtanh.f32 %v12505_v15  ;;  %12665 = vst [vmem:[%s21748_s10 + $0x78] sm:$0xff] %v12505_v15  ;;  %v13165_v43 = vmul.f32 -1.442695, %v11608_v46  ;;  %v11609_v42 = vadd.f32 %v21633_v1, %v25054_v24  ;;  %v11611_v26 = vadd.f32 %v21627_v16, %v21997_v27 }
 0x936   : > { %v15863_v58 = vpop.eup %15862  ;;  %v12282_v18 = vmul.f32 %v15861_v29, %v1836_v3  ;;  %15882 = vrcp.f32 %v12000_v41  ;;  %v1805_v14 = vmul.f32 %v13091_v60, %v25055_v31  ;;  %v1515_v21 = vadd.f32 %v1483_v10, %v1193_v47  ;;  %v25058_v31 = vld [vmem:[#allocation97_spill] sm:$0xff] }
 0x937   : > { %v15865_v37 = vpop.eup %15864  ;;  %v12568_v36 = vmul.f32 %v15863_v58, %v15843_v45  ;;  %15884 = vpow2.f32 %v13164_v63  ;;  %v22304_v45 = vpop.permute.xlu1 %12427  ;;  %v11612_v49 = vadd.f32 %v21629_v34, %v25056_v35  ;;  %v11614_v50 = vadd.f32 %v21625_v2, %v22009_v9 }
 0x938   : > { %v15867_v62 = vpop.eup %15866  ;;  %15886 = vrcp.f32 %v11996_v44  ;;  %v12315_v13 = vmul.f32 %v15865_v37, %v15859_v8  ;;  %v12346_v4 = vadd.f32 %v12314_v59, %v12282_v18  ;;  %v13167_v41 = vmul.f32 -1.442695, %v11611_v26  ;;  %v12965_v8 = vld [vmem:[%s16558_s23 + $0x198] sm:$0xff]  ;;  %v22320_v26 = vpop.permute.xlu0 %12431 }
 0x939   : > { %v15869_v0 = vpop.eup %15868  ;;  %v12600_v56 = vmul.f32 %v12568_v36, %v22260_v28  ;;  %15888 = vpow2.f32 %v13166_v5  ;;  %v1837_v63 = vadd.f32 %v1805_v14, %v1515_v21  ;;  %v11999_v3 = vadd.f32 1.0, %v15867_v62  ;;  %v25057_v5 = vld [vmem:[#allocation231_spill] sm:$0xff] }
 0x93a   : > { %v15871_v27 = vpop.eup %15870  ;;  %v12506_v61 = vmul.f32 %v22304_v45, %v12346_v4  ;;  %v12001_v46 = vadd.f32 1.0, %v15869_v0  ;;  %15890 = vpow2.f32 %v13165_v43  ;;  %v13168_v29 = vmul.f32 -1.442695, %v11612_v49  ;;  %v25059_v49 = vld [vmem:[#allocation63_spill] sm:$0xff] }
 0x93b   : > { %v15873_v15 = vpop.eup %15872  ;;  %12632 = vst [vmem:[%s21960_s12 + $0x70] sm:$0xff] %v12600_v56  ;;  %15892 = vtanh.f32 %v11609_v42  ;;  %v13169_v60 = vmul.f32 -1.442695, %v11614_v50  ;;  %v1163_v58 = vmul.f32 %v12965_v8, %v25057_v5  ;;  %v11613_v47 = vadd.f32 %v21633_v1, %v21999_v22  ;;  %v809_v42 = vld [vmem:[%s16558_s23 + $0x98] sm:$0xff]  ;;  %v25063_v5 = vld [vmem:[#allocation233_spill] sm:$0xff] }
 0x93c   : > { %v15875_v28 = vpop.eup %15874  ;;  %15894 = vtanh.f32 %v12506_v61  ;;  %12666 = vst [vmem:[%s21748_s10 + $0x80] sm:$0xff] %v12506_v61  ;;  %v12003_v44 = vadd.f32 1.0, %v15873_v15  ;;  %v11615_v36 = vadd.f32 %v21627_v16, %v22015_v53  ;;  %v11616_v14 = vadd.f32 %v21629_v34, %v25058_v31  ;;  %v13029_v61 = vld [vmem:[%s16558_s23 + $0x298] sm:$0xff] }
 0x93d   : > { %v15877_v59 = vpop.eup %15876  ;;  %15896 = vrcp.f32 %v12001_v46  ;;  %v11618_v22 = vadd.f32 %v21625_v2, %v22032_v7  ;;  %v12002_v56 = vadd.f32 1.0, %v15875_v28  ;;  %v13093_v15 = vld [vmem:[%s16558_s23 + $0x398] sm:$0xff] }
 0x93e   : > { %v15879_v30 = vpop.eup %15878  ;;  %v12283_v10 = vmul.f32 %v15877_v59, %v1837_v63  ;;  %15898 = vrcp.f32 %v12003_v44  ;;  %v13170_v7 = vmul.f32 -1.442695, %v11615_v36  ;;  %v25061_v59 = vld [vmem:[#allocation232_spill] sm:$0xff] }
 0x93f   : > { %v15881_v9 = vpop.eup %15880  ;;  %15900 = vpow2.f32 %v13167_v41  ;;  %v25060_v41 = vld [vmem:[#allocation113_spill] sm:$0xff]  ;;  %v13172_v28 = vmul.f32 -1.442695, %v11618_v22 }
 0x940   : > { %v15883_v18 = vpop.eup %15882  ;;  %v12569_v43 = vmul.f32 %v15881_v9, %v15871_v27  ;;  %15902 = vrcp.f32 %v11999_v3  ;;  %v12347_v37 = vadd.f32 %v12315_v13, %v12283_v10  ;;  %v841_v27 = vmul.f32 %v809_v42, %v25059_v49  ;;  %v25062_v10 = vld [vmem:[#allocation98_spill] sm:$0xff] }
 0x941   : > { %v15885_v24 = vpop.eup %15884  ;;  %v12316_v62 = vmul.f32 %v15883_v18, %v15879_v30  ;;  %15904 = vpow2.f32 %v13168_v29  ;;  %v11619_v63 = vadd.f32 %v21627_v16, %v25060_v41  ;;  %v1485_v29 = vmul.f32 %v13029_v61, %v25061_v59  ;;  %v25064_v18 = vld [vmem:[#allocation58_spill] sm:$0xff]  ;;  %v25067_v59 = vld [vmem:[#allocation108_spill] sm:$0xff] }
 0x942   : > { %v15887_v4 = vpop.eup %15886  ;;  %v12601_v13 = vmul.f32 %v12569_v43, %v22290_v12  ;;  %v12507_v53 = vmul.f32 %v22320_v26, %v12347_v37  ;;  %v12004_v0 = vadd.f32 1.0, %v15885_v24  ;;  %15906 = vpow2.f32 %v13169_v60  ;;  %v25065_v37 = vld [vmem:[#allocation177_spill] sm:$0xff]  ;;  %v25066_v41 = vld [vmem:[#allocation54_spill] sm:$0xff] }
 0x943   : > { %v15889_v21 = vpop.eup %15888  ;;  %15908 = vtanh.f32 %v11613_v47  ;;  %v13171_v12 = vmul.f32 -1.442695, %v11616_v14  ;;  %v1195_v3 = vadd.f32 %v1163_v58, %v841_v27  ;;  %v11617_v60 = vadd.f32 %v21633_v1, %v25062_v10 }
 0x944   : > { %v15891_v35 = vpop.eup %15890  ;;  %12633 = vst [vmem:[%s21960_s12 + $0x78] sm:$0xff] %v12601_v13  ;;  %15910 = vtanh.f32 %v12507_v53  ;;  %12667 = vst [vmem:[%s21748_s10 + $0x88] sm:$0xff] %v12507_v53  ;;  %v12006_v46 = vadd.f32 1.0, %v15889_v21  ;;  %v1807_v47 = vmul.f32 %v13093_v15, %v25063_v5  ;;  %v11620_v58 = vadd.f32 %v21629_v34, %v25065_v37  ;;  %v22346_v21 = vpop.permute.xlu1 %12435 }
 0x945   : > { %v15893_v50 = vpop.eup %15892  ;;  %15912 = vrcp.f32 %v12004_v0  ;;  %v13173_v31 = vmul.f32 -1.442695, %v11619_v63  ;;  %v11622_v13 = vadd.f32 %v21625_v2, %v22059_v57  ;;  %v1517_v0 = vadd.f32 %v1485_v29, %v1195_v3 }
 0x946   : > { %v15895_v8 = vpop.eup %15894  ;;  %15914 = vrcp.f32 %v12006_v46  ;;  %v12005_v49 = vadd.f32 1.0, %v15891_v35  ;;  %v13174_v46 = vmul.f32 -1.442695, %v11620_v58  ;;  %v11621_v35 = vadd.f32 %v21633_v1, %v25066_v41 }
 0x947   : > { %v15897_v44 = vpop.eup %15896  ;;  %v12570_v30 = vmul.f32 %v15895_v8, %v15887_v4  ;;  %15916 = vrcp.f32 %v12002_v56  ;;  %v11624_v29 = vadd.f32 %v21629_v34, %v25067_v59  ;;  %v11628_v41 = vadd.f32 %v21629_v34, %v22082_v51  ;;  %v25070_v59 = vld [vmem:[#allocation237_spill] sm:$0xff] }
 0x948   : > { %v15899_v9 = vpop.eup %15898  ;;  %v12284_v43 = vmul.f32 %v15897_v44, %v25064_v18  ;;  %15918 = vpow2.f32 %v13170_v7  ;;  %v1839_v7 = vadd.f32 %v1807_v47, %v1517_v0  ;;  %v11626_v47 = vadd.f32 %v21625_v2, %v22080_v23 }
 0x949   : > { %v15901_v36 = vpop.eup %15900  ;;  %v12602_v24 = vmul.f32 %v12570_v30, %v22304_v45  ;;  %v12317_v42 = vmul.f32 %v15899_v9, %v15893_v50  ;;  %15920 = vpow2.f32 %v13171_v12  ;;  %v13175_v50 = vmul.f32 -1.442695, %v11622_v13  ;;  %v22358_v9 = vpop.permute.xlu0 %12439 }
 0x94a   : > { %v15903_v14 = vpop.eup %15902  ;;  %v12348_v22 = vadd.f32 %v12316_v62, %v12284_v43  ;;  %v12007_v4 = vadd.f32 1.0, %v15901_v36  ;;  %15922 = vpow2.f32 %v13172_v28  ;;  %v11623_v62 = vadd.f32 %v21627_v16, %v22065_v25 }
 0x94b   : > { %v15905_v53 = vpop.eup %15904  ;;  %12634 = vst [vmem:[%s21960_s12 + $0x80] sm:$0xff] %v12602_v24  ;;  %15924 = vtanh.f32 %v11617_v60  ;;  %v13177_v36 = vmul.f32 -1.442695, %v11624_v29  ;;  %v13178_v23 = vmul.f32 -1.442695, %v11626_v47 }
 0x94c   : > { %v15907_v56 = vpop.eup %15906  ;;  %v12508_v45 = vmul.f32 %v22346_v21, %v12348_v22  ;;  %15926 = vrcp.f32 %v12007_v4  ;;  %v13176_v25 = vmul.f32 -1.442695, %v11623_v62  ;;  %v12008_v43 = vadd.f32 1.0, %v15905_v53  ;;  %v25069_v53 = vld [vmem:[#allocation109_spill] sm:$0xff] }
 0x94d   : > { %v15909_v27 = vpop.eup %15908  ;;  %v12009_v61 = vadd.f32 1.0, %v15907_v56  ;;  %15928 = vpow2.f32 %v13173_v31  ;;  %v11625_v0 = vadd.f32 %v21633_v1, %v25069_v53  ;;  %v13180_v51 = vmul.f32 -1.442695, %v11628_v41 }
 0x94e   : > { %v15911_v57 = vpop.eup %15910  ;;  %15930 = vtanh.f32 %v12508_v45  ;;  %12668 = vst [vmem:[%s21748_s10 + $0x90] sm:$0xff] %v12508_v45  ;;  %v11633_v41 = vadd.f32 %v21633_v1, %v22109_v11 }
 0x94f   : > { %v15913_v15 = vpop.eup %15912  ;;  %v12571_v12 = vmul.f32 %v15911_v57, %v15903_v14  ;;  %15932 = vrcp.f32 %v12009_v61  ;;  %v25068_v14 = vld [vmem:[#allocation238_spill] sm:$0xff] }
 0x950   : > { %v15915_v63 = vpop.eup %15914  ;;  %15934 = vrcp.f32 %v12005_v49  ;;  %v12285_v8 = vmul.f32 %v15913_v15, %v1839_v7 }
 0x951   : > { %v15917_v3 = vpop.eup %15916  ;;  %v12603_v28 = vmul.f32 %v12571_v12, %v22320_v26  ;;  %v12318_v44 = vmul.f32 %v15915_v63, %v15909_v27  ;;  %15936 = vpow2.f32 %v13174_v46  ;;  %v22369_v27 = vpop.permute.xlu1 %12443 }
 0x952   : > { %v15919_v30 = vpop.eup %15918  ;;  %v12349_v10 = vadd.f32 %v12317_v42, %v12285_v8  ;;  %15938 = vpow2.f32 %v13175_v50  ;;  %v11627_v42 = vadd.f32 %v21627_v16, %v22088_v33  ;;  %v11630_v50 = vadd.f32 %v21625_v2, %v22100_v19 }
 0x953   : > { %v15921_v60 = vpop.eup %15920  ;;  %12635 = vst [vmem:[%s21960_s12 + $0x88] sm:$0xff] %v12603_v28  ;;  %v12010_v5 = vadd.f32 1.0, %v15919_v30  ;;  %15940 = vtanh.f32 %v11621_v35 }
 0x954   : > { %v15923_v18 = vpop.eup %15922  ;;  %v12509_v26 = vmul.f32 %v22358_v9, %v12349_v10  ;;  %15942 = vpow2.f32 %v13176_v25  ;;  %v13179_v61 = vmul.f32 -1.442695, %v11627_v42  ;;  %v12011_v12 = vadd.f32 1.0, %v15921_v60 }
 0x955   : > { %v15925_v37 = vpop.eup %15924  ;;  %15944 = vrcp.f32 %v12010_v5  ;;  %v12012_v58 = vadd.f32 1.0, %v15923_v18  ;;  %v13181_v28 = vmul.f32 -1.442695, %v11630_v50  ;;  %v11632_v60 = vadd.f32 %v21629_v34, %v22102_v6 }
 0x956   : > { %v15927_v24 = vpop.eup %15926  ;;  %15946 = vtanh.f32 %v12509_v26  ;;  %12669 = vst [vmem:[%s21748_s10 + $0x98] sm:$0xff] %v12509_v26  ;;  %v11634_v26 = vadd.f32 %v21625_v2, %v22122_v32 }
 0x957   : > { %v15929_v31 = vpop.eup %15928  ;;  %v12286_v22 = vmul.f32 %v15927_v24, %v25068_v14  ;;  %15948 = vrcp.f32 %v12012_v58  ;;  %v25072_v14 = vld [vmem:[#allocation117_spill] sm:$0xff] }
 0x958   : > { %v15931_v4 = vpop.eup %15930  ;;  %15950 = vrcp.f32 %v12008_v43  ;;  %v12013_v13 = vadd.f32 1.0, %v15929_v31 }
 0x959   : > { %v15933_v56 = vpop.eup %15932  ;;  %v12572_v45 = vmul.f32 %v15931_v4, %v15917_v3  ;;  %v12350_v49 = vadd.f32 %v12318_v44, %v12286_v22  ;;  %15952 = vpow2.f32 %v13177_v36  ;;  %v25071_v36 = vld [vmem:[#allocation179_spill] sm:$0xff] }
 0x95a   : > { %v15935_v62 = vpop.eup %15934  ;;  %v12319_v33 = vmul.f32 %v15933_v56, %v15925_v37  ;;  %15954 = vrcp.f32 %v12013_v13  ;;  %v22386_v37 = vpop.permute.xlu0 %12447  ;;  %v11629_v24 = vadd.f32 %v21633_v1, %v25071_v36  ;;  %v13184_v13 = vmul.f32 -1.442695, %v11634_v26 }
 0x95b   : > { %v15937_v46 = vpop.eup %15936  ;;  %v12604_v57 = vmul.f32 %v12572_v45, %v22346_v21  ;;  %v12510_v7 = vmul.f32 %v22369_v27, %v12350_v49  ;;  %15956 = vpow2.f32 %v13178_v23  ;;  %v11631_v21 = vadd.f32 %v21627_v16, %v22107_v55  ;;  %v22397_v49 = vpop.permute.xlu1 %12451 }
 0x95c   : > { %v15939_v15 = vpop.eup %15938  ;;  %15958 = vtanh.f32 %v11625_v0  ;;  %v12014_v25 = vadd.f32 1.0, %v15937_v46  ;;  %v13183_v23 = vmul.f32 -1.442695, %v11632_v60  ;;  %v11642_v26 = vadd.f32 %v21625_v2, %v22159_v39 }
 0x95d   : > { %v15941_v35 = vpop.eup %15940  ;;  %12636 = vst [vmem:[%s21960_s12 + $0x90] sm:$0xff] %v12604_v57  ;;  %15960 = vtanh.f32 %v12510_v7  ;;  %12670 = vst [vmem:[%s21748_s10 + $0xa0] sm:$0xff] %v12510_v7  ;;  %v12015_v63 = vadd.f32 1.0, %v15939_v15  ;;  %v13182_v55 = vmul.f32 -1.442695, %v11631_v21  ;;  %v25074_v21 = vld [vmem:[#allocation50_spill] sm:$0xff] }
 0x95e   : > { %v15943_v8 = vpop.eup %15942  ;;  %15962 = vpow2.f32 %v13179_v61  ;;  %v13190_v39 = vmul.f32 -1.442695, %v11642_v26 }
 0x95f   : > { %v15945_v3 = vpop.eup %15944  ;;  %15964 = vrcp.f32 %v12015_v63  ;;  %v12016_v19 = vadd.f32 1.0, %v15943_v8  ;;  %v11638_v8 = vadd.f32 %v21625_v2, %v25074_v21 }
 0x960   : > { %v15947_v44 = vpop.eup %15946  ;;  %15966 = vrcp.f32 %v12011_v12  ;;  %v12287_v29 = vmul.f32 %v15945_v3, %v25070_v59 }
 0x961   : > { %v15949_v30 = vpop.eup %15948  ;;  %v12573_v10 = vmul.f32 %v15947_v44, %v15935_v62  ;;  %15968 = vrcp.f32 %v12016_v19  ;;  %v11636_v62 = vadd.f32 %v21629_v34, %v22124_v40  ;;  %v25075_v44 = vld [vmem:[#allocation194_spill] sm:$0xff]  ;;  %v13187_v60 = vmul.f32 -1.442695, %v11638_v8 }
 0x962   : > { %v15951_v5 = vpop.eup %15950  ;;  %v12351_v47 = vadd.f32 %v12319_v33, %v12287_v29  ;;  %15970 = vrcp.f32 %v12014_v25  ;;  %v12320_v18 = vmul.f32 %v15949_v30, %v15941_v35  ;;  %v25073_v35 = vld [vmem:[#allocation247_spill] sm:$0xff]  ;;  %v11639_v59 = vadd.f32 %v21627_v16, %v25075_v44  ;;  %v22412_v29 = vpop.permute.xlu0 %12455 }
 0x963   : > { %v15953_v43 = vpop.eup %15952  ;;  %v12605_v58 = vmul.f32 %v12573_v10, %v22358_v9  ;;  %15972 = vpow2.f32 %v13181_v28  ;;  %v11635_v9 = vadd.f32 %v21627_v16, %v22129_v54 }
 0x964   : > { %v15955_v6 = vpop.eup %15954  ;;  %v12511_v42 = vmul.f32 %v22386_v37, %v12351_v47  ;;  %15974 = vpow2.f32 %v13180_v51  ;;  %v12017_v46 = vadd.f32 1.0, %v15953_v43  ;;  %v25076_v47 = vld [vmem:[#allocation185_spill] sm:$0xff] }
 0x965   : > { %v15957_v31 = vpop.eup %15956  ;;  %12637 = vst [vmem:[%s21960_s12 + $0x98] sm:$0xff] %v12605_v58  ;;  %v12288_v22 = vmul.f32 %v15955_v6, %v25072_v14  ;;  %15976 = vpow2.f32 %v13182_v55  ;;  %v13185_v15 = vmul.f32 -1.442695, %v11635_v9  ;;  %v13188_v58 = vmul.f32 -1.442695, %v11639_v59  ;;  %v25077_v14 = vld [vmem:[#allocation193_spill] sm:$0xff] }
 0x966   : > { %v15959_v32 = vpop.eup %15958  ;;  %15978 = vtanh.f32 %v12511_v42  ;;  %12671 = vst [vmem:[%s21748_s10 + $0xa8] sm:$0xff] %v12511_v42  ;;  %v12018_v4 = vadd.f32 1.0, %v15957_v31 }
 0x967   : > { %v15961_v53 = vpop.eup %15960  ;;  %v12352_v0 = vadd.f32 %v12320_v18, %v12288_v22  ;;  %15980 = vtanh.f32 %v11629_v24  ;;  %v11637_v18 = vadd.f32 %v21633_v1, %v25076_v47  ;;  %v11640_v22 = vadd.f32 %v21629_v34, %v25077_v14 }
 0x968   : > { %v15963_v56 = vpop.eup %15962  ;;  %v12574_v45 = vmul.f32 %v15961_v53, %v15951_v5  ;;  %15982 = vrcp.f32 %v12018_v4  ;;  %v25078_v53 = vld [vmem:[#allocation155_spill] sm:$0xff] }
 0x969   : > { %v15965_v33 = vpop.eup %15964  ;;  %v12512_v61 = vmul.f32 %v22397_v49, %v12352_v0  ;;  %v12019_v57 = vadd.f32 1.0, %v15963_v56  ;;  %15984 = vpow2.f32 %v13183_v23  ;;  %v25079_v56 = vld [vmem:[#allocation246_spill] sm:$0xff] }
 0x96a   : > { %v15967_v54 = vpop.eup %15966  ;;  %v12606_v7 = vmul.f32 %v12574_v45, %v22369_v27  ;;  %v12321_v50 = vmul.f32 %v15965_v33, %v15959_v32  ;;  %15986 = vpow2.f32 %v13184_v13  ;;  %v13186_v27 = vmul.f32 -1.442695, %v11636_v62 }
 0x96b   : > { %v15969_v12 = vpop.eup %15968  ;;  %15988 = vtanh.f32 %v12512_v61  ;;  %12672 = vst [vmem:[%s21748_s10 + $0xb0] sm:$0xff] %v12512_v61  ;;  %v13189_v61 = vmul.f32 -1.442695, %v11640_v22 }
 0x96c   : > { %v15971_v40 = vpop.eup %15970  ;;  %12638 = vst [vmem:[%s21960_s12 + $0xa0] sm:$0xff] %v12606_v7  ;;  %v12289_v63 = vmul.f32 %v15969_v12, %v25073_v35  ;;  %15990 = vrcp.f32 %v12019_v57  ;;  %v25080_v35 = vld [vmem:[#allocation202_spill] sm:$0xff] }
 0x96d   : > { %v15973_v25 = vpop.eup %15972  ;;  %15992 = vrcp.f32 %v12017_v46  ;;  %v11646_v46 = vadd.f32 %v21625_v2, %v22182_v48 }
 0x96e   : > { %v15975_v3 = vpop.eup %15974  ;;  %v12353_v19 = vadd.f32 %v12321_v50, %v12289_v63  ;;  %v12021_v28 = vadd.f32 1.0, %v15973_v25  ;;  %15994 = vpow2.f32 %v13185_v15  ;;  %v22430_v15 = vpop.permute.xlu1 %12459  ;;  %v11641_v63 = vadd.f32 %v21633_v1, %v25080_v35 }
 0x96f   : > { %v15977_v11 = vpop.eup %15976  ;;  %15996 = vtanh.f32 %v11633_v41  ;;  %v12020_v31 = vadd.f32 1.0, %v15975_v3  ;;  %v13193_v21 = vmul.f32 -1.442695, %v11646_v46  ;;  %v25081_v3 = vld [vmem:[#allocation254_spill] sm:$0xff] }
 0x970   : > { %v15979_v51 = vpop.eup %15978  ;;  %v12513_v30 = vmul.f32 %v22412_v29, %v12353_v19  ;;  %15998 = vrcp.f32 %v12021_v28  ;;  %v12022_v10 = vadd.f32 1.0, %v15977_v11 }
 0x971   : > { %v15981_v55 = vpop.eup %15980  ;;  %v12575_v5 = vmul.f32 %v15979_v51, %v15967_v54  ;;  %16000 = vpow2.f32 %v13186_v27  ;;  %v25082_v51 = vld [vmem:[#allocation72_spill] sm:$0xff] }
 0x972   : > { %v15983_v43 = vpop.eup %15982  ;;  %16002 = vtanh.f32 %v12513_v30  ;;  %12673 = vst [vmem:[%s21748_s10 + $0xb8] sm:$0xff] %v12513_v30  ;;  %v11647_v30 = vadd.f32 %v21627_v16, %v25082_v51 }
 0x973   : > { %v15985_v36 = vpop.eup %15984  ;;  %v12607_v24 = vmul.f32 %v12575_v5, %v22386_v37  ;;  %v12322_v6 = vmul.f32 %v15983_v43, %v15981_v55  ;;  %16004 = vrcp.f32 %v12022_v10  ;;  %v11643_v37 = vadd.f32 %v21627_v16, %v25078_v53  ;;  %v25083_v55 = vld [vmem:[#allocation210_spill] sm:$0xff]  ;;  %v25084_v43 = vld [vmem:[#allocation211_spill] sm:$0xff] }
 0x974   : > { %v15987_v42 = vpop.eup %15986  ;;  %16006 = vpow2.f32 %v13187_v60  ;;  %v12023_v9 = vadd.f32 1.0, %v15985_v36  ;;  %v11644_v5 = vadd.f32 %v21629_v34, %v25083_v55  ;;  %v25090_v55 = vld [vmem:[#allocation104_spill] sm:$0xff] }
 0x975   : > { %v15989_v23 = vpop.eup %15988  ;;  %12639 = vst [vmem:[%s21960_s12 + $0xa8] sm:$0xff] %v12607_v24  ;;  %v12024_v32 = vadd.f32 1.0, %v15987_v42  ;;  %16008 = vtanh.f32 %v11637_v18  ;;  %v13191_v12 = vmul.f32 -1.442695, %v11643_v37  ;;  %v22443_v18 = vpop.permute.xlu0 %12463 }
 0x976   : > { %v15991_v4 = vpop.eup %15990  ;;  %v12576_v13 = vmul.f32 %v15989_v23, %v15971_v40  ;;  %16010 = vpow2.f32 %v13188_v58  ;;  %v13192_v23 = vmul.f32 -1.442695, %v11644_v5  ;;  %v11652_v5 = vadd.f32 %v21629_v34, %v25090_v55 }
 0x977   : > { %v15993_v0 = vpop.eup %15992  ;;  %v12290_v45 = vmul.f32 %v15991_v4, %v25079_v56  ;;  %16012 = vrcp.f32 %v12024_v32 }
 0x978   : > { %v15995_v62 = vpop.eup %15994  ;;  %v12608_v33 = vmul.f32 %v12576_v13, %v22397_v49  ;;  %16014 = vrcp.f32 %v12020_v31  ;;  %v13194_v31 = vmul.f32 -1.442695, %v11647_v30 }
 0x979   : > { %v15997_v57 = vpop.eup %15996  ;;  %v12354_v54 = vadd.f32 %v12322_v6, %v12290_v45  ;;  %v12025_v7 = vadd.f32 1.0, %v15995_v62  ;;  %16016 = vpow2.f32 %v13190_v39  ;;  %v11650_v6 = vadd.f32 %v21625_v2, %v22206_v38  ;;  %v25085_v39 = vld [vmem:[#allocation165_spill] sm:$0xff]  ;;  %v12472_v30 = vpop.permute.xlu0 %12471 }
 0x97a   : > { %v15999_v50 = vpop.eup %15998  ;;  %12640 = vst [vmem:[%s21960_s12 + $0xb0] sm:$0xff] %v12608_v33  ;;  %16018 = vrcp.f32 %v12023_v9  ;;  %v11649_v4 = vadd.f32 %v21633_v1, %v25085_v39  ;;  %v25086_v9 = vld [vmem:[#allocation259_spill] sm:$0xff]  ;;  %v11651_v38 = vadd.f32 %v21627_v16, %v22212_v17  ;;  %v25087_v17 = vld [vmem:[#allocation217_spill] sm:$0xff] }
 0x97b   : > { %v16001_v41 = vpop.eup %16000  ;;  %v12514_v40 = vmul.f32 %v22430_v15, %v12354_v54  ;;  %v12323_v49 = vmul.f32 %v15999_v50, %v15997_v57  ;;  %16020 = vrcp.f32 %v12025_v7  ;;  %v13196_v37 = vmul.f32 -1.442695, %v11650_v6  ;;  %v25091_v6 = vld [vmem:[#allocation266_spill] sm:$0xff] }
 0x97c   : > { %v16003_v48 = vpop.eup %16002  ;;  %16022 = vpow2.f32 %v13189_v61  ;;  %v12026_v28 = vadd.f32 1.0, %v16001_v41  ;;  %v22457_v61 = vpop.permute.xlu1 %12467  ;;  %v11654_v57 = vadd.f32 %v21625_v2, %v22222_v20 }
 0x97d   : > { %v16005_v8 = vpop.eup %16004  ;;  %v12577_v25 = vmul.f32 %v16003_v48, %v15993_v0  ;;  %16024 = vtanh.f32 %v12514_v40  ;;  %12674 = vst [vmem:[%s21748_s10 + $0xc0] sm:$0xff] %v12514_v40 }
 0x97e   : > { %v16007_v27 = vpop.eup %16006  ;;  %v12291_v19 = vmul.f32 %v16005_v8, %v25081_v3  ;;  %16026 = vpow2.f32 %v13191_v12  ;;  %v11648_v12 = vadd.f32 %v21629_v34, %v25087_v17  ;;  %v13199_v20 = vmul.f32 -1.442695, %v11654_v57 }
 0x97f   : > { %v16009_v44 = vpop.eup %16008  ;;  %v12609_v59 = vmul.f32 %v12577_v25, %v22412_v29  ;;  %v12027_v11 = vadd.f32 1.0, %v16007_v27  ;;  %16028 = vtanh.f32 %v11641_v63  ;;  %v11645_v29 = vadd.f32 %v21633_v1, %v25084_v43 }
 0x980   : > { %v16011_v10 = vpop.eup %16010  ;;  %v12355_v60 = vadd.f32 %v12323_v49, %v12291_v19  ;;  %16030 = vpow2.f32 %v13193_v21  ;;  %v13197_v49 = vmul.f32 -1.442695, %v11651_v38  ;;  %v25088_v21 = vld [vmem:[#allocation258_spill] sm:$0xff]  ;;  %v13195_v25 = vmul.f32 -1.442695, %v11648_v12  ;;  %v25094_v12 = vld [vmem:[#allocation271_spill] sm:$0xff] }
 0x981   : > { %v16013_v47 = vpop.eup %16012  ;;  %12641 = vst [vmem:[%s21960_s12 + $0xb8] sm:$0xff] %v12609_v59  ;;  %16032 = vrcp.f32 %v12027_v11  ;;  %v12028_v26 = vadd.f32 1.0, %v16011_v10  ;;  %v11655_v27 = vadd.f32 %v21627_v16, %v22228_v52 }
 0x982   : > { %v16015_v58 = vpop.eup %16014  ;;  %v12515_v36 = vmul.f32 %v22443_v18, %v12355_v60  ;;  %16034 = vrcp.f32 %v12026_v28  ;;  %v12324_v24 = vmul.f32 %v16013_v47, %v16009_v44  ;;  %v25089_v28 = vld [vmem:[#allocation107_spill] sm:$0xff] }
 0x983   : > { %v16017_v42 = vpop.eup %16016  ;;  %16036 = vrcp.f32 %v12028_v26  ;;  %v11653_v44 = vadd.f32 %v21633_v1, %v25089_v28  ;;  %v13200_v26 = vmul.f32 -1.442695, %v11655_v27  ;;  %v25096_v28 = vld [vmem:[#allocation270_spill] sm:$0xff] }
 0x984   : > { %v16019_v14 = vpop.eup %16018  ;;  %16038 = vtanh.f32 %v12515_v36  ;;  %12675 = vst [vmem:[%s21748_s10 + $0xc8] sm:$0xff] %v12515_v36  ;;  %v12030_v22 = vadd.f32 1.0, %v16017_v42 }
 0x985   : > { %v16021_v32 = vpop.eup %16020  ;;  %16040 = vtanh.f32 %v11645_v29 }
 0x986   : > { %v16023_v13 = vpop.eup %16022  ;;  %v12292_v53 = vmul.f32 %v16021_v32, %v25086_v9  ;;  %16042 = vrcp.f32 %v12030_v22  ;;  %v12476_v9 = vpop.permute.xlu1 %12475 }
 0x987   : > { %v16025_v0 = vpop.eup %16024  ;;  %16044 = vpow2.f32 %v13194_v31  ;;  %v12029_v63 = vadd.f32 1.0, %v16023_v13  ;;  %v13198_v31 = vmul.f32 -1.442695, %v11652_v5 }
 0x988   : > { %v16027_v56 = vpop.eup %16026  ;;  %v12578_v45 = vmul.f32 %v16025_v0, %v16015_v58  ;;  %v12356_v62 = vadd.f32 %v12324_v24, %v12292_v53  ;;  %16046 = vpow2.f32 %v13192_v23  ;;  %v25092_v23 = vld [vmem:[#allocation227_spill] sm:$0xff] }
 0x989   : > { %v16029_v33 = vpop.eup %16028  ;;  %v12031_v46 = vadd.f32 1.0, %v16027_v56  ;;  %16048 = vtanh.f32 %v11649_v4  ;;  %v11657_v32 = vadd.f32 %v21633_v1, %v25092_v23  ;;  %v25093_v56 = vld [vmem:[#allocation219_spill] sm:$0xff] }
 0x98a   : > { %v16031_v54 = vpop.eup %16030  ;;  %v12610_v7 = vmul.f32 %v12578_v45, %v22430_v15  ;;  %v12516_v50 = vmul.f32 %v22457_v61, %v12356_v62  ;;  %16050 = vpow2.f32 %v13196_v37  ;;  %v11656_v45 = vadd.f32 %v21629_v34, %v25093_v56 }
 0x98b   : > { %v16033_v41 = vpop.eup %16032  ;;  %16052 = vrcp.f32 %v12031_v46  ;;  %v12033_v40 = vadd.f32 1.0, %v16031_v54 }
 0x98c   : > { %v16035_v35 = vpop.eup %16034  ;;  %12642 = vst [vmem:[%s21960_s12 + $0xc0] sm:$0xff] %v12610_v7  ;;  %16054 = vtanh.f32 %v12516_v50  ;;  %12676 = vst [vmem:[%s21748_s10 + $0xd0] sm:$0xff] %v12516_v50  ;;  %v12325_v48 = vmul.f32 %v16033_v41, %v16029_v33  ;;  %v13104_v7 = vld [vmem:[%s16558_s23 + $0x3f0] sm:$0xff] }
 0x98d   : > { %v16037_v2 = vpop.eup %16036  ;;  %16056 = vrcp.f32 %v12033_v40 }
 0x98e   : > { %v16039_v15 = vpop.eup %16038  ;;  %v12293_v8 = vmul.f32 %v16037_v2, %v25088_v21  ;;  %16058 = vpow2.f32 %v13197_v49  ;;  %v12480_v21 = vpop.permute.xlu0 %12479 }
 0x98f   : > { %v16041_v3 = vpop.eup %16040  ;;  %v12579_v19 = vmul.f32 %v16039_v15, %v16019_v14  ;;  %16060 = vrcp.f32 %v12029_v63  ;;  %v25095_v63 = vld [vmem:[#allocation269_spill] sm:$0xff] }
 0x990   : > { %v16043_v59 = vpop.eup %16042  ;;  %v12357_v11 = vadd.f32 %v12325_v48, %v12293_v8  ;;  %16062 = vpow2.f32 %v13199_v20  ;;  %v1818_v48 = vmul.f32 %v13104_v7, %v25095_v63 }
 0x991   : > { %v16045_v51 = vpop.eup %16044  ;;  %v12611_v10 = vmul.f32 %v12579_v19, %v22443_v18  ;;  %v12326_v60 = vmul.f32 %v16043_v59, %v16041_v3  ;;  %16064 = vpow2.f32 %v13195_v25  ;;  %v13105_v3 = vld [vmem:[%s16558_s23 + $0x3f8] sm:$0xff] }
 0x992   : > { %v16047_v16 = vpop.eup %16046  ;;  %v12517_v52 = vmul.f32 %v12472_v30, %v12357_v11  ;;  %v12034_v47 = vadd.f32 1.0, %v16045_v51  ;;  %16066 = vtanh.f32 %v11653_v44  ;;  %v1850_v44 = vadd.f32 %v1818_v48, %v25096_v28 }
 0x993   : > { %v16049_v43 = vpop.eup %16048  ;;  %12643 = vst [vmem:[%s21960_s12 + $0xc8] sm:$0xff] %v12611_v10  ;;  %v12032_v36 = vadd.f32 1.0, %v16047_v16 }
 0x994   : > { %v16051_v29 = vpop.eup %16050  ;;  %16068 = vtanh.f32 %v12517_v52  ;;  %12677 = vst [vmem:[%s21748_s10 + $0xd8] sm:$0xff] %v12517_v52 }
 0x995   : > { %v16053_v58 = vpop.eup %16052  ;;  %16070 = vrcp.f32 %v12034_v47  ;;  %v12036_v18 = vadd.f32 1.0, %v16051_v29  ;;  %v12484_v47 = vpop.permute.xlu1 %12483 }
 0x996   : > { %v16055_v24 = vpop.eup %16054  ;;  %v12294_v42 = vmul.f32 %v16053_v58, %v25091_v6  ;;  %16072 = vpow2.f32 %v13200_v26 }
 0x997   : > { %v16057_v14 = vpop.eup %16056  ;;  %v12580_v22 = vmul.f32 %v16055_v24, %v16035_v35  ;;  %16074 = vrcp.f32 %v12036_v18 }
 0x998   : > { %v12358_v39 = vadd.f32 %v12326_v60, %v12294_v42  ;;  %v12327_v4 = vmul.f32 %v16057_v14, %v16049_v43  ;;  %v16059_v13 = vpop.eup %16058  ;;  %16076 = vrcp.f32 %v12032_v36  ;;  %v25098_v43 = vld [vmem:[#allocation276_spill] sm:$0xff]  ;;  %v12488_v14 = vpop.permute.xlu0 %12487 }
 0x999   : > { %v12612_v53 = vmul.f32 %v12580_v22, %v22457_v61  ;;  %v16061_v37 = vpop.eup %16060  ;;  %16078 = vpow2.f32 %v13198_v31  ;;  %v12037_v38 = vadd.f32 1.0, %v16059_v13  ;;  %v13201_v61 = vmul.f32 -1.442695, %v11656_v45 }
 0x99a   : > { %v12518_v0 = vmul.f32 %v12476_v9, %v12358_v39  ;;  %v16063_v62 = vpop.eup %16062  ;;  %16080 = vtanh.f32 %v11657_v32 }
 0x99b   : > { %12644 = vst [vmem:[%s21960_s12 + $0xd0] sm:$0xff] %v12612_v53  ;;  %v16065_v1 = vpop.eup %16064  ;;  %v12039_v33 = vadd.f32 1.0, %v16063_v62 }
 0x99c   : > { %16082 = vtanh.f32 %v12518_v0  ;;  %12678 = vst [vmem:[%s21748_s10 + $0xe0] sm:$0xff] %v12518_v0  ;;  %v16067_v46 = vpop.eup %16066  ;;  %v12035_v49 = vadd.f32 1.0, %v16065_v1 }
 0x99d   : > { %16084 = vrcp.f32 %v12037_v38 }
 0x99e   : > { %v16069_v57 = vpop.eup %16068  ;;  %16086 = vrcp.f32 %v12039_v33 }
 0x99f   : > { %v16071_v54 = vpop.eup %16070  ;;  %v12581_v50 = vmul.f32 %v16069_v57, %v16061_v37  ;;  %16088 = vpow2.f32 %v13201_v61 }
 0x9a0   : > { %v16073_v17 = vpop.eup %16072  ;;  %v12295_v41 = vmul.f32 %v16071_v54, %v25094_v12 }
 0x9a1   : > { %v16075_v34 = vpop.eup %16074  ;;  %v12613_v40 = vmul.f32 %v12581_v50, %v12472_v30  ;;  %v12040_v35 = vadd.f32 1.0, %v16073_v17  ;;  %v25097_v30 = vld [vmem:[#allocation277_spill] sm:$0xff] }
 0x9a2   : > { %v12359_v2 = vadd.f32 %v12327_v4, %v12295_v41  ;;  %v12328_v20 = vmul.f32 %v16075_v34, %v16067_v46  ;;  %v16077_v15 = vpop.eup %16076  ;;  %v1819_v10 = vmul.f32 %v13105_v3, %v25097_v30 }
 0x9a3   : > { %12645 = vst [vmem:[%s21960_s12 + $0xd8] sm:$0xff] %v12613_v40  ;;  %16090 = vrcp.f32 %v12040_v35  ;;  %v16079_v8 = vpop.eup %16078 }
 0x9a4   : > { %v12519_v25 = vmul.f32 %v12480_v21, %v12359_v2  ;;  %v16081_v27 = vpop.eup %16080  ;;  %16092 = vrcp.f32 %v12035_v49  ;;  %v12038_v5 = vadd.f32 1.0, %v16079_v8  ;;  %v1851_v29 = vadd.f32 %v1819_v10, %v25098_v43 }
 0x9a6   : > { %v16083_v19 = vpop.eup %16082  ;;  %16094 = vtanh.f32 %v12519_v25  ;;  %12679 = vst [vmem:[%s21748_s10 + $0xe8] sm:$0xff] %v12519_v25 }
 0x9a7   : > { %v16085_v59 = vpop.eup %16084  ;;  %v12582_v11 = vmul.f32 %v16083_v19, %v16077_v15  ;;  %16096 = vrcp.f32 %v12038_v5 }
 0x9a8   : > { %v16087_v51 = vpop.eup %16086  ;;  %v12296_v60 = vmul.f32 %v16085_v59, %v1850_v44 }
 0x9a9   : > { %v12614_v55 = vmul.f32 %v12582_v11, %v12476_v9  ;;  %v12329_v16 = vmul.f32 %v16087_v51, %v16081_v27  ;;  %v16089_v26 = vpop.eup %16088 }
 0x9aa   : > { %v12360_v52 = vadd.f32 %v12328_v20, %v12296_v60  ;;  %v12041_v6 = vadd.f32 1.0, %v16089_v26 }
 0x9ab   : > { %12646 = vst [vmem:[%s21960_s12 + $0xe0] sm:$0xff] %v12614_v55 }
 0x9ac   : > { %v12520_v58 = vmul.f32 %v12484_v47, %v12360_v52 }
 0x9ad   : > { %v16091_v36 = vpop.eup %16090 }
 0x9ae   : > { %16098 = vtanh.f32 %v12520_v58  ;;  %12680 = vst [vmem:[%s21748_s10 + $0xf0] sm:$0xff] %v12520_v58  ;;  %v12297_v18 = vmul.f32 %v16091_v36, %v1851_v29  ;;  %v16093_v24 = vpop.eup %16092 }
 0x9af   : > { %16100 = vrcp.f32 %v12041_v6 }
 0x9b0   : > { %v16095_v42 = vpop.eup %16094  ;;  %v12361_v31 = vadd.f32 %v12329_v16, %v12297_v18 }
 0x9b1   : > { %v12583_v22 = vmul.f32 %v16095_v42, %v16093_v24 }
 0x9b2   : > { %v12521_v23 = vmul.f32 %v12488_v14, %v12361_v31 }
 0x9b3   : > { %v12615_v32 = vmul.f32 %v12583_v22, %v12480_v21 }
 0x9b4   : > { %16102 = vtanh.f32 %v12521_v23  ;;  %12681 = vst [vmem:[%s21748_s10 + $0xf8] sm:$0xff] %v12521_v23 }
 0x9b5   : > { %12647 = vst [vmem:[%s21960_s12 + $0xe8] sm:$0xff] %v12615_v32 }
 0x9b6   : > { %16209 = shalt.err (!%p16206_p5)
}
 0x9b7   : > { %s16210_s14 = scalar_lea.hbm %s22503_s20, 4096  ;;  %s16214_s21 = scalar_lea.hbm %s22601_s8, 8192 }
 0x9b8   : > { %p16211_p6 = scmp.ne.s32.totalorder %s22503_s20, %s16210_s14  ;;  %p16215_p13 = scmp.lt.u32.totalorder %s22503_s20, %s22601_s8 }
 0x9b9   : > { %p16216_p0 = scmp.lt.u32.totalorder %s16214_s21, %s16210_s14  ;;  %p16218_p9 = scmp.lt.u32.totalorder %s16210_s14, %s22503_s20 }
 0x9ba   : > { %p16212_p11 = pnand %p16211_p6, %p25099_p8 }
 0x9bb   : > { %p16217_p7 = por %p16216_p0, %p16215_p13 }
 0x9bc   : > { %p16213_p12 = pneg %p16212_p11 }
 0x9bd   : > { %p16219_p10 = por %p16218_p9, %p16217_p7 }
 0x9bf   : > { %p16220_p1 = pnand %p16219_p10, %p16213_p12 }
 0x9c1   : > { %16223 = shalt.err (!%p16220_p1)
}
 0x9c2   : > { %s16331_s19 = smov 128   ;;  %s16332_s23 = smov 8   ;;  %v16097_v39 = vpop.eup %16096 }
 0x9c3   : > { %15417 = dma.vmem_to_hbm [thread:$0]  (%p25099_p8), %s22505_s15, 4096, %s22503_s20, %s12688_s16, %s16331_s19, %s16331_s19, %s16332_s23   ;;  %v16099_v4 = vpop.eup %16098 }
 0x9c4   : > { %v12584_v13 = vmul.f32 %v16099_v4, %v16097_v39  ;;  %v16101_v53 = vpop.eup %16100  ;;  %s12701_s18 = sshll.u32 %s21960_s12, 4  ;;  %s22543_s25 = scalar_lea.hbm %s22600_s7, %s13212_s2  ;;  %s22545_s18 = int_to_ptr.vmem [resolvable:$true] %s12701_s18 }
 0x9c5   : > { %v16103_v37 = vpop.eup %16102  ;;  %s12683_s15 = scalar_lea.sflag [#allocation4], %s16547_s11  ;;  %s16224_s20 = scalar_lea.vmem %s22545_s18, 4096 }
 0x9c6   : > { %v12616_v9 = vmul.f32 %v12584_v13, %v12484_v47  ;;  %v12585_v0 = vmul.f32 %v16103_v37, %v16101_v53  ;;  %p16225_p2 = scmp.ne.s32.totalorder %s22545_s18, %s16224_s20  ;;  %s16333_s16 = smov [#allocation10]  }
 0x9c7   : > { %s16228_s14 = sshll.u32 %s16333_s16, 4  ;;  %s16229_s14 = int_to_ptr.vmem [resolvable:$false] %s16228_s14 }
 0x9c8   : > { %12648 = vst [vmem:[%s21960_s12 + $0xf0] sm:$0xff] %v12616_v9  ;;  %v12617_v38 = vmul.f32 %v12585_v0, %v12488_v14  ;;  %p16226_p3 = pnand %p16225_p2, %p25099_p8  ;;  %s16230_s9 = scalar_lea.vmem %s16229_s14, 8192 }
 0x9c9   : > { %p16231_p6 = scmp.lt.s32.totalorder %s22545_s18, %s16229_s14  ;;  %p16232_p11 = scmp.lt.s32.totalorder %s16230_s9, %s16224_s20 }
 0x9ca   : > { %12649 = vst [vmem:[%s21960_s12 + $0xf8] sm:$0xff] %v12617_v38  ;;  %p16227_p5 = pneg %p16226_p3 }
 0x9cb   : > { %p16233_p12 = por %p16232_p11, %p16231_p6 }
 0x9cd   : > { %p16234_p13 = pnand %p16233_p12, %p16227_p5 }
 0x9cf   : > { %16237 = shalt.err (!%p16234_p13)
}
 0x9d0   : > { %s16238_s12 = scalar_lea.hbm %s22543_s25, 4096  ;;  %s16242_s26 = scalar_lea.hbm %s22600_s7, 8192 }
 0x9d1   : > { %p16239_p0 = scmp.ne.s32.totalorder %s22543_s25, %s16238_s12  ;;  %p16243_p10 = scmp.lt.u32.totalorder %s22543_s25, %s22600_s7 }
 0x9d2   : > { %p16244_p1 = scmp.lt.u32.totalorder %s16242_s26, %s16238_s12  ;;  %p16246_p3 = scmp.lt.u32.totalorder %s16238_s12, %s22543_s25 }
 0x9d3   : > { %p16240_p7 = pnand %p16239_p0, %p25099_p8 }
 0x9d4   : > { %p16245_p2 = por %p16244_p1, %p16243_p10 }
 0x9d5   : > { %p16241_p9 = pneg %p16240_p7 }
 0x9d6   : > { %p16247_p5 = por %p16246_p3, %p16245_p2 }
 0x9d8   : > { %p16248_p6 = pnand %p16247_p5, %p16241_p9 }
 0x9da   : > { %16251 = shalt.err (!%p16248_p6)
}
 0x9db   : > { %15416 = dma.vmem_to_hbm [thread:$0]  (%p25099_p8), %s22545_s18, 4096, %s22543_s25, %s12683_s15, %s16331_s19, %s16331_s19, %s16332_s23  }
 0x9dc PF: > { %s25100_s10 = sld [smem:[#allocation25_spill]]  ;;  %s25101_s24 = sld [smem:[#allocation28_spill]] }
 0x9e2   : > { %s12732_s13 = sand.u32 1, %s25100_s10   ;;  %p25102_p11 = scmp.ne.s32.totalorder %s25101_s24, 0 }
 0x9e3   : > { %s12733_s20 = scalar_lea.sflag [#allocation4], %s12732_s13 }
 0x9e4   : > { %p15428_p12 = pnand %p12892_p4, %p25102_p11 }
 0x9e6   : > { %16285 = dma.done.wait (!%p15428_p12), %s12733_s20, 4096  }
 0x9e7   : > { %16287 = vsyncadd (!%p15428_p12), %s12733_s20, 4294963200  ;;  %s12742_s17 = scalar_lea.sflag [#allocation12], %s12732_s13 }
 0x9e8   : > { %16289 = dma.done.wait (!%p15428_p12), %s12742_s17, 4096  }
 0x9e9   : > { %16291 = vsyncadd (!%p15428_p12), %s12742_s17, 4294963200  ;;  %s25103_s30 = sld [smem:[#allocation26_spill]]  ;;  %s25104_s11 = sld [smem:[#allocation27_spill]] }
 0x9ea   : > { %s25105_s27 = smov %s16298_s28  ;;  %s25106_s28 = smov %s16302_s29 }
 0x9ef   : > { %p29_p8 = scmp.ge.s32.totalorder %s25103_s30, 4   ;;  %s25107_s29 = smov %s25104_s11 }
 0x9f1   :  { %31 = sbr.rel (!%p29_p8) target bundleno = 12 (0xc), region = 153 }
 0x9f8   :  { %12747 = vsyncpa [#allocation3], 1 }
 0x9f9   :  { %12749 = vsyncpa [#allocation3 + $0x1], 1 }
 0x9fa   :  { %12750 = vsyncpa [#allocation6], 1 }
 0x9fb   :  { %12752 = vsyncpa [#allocation6 + $0x1], 1 }
 0x9fc   :  { %12753 = vsyncpa [#allocation9], 1 }
 0x9fd   :  { %12754 = vsyncpa [#allocation4], 1 }
 0x9fe   :  { %12756 = vsyncpa [#allocation4 + $0x1], 1 }
 0x9ff   :  { %12757 = vsyncpa [#allocation12], 1 }
 0xa00   :  { %12759 = vsyncpa [#allocation12 + $0x1], 1 }

</bundles_post_ra>
